<compile_context>
chip_gen: v7x
topology: tpu7x:2x2x1
jax: 0.10.0
libtpu: 0.0.40
codegen_flags: <defaults>
</compile_context>

<pallas_src>
import functools

import numpy as np
import jax
import jax.numpy as jnp
from jax.experimental import pallas as pl
from jax.experimental.pallas import tpu as pltpu

EPS = 1e-5
_HIGH = jax.lax.Precision.HIGHEST
_BF16 = jnp.bfloat16


def _pad_to(n, m):
    return ((n + m - 1) // m) * m


# ----------------------------------------------------------------------------
# Host-side geometry: per-tap 0/1 selection matrices (conv zero padding folded
# in as all-zero columns), concatenated along K in tap-major order.
# ----------------------------------------------------------------------------
def _build_selection(h, w, kernel, stride, pad):
    kh, kw = kernel
    sh, sw = stride
    ph, pw = pad
    ho = (h + 2 * ph - kh) // sh + 1
    wo = (w + 2 * pw - kw) // sw + 1
    mi, mo = _pad_to(h * w, 8), _pad_to(ho * wo, 8)
    sel = np.zeros((kh * kw, mo, mi), np.float32)
    for ki in range(kh):
        for kj in range(kw):
            k = ki * kw + kj
            for oy in range(ho):
                iy = oy * sh + ki - ph
                if iy < 0 or iy >= h:
                    continue
                for ox in range(wo):
                    ix = ox * sw + kj - pw
                    if ix < 0 or ix >= w:
                        continue
                    sel[k, oy * wo + ox, iy * w + ix] = 1.0
    sel_cat = np.concatenate(list(sel), axis=1)           # (mo, k_taps * mi)
    return sel_cat, (ho, wo)


def make_conv_cfg(raw_ni):
    # (cin, cout, kernel, stride, pad) for the 7 SepConv2d blocks.
    return [
        (raw_ni, 32, (5, 1), (2, 1), (3, 3)),
        (32, 32, (3, 2), (2, 1), (1, 1)),
        (32, 64, (5, 3), (4, 2), (3, 3)),
        (64, 64, (3, 3), (1, 1), (1, 1)),
        (64, 128, (5, 4), (4, 1), (1, 1)),
        (128, 128, (3, 3), (2, 2), (1, 1)),
        (128, 256, (1, 1), (4, 4), (2, 2)),
    ]


def build_geometry(conv_cfg, h, w):
    blocks = []
    ch, cw = h, w
    for cin, cout, kernel, stride, pad in conv_cfg:
        sel_cat, (ho, wo) = _build_selection(ch, cw, kernel, stride, pad)
        blocks.append(dict(sel_cat=sel_cat, cin=cin, cout=cout,
                           k_taps=kernel[0] * kernel[1],
                           m_in_pad=_pad_to(ch * cw, 8),
                           m_out=ho * wo, m_out_pad=_pad_to(ho * wo, 8)))
        ch, cw = ho, wo
    return dict(blocks=blocks, m_in0=h * w, m_in0_pad=_pad_to(h * w, 8),
                hw_out=ch * cw, c_last=conv_cfg[-1][1],
                final_feat=ch * cw * conv_cfg[-1][1])


# ----------------------------------------------------------------------------
# Fused Pallas kernel: B_TILE samples per grid step (conv stack per sample,
# one batched MLP head per step).
# ----------------------------------------------------------------------------
def _make_fused_kernel(meta, hw_out, c_last, b_tile, dbg_idx=None):
    nb = len(meta)
    n_feat = hw_out * c_last
    feat_w = n_feat + 128                      # + lane-padded positional features
    f32 = jnp.float32

    def kernel(*refs):
        x_ref, n_ref = refs[0], refs[1]
        sel_refs = refs[2:2 + nb]
        wdw_ref, wpw_ref, epi_ref = refs[2 + nb:5 + nb]
        w1_ref, w2_ref, w3_ref, w4_ref, hv_ref = refs[5 + nb:10 + nb]
        out_ref = refs[10 + nb]
        if dbg_idx is None:
            dbg_ref, feats_ref = None, refs[11 + nb]
        else:
            dbg_ref, feats_ref = refs[11 + nb], refs[12 + nb]

        # Rows >= b_tile of the head-input slab stay zero -> padded batch rows
        # are benign; positional features ride the same slab (lane-padded).
        feats_ref[...] = jnp.zeros((8, feat_w), f32)
        feats_ref[:, n_feat:] = n_ref[0]

        # --- 7 SepConv2d blocks per sample: depthwise gather (one matmul with
        #     the tap-concatenated 0/1 selection matrix) -> pointwise 1x1 (MXU)
        #     -> ReLU -> BatchNorm2d (eval scale/shift) ---------------------
        for b in range(b_tile):
            x = x_ref[b]                       # (m0_pad, c0) f32, row = h*W + w
            for bi, m in enumerate(meta):
                kt, cin, cout = m["k_taps"], m["cin"], m["cout"]
                woff, poff = m["wdw_off"], m["wpw_off"]
                taps = [x * wdw_ref[woff + k:woff + k + 1, :cin]
                        for k in range(kt)]
                x_stack = taps[0] if kt == 1 else jnp.concatenate(taps, axis=0)
                dw = jnp.dot(sel_refs[bi][...], x_stack.astype(_BF16),
                             preferred_element_type=f32)       # (m_out_pad, cin)
                y = jnp.dot(dw.astype(_BF16), wpw_ref[poff:poff + cin, :cout],
                            preferred_element_type=f32)        # (m_out_pad, cout)
                y = jnp.maximum(y + epi_ref[3 * bi:3 * bi + 1, :cout], 0.0)
                x = y * epi_ref[3 * bi + 1:3 * bi + 2, :cout] \
                    + epi_ref[3 * bi + 2:3 * bi + 3, :cout]
                if dbg_idx is not None and bi == dbg_idx:
                    dbg_ref[0, b * 8:(b + 1) * 8, :] = x
            # NCHW flatten order is absorbed into w1; scatter valid spatial
            # rows of sample b into row b of the head-input slab.
            for hw in range(hw_out):
                feats_ref[b:b + 1, hw * c_last:(hw + 1) * c_last] = x[hw:hw + 1, :]

        # --- MLP head over the whole batch tile (M = 8 sublane rows) ---------
        nm = n_ref[0]                                          # (8, 128) f32
        z1 = jnp.dot(feats_ref[...].astype(_BF16), w1_ref[...],
                     preferred_element_type=f32) + hv_ref[0:1, :]
        a1 = hv_ref[6:7, 0:1]
        z1 = jnp.where(z1 >= 0.0, z1, a1 * z1)                 # PReLU
        # BatchNorm1d(512) (eval) is folded into w2 / its bias.

        z1n = jnp.concatenate([z1, nm], axis=1)                # (8, 640)
        z2 = jnp.dot(z1n.astype(_BF16), w2_ref[...],
                     preferred_element_type=f32) + hv_ref[1:2, :128]
        a2 = hv_ref[6:7, 1:2]
        z2 = jnp.where(z2 >= 0.0, z2, a2 * z2)                 # PReLU
        z2 = z2 * hv_ref[2:3, :128] + hv_ref[3:4, :128]        # BatchNorm1d(128)
        a3 = hv_ref[6:7, 2:3]
        z2 = jnp.where(z2 >= 0.0, z2, a3 * z2)                 # PReLU

        z2n = jnp.concatenate([z2, nm], axis=1)                # (8, 256)
        z3 = jnp.dot(z2n.astype(_BF16), w3_ref[...],
                     preferred_element_type=f32) + hv_ref[4:5, :64]
        z3 = jnp.maximum(z3, 0.0)

        out_ref[0] = jnp.dot(z3.astype(_BF16), w4_ref[...],
                             preferred_element_type=f32) + hv_ref[5:6, :128]

    return kernel


# ----------------------------------------------------------------------------
# Forward wrapper: one pallas_call for the whole network.
# ----------------------------------------------------------------------------
def classifier3l_2d_forward(static, arrays, t_raw, n_raw, *, debug_block=None):
    meta = static["meta"]
    hw_out, c_last = static["hw_out"], static["c_last"]
    m0, m0p = static["m_in0"], static["m_in0_pad"]
    num_pos, no = static["num_pos"], static["no"]
    n_batch, c0, h, w = t_raw.shape
    assert h * w == m0 and num_pos <= 128

    # Batch tile: amortizes per-grid-step overhead and gives the head matmuls a
    # real M dimension; keeps >= 2 grid steps so both v7x TensorCores get work.
    b_tile = min(8, max(1, -(-n_batch // 2)))
    steps = -(-n_batch // b_tile)
    n_pad = steps * b_tile

    # NCHW -> per-sample activation rows (row = h*W + w, channels on lanes).
    x0 = jnp.transpose(t_raw, (0, 2, 3, 1)).reshape(n_batch, m0, c0)
    x0 = jnp.pad(x0, ((0, n_pad - n_batch), (0, m0p - m0), (0, 0)))

    nf = jnp.pad(n_raw.astype(jnp.float32),
                 ((0, n_pad - n_batch), (0, 128 - num_pos)))
    nf = nf.reshape(steps, b_tile, 128)
    nf = jnp.pad(nf, ((0, 0), (0, 8 - b_tile), (0, 0)))

    inputs = [x0, nf] + list(arrays["sel"]) + [
        arrays["wdw_all"], arrays["wpw_all"], arrays["epi_all"],
        arrays["w1"], arrays["w2"], arrays["w3"], arrays["w4"], arrays["hv"]]

    def _const_spec(a):
        nd = a.ndim
        return pl.BlockSpec(tuple(a.shape), lambda i, nd=nd: (0,) * nd)

    in_specs = [pl.BlockSpec((b_tile, m0p, c0), lambda i: (i, 0, 0)),
                pl.BlockSpec((1, 8, 128), lambda i: (i, 0, 0))] + \
               [_const_spec(a) for a in inputs[2:]]

    out_shape = [jax.ShapeDtypeStruct((steps, 8, 128), jnp.float32)]
    out_specs = [pl.BlockSpec((1, 8, 128), lambda i: (i, 0, 0))]
    if debug_block is not None:
        dm = meta[debug_block]
        assert dm["m_out_pad"] == 8 and dm["cout"] == 128
        out_shape.append(jax.ShapeDtypeStruct((steps, b_tile * 8, 128),
                                              jnp.float32))
        out_specs.append(pl.BlockSpec((1, b_tile * 8, 128), lambda i: (i, 0, 0)))

    # Advisory cost hint for XLA's scheduler.
    flops_s = 0
    for m in meta:
        flops_s += 2 * m["m_out_pad"] * (m["k_taps"] * m["m_in_pad"]) * m["cin"]
        flops_s += 2 * m["m_out_pad"] * m["cin"] * m["cout"]
    flops_s += 2 * ((hw_out * c_last + 128) * 512 + 640 * 128 + 256 * 64 + 64 * 128)
    bytes_accessed = int(sum(a.size * a.dtype.itemsize for a in inputs)
                         + n_pad * 128 * 4)

    res = pl.pallas_call(
        _make_fused_kernel(meta, hw_out, c_last, b_tile, dbg_idx=debug_block),
        grid=(steps,),
        in_specs=in_specs,
        out_specs=tuple(out_specs) if debug_block is not None else out_specs[0],
        out_shape=tuple(out_shape) if debug_block is not None else out_shape[0],
        scratch_shapes=[pltpu.VMEM((8, hw_out * c_last + 128), jnp.float32)],
        compiler_params=pltpu.CompilerParams(
            dimension_semantics=("parallel",),
            vmem_limit_bytes=32 * 1024 * 1024),
        cost_estimate=pl.CostEstimate(flops=int(flops_s * n_pad),
                                      transcendentals=0,
                                      bytes_accessed=bytes_accessed),
    )(*inputs)

    out = res[0] if debug_block is not None else res
    logits = out[:, :b_tile, :no].reshape(n_pad, no)[:n_batch]
    if debug_block is not None:
        dbg = res[1].reshape(n_pad, 8, 128)[:n_batch]
        return logits, dbg
    return logits


# ----------------------------------------------------------------------------
# Deterministic parameters (torch layout) + derivation of kernel-side params.
# ----------------------------------------------------------------------------
def init_raw_params(key, conv_cfg, no, num_positions):
    conv = []
    for cin, cout, kernel, stride, pad in conv_cfg:
        key, k1, k2, k3, k4, k5, k6, k7, k8 = jax.random.split(key, 9)
        kh, kw = kernel
        conv.append(dict(
            kernel=kernel, stride=stride, pad=pad,
            dw_w=(jax.random.normal(k1, (cin, kh, kw))
                  * np.sqrt(2.0 / (kh * kw))).astype(jnp.float32),
            dw_b=(0.01 * jax.random.normal(k2, (cin,))).astype(jnp.float32),
            pw_w=(jax.random.normal(k3, (cout, cin))
                  * np.sqrt(2.0 / cin)).astype(jnp.float32),
            pw_b=(0.01 * jax.random.normal(k4, (cout,))).astype(jnp.float32),
            gamma=(1.0 + 0.1 * jax.random.normal(k5, (cout,))).astype(jnp.float32),
            beta=(0.05 * jax.random.normal(k6, (cout,))).astype(jnp.float32),
            mean=(0.05 * jax.random.normal(k7, (cout,))).astype(jnp.float32),
            var=jax.random.uniform(k8, (cout,), jnp.float32, 0.5, 1.5)))

    p = num_positions
    key, *ks = jax.random.split(key, 17)

    def _lin(k, o, i):
        return (jax.random.normal(k, (o, i)) * np.sqrt(2.0 / i)).astype(jnp.float32)

    def _bias(k, o):
        return (0.01 * jax.random.normal(k, (o,))).astype(jnp.float32)

    head = dict(
        W1=_lin(ks[0], 512, 1024 + p), b1=_bias(ks[1], 512),
        g1=(1.0 + 0.1 * jax.random.normal(ks[2], (512,))).astype(jnp.float32),
        be1=(0.05 * jax.random.normal(ks[3], (512,))).astype(jnp.float32),
        m1=(0.05 * jax.random.normal(ks[4], (512,))).astype(jnp.float32),
        v1=jax.random.uniform(ks[5], (512,), jnp.float32, 0.5, 1.5),
        W2=_lin(ks[6], 128, 512 + p), b2=_bias(ks[7], 128),
        g2=(1.0 + 0.1 * jax.random.normal(ks[8], (128,))).astype(jnp.float32),
        be2=(0.05 * jax.random.normal(ks[9], (128,))).astype(jnp.float32),
        m2=(0.05 * jax.random.normal(ks[10], (128,))).astype(jnp.float32),
        v2=jax.random.uniform(ks[11], (128,), jnp.float32, 0.5, 1.5),
        W3=_lin(ks[12], 64, 128 + p), b3=_bias(ks[13], 64),
        W4=_lin(ks[14], no, 64), b4=_bias(ks[15], no),
        a1=jnp.float32(0.25), a2=jnp.float32(0.25), a3=jnp.float32(0.25))
    return dict(conv=conv, head=head)


def derive_kernel_params(raw, geom, num_positions, no):
    blocks = geom["blocks"]
    nb = len(blocks)

    total_taps = sum(b["k_taps"] for b in blocks)
    wdw_all = np.zeros((_pad_to(total_taps, 8), 128), np.float32)
    wpw_rows = sum(_pad_to(b["cin"], 16) for b in blocks)
    wpw_all = np.zeros((wpw_rows, 256), np.float32)
    epi_all = np.zeros((_pad_to(3 * nb, 8), 256), np.float32)

    sel_list, meta = [], []
    wdw_off = wpw_off = 0
    for bi, (blk, g) in enumerate(zip(raw["conv"], blocks)):
        cin, cout, kt = g["cin"], g["cout"], g["k_taps"]
        # wdw[k, c] = torch depthwise weight[c, ki, kj] with k = ki*kw + kj
        wdw_all[wdw_off:wdw_off + kt, :cin] = \
            np.asarray(blk["dw_w"]).reshape(cin, kt).T
        pw_w = np.asarray(blk["pw_w"]).T                             # (cin, cout)
        wpw_all[wpw_off:wpw_off + cin, :cout] = pw_w
        b_fold = np.asarray(blk["dw_b"]) @ pw_w + np.asarray(blk["pw_b"])
        scale = np.asarray(blk["gamma"]) / np.sqrt(np.asarray(blk["var"]) + EPS)
        shift = np.asarray(blk["beta"]) - np.asarray(blk["mean"]) * scale
        epi_all[3 * bi + 0, :cout] = b_fold
        epi_all[3 * bi + 1, :cout] = scale
        epi_all[3 * bi + 2, :cout] = shift
        sel_list.append(jnp.asarray(g["sel_cat"], dtype=_BF16))
        meta.append(dict(k_taps=kt, m_in_pad=g["m_in_pad"], m_out=g["m_out"],
                         m_out_pad=g["m_out_pad"], cin=cin, cout=cout,
                         wdw_off=wdw_off, wpw_off=wpw_off))
        wdw_off += kt
        wpw_off += _pad_to(cin, 16)

    # ------------- MLP head (flatten order / BN1d(512) folded in) -----------
    h = raw["head"]
    hw_out, c_last = geom["hw_out"], geom["c_last"]
    p = num_positions
    n_feat = hw_out * c_last                                         # 1024

    W1 = np.asarray(h["W1"])
    w1_full = np.zeros((n_feat + 128, 512), np.float32)
    # torch flatten is NCHW (feature = c*HW + hw); the kernel's feats slab is
    # (hw, c)-major, so permute W1 accordingly.
    w1_full[:n_feat] = W1[:, :n_feat].reshape(512, c_last, hw_out) \
        .transpose(2, 1, 0).reshape(n_feat, 512)
    w1_full[n_feat:n_feat + p] = W1[:, n_feat:].T

    s1 = np.asarray(h["g1"]) / np.sqrt(np.asarray(h["v1"]) + EPS)
    t1 = np.asarray(h["be1"]) - np.asarray(h["m1"]) * s1
    W2 = np.asarray(h["W2"])
    w2a_raw = W2[:, :512].T                                          # (512, 128)
    w2_full = np.zeros((512 + 128, 128), np.float32)
    w2_full[:512] = s1[:, None] * w2a_raw
    w2_full[512:512 + p] = W2[:, 512:].T
    b2_fold = np.asarray(h["b2"]) + t1 @ w2a_raw

    s2 = np.asarray(h["g2"]) / np.sqrt(np.asarray(h["v2"]) + EPS)
    t2 = np.asarray(h["be2"]) - np.asarray(h["m2"]) * s2

    W3 = np.asarray(h["W3"])
    w3_full = np.zeros((128 + 128, 64), np.float32)
    w3_full[:128] = W3[:, :128].T
    w3_full[128:128 + p] = W3[:, 128:].T

    w4_pad = np.zeros((64, 128), np.float32)
    w4_pad[:, :no] = np.asarray(h["W4"]).T

    hv = np.zeros((8, 512), np.float32)
    hv[0] = np.asarray(h["b1"])
    hv[1, :128] = b2_fold
    hv[2, :128] = s2
    hv[3, :128] = t2
    hv[4, :64] = np.asarray(h["b3"])
    hv[5, :no] = np.asarray(h["b4"])
    hv[6, 0], hv[6, 1], hv[6, 2] = float(h["a1"]), float(h["a2"]), float(h["a3"])

    arrays = dict(sel=sel_list,
                  wdw_all=jnp.asarray(wdw_all),
                  wpw_all=jnp.asarray(wpw_all, dtype=_BF16),
                  epi_all=jnp.asarray(epi_all),
                  w1=jnp.asarray(w1_full, dtype=_BF16),
                  w2=jnp.asarray(w2_full, dtype=_BF16),
                  w3=jnp.asarray(w3_full, dtype=_BF16),
                  w4=jnp.asarray(w4_pad, dtype=_BF16),
                  hv=jnp.asarray(hv))
    static = dict(meta=meta, hw_out=hw_out, c_last=c_last,
                  m_in0=geom["m_in0"], m_in0_pad=geom["m_in0_pad"],
                  num_pos=p, no=no)
    return arrays, static


# ----------------------------------------------------------------------------
# Pure-JAX (XLA, f32) reference of the original torch graph, for validation.
# ----------------------------------------------------------------------------
def reference_forward(raw, t_raw, n_raw, *, upto_block=None):
    x = t_raw
    for bi, blk in enumerate(raw["conv"]):
        cin = blk["dw_w"].shape[0]
        ph, pw = blk["pad"]
        x = jax.lax.conv_general_dilated(
            x, blk["dw_w"][:, None, :, :], blk["stride"], [(ph, ph), (pw, pw)],
            dimension_numbers=("NCHW", "OIHW", "NCHW"),
            feature_group_count=cin, precision=_HIGH)
        x = x + blk["dw_b"].reshape(1, -1, 1, 1)
        x = jax.lax.conv_general_dilated(
            x, blk["pw_w"][:, :, None, None], (1, 1), [(0, 0), (0, 0)],
            dimension_numbers=("NCHW", "OIHW", "NCHW"), precision=_HIGH)
        x = x + blk["pw_b"].reshape(1, -1, 1, 1)
        x = jnp.maximum(x, 0.0)
        s = blk["gamma"] / jnp.sqrt(blk["var"] + EPS)
        x = x * s.reshape(1, -1, 1, 1) + \
            (blk["beta"] - blk["mean"] * s).reshape(1, -1, 1, 1)
        if upto_block is not None and bi == upto_block:
            return x

    h = raw["head"]
    nf = n_raw.astype(jnp.float32)
    raw_out = x.reshape(x.shape[0], -1)

    def lin(v, wt, b):
        return jnp.dot(v, wt.T, precision=_HIGH) + b

    z1 = lin(jnp.concatenate([raw_out, nf], axis=1), h["W1"], h["b1"])
    z1 = jnp.where(z1 >= 0, z1, h["a1"] * z1)
    s1 = h["g1"] / jnp.sqrt(h["v1"] + EPS)
    z1 = z1 * s1 + (h["be1"] - h["m1"] * s1)

    z2 = lin(jnp.concatenate([z1, nf], axis=1), h["W2"], h["b2"])
    z2 = jnp.where(z2 >= 0, z2, h["a2"] * z2)
    s2 = h["g2"] / jnp.sqrt(h["v2"] + EPS)
    z2 = z2 * s2 + (h["be2"] - h["m2"] * s2)
    z2 = jnp.where(z2 >= 0, z2, h["a3"] * z2)

    z3 = jnp.maximum(lin(jnp.concatenate([z2, nf], axis=1), h["W3"], h["b3"]), 0.0)
    return lin(z3, h["W4"], h["b4"])


# ----------------------------------------------------------------------------
if __name__ == "__main__":
    N, RAW_NI, NO, NUM_POS = 2, 4, 5, 12
    # (H, W) = (24, 3): the conv stack yields (N, 256, 2, 2) -> 1024 features,
    # matching nn.Linear(1024 + num_positions, 512) in feat1.
    H, W = 24, 3

    key = jax.random.PRNGKey(0)
    k_x, k_n, k_p = jax.random.split(key, 3)
    t_raw = jax.random.normal(k_x, (N, RAW_NI, H, W), jnp.float32)
    n_raw = jax.random.randint(k_n, (N, NUM_POS), 0, NUM_POS).astype(jnp.float32)

    conv_cfg = make_conv_cfg(RAW_NI)
    geom = build_geometry(conv_cfg, H, W)
    assert geom["final_feat"] == 1024, geom["final_feat"]

    raw_params = init_raw_params(k_p, conv_cfg, NO, NUM_POS)
    arrays, static = derive_kernel_params(raw_params, geom, NUM_POS, NO)

    fwd = jax.jit(functools.partial(classifier3l_2d_forward, static))
    out = jax.block_until_ready(fwd(arrays, t_raw, n_raw))
    assert out.shape == (N, NO), out.shape
    assert bool(jnp.all(jnp.isfinite(out)))

    # End-to-end check vs the pure-JAX f32 reference of the torch graph
    # (bf16 matmul operands -> ~1e-2 scale tolerance).
    ref = jax.block_until_ready(reference_forward(raw_params, t_raw, n_raw))
    rel = float(jnp.max(jnp.abs(out - ref)) / (jnp.max(jnp.abs(ref)) + 1e-6))
    assert rel < 3e-2, f"logits mismatch vs reference: rel_err={rel}"

    # At this geometry the last SepConv2d (1x1 kernel, stride 4, pad 2 on a 1x3
    # map) only samples conv zero-padding, so the logits alone cannot exercise
    # the depthwise-gather machinery; also validate an intermediate activation.
    DBG = 5
    fwd_dbg = jax.jit(functools.partial(classifier3l_2d_forward, static,
                                        debug_block=DBG))
    _, act = fwd_dbg(arrays, t_raw, n_raw)
    act = jax.block_until_ready(act)
    ref_act = reference_forward(raw_params, t_raw, n_raw, upto_block=DBG)
    ref_act = jnp.transpose(ref_act, (0, 2, 3, 1)).reshape(
        N, -1, ref_act.shape[1])                         # (N, h*w, c)
    m_valid, cc = ref_act.shape[1], ref_act.shape[2]
    rel_a = float(jnp.max(jnp.abs(act[:, :m_valid, :cc] - ref_act))
                  / (jnp.max(jnp.abs(ref_act)) + 1e-6))
    assert rel_a < 5e-2, f"conv-stack mismatch vs reference: rel_err={rel_a}"

    print("KERNEL_OK")
</pallas_src>

<mosaic_0001>
module attributes {stable_mosaic.version = 11 : i64} {
  func.func @kernel(%arg0: i32, %arg1: memref<1x72x4xf32, #tpu.memory_space<vmem>>, %arg2: memref<1x8x128xf32, #tpu.memory_space<vmem>>, %arg3: memref<120x360xbf16, #tpu.memory_space<vmem>>, %arg4: memref<72x720xbf16, #tpu.memory_space<vmem>>, %arg5: memref<24x1080xbf16, #tpu.memory_space<vmem>>, %arg6: memref<24x216xbf16, #tpu.memory_space<vmem>>, %arg7: memref<8x480xbf16, #tpu.memory_space<vmem>>, %arg8: memref<8x72xbf16, #tpu.memory_space<vmem>>, %arg9: memref<8x8xbf16, #tpu.memory_space<vmem>>, %arg10: memref<72x128xf32, #tpu.memory_space<vmem>>, %arg11: memref<464x256xbf16, #tpu.memory_space<vmem>>, %arg12: memref<24x256xf32, #tpu.memory_space<vmem>>, %arg13: memref<1152x512xbf16, #tpu.memory_space<vmem>>, %arg14: memref<640x128xbf16, #tpu.memory_space<vmem>>, %arg15: memref<256x64xbf16, #tpu.memory_space<vmem>>, %arg16: memref<64x128xbf16, #tpu.memory_space<vmem>>, %arg17: memref<8x512xf32, #tpu.memory_space<vmem>>, %arg18: memref<1x8x128xf32, #tpu.memory_space<vmem>>, %arg19: memref<8x1152xf32, #tpu.memory_space<vmem>>) attributes {dimension_semantics = [#tpu.dimension_semantics<parallel>], iteration_bounds = array<i64: 2>, scalar_prefetch = 0 : i64, scratch_operands = 1 : i64, tpu.core_type = #tpu.core_type<tc>, window_params = [{transform_indices = @transform_0, window_bounds = array<i64: 1, 72, 4>}, {transform_indices = @transform_1, window_bounds = array<i64: 1, 8, 128>}, {pipeline_mode = #tpu.pipeline_mode<synchronous>, transform_indices = @transform_2, window_bounds = array<i64: 120, 360>}, {pipeline_mode = #tpu.pipeline_mode<synchronous>, transform_indices = @transform_3, window_bounds = array<i64: 72, 720>}, {pipeline_mode = #tpu.pipeline_mode<synchronous>, transform_indices = @transform_4, window_bounds = array<i64: 24, 1080>}, {pipeline_mode = #tpu.pipeline_mode<synchronous>, transform_indices = @transform_5, window_bounds = array<i64: 24, 216>}, {pipeline_mode = #tpu.pipeline_mode<synchronous>, transform_indices = @transform_6, window_bounds = array<i64: 8, 480>}, {pipeline_mode = #tpu.pipeline_mode<synchronous>, transform_indices = @transform_7, window_bounds = array<i64: 8, 72>}, {pipeline_mode = #tpu.pipeline_mode<synchronous>, transform_indices = @transform_8, window_bounds = array<i64: 8, 8>}, {pipeline_mode = #tpu.pipeline_mode<synchronous>, transform_indices = @transform_9, window_bounds = array<i64: 72, 128>}, {pipeline_mode = #tpu.pipeline_mode<synchronous>, transform_indices = @transform_10, window_bounds = array<i64: 464, 256>}, {pipeline_mode = #tpu.pipeline_mode<synchronous>, transform_indices = @transform_11, window_bounds = array<i64: 24, 256>}, {pipeline_mode = #tpu.pipeline_mode<synchronous>, transform_indices = @transform_12, window_bounds = array<i64: 1152, 512>}, {pipeline_mode = #tpu.pipeline_mode<synchronous>, transform_indices = @transform_13, window_bounds = array<i64: 640, 128>}, {pipeline_mode = #tpu.pipeline_mode<synchronous>, transform_indices = @transform_14, window_bounds = array<i64: 256, 64>}, {pipeline_mode = #tpu.pipeline_mode<synchronous>, transform_indices = @transform_15, window_bounds = array<i64: 64, 128>}, {pipeline_mode = #tpu.pipeline_mode<synchronous>, transform_indices = @transform_16, window_bounds = array<i64: 8, 512>}, {transform_indices = @transform_17, window_bounds = array<i64: 1, 8, 128>}]} {
    %cst = arith.constant 0.000000e+00 : f32
    %0 = vector.broadcast %cst : f32 to vector<8x1152xf32>
    %c0 = arith.constant 0 : index
    %c0_0 = arith.constant 0 : index
    %1 = vector.load %arg19[%c0, %c0_0] : memref<8x1152xf32, #tpu.memory_space<vmem>>, vector<8x1152xf32>
    tpu.vector_store %arg19[%c0, %c0_0], %0 {strides = array<i32>} : memref<8x1152xf32, #tpu.memory_space<vmem>>, vector<8x1152xf32>,
    %c0_1 = arith.constant 0 : index
    %c0_2 = arith.constant 0 : index
    %c0_3 = arith.constant 0 : index
    %2 = vector.load %arg2[%c0_1, %c0_2, %c0_3] : memref<1x8x128xf32, #tpu.memory_space<vmem>>, vector<1x8x128xf32>
    %3 = vector.shape_cast %2 : vector<1x8x128xf32> to vector<8x128xf32>
    %c0_4 = arith.constant 0 : index
    %c1024 = arith.constant 1024 : index
    %4 = vector.load %arg19[%c0_4, %c1024] : memref<8x1152xf32, #tpu.memory_space<vmem>>, vector<8x128xf32>
    tpu.vector_store %arg19[%c0_4, %c1024], %3 {strides = array<i32>} : memref<8x1152xf32, #tpu.memory_space<vmem>>, vector<8x128xf32>,
    %c0_5 = arith.constant 0 : index
    %c0_6 = arith.constant 0 : index
    %c0_7 = arith.constant 0 : index
    %5 = vector.load %arg1[%c0_5, %c0_6, %c0_7] : memref<1x72x4xf32, #tpu.memory_space<vmem>>, vector<1x72x4xf32>
    %6 = vector.shape_cast %5 : vector<1x72x4xf32> to vector<72x4xf32>
    %c0_8 = arith.constant 0 : index
    %c0_9 = arith.constant 0 : index
    %7 = vector.load %arg10[%c0_8, %c0_9] : memref<72x128xf32, #tpu.memory_space<vmem>>, vector<1x4xf32>
    %8 = vector.broadcast %7 : vector<1x4xf32> to vector<72x4xf32>
    %9 = arith.mulf %6, %8 : vector<72x4xf32>
    %c1 = arith.constant 1 : index
    %c0_10 = arith.constant 0 : index
    %10 = vector.load %arg10[%c1, %c0_10] : memref<72x128xf32, #tpu.memory_space<vmem>>, vector<1x4xf32>
    %11 = vector.broadcast %10 : vector<1x4xf32> to vector<72x4xf32>
    %12 = arith.mulf %6, %11 : vector<72x4xf32>
    %c2 = arith.constant 2 : index
    %c0_11 = arith.constant 0 : index
    %13 = vector.load %arg10[%c2, %c0_11] : memref<72x128xf32, #tpu.memory_space<vmem>>, vector<1x4xf32>
    %14 = vector.broadcast %13 : vector<1x4xf32> to vector<72x4xf32>
    %15 = arith.mulf %6, %14 : vector<72x4xf32>
    %c3 = arith.constant 3 : index
    %c0_12 = arith.constant 0 : index
    %16 = vector.load %arg10[%c3, %c0_12] : memref<72x128xf32, #tpu.memory_space<vmem>>, vector<1x4xf32>
    %17 = vector.broadcast %16 : vector<1x4xf32> to vector<72x4xf32>
    %18 = arith.mulf %6, %17 : vector<72x4xf32>
    %c4 = arith.constant 4 : index
    %c0_13 = arith.constant 0 : index
    %19 = vector.load %arg10[%c4, %c0_13] : memref<72x128xf32, #tpu.memory_space<vmem>>, vector<1x4xf32>
    %20 = vector.broadcast %19 : vector<1x4xf32> to vector<72x4xf32>
    %21 = arith.mulf %6, %20 : vector<72x4xf32>
    %22 = tpu.concatenate %9, %12, %15, %18, %21 in 0 : vector<72x4xf32>, vector<72x4xf32>, vector<72x4xf32>, vector<72x4xf32>, vector<72x4xf32> -> vector<360x4xf32>
    %c0_14 = arith.constant 0 : index
    %c0_15 = arith.constant 0 : index
    %23 = vector.load %arg3[%c0_14, %c0_15] : memref<120x360xbf16, #tpu.memory_space<vmem>>, vector<120x360xbf16>
    %24 = arith.truncf %22 : vector<360x4xf32> to vector<360x4xbf16>
    %cst_16 = arith.constant dense<0.000000e+00> : vector<120x4xf32>
    %25 = tpu.matmul %23, %24, %cst_16 {dimension_numbers = #tpu.dot_dimension_numbers<[1], [0], [0], [1], [0, 0, 1, 1], [], []>} : vector<120x360xbf16>, vector<360x4xbf16>, vector<120x4xf32> -> vector<120x4xf32>
    %26 = arith.truncf %25 : vector<120x4xf32> to vector<120x4xbf16>
    %c0_17 = arith.constant 0 : index
    %c0_18 = arith.constant 0 : index
    %27 = vector.load %arg11[%c0_17, %c0_18] : memref<464x256xbf16, #tpu.memory_space<vmem>>, vector<4x32xbf16>
    %cst_19 = arith.constant dense<0.000000e+00> : vector<120x32xf32>
    %28 = tpu.matmul %26, %27, %cst_19 {dimension_numbers = #tpu.dot_dimension_numbers<[1], [0], [0], [1], [0, 0, 1, 1], [], []>} : vector<120x4xbf16>, vector<4x32xbf16>, vector<120x32xf32> -> vector<120x32xf32>
    %c0_20 = arith.constant 0 : index
    %c0_21 = arith.constant 0 : index
    %29 = vector.load %arg12[%c0_20, %c0_21] : memref<24x256xf32, #tpu.memory_space<vmem>>, vector<1x32xf32>
    %30 = vector.broadcast %29 : vector<1x32xf32> to vector<120x32xf32>
    %31 = arith.addf %28, %30 : vector<120x32xf32>
    %cst_22 = arith.constant 0.000000e+00 : f32
    %32 = vector.broadcast %cst_22 : f32 to vector<120x32xf32>
    %33 = arith.maximumf %31, %32 : vector<120x32xf32>
    %c1_23 = arith.constant 1 : index
    %c0_24 = arith.constant 0 : index
    %34 = vector.load %arg12[%c1_23, %c0_24] : memref<24x256xf32, #tpu.memory_space<vmem>>, vector<1x32xf32>
    %35 = vector.broadcast %34 : vector<1x32xf32> to vector<120x32xf32>
    %36 = arith.mulf %33, %35 : vector<120x32xf32>
    %c2_25 = arith.constant 2 : index
    %c0_26 = arith.constant 0 : index
    %37 = vector.load %arg12[%c2_25, %c0_26] : memref<24x256xf32, #tpu.memory_space<vmem>>, vector<1x32xf32>
    %38 = vector.broadcast %37 : vector<1x32xf32> to vector<120x32xf32>
    %39 = arith.addf %36, %38 : vector<120x32xf32>
    %c5 = arith.constant 5 : index
    %c0_27 = arith.constant 0 : index
    %40 = vector.load %arg10[%c5, %c0_27] : memref<72x128xf32, #tpu.memory_space<vmem>>, vector<1x32xf32>
    %41 = vector.broadcast %40 : vector<1x32xf32> to vector<120x32xf32>
    %42 = arith.mulf %39, %41 : vector<120x32xf32>
    %c6 = arith.constant 6 : index
    %c0_28 = arith.constant 0 : index
    %43 = vector.load %arg10[%c6, %c0_28] : memref<72x128xf32, #tpu.memory_space<vmem>>, vector<1x32xf32>
    %44 = vector.broadcast %43 : vector<1x32xf32> to vector<120x32xf32>
    %45 = arith.mulf %39, %44 : vector<120x32xf32>
    %c7 = arith.constant 7 : index
    %c0_29 = arith.constant 0 : index
    %46 = vector.load %arg10[%c7, %c0_29] : memref<72x128xf32, #tpu.memory_space<vmem>>, vector<1x32xf32>
    %47 = vector.broadcast %46 : vector<1x32xf32> to vector<120x32xf32>
    %48 = arith.mulf %39, %47 : vector<120x32xf32>
    %c8 = arith.constant 8 : index
    %c0_30 = arith.constant 0 : index
    %49 = vector.load %arg10[%c8, %c0_30] : memref<72x128xf32, #tpu.memory_space<vmem>>, vector<1x32xf32>
    %50 = vector.broadcast %49 : vector<1x32xf32> to vector<120x32xf32>
    %51 = arith.mulf %39, %50 : vector<120x32xf32>
    %c9 = arith.constant 9 : index
    %c0_31 = arith.constant 0 : index
    %52 = vector.load %arg10[%c9, %c0_31] : memref<72x128xf32, #tpu.memory_space<vmem>>, vector<1x32xf32>
    %53 = vector.broadcast %52 : vector<1x32xf32> to vector<120x32xf32>
    %54 = arith.mulf %39, %53 : vector<120x32xf32>
    %c10 = arith.constant 10 : index
    %c0_32 = arith.constant 0 : index
    %55 = vector.load %arg10[%c10, %c0_32] : memref<72x128xf32, #tpu.memory_space<vmem>>, vector<1x32xf32>
    %56 = vector.broadcast %55 : vector<1x32xf32> to vector<120x32xf32>
    %57 = arith.mulf %39, %56 : vector<120x32xf32>
    %58 = tpu.concatenate %42, %45, %48, %51, %54, %57 in 0 : vector<120x32xf32>, vector<120x32xf32>, vector<120x32xf32>, vector<120x32xf32>, vector<120x32xf32>, vector<120x32xf32> -> vector<720x32xf32>
    %c0_33 = arith.constant 0 : index
    %c0_34 = arith.constant 0 : index
    %59 = vector.load %arg4[%c0_33, %c0_34] : memref<72x720xbf16, #tpu.memory_space<vmem>>, vector<72x720xbf16>
    %60 = arith.truncf %58 : vector<720x32xf32> to vector<720x32xbf16>
    %cst_35 = arith.constant dense<0.000000e+00> : vector<72x32xf32>
    %61 = tpu.matmul %59, %60, %cst_35 {dimension_numbers = #tpu.dot_dimension_numbers<[1], [0], [0], [1], [0, 0, 1, 1], [], []>} : vector<72x720xbf16>, vector<720x32xbf16>, vector<72x32xf32> -> vector<72x32xf32>
    %62 = arith.truncf %61 : vector<72x32xf32> to vector<72x32xbf16>
    %c16 = arith.constant 16 : index
    %c0_36 = arith.constant 0 : index
    %63 = vector.load %arg11[%c16, %c0_36] : memref<464x256xbf16, #tpu.memory_space<vmem>>, vector<32x32xbf16>
    %cst_37 = arith.constant dense<0.000000e+00> : vector<72x32xf32>
    %64 = tpu.matmul %62, %63, %cst_37 {dimension_numbers = #tpu.dot_dimension_numbers<[1], [0], [0], [1], [0, 0, 1, 1], [], []>} : vector<72x32xbf16>, vector<32x32xbf16>, vector<72x32xf32> -> vector<72x32xf32>
    %c3_38 = arith.constant 3 : index
    %c0_39 = arith.constant 0 : index
    %65 = vector.load %arg12[%c3_38, %c0_39] : memref<24x256xf32, #tpu.memory_space<vmem>>, vector<1x32xf32>
    %66 = vector.broadcast %65 : vector<1x32xf32> to vector<72x32xf32>
    %67 = arith.addf %64, %66 : vector<72x32xf32>
    %cst_40 = arith.constant 0.000000e+00 : f32
    %68 = vector.broadcast %cst_40 : f32 to vector<72x32xf32>
    %69 = arith.maximumf %67, %68 : vector<72x32xf32>
    %c4_41 = arith.constant 4 : index
    %c0_42 = arith.constant 0 : index
    %70 = vector.load %arg12[%c4_41, %c0_42] : memref<24x256xf32, #tpu.memory_space<vmem>>, vector<1x32xf32>
    %71 = vector.broadcast %70 : vector<1x32xf32> to vector<72x32xf32>
    %72 = arith.mulf %69, %71 : vector<72x32xf32>
    %c5_43 = arith.constant 5 : index
    %c0_44 = arith.constant 0 : index
    %73 = vector.load %arg12[%c5_43, %c0_44] : memref<24x256xf32, #tpu.memory_space<vmem>>, vector<1x32xf32>
    %74 = vector.broadcast %73 : vector<1x32xf32> to vector<72x32xf32>
    %75 = arith.addf %72, %74 : vector<72x32xf32>
    %c11 = arith.constant 11 : index
    %c0_45 = arith.constant 0 : index
    %76 = vector.load %arg10[%c11, %c0_45] : memref<72x128xf32, #tpu.memory_space<vmem>>, vector<1x32xf32>
    %77 = vector.broadcast %76 : vector<1x32xf32> to vector<72x32xf32>
    %78 = arith.mulf %75, %77 : vector<72x32xf32>
    %c12 = arith.constant 12 : index
    %c0_46 = arith.constant 0 : index
    %79 = vector.load %arg10[%c12, %c0_46] : memref<72x128xf32, #tpu.memory_space<vmem>>, vector<1x32xf32>
    %80 = vector.broadcast %79 : vector<1x32xf32> to vector<72x32xf32>
    %81 = arith.mulf %75, %80 : vector<72x32xf32>
    %c13 = arith.constant 13 : index
    %c0_47 = arith.constant 0 : index
    %82 = vector.load %arg10[%c13, %c0_47] : memref<72x128xf32, #tpu.memory_space<vmem>>, vector<1x32xf32>
    %83 = vector.broadcast %82 : vector<1x32xf32> to vector<72x32xf32>
    %84 = arith.mulf %75, %83 : vector<72x32xf32>
    %c14 = arith.constant 14 : index
    %c0_48 = arith.constant 0 : index
    %85 = vector.load %arg10[%c14, %c0_48] : memref<72x128xf32, #tpu.memory_space<vmem>>, vector<1x32xf32>
    %86 = vector.broadcast %85 : vector<1x32xf32> to vector<72x32xf32>
    %87 = arith.mulf %75, %86 : vector<72x32xf32>
    %c15 = arith.constant 15 : index
    %c0_49 = arith.constant 0 : index
    %88 = vector.load %arg10[%c15, %c0_49] : memref<72x128xf32, #tpu.memory_space<vmem>>, vector<1x32xf32>
    %89 = vector.broadcast %88 : vector<1x32xf32> to vector<72x32xf32>
    %90 = arith.mulf %75, %89 : vector<72x32xf32>
    %c16_50 = arith.constant 16 : index
    %c0_51 = arith.constant 0 : index
    %91 = vector.load %arg10[%c16_50, %c0_51] : memref<72x128xf32, #tpu.memory_space<vmem>>, vector<1x32xf32>
    %92 = vector.broadcast %91 : vector<1x32xf32> to vector<72x32xf32>
    %93 = arith.mulf %75, %92 : vector<72x32xf32>
    %c17 = arith.constant 17 : index
    %c0_52 = arith.constant 0 : index
    %94 = vector.load %arg10[%c17, %c0_52] : memref<72x128xf32, #tpu.memory_space<vmem>>, vector<1x32xf32>
    %95 = vector.broadcast %94 : vector<1x32xf32> to vector<72x32xf32>
    %96 = arith.mulf %75, %95 : vector<72x32xf32>
    %c18 = arith.constant 18 : index
    %c0_53 = arith.constant 0 : index
    %97 = vector.load %arg10[%c18, %c0_53] : memref<72x128xf32, #tpu.memory_space<vmem>>, vector<1x32xf32>
    %98 = vector.broadcast %97 : vector<1x32xf32> to vector<72x32xf32>
    %99 = arith.mulf %75, %98 : vector<72x32xf32>
    %c19 = arith.constant 19 : index
    %c0_54 = arith.constant 0 : index
    %100 = vector.load %arg10[%c19, %c0_54] : memref<72x128xf32, #tpu.memory_space<vmem>>, vector<1x32xf32>
    %101 = vector.broadcast %100 : vector<1x32xf32> to vector<72x32xf32>
    %102 = arith.mulf %75, %101 : vector<72x32xf32>
    %c20 = arith.constant 20 : index
    %c0_55 = arith.constant 0 : index
    %103 = vector.load %arg10[%c20, %c0_55] : memref<72x128xf32, #tpu.memory_space<vmem>>, vector<1x32xf32>
    %104 = vector.broadcast %103 : vector<1x32xf32> to vector<72x32xf32>
    %105 = arith.mulf %75, %104 : vector<72x32xf32>
    %c21 = arith.constant 21 : index
    %c0_56 = arith.constant 0 : index
    %106 = vector.load %arg10[%c21, %c0_56] : memref<72x128xf32, #tpu.memory_space<vmem>>, vector<1x32xf32>
    %107 = vector.broadcast %106 : vector<1x32xf32> to vector<72x32xf32>
    %108 = arith.mulf %75, %107 : vector<72x32xf32>
    %c22 = arith.constant 22 : index
    %c0_57 = arith.constant 0 : index
    %109 = vector.load %arg10[%c22, %c0_57] : memref<72x128xf32, #tpu.memory_space<vmem>>, vector<1x32xf32>
    %110 = vector.broadcast %109 : vector<1x32xf32> to vector<72x32xf32>
    %111 = arith.mulf %75, %110 : vector<72x32xf32>
    %c23 = arith.constant 23 : index
    %c0_58 = arith.constant 0 : index
    %112 = vector.load %arg10[%c23, %c0_58] : memref<72x128xf32, #tpu.memory_space<vmem>>, vector<1x32xf32>
    %113 = vector.broadcast %112 : vector<1x32xf32> to vector<72x32xf32>
    %114 = arith.mulf %75, %113 : vector<72x32xf32>
    %c24 = arith.constant 24 : index
    %c0_59 = arith.constant 0 : index
    %115 = vector.load %arg10[%c24, %c0_59] : memref<72x128xf32, #tpu.memory_space<vmem>>, vector<1x32xf32>
    %116 = vector.broadcast %115 : vector<1x32xf32> to vector<72x32xf32>
    %117 = arith.mulf %75, %116 : vector<72x32xf32>
    %c25 = arith.constant 25 : index
    %c0_60 = arith.constant 0 : index
    %118 = vector.load %arg10[%c25, %c0_60] : memref<72x128xf32, #tpu.memory_space<vmem>>, vector<1x32xf32>
    %119 = vector.broadcast %118 : vector<1x32xf32> to vector<72x32xf32>
    %120 = arith.mulf %75, %119 : vector<72x32xf32>
    %121 = tpu.concatenate %78, %81, %84, %87, %90, %93, %96, %99, %102, %105, %108, %111, %114, %117, %120 in 0 : vector<72x32xf32>, vector<72x32xf32>, vector<72x32xf32>, vector<72x32xf32>, vector<72x32xf32>, vector<72x32xf32>, vector<72x32xf32>, vector<72x32xf32>, vector<72x32xf32>, vector<72x32xf32>, vector<72x32xf32>, vector<72x32xf32>, vector<72x32xf32>, vector<72x32xf32>, vector<72x32xf32> -> vector<1080x32xf32>
    %c0_61 = arith.constant 0 : index
    %c0_62 = arith.constant 0 : index
    %122 = vector.load %arg5[%c0_61, %c0_62] : memref<24x1080xbf16, #tpu.memory_space<vmem>>, vector<24x1080xbf16>
    %123 = arith.truncf %121 : vector<1080x32xf32> to vector<1080x32xbf16>
    %cst_63 = arith.constant dense<0.000000e+00> : vector<24x32xf32>
    %124 = tpu.matmul %122, %123, %cst_63 {dimension_numbers = #tpu.dot_dimension_numbers<[1], [0], [0], [1], [0, 0, 1, 1], [], []>} : vector<24x1080xbf16>, vector<1080x32xbf16>, vector<24x32xf32> -> vector<24x32xf32>
    %125 = arith.truncf %124 : vector<24x32xf32> to vector<24x32xbf16>
    %c48 = arith.constant 48 : index
    %c0_64 = arith.constant 0 : index
    %126 = vector.load %arg11[%c48, %c0_64] : memref<464x256xbf16, #tpu.memory_space<vmem>>, vector<32x64xbf16>
    %cst_65 = arith.constant dense<0.000000e+00> : vector<24x64xf32>
    %127 = tpu.matmul %125, %126, %cst_65 {dimension_numbers = #tpu.dot_dimension_numbers<[1], [0], [0], [1], [0, 0, 1, 1], [], []>} : vector<24x32xbf16>, vector<32x64xbf16>, vector<24x64xf32> -> vector<24x64xf32>
    %c6_66 = arith.constant 6 : index
    %c0_67 = arith.constant 0 : index
    %128 = vector.load %arg12[%c6_66, %c0_67] : memref<24x256xf32, #tpu.memory_space<vmem>>, vector<1x64xf32>
    %129 = vector.broadcast %128 : vector<1x64xf32> to vector<24x64xf32>
    %130 = arith.addf %127, %129 : vector<24x64xf32>
    %cst_68 = arith.constant 0.000000e+00 : f32
    %131 = vector.broadcast %cst_68 : f32 to vector<24x64xf32>
    %132 = arith.maximumf %130, %131 : vector<24x64xf32>
    %c7_69 = arith.constant 7 : index
    %c0_70 = arith.constant 0 : index
    %133 = vector.load %arg12[%c7_69, %c0_70] : memref<24x256xf32, #tpu.memory_space<vmem>>, vector<1x64xf32>
    %134 = vector.broadcast %133 : vector<1x64xf32> to vector<24x64xf32>
    %135 = arith.mulf %132, %134 : vector<24x64xf32>
    %c8_71 = arith.constant 8 : index
    %c0_72 = arith.constant 0 : index
    %136 = vector.load %arg12[%c8_71, %c0_72] : memref<24x256xf32, #tpu.memory_space<vmem>>, vector<1x64xf32>
    %137 = vector.broadcast %136 : vector<1x64xf32> to vector<24x64xf32>
    %138 = arith.addf %135, %137 : vector<24x64xf32>
    %c26 = arith.constant 26 : index
    %c0_73 = arith.constant 0 : index
    %139 = vector.load %arg10[%c26, %c0_73] : memref<72x128xf32, #tpu.memory_space<vmem>>, vector<1x64xf32>
    %140 = vector.broadcast %139 : vector<1x64xf32> to vector<24x64xf32>
    %141 = arith.mulf %138, %140 : vector<24x64xf32>
    %c27 = arith.constant 27 : index
    %c0_74 = arith.constant 0 : index
    %142 = vector.load %arg10[%c27, %c0_74] : memref<72x128xf32, #tpu.memory_space<vmem>>, vector<1x64xf32>
    %143 = vector.broadcast %142 : vector<1x64xf32> to vector<24x64xf32>
    %144 = arith.mulf %138, %143 : vector<24x64xf32>
    %c28 = arith.constant 28 : index
    %c0_75 = arith.constant 0 : index
    %145 = vector.load %arg10[%c28, %c0_75] : memref<72x128xf32, #tpu.memory_space<vmem>>, vector<1x64xf32>
    %146 = vector.broadcast %145 : vector<1x64xf32> to vector<24x64xf32>
    %147 = arith.mulf %138, %146 : vector<24x64xf32>
    %c29 = arith.constant 29 : index
    %c0_76 = arith.constant 0 : index
    %148 = vector.load %arg10[%c29, %c0_76] : memref<72x128xf32, #tpu.memory_space<vmem>>, vector<1x64xf32>
    %149 = vector.broadcast %148 : vector<1x64xf32> to vector<24x64xf32>
    %150 = arith.mulf %138, %149 : vector<24x64xf32>
    %c30 = arith.constant 30 : index
    %c0_77 = arith.constant 0 : index
    %151 = vector.load %arg10[%c30, %c0_77] : memref<72x128xf32, #tpu.memory_space<vmem>>, vector<1x64xf32>
    %152 = vector.broadcast %151 : vector<1x64xf32> to vector<24x64xf32>
    %153 = arith.mulf %138, %152 : vector<24x64xf32>
    %c31 = arith.constant 31 : index
    %c0_78 = arith.constant 0 : index
    %154 = vector.load %arg10[%c31, %c0_78] : memref<72x128xf32, #tpu.memory_space<vmem>>, vector<1x64xf32>
    %155 = vector.broadcast %154 : vector<1x64xf32> to vector<24x64xf32>
    %156 = arith.mulf %138, %155 : vector<24x64xf32>
    %c32 = arith.constant 32 : index
    %c0_79 = arith.constant 0 : index
    %157 = vector.load %arg10[%c32, %c0_79] : memref<72x128xf32, #tpu.memory_space<vmem>>, vector<1x64xf32>
    %158 = vector.broadcast %157 : vector<1x64xf32> to vector<24x64xf32>
    %159 = arith.mulf %138, %158 : vector<24x64xf32>
    %c33 = arith.constant 33 : index
    %c0_80 = arith.constant 0 : index
    %160 = vector.load %arg10[%c33, %c0_80] : memref<72x128xf32, #tpu.memory_space<vmem>>, vector<1x64xf32>
    %161 = vector.broadcast %160 : vector<1x64xf32> to vector<24x64xf32>
    %162 = arith.mulf %138, %161 : vector<24x64xf32>
    %c34 = arith.constant 34 : index
    %c0_81 = arith.constant 0 : index
    %163 = vector.load %arg10[%c34, %c0_81] : memref<72x128xf32, #tpu.memory_space<vmem>>, vector<1x64xf32>
    %164 = vector.broadcast %163 : vector<1x64xf32> to vector<24x64xf32>
    %165 = arith.mulf %138, %164 : vector<24x64xf32>
    %166 = tpu.concatenate %141, %144, %147, %150, %153, %156, %159, %162, %165 in 0 : vector<24x64xf32>, vector<24x64xf32>, vector<24x64xf32>, vector<24x64xf32>, vector<24x64xf32>, vector<24x64xf32>, vector<24x64xf32>, vector<24x64xf32>, vector<24x64xf32> -> vector<216x64xf32>
    %c0_82 = arith.constant 0 : index
    %c0_83 = arith.constant 0 : index
    %167 = vector.load %arg6[%c0_82, %c0_83] : memref<24x216xbf16, #tpu.memory_space<vmem>>, vector<24x216xbf16>
    %168 = arith.truncf %166 : vector<216x64xf32> to vector<216x64xbf16>
    %cst_84 = arith.constant dense<0.000000e+00> : vector<24x64xf32>
    %169 = tpu.matmul %167, %168, %cst_84 {dimension_numbers = #tpu.dot_dimension_numbers<[1], [0], [0], [1], [0, 0, 1, 1], [], []>} : vector<24x216xbf16>, vector<216x64xbf16>, vector<24x64xf32> -> vector<24x64xf32>
    %170 = arith.truncf %169 : vector<24x64xf32> to vector<24x64xbf16>
    %c80 = arith.constant 80 : index
    %c0_85 = arith.constant 0 : index
    %171 = vector.load %arg11[%c80, %c0_85] : memref<464x256xbf16, #tpu.memory_space<vmem>>, vector<64x64xbf16>
    %cst_86 = arith.constant dense<0.000000e+00> : vector<24x64xf32>
    %172 = tpu.matmul %170, %171, %cst_86 {dimension_numbers = #tpu.dot_dimension_numbers<[1], [0], [0], [1], [0, 0, 1, 1], [], []>} : vector<24x64xbf16>, vector<64x64xbf16>, vector<24x64xf32> -> vector<24x64xf32>
    %c9_87 = arith.constant 9 : index
    %c0_88 = arith.constant 0 : index
    %173 = vector.load %arg12[%c9_87, %c0_88] : memref<24x256xf32, #tpu.memory_space<vmem>>, vector<1x64xf32>
    %174 = vector.broadcast %173 : vector<1x64xf32> to vector<24x64xf32>
    %175 = arith.addf %172, %174 : vector<24x64xf32>
    %cst_89 = arith.constant 0.000000e+00 : f32
    %176 = vector.broadcast %cst_89 : f32 to vector<24x64xf32>
    %177 = arith.maximumf %175, %176 : vector<24x64xf32>
    %c10_90 = arith.constant 10 : index
    %c0_91 = arith.constant 0 : index
    %178 = vector.load %arg12[%c10_90, %c0_91] : memref<24x256xf32, #tpu.memory_space<vmem>>, vector<1x64xf32>
    %179 = vector.broadcast %178 : vector<1x64xf32> to vector<24x64xf32>
    %180 = arith.mulf %177, %179 : vector<24x64xf32>
    %c11_92 = arith.constant 11 : index
    %c0_93 = arith.constant 0 : index
    %181 = vector.load %arg12[%c11_92, %c0_93] : memref<24x256xf32, #tpu.memory_space<vmem>>, vector<1x64xf32>
    %182 = vector.broadcast %181 : vector<1x64xf32> to vector<24x64xf32>
    %183 = arith.addf %180, %182 : vector<24x64xf32>
    %c35 = arith.constant 35 : index
    %c0_94 = arith.constant 0 : index
    %184 = vector.load %arg10[%c35, %c0_94] : memref<72x128xf32, #tpu.memory_space<vmem>>, vector<1x64xf32>
    %185 = vector.broadcast %184 : vector<1x64xf32> to vector<24x64xf32>
    %186 = arith.mulf %183, %185 : vector<24x64xf32>
    %c36 = arith.constant 36 : index
    %c0_95 = arith.constant 0 : index
    %187 = vector.load %arg10[%c36, %c0_95] : memref<72x128xf32, #tpu.memory_space<vmem>>, vector<1x64xf32>
    %188 = vector.broadcast %187 : vector<1x64xf32> to vector<24x64xf32>
    %189 = arith.mulf %183, %188 : vector<24x64xf32>
    %c37 = arith.constant 37 : index
    %c0_96 = arith.constant 0 : index
    %190 = vector.load %arg10[%c37, %c0_96] : memref<72x128xf32, #tpu.memory_space<vmem>>, vector<1x64xf32>
    %191 = vector.broadcast %190 : vector<1x64xf32> to vector<24x64xf32>
    %192 = arith.mulf %183, %191 : vector<24x64xf32>
    %c38 = arith.constant 38 : index
    %c0_97 = arith.constant 0 : index
    %193 = vector.load %arg10[%c38, %c0_97] : memref<72x128xf32, #tpu.memory_space<vmem>>, vector<1x64xf32>
    %194 = vector.broadcast %193 : vector<1x64xf32> to vector<24x64xf32>
    %195 = arith.mulf %183, %194 : vector<24x64xf32>
    %c39 = arith.constant 39 : index
    %c0_98 = arith.constant 0 : index
    %196 = vector.load %arg10[%c39, %c0_98] : memref<72x128xf32, #tpu.memory_space<vmem>>, vector<1x64xf32>
    %197 = vector.broadcast %196 : vector<1x64xf32> to vector<24x64xf32>
    %198 = arith.mulf %183, %197 : vector<24x64xf32>
    %c40 = arith.constant 40 : index
    %c0_99 = arith.constant 0 : index
    %199 = vector.load %arg10[%c40, %c0_99] : memref<72x128xf32, #tpu.memory_space<vmem>>, vector<1x64xf32>
    %200 = vector.broadcast %199 : vector<1x64xf32> to vector<24x64xf32>
    %201 = arith.mulf %183, %200 : vector<24x64xf32>
    %c41 = arith.constant 41 : index
    %c0_100 = arith.constant 0 : index
    %202 = vector.load %arg10[%c41, %c0_100] : memref<72x128xf32, #tpu.memory_space<vmem>>, vector<1x64xf32>
    %203 = vector.broadcast %202 : vector<1x64xf32> to vector<24x64xf32>
    %204 = arith.mulf %183, %203 : vector<24x64xf32>
    %c42 = arith.constant 42 : index
    %c0_101 = arith.constant 0 : index
    %205 = vector.load %arg10[%c42, %c0_101] : memref<72x128xf32, #tpu.memory_space<vmem>>, vector<1x64xf32>
    %206 = vector.broadcast %205 : vector<1x64xf32> to vector<24x64xf32>
    %207 = arith.mulf %183, %206 : vector<24x64xf32>
    %c43 = arith.constant 43 : index
    %c0_102 = arith.constant 0 : index
    %208 = vector.load %arg10[%c43, %c0_102] : memref<72x128xf32, #tpu.memory_space<vmem>>, vector<1x64xf32>
    %209 = vector.broadcast %208 : vector<1x64xf32> to vector<24x64xf32>
    %210 = arith.mulf %183, %209 : vector<24x64xf32>
    %c44 = arith.constant 44 : index
    %c0_103 = arith.constant 0 : index
    %211 = vector.load %arg10[%c44, %c0_103] : memref<72x128xf32, #tpu.memory_space<vmem>>, vector<1x64xf32>
    %212 = vector.broadcast %211 : vector<1x64xf32> to vector<24x64xf32>
    %213 = arith.mulf %183, %212 : vector<24x64xf32>
    %c45 = arith.constant 45 : index
    %c0_104 = arith.constant 0 : index
    %214 = vector.load %arg10[%c45, %c0_104] : memref<72x128xf32, #tpu.memory_space<vmem>>, vector<1x64xf32>
    %215 = vector.broadcast %214 : vector<1x64xf32> to vector<24x64xf32>
    %216 = arith.mulf %183, %215 : vector<24x64xf32>
    %c46 = arith.constant 46 : index
    %c0_105 = arith.constant 0 : index
    %217 = vector.load %arg10[%c46, %c0_105] : memref<72x128xf32, #tpu.memory_space<vmem>>, vector<1x64xf32>
    %218 = vector.broadcast %217 : vector<1x64xf32> to vector<24x64xf32>
    %219 = arith.mulf %183, %218 : vector<24x64xf32>
    %c47 = arith.constant 47 : index
    %c0_106 = arith.constant 0 : index
    %220 = vector.load %arg10[%c47, %c0_106] : memref<72x128xf32, #tpu.memory_space<vmem>>, vector<1x64xf32>
    %221 = vector.broadcast %220 : vector<1x64xf32> to vector<24x64xf32>
    %222 = arith.mulf %183, %221 : vector<24x64xf32>
    %c48_107 = arith.constant 48 : index
    %c0_108 = arith.constant 0 : index
    %223 = vector.load %arg10[%c48_107, %c0_108] : memref<72x128xf32, #tpu.memory_space<vmem>>, vector<1x64xf32>
    %224 = vector.broadcast %223 : vector<1x64xf32> to vector<24x64xf32>
    %225 = arith.mulf %183, %224 : vector<24x64xf32>
    %c49 = arith.constant 49 : index
    %c0_109 = arith.constant 0 : index
    %226 = vector.load %arg10[%c49, %c0_109] : memref<72x128xf32, #tpu.memory_space<vmem>>, vector<1x64xf32>
    %227 = vector.broadcast %226 : vector<1x64xf32> to vector<24x64xf32>
    %228 = arith.mulf %183, %227 : vector<24x64xf32>
    %c50 = arith.constant 50 : index
    %c0_110 = arith.constant 0 : index
    %229 = vector.load %arg10[%c50, %c0_110] : memref<72x128xf32, #tpu.memory_space<vmem>>, vector<1x64xf32>
    %230 = vector.broadcast %229 : vector<1x64xf32> to vector<24x64xf32>
    %231 = arith.mulf %183, %230 : vector<24x64xf32>
    %c51 = arith.constant 51 : index
    %c0_111 = arith.constant 0 : index
    %232 = vector.load %arg10[%c51, %c0_111] : memref<72x128xf32, #tpu.memory_space<vmem>>, vector<1x64xf32>
    %233 = vector.broadcast %232 : vector<1x64xf32> to vector<24x64xf32>
    %234 = arith.mulf %183, %233 : vector<24x64xf32>
    %c52 = arith.constant 52 : index
    %c0_112 = arith.constant 0 : index
    %235 = vector.load %arg10[%c52, %c0_112] : memref<72x128xf32, #tpu.memory_space<vmem>>, vector<1x64xf32>
    %236 = vector.broadcast %235 : vector<1x64xf32> to vector<24x64xf32>
    %237 = arith.mulf %183, %236 : vector<24x64xf32>
    %c53 = arith.constant 53 : index
    %c0_113 = arith.constant 0 : index
    %238 = vector.load %arg10[%c53, %c0_113] : memref<72x128xf32, #tpu.memory_space<vmem>>, vector<1x64xf32>
    %239 = vector.broadcast %238 : vector<1x64xf32> to vector<24x64xf32>
    %240 = arith.mulf %183, %239 : vector<24x64xf32>
    %c54 = arith.constant 54 : index
    %c0_114 = arith.constant 0 : index
    %241 = vector.load %arg10[%c54, %c0_114] : memref<72x128xf32, #tpu.memory_space<vmem>>, vector<1x64xf32>
    %242 = vector.broadcast %241 : vector<1x64xf32> to vector<24x64xf32>
    %243 = arith.mulf %183, %242 : vector<24x64xf32>
    %244 = tpu.concatenate %186, %189, %192, %195, %198, %201, %204, %207, %210, %213, %216, %219, %222, %225, %228, %231 in 0 : vector<24x64xf32>, vector<24x64xf32>, vector<24x64xf32>, vector<24x64xf32>, vector<24x64xf32>, vector<24x64xf32>, vector<24x64xf32>, vector<24x64xf32>, vector<24x64xf32>, vector<24x64xf32>, vector<24x64xf32>, vector<24x64xf32>, vector<24x64xf32>, vector<24x64xf32>, vector<24x64xf32>, vector<24x64xf32> -> vector<384x64xf32>
    %245 = tpu.concatenate %234, %237, %240, %243 in 0 : vector<24x64xf32>, vector<24x64xf32>, vector<24x64xf32>, vector<24x64xf32> -> vector<96x64xf32>
    %246 = tpu.concatenate %244, %245 in 0 : vector<384x64xf32>, vector<96x64xf32> -> vector<480x64xf32>
    %c0_115 = arith.constant 0 : index
    %c0_116 = arith.constant 0 : index
    %247 = vector.load %arg7[%c0_115, %c0_116] : memref<8x480xbf16, #tpu.memory_space<vmem>>, vector<8x480xbf16>
    %248 = arith.truncf %246 : vector<480x64xf32> to vector<480x64xbf16>
    %cst_117 = arith.constant dense<0.000000e+00> : vector<8x64xf32>
    %249 = tpu.matmul %247, %248, %cst_117 {dimension_numbers = #tpu.dot_dimension_numbers<[1], [0], [0], [1], [0, 0, 1, 1], [], []>} : vector<8x480xbf16>, vector<480x64xbf16>, vector<8x64xf32> -> vector<8x64xf32>
    %250 = arith.truncf %249 : vector<8x64xf32> to vector<8x64xbf16>
    %c144 = arith.constant 144 : index
    %c0_118 = arith.constant 0 : index
    %251 = vector.load %arg11[%c144, %c0_118] : memref<464x256xbf16, #tpu.memory_space<vmem>>, vector<64x128xbf16>
    %cst_119 = arith.constant dense<0.000000e+00> : vector<8x128xf32>
    %252 = tpu.matmul %250, %251, %cst_119 {dimension_numbers = #tpu.dot_dimension_numbers<[1], [0], [0], [1], [0, 0, 1, 1], [], []>} : vector<8x64xbf16>, vector<64x128xbf16>, vector<8x128xf32> -> vector<8x128xf32>
    %c12_120 = arith.constant 12 : index
    %c0_121 = arith.constant 0 : index
    %253 = vector.load %arg12[%c12_120, %c0_121] : memref<24x256xf32, #tpu.memory_space<vmem>>, vector<1x128xf32>
    %254 = vector.broadcast %253 : vector<1x128xf32> to vector<8x128xf32>
    %255 = arith.addf %252, %254 : vector<8x128xf32>
    %cst_122 = arith.constant 0.000000e+00 : f32
    %256 = vector.broadcast %cst_122 : f32 to vector<8x128xf32>
    %257 = arith.maximumf %255, %256 : vector<8x128xf32>
    %c13_123 = arith.constant 13 : index
    %c0_124 = arith.constant 0 : index
    %258 = vector.load %arg12[%c13_123, %c0_124] : memref<24x256xf32, #tpu.memory_space<vmem>>, vector<1x128xf32>
    %259 = vector.broadcast %258 : vector<1x128xf32> to vector<8x128xf32>
    %260 = arith.mulf %257, %259 : vector<8x128xf32>
    %c14_125 = arith.constant 14 : index
    %c0_126 = arith.constant 0 : index
    %261 = vector.load %arg12[%c14_125, %c0_126] : memref<24x256xf32, #tpu.memory_space<vmem>>, vector<1x128xf32>
    %262 = vector.broadcast %261 : vector<1x128xf32> to vector<8x128xf32>
    %263 = arith.addf %260, %262 : vector<8x128xf32>
    %c55 = arith.constant 55 : index
    %c0_127 = arith.constant 0 : index
    %264 = vector.load %arg10[%c55, %c0_127] : memref<72x128xf32, #tpu.memory_space<vmem>>, vector<1x128xf32>
    %265 = vector.broadcast %264 : vector<1x128xf32> to vector<8x128xf32>
    %266 = arith.mulf %263, %265 : vector<8x128xf32>
    %c56 = arith.constant 56 : index
    %c0_128 = arith.constant 0 : index
    %267 = vector.load %arg10[%c56, %c0_128] : memref<72x128xf32, #tpu.memory_space<vmem>>, vector<1x128xf32>
    %268 = vector.broadcast %267 : vector<1x128xf32> to vector<8x128xf32>
    %269 = arith.mulf %263, %268 : vector<8x128xf32>
    %c57 = arith.constant 57 : index
    %c0_129 = arith.constant 0 : index
    %270 = vector.load %arg10[%c57, %c0_129] : memref<72x128xf32, #tpu.memory_space<vmem>>, vector<1x128xf32>
    %271 = vector.broadcast %270 : vector<1x128xf32> to vector<8x128xf32>
    %272 = arith.mulf %263, %271 : vector<8x128xf32>
    %c58 = arith.constant 58 : index
    %c0_130 = arith.constant 0 : index
    %273 = vector.load %arg10[%c58, %c0_130] : memref<72x128xf32, #tpu.memory_space<vmem>>, vector<1x128xf32>
    %274 = vector.broadcast %273 : vector<1x128xf32> to vector<8x128xf32>
    %275 = arith.mulf %263, %274 : vector<8x128xf32>
    %c59 = arith.constant 59 : index
    %c0_131 = arith.constant 0 : index
    %276 = vector.load %arg10[%c59, %c0_131] : memref<72x128xf32, #tpu.memory_space<vmem>>, vector<1x128xf32>
    %277 = vector.broadcast %276 : vector<1x128xf32> to vector<8x128xf32>
    %278 = arith.mulf %263, %277 : vector<8x128xf32>
    %c60 = arith.constant 60 : index
    %c0_132 = arith.constant 0 : index
    %279 = vector.load %arg10[%c60, %c0_132] : memref<72x128xf32, #tpu.memory_space<vmem>>, vector<1x128xf32>
    %280 = vector.broadcast %279 : vector<1x128xf32> to vector<8x128xf32>
    %281 = arith.mulf %263, %280 : vector<8x128xf32>
    %c61 = arith.constant 61 : index
    %c0_133 = arith.constant 0 : index
    %282 = vector.load %arg10[%c61, %c0_133] : memref<72x128xf32, #tpu.memory_space<vmem>>, vector<1x128xf32>
    %283 = vector.broadcast %282 : vector<1x128xf32> to vector<8x128xf32>
    %284 = arith.mulf %263, %283 : vector<8x128xf32>
    %c62 = arith.constant 62 : index
    %c0_134 = arith.constant 0 : index
    %285 = vector.load %arg10[%c62, %c0_134] : memref<72x128xf32, #tpu.memory_space<vmem>>, vector<1x128xf32>
    %286 = vector.broadcast %285 : vector<1x128xf32> to vector<8x128xf32>
    %287 = arith.mulf %263, %286 : vector<8x128xf32>
    %c63 = arith.constant 63 : index
    %c0_135 = arith.constant 0 : index
    %288 = vector.load %arg10[%c63, %c0_135] : memref<72x128xf32, #tpu.memory_space<vmem>>, vector<1x128xf32>
    %289 = vector.broadcast %288 : vector<1x128xf32> to vector<8x128xf32>
    %290 = arith.mulf %263, %289 : vector<8x128xf32>
    %291 = tpu.concatenate %266, %269, %272, %275, %278, %281, %284, %287, %290 in 0 : vector<8x128xf32>, vector<8x128xf32>, vector<8x128xf32>, vector<8x128xf32>, vector<8x128xf32>, vector<8x128xf32>, vector<8x128xf32>, vector<8x128xf32>, vector<8x128xf32> -> vector<72x128xf32>
    %c0_136 = arith.constant 0 : index
    %c0_137 = arith.constant 0 : index
    %292 = vector.load %arg8[%c0_136, %c0_137] : memref<8x72xbf16, #tpu.memory_space<vmem>>, vector<8x72xbf16>
    %293 = arith.truncf %291 : vector<72x128xf32> to vector<72x128xbf16>
    %cst_138 = arith.constant dense<0.000000e+00> : vector<8x128xf32>
    %294 = tpu.matmul %292, %293, %cst_138 {dimension_numbers = #tpu.dot_dimension_numbers<[1], [0], [0], [1], [0, 0, 1, 1], [], []>} : vector<8x72xbf16>, vector<72x128xbf16>, vector<8x128xf32> -> vector<8x128xf32>
    %295 = arith.truncf %294 : vector<8x128xf32> to vector<8x128xbf16>
    %c208 = arith.constant 208 : index
    %c0_139 = arith.constant 0 : index
    %296 = vector.load %arg11[%c208, %c0_139] : memref<464x256xbf16, #tpu.memory_space<vmem>>, vector<128x128xbf16>
    %cst_140 = arith.constant dense<0.000000e+00> : vector<8x128xf32>
    %297 = tpu.matmul %295, %296, %cst_140 {dimension_numbers = #tpu.dot_dimension_numbers<[1], [0], [0], [1], [0, 0, 1, 1], [], []>} : vector<8x128xbf16>, vector<128x128xbf16>, vector<8x128xf32> -> vector<8x128xf32>
    %c15_141 = arith.constant 15 : index
    %c0_142 = arith.constant 0 : index
    %298 = vector.load %arg12[%c15_141, %c0_142] : memref<24x256xf32, #tpu.memory_space<vmem>>, vector<1x128xf32>
    %299 = vector.broadcast %298 : vector<1x128xf32> to vector<8x128xf32>
    %300 = arith.addf %297, %299 : vector<8x128xf32>
    %cst_143 = arith.constant 0.000000e+00 : f32
    %301 = vector.broadcast %cst_143 : f32 to vector<8x128xf32>
    %302 = arith.maximumf %300, %301 : vector<8x128xf32>
    %c16_144 = arith.constant 16 : index
    %c0_145 = arith.constant 0 : index
    %303 = vector.load %arg12[%c16_144, %c0_145] : memref<24x256xf32, #tpu.memory_space<vmem>>, vector<1x128xf32>
    %304 = vector.broadcast %303 : vector<1x128xf32> to vector<8x128xf32>
    %305 = arith.mulf %302, %304 : vector<8x128xf32>
    %c17_146 = arith.constant 17 : index
    %c0_147 = arith.constant 0 : index
    %306 = vector.load %arg12[%c17_146, %c0_147] : memref<24x256xf32, #tpu.memory_space<vmem>>, vector<1x128xf32>
    %307 = vector.broadcast %306 : vector<1x128xf32> to vector<8x128xf32>
    %308 = arith.addf %305, %307 : vector<8x128xf32>
    %c64 = arith.constant 64 : index
    %c0_148 = arith.constant 0 : index
    %309 = vector.load %arg10[%c64, %c0_148] : memref<72x128xf32, #tpu.memory_space<vmem>>, vector<1x128xf32>
    %310 = vector.broadcast %309 : vector<1x128xf32> to vector<8x128xf32>
    %311 = arith.mulf %308, %310 : vector<8x128xf32>
    %c0_149 = arith.constant 0 : index
    %c0_150 = arith.constant 0 : index
    %312 = vector.load %arg9[%c0_149, %c0_150] : memref<8x8xbf16, #tpu.memory_space<vmem>>, vector<8x8xbf16>
    %313 = arith.truncf %311 : vector<8x128xf32> to vector<8x128xbf16>
    %cst_151 = arith.constant dense<0.000000e+00> : vector<8x128xf32>
    %314 = tpu.matmul %312, %313, %cst_151 {dimension_numbers = #tpu.dot_dimension_numbers<[1], [0], [0], [1], [0, 0, 1, 1], [], []>} : vector<8x8xbf16>, vector<8x128xbf16>, vector<8x128xf32> -> vector<8x128xf32>
    %315 = arith.truncf %314 : vector<8x128xf32> to vector<8x128xbf16>
    %c336 = arith.constant 336 : index
    %c0_152 = arith.constant 0 : index
    %316 = vector.load %arg11[%c336, %c0_152] : memref<464x256xbf16, #tpu.memory_space<vmem>>, vector<128x256xbf16>
    %cst_153 = arith.constant dense<0.000000e+00> : vector<8x256xf32>
    %317 = tpu.matmul %315, %316, %cst_153 {dimension_numbers = #tpu.dot_dimension_numbers<[1], [0], [0], [1], [0, 0, 1, 1], [], []>} : vector<8x128xbf16>, vector<128x256xbf16>, vector<8x256xf32> -> vector<8x256xf32>
    %c18_154 = arith.constant 18 : index
    %c0_155 = arith.constant 0 : index
    %318 = vector.load %arg12[%c18_154, %c0_155] : memref<24x256xf32, #tpu.memory_space<vmem>>, vector<1x256xf32>
    %319 = vector.broadcast %318 : vector<1x256xf32> to vector<8x256xf32>
    %320 = arith.addf %317, %319 : vector<8x256xf32>
    %cst_156 = arith.constant 0.000000e+00 : f32
    %321 = vector.broadcast %cst_156 : f32 to vector<8x256xf32>
    %322 = arith.maximumf %320, %321 : vector<8x256xf32>
    %c19_157 = arith.constant 19 : index
    %c0_158 = arith.constant 0 : index
    %323 = vector.load %arg12[%c19_157, %c0_158] : memref<24x256xf32, #tpu.memory_space<vmem>>, vector<1x256xf32>
    %324 = vector.broadcast %323 : vector<1x256xf32> to vector<8x256xf32>
    %325 = arith.mulf %322, %324 : vector<8x256xf32>
    %c20_159 = arith.constant 20 : index
    %c0_160 = arith.constant 0 : index
    %326 = vector.load %arg12[%c20_159, %c0_160] : memref<24x256xf32, #tpu.memory_space<vmem>>, vector<1x256xf32>
    %327 = vector.broadcast %326 : vector<1x256xf32> to vector<8x256xf32>
    %328 = arith.addf %325, %327 : vector<8x256xf32>
    %329 = vector.extract_strided_slice %328 {offsets = [0, 0], sizes = [1, 256], strides = [1, 1]} : vector<8x256xf32> to vector<1x256xf32>
    %c0_161 = arith.constant 0 : index
    %c0_162 = arith.constant 0 : index
    %330 = vector.load %arg19[%c0_161, %c0_162] : memref<8x1152xf32, #tpu.memory_space<vmem>>, vector<1x256xf32>
    tpu.vector_store %arg19[%c0_161, %c0_162], %329 {strides = array<i32>} : memref<8x1152xf32, #tpu.memory_space<vmem>>, vector<1x256xf32>,
    %331 = vector.extract_strided_slice %328 {offsets = [1, 0], sizes = [1, 256], strides = [1, 1]} : vector<8x256xf32> to vector<1x256xf32>
    %c0_163 = arith.constant 0 : index
    %c256 = arith.constant 256 : index
    %332 = vector.load %arg19[%c0_163, %c256] : memref<8x1152xf32, #tpu.memory_space<vmem>>, vector<1x256xf32>
    tpu.vector_store %arg19[%c0_163, %c256], %331 {strides = array<i32>} : memref<8x1152xf32, #tpu.memory_space<vmem>>, vector<1x256xf32>,
    %333 = vector.extract_strided_slice %328 {offsets = [2, 0], sizes = [1, 256], strides = [1, 1]} : vector<8x256xf32> to vector<1x256xf32>
    %c0_164 = arith.constant 0 : index
    %c512 = arith.constant 512 : index
    %334 = vector.load %arg19[%c0_164, %c512] : memref<8x1152xf32, #tpu.memory_space<vmem>>, vector<1x256xf32>
    tpu.vector_store %arg19[%c0_164, %c512], %333 {strides = array<i32>} : memref<8x1152xf32, #tpu.memory_space<vmem>>, vector<1x256xf32>,
    %335 = vector.extract_strided_slice %328 {offsets = [3, 0], sizes = [1, 256], strides = [1, 1]} : vector<8x256xf32> to vector<1x256xf32>
    %c0_165 = arith.constant 0 : index
    %c768 = arith.constant 768 : index
    %336 = vector.load %arg19[%c0_165, %c768] : memref<8x1152xf32, #tpu.memory_space<vmem>>, vector<1x256xf32>
    tpu.vector_store %arg19[%c0_165, %c768], %335 {strides = array<i32>} : memref<8x1152xf32, #tpu.memory_space<vmem>>, vector<1x256xf32>,
    %c0_166 = arith.constant 0 : index
    %c0_167 = arith.constant 0 : index
    %c0_168 = arith.constant 0 : index
    %337 = vector.load %arg2[%c0_166, %c0_167, %c0_168] : memref<1x8x128xf32, #tpu.memory_space<vmem>>, vector<1x8x128xf32>
    %338 = vector.shape_cast %337 : vector<1x8x128xf32> to vector<8x128xf32>
    %c0_169 = arith.constant 0 : index
    %c0_170 = arith.constant 0 : index
    %339 = vector.load %arg19[%c0_169, %c0_170] : memref<8x1152xf32, #tpu.memory_space<vmem>>, vector<8x1152xf32>
    %340 = arith.truncf %339 : vector<8x1152xf32> to vector<8x1152xbf16>
    %c0_171 = arith.constant 0 : index
    %c0_172 = arith.constant 0 : index
    %341 = vector.load %arg13[%c0_171, %c0_172] : memref<1152x512xbf16, #tpu.memory_space<vmem>>, vector<1152x512xbf16>
    %cst_173 = arith.constant dense<0.000000e+00> : vector<8x512xf32>
    %342 = tpu.matmul %340, %341, %cst_173 {dimension_numbers = #tpu.dot_dimension_numbers<[1], [0], [0], [1], [0, 0, 1, 1], [], []>} : vector<8x1152xbf16>, vector<1152x512xbf16>, vector<8x512xf32> -> vector<8x512xf32>
    %c0_174 = arith.constant 0 : index
    %c0_175 = arith.constant 0 : index
    %343 = vector.load %arg17[%c0_174, %c0_175] : memref<8x512xf32, #tpu.memory_space<vmem>>, vector<1x512xf32>
    %344 = vector.broadcast %343 : vector<1x512xf32> to vector<8x512xf32>
    %345 = arith.addf %342, %344 : vector<8x512xf32>
    %c6_176 = arith.constant 6 : index
    %c0_177 = arith.constant 0 : index
    %346 = vector.load %arg17[%c6_176, %c0_177] : memref<8x512xf32, #tpu.memory_space<vmem>>, vector<1x1xf32>
    %cst_178 = arith.constant 0.000000e+00 : f32
    %347 = vector.broadcast %cst_178 : f32 to vector<8x512xf32>
    %348 = arith.cmpf oge, %345, %347 : vector<8x512xf32>
    %349 = vector.broadcast %346 : vector<1x1xf32> to vector<8x512xf32>
    %350 = arith.mulf %349, %345 : vector<8x512xf32>
    %351 = arith.select %348, %345, %350 : vector<8x512xi1>, vector<8x512xf32>
    %352 = tpu.concatenate %351, %338 in 1 : vector<8x512xf32>, vector<8x128xf32> -> vector<8x640xf32>
    %353 = arith.truncf %352 : vector<8x640xf32> to vector<8x640xbf16>
    %c0_179 = arith.constant 0 : index
    %c0_180 = arith.constant 0 : index
    %354 = vector.load %arg14[%c0_179, %c0_180] : memref<640x128xbf16, #tpu.memory_space<vmem>>, vector<640x128xbf16>
    %cst_181 = arith.constant dense<0.000000e+00> : vector<8x128xf32>
    %355 = tpu.matmul %353, %354, %cst_181 {dimension_numbers = #tpu.dot_dimension_numbers<[1], [0], [0], [1], [0, 0, 1, 1], [], []>} : vector<8x640xbf16>, vector<640x128xbf16>, vector<8x128xf32> -> vector<8x128xf32>
    %c1_182 = arith.constant 1 : index
    %c0_183 = arith.constant 0 : index
    %356 = vector.load %arg17[%c1_182, %c0_183] : memref<8x512xf32, #tpu.memory_space<vmem>>, vector<1x128xf32>
    %357 = vector.broadcast %356 : vector<1x128xf32> to vector<8x128xf32>
    %358 = arith.addf %355, %357 : vector<8x128xf32>
    %c6_184 = arith.constant 6 : index
    %c1_185 = arith.constant 1 : index
    %359 = vector.load %arg17[%c6_184, %c1_185] : memref<8x512xf32, #tpu.memory_space<vmem>>, vector<1x1xf32>
    %cst_186 = arith.constant 0.000000e+00 : f32
    %360 = vector.broadcast %cst_186 : f32 to vector<8x128xf32>
    %361 = arith.cmpf oge, %358, %360 : vector<8x128xf32>
    %362 = vector.broadcast %359 : vector<1x1xf32> to vector<8x128xf32>
    %363 = arith.mulf %362, %358 : vector<8x128xf32>
    %364 = arith.select %361, %358, %363 : vector<8x128xi1>, vector<8x128xf32>
    %c2_187 = arith.constant 2 : index
    %c0_188 = arith.constant 0 : index
    %365 = vector.load %arg17[%c2_187, %c0_188] : memref<8x512xf32, #tpu.memory_space<vmem>>, vector<1x128xf32>
    %366 = vector.broadcast %365 : vector<1x128xf32> to vector<8x128xf32>
    %367 = arith.mulf %364, %366 : vector<8x128xf32>
    %c3_189 = arith.constant 3 : index
    %c0_190 = arith.constant 0 : index
    %368 = vector.load %arg17[%c3_189, %c0_190] : memref<8x512xf32, #tpu.memory_space<vmem>>, vector<1x128xf32>
    %369 = vector.broadcast %368 : vector<1x128xf32> to vector<8x128xf32>
    %370 = arith.addf %367, %369 : vector<8x128xf32>
    %c6_191 = arith.constant 6 : index
    %c2_192 = arith.constant 2 : index
    %371 = vector.load %arg17[%c6_191, %c2_192] : memref<8x512xf32, #tpu.memory_space<vmem>>, vector<1x1xf32>
    %cst_193 = arith.constant 0.000000e+00 : f32
    %372 = vector.broadcast %cst_193 : f32 to vector<8x128xf32>
    %373 = arith.cmpf oge, %370, %372 : vector<8x128xf32>
    %374 = vector.broadcast %371 : vector<1x1xf32> to vector<8x128xf32>
    %375 = arith.mulf %374, %370 : vector<8x128xf32>
    %376 = arith.select %373, %370, %375 : vector<8x128xi1>, vector<8x128xf32>
    %377 = tpu.concatenate %376, %338 in 1 : vector<8x128xf32>, vector<8x128xf32> -> vector<8x256xf32>
    %378 = arith.truncf %377 : vector<8x256xf32> to vector<8x256xbf16>
    %c0_194 = arith.constant 0 : index
    %c0_195 = arith.constant 0 : index
    %379 = vector.load %arg15[%c0_194, %c0_195] : memref<256x64xbf16, #tpu.memory_space<vmem>>, vector<256x64xbf16>
    %cst_196 = arith.constant dense<0.000000e+00> : vector<8x64xf32>
    %380 = tpu.matmul %378, %379, %cst_196 {dimension_numbers = #tpu.dot_dimension_numbers<[1], [0], [0], [1], [0, 0, 1, 1], [], []>} : vector<8x256xbf16>, vector<256x64xbf16>, vector<8x64xf32> -> vector<8x64xf32>
    %c4_197 = arith.constant 4 : index
    %c0_198 = arith.constant 0 : index
    %381 = vector.load %arg17[%c4_197, %c0_198] : memref<8x512xf32, #tpu.memory_space<vmem>>, vector<1x64xf32>
    %382 = vector.broadcast %381 : vector<1x64xf32> to vector<8x64xf32>
    %383 = arith.addf %380, %382 : vector<8x64xf32>
    %cst_199 = arith.constant 0.000000e+00 : f32
    %384 = vector.broadcast %cst_199 : f32 to vector<8x64xf32>
    %385 = arith.maximumf %383, %384 : vector<8x64xf32>
    %386 = arith.truncf %385 : vector<8x64xf32> to vector<8x64xbf16>
    %c0_200 = arith.constant 0 : index
    %c0_201 = arith.constant 0 : index
    %387 = vector.load %arg16[%c0_200, %c0_201] : memref<64x128xbf16, #tpu.memory_space<vmem>>, vector<64x128xbf16>
    %cst_202 = arith.constant dense<0.000000e+00> : vector<8x128xf32>
    %388 = tpu.matmul %386, %387, %cst_202 {dimension_numbers = #tpu.dot_dimension_numbers<[1], [0], [0], [1], [0, 0, 1, 1], [], []>} : vector<8x64xbf16>, vector<64x128xbf16>, vector<8x128xf32> -> vector<8x128xf32>
    %c5_203 = arith.constant 5 : index
    %c0_204 = arith.constant 0 : index
    %389 = vector.load %arg17[%c5_203, %c0_204] : memref<8x512xf32, #tpu.memory_space<vmem>>, vector<1x128xf32>
    %390 = vector.broadcast %389 : vector<1x128xf32> to vector<8x128xf32>
    %391 = arith.addf %388, %390 : vector<8x128xf32>
    %c0_205 = arith.constant 0 : index
    %c0_206 = arith.constant 0 : index
    %c0_207 = arith.constant 0 : index
    %392 = vector.load %arg18[%c0_205, %c0_206, %c0_207] : memref<1x8x128xf32, #tpu.memory_space<vmem>>, vector<1x8x128xf32>
    %393 = vector.shape_cast %392 : vector<1x8x128xf32> to vector<8x128xf32>
    %394 = vector.shape_cast %391 : vector<8x128xf32> to vector<1x8x128xf32>
    tpu.vector_store %arg18[%c0_205, %c0_206, %c0_207], %394 {strides = array<i32>} : memref<1x8x128xf32, #tpu.memory_space<vmem>>, vector<1x8x128xf32>,
    return
  }
  func.func @transform_0(%arg0: i32) -> (i32, i32, i32) {
    %c0_i32 = arith.constant 0 : i32
    %c0_i32_0 = arith.constant 0 : i32
    %c0_i32_1 = arith.constant 0 : i32
    return %arg0, %c0_i32, %c0_i32_0 : i32, i32, i32
  }
  func.func @transform_1(%arg0: i32) -> (i32, i32, i32) {
    %c0_i32 = arith.constant 0 : i32
    %c0_i32_0 = arith.constant 0 : i32
    %c0_i32_1 = arith.constant 0 : i32
    return %arg0, %c0_i32, %c0_i32_0 : i32, i32, i32
  }
  func.func @transform_2(%arg0: i32) -> (i32, i32) {
    %c0_i32 = arith.constant 0 : i32
    %c0_i32_0 = arith.constant 0 : i32
    %c0_i32_1 = arith.constant 0 : i32
    return %c0_i32, %c0_i32_0 : i32, i32
  }
  func.func @transform_3(%arg0: i32) -> (i32, i32) {
    %c0_i32 = arith.constant 0 : i32
    %c0_i32_0 = arith.constant 0 : i32
    %c0_i32_1 = arith.constant 0 : i32
    return %c0_i32, %c0_i32_0 : i32, i32
  }
  func.func @transform_4(%arg0: i32) -> (i32, i32) {
    %c0_i32 = arith.constant 0 : i32
    %c0_i32_0 = arith.constant 0 : i32
    %c0_i32_1 = arith.constant 0 : i32
    return %c0_i32, %c0_i32_0 : i32, i32
  }
  func.func @transform_5(%arg0: i32) -> (i32, i32) {
    %c0_i32 = arith.constant 0 : i32
    %c0_i32_0 = arith.constant 0 : i32
    %c0_i32_1 = arith.constant 0 : i32
    return %c0_i32, %c0_i32_0 : i32, i32
  }
  func.func @transform_6(%arg0: i32) -> (i32, i32) {
    %c0_i32 = arith.constant 0 : i32
    %c0_i32_0 = arith.constant 0 : i32
    %c0_i32_1 = arith.constant 0 : i32
    return %c0_i32, %c0_i32_0 : i32, i32
  }
  func.func @transform_7(%arg0: i32) -> (i32, i32) {
    %c0_i32 = arith.constant 0 : i32
    %c0_i32_0 = arith.constant 0 : i32
    %c0_i32_1 = arith.constant 0 : i32
    return %c0_i32, %c0_i32_0 : i32, i32
  }
  func.func @transform_8(%arg0: i32) -> (i32, i32) {
    %c0_i32 = arith.constant 0 : i32
    %c0_i32_0 = arith.constant 0 : i32
    %c0_i32_1 = arith.constant 0 : i32
    return %c0_i32, %c0_i32_0 : i32, i32
  }
  func.func @transform_9(%arg0: i32) -> (i32, i32) {
    %c0_i32 = arith.constant 0 : i32
    %c0_i32_0 = arith.constant 0 : i32
    %c0_i32_1 = arith.constant 0 : i32
    return %c0_i32, %c0_i32_0 : i32, i32
  }
  func.func @transform_10(%arg0: i32) -> (i32, i32) {
    %c0_i32 = arith.constant 0 : i32
    %c0_i32_0 = arith.constant 0 : i32
    %c0_i32_1 = arith.constant 0 : i32
    return %c0_i32, %c0_i32_0 : i32, i32
  }
  func.func @transform_11(%arg0: i32) -> (i32, i32) {
    %c0_i32 = arith.constant 0 : i32
    %c0_i32_0 = arith.constant 0 : i32
    %c0_i32_1 = arith.constant 0 : i32
    return %c0_i32, %c0_i32_0 : i32, i32
  }
  func.func @transform_12(%arg0: i32) -> (i32, i32) {
    %c0_i32 = arith.constant 0 : i32
    %c0_i32_0 = arith.constant 0 : i32
    %c0_i32_1 = arith.constant 0 : i32
    return %c0_i32, %c0_i32_0 : i32, i32
  }
  func.func @transform_13(%arg0: i32) -> (i32, i32) {
    %c0_i32 = arith.constant 0 : i32
    %c0_i32_0 = arith.constant 0 : i32
    %c0_i32_1 = arith.constant 0 : i32
    return %c0_i32, %c0_i32_0 : i32, i32
  }
  func.func @transform_14(%arg0: i32) -> (i32, i32) {
    %c0_i32 = arith.constant 0 : i32
    %c0_i32_0 = arith.constant 0 : i32
    %c0_i32_1 = arith.constant 0 : i32
    return %c0_i32, %c0_i32_0 : i32, i32
  }
  func.func @transform_15(%arg0: i32) -> (i32, i32) {
    %c0_i32 = arith.constant 0 : i32
    %c0_i32_0 = arith.constant 0 : i32
    %c0_i32_1 = arith.constant 0 : i32
    return %c0_i32, %c0_i32_0 : i32, i32
  }
  func.func @transform_16(%arg0: i32) -> (i32, i32) {
    %c0_i32 = arith.constant 0 : i32
    %c0_i32_0 = arith.constant 0 : i32
    %c0_i32_1 = arith.constant 0 : i32
    return %c0_i32, %c0_i32_0 : i32, i32
  }
  func.func @transform_17(%arg0: i32) -> (i32, i32, i32) {
    %c0_i32 = arith.constant 0 : i32
    %c0_i32_0 = arith.constant 0 : i32
    %c0_i32_1 = arith.constant 0 : i32
    return %arg0, %c0_i32, %c0_i32_0 : i32, i32, i32
  }
}

</mosaic_0001>

<bundles_post_ra>
// kernel: classifier3l_2d_forward.1
= control target key start
LH: loop header
LB: loop body
LE: loop exit
PB: predicated region body
PF: predicated region fallthrough
CT: control target
= control target key end

     0   :  { %s11796_s0 = inlined_call_operand.vmem [shape: f32[2,72,4], index: 0, kind: input, shape index: {}]   ;;  %s11797_s1 = inlined_call_operand.vmem [shape: f32[2,8,128], index: 1, kind: input, shape index: {}]   ;;  %s11798_s2 = inlined_call_operand.hbm [shape: bf16[120,360], index: 2, kind: input, shape index: {}]   ;;  %s11799_s3 = inlined_call_operand.hbm [shape: bf16[72,720], index: 3, kind: input, shape index: {}]   ;;  %s11800_s4 = inlined_call_operand.hbm [shape: bf16[24,1080], index: 4, kind: input, shape index: {}]   ;;  %s11801_s5 = inlined_call_operand.hbm [shape: bf16[24,216], index: 5, kind: input, shape index: {}]   ;;  %s11802_s6 = inlined_call_operand.hbm [shape: bf16[8,480], index: 6, kind: input, shape index: {}]   ;;  %s11803_s7 = inlined_call_operand.hbm [shape: bf16[8,72], index: 7, kind: input, shape index: {}]   ;;  %s11804_s8 = inlined_call_operand.hbm [shape: bf16[8,8], index: 8, kind: input, shape index: {}]   ;;  %s11805_s9 = inlined_call_operand.hbm [shape: f32[72,128], index: 9, kind: input, shape index: {}]   ;;  %s11806_s10 = inlined_call_operand.hbm [shape: bf16[464,256], index: 10, kind: input, shape index: {}]   ;;  %s11807_s11 = inlined_call_operand.hbm [shape: f32[24,256], index: 11, kind: input, shape index: {}]   ;;  %s11808_s12 = inlined_call_operand.hbm [shape: bf16[1152,512], index: 12, kind: input, shape index: {}]   ;;  %s11809_s13 = inlined_call_operand.hbm [shape: bf16[640,128], index: 13, kind: input, shape index: {}]   ;;  %s11810_s14 = inlined_call_operand.vmem [shape: bf16[256,64], index: 14, kind: input, shape index: {}]   ;;  %s11811_s15 = inlined_call_operand.hbm [shape: bf16[64,128], index: 15, kind: input, shape index: {}]   ;;  %s11812_s16 = inlined_call_operand.hbm [shape: f32[8,512], index: 16, kind: input, shape index: {}]   ;;  %s11813_s17 = inlined_call_operand.vmem [shape: f32[2,8,128], index: 17, kind: output, shape index: {}]  }
   0x1   :  { %11884 = sst [smem:[#allocation76_spill]] %s11796_s0 }
   0x2   :  { %11885 = sst [smem:[#allocation77_spill]] %s11797_s1 }
   0x3   :  { %11886 = sst [smem:[#allocation78_spill]] %s11798_s2 }
   0x4   :  { %11887 = sst [smem:[#allocation79_spill]] %s11799_s3 }
   0x5   :  { %11888 = sst [smem:[#allocation80_spill]] %s11810_s14 }
   0x6   :  { %11889 = sst [smem:[#allocation81_spill]] %s11813_s17 }
   0x7   :  { %22 = vsyncpa [#allocation4], 0 }
   0x8   :  { %23 = vsyncpa [#allocation6], 0 }
   0x9   :  { %24 = vsyncpa [#allocation9], 0 }
   0xa   :  { %25 = vsyncpa [#allocation12], 0 }
   0xb   :  { %26 = vsyncpa [#allocation15], 0 }
   0xc   :  { %27 = vsyncpa [#allocation18], 0 }
   0xd   :  { %28 = vsyncpa [#allocation21], 0 }
   0xe   :  { %29 = vsyncpa [#allocation24], 0  ;;  %s9711_s24 = smov 0  }
   0xf LB: > { %11890 = sst [smem:[#allocation33_spill]] %s9587_s24  ;;  %s9589_s25 = smov [#allocation5]   ;;  %s9587_s24 = sphi %s9711_s24, %s35_s24  }
  0x10   : > { %s458_s26 = sshll.u32 %s9589_s25, 4  ;;  %s9717_s27 = sadd.s32 4294967295, %s9587_s24   ;;  %s9722_s26 = int_to_ptr.vmem [resolvable:$true] %s458_s26 }
  0x11   : > { %11891 = sst [smem:[#allocation34_spill]] %s9717_s27  ;;  %p7073_p0 = scmp.ge.s32.totalorder %s9587_s24, 1 }
  0x12   : > { %p433_p1 = scmp.lt.s32.totalorder %s9587_s24, 3  ;;  %p11818_p2 = scmp.eq.s32.totalorder %s9717_s27, 0 }
  0x13   : > { %s9590_s29 = smov [#allocation8]   ;;  %s9591_s18 = smov [#allocation11]  }
  0x14   : > { %p9724_p3 = pnand %p7073_p0, %p433_p1  ;;  %s484_s0 = sshll.u32 %s9590_s29, 4  ;;  %s9730_s0 = int_to_ptr.vmem [resolvable:$true] %s484_s0 }
  0x15   : > { %s9738_s19 = sshll.u32 %s9591_s18, 4  ;;  %s11894_s3 = sld [smem:[#allocation79_spill]]  ;;  %s510_s19 = int_to_ptr.vmem [resolvable:$true] %s9738_s19 }
  0x16   : > { %s11892_s28 = scalar_select %p9724_p3, 1, 0 }
  0x17   : > { %p8400_p4 = pneg %p9724_p3 }
  0x19   : > { %p9734_p5 = pnand %p11818_p2, %p8400_p4 }
  0x1b   : > { %s9157_s21 = scalar_lea.hbm %s11894_s3, 3456  ;;  %p9748_p7 = pneg %p9734_p5 }
  0x1c   : > { %p9158_p6 = scmp.ne.s32.totalorder %s11894_s3, %s9157_s21  ;;  %p9164_p10 = scmp.lt.u32.totalorder %s9157_s21, %s11894_s3 }
  0x1e   : > { %p9160_p8 = pnand %p9748_p7, %p9158_p6 }
  0x20   : > { %p9161_p9 = pneg %p9160_p8 }
  0x22   : > { %p9166_p11 = pnand %p9164_p10, %p9161_p9 }
  0x24   : > { %9169 = shalt.err (!%p9166_p11)
}
  0x25   : > { %s9170_s1 = scalar_lea.vmem %s9722_s26, 3456  ;;  %p9178_p1 = scmp.lt.s32.totalorder %s9722_s26, %s9722_s26 }
  0x26   : > { %p9171_p12 = scmp.ne.s32.totalorder %s9722_s26, %s9170_s1  ;;  %p9179_p4 = scmp.lt.s32.totalorder %s9170_s1, %s9170_s1 }
  0x28   : > { %p9173_p13 = pnand %p9171_p12, %p9748_p7  ;;  %p9180_p6 = por %p9179_p4, %p9178_p1 }
  0x2a   : > { %p9174_p0 = pneg %p9173_p13 }
  0x2c   : > { %p9181_p8 = pnand %p9180_p6, %p9174_p0 }
  0x2e   : > { %9184 = shalt.err (!%p9181_p8)
}
  0x2f   : > { %s9592_s20 = smov 384   ;;  %s9593_s21 = smov 24  }
  0x30   : > { %8406 = dma.hbm_to_vmem [thread:$0]  (!%p9734_p5), %s11894_s3, 3456, %s9722_s26, [#allocation6], %s9592_s20, %s9592_s20, %s9593_s21  }
  0x31   : > { %s9185_s24 = scalar_lea.hbm %s11801_s5, 384 }
  0x32   : > { %p9186_p9 = scmp.ne.s32.totalorder %s11801_s5, %s9185_s24  ;;  %p9192_p12 = scmp.lt.u32.totalorder %s9185_s24, %s11801_s5 }
  0x34   : > { %p9188_p10 = pnand %p9186_p9, %p9748_p7 }
  0x36   : > { %p9189_p11 = pneg %p9188_p10 }
  0x38   : > { %p9194_p13 = pnand %p9192_p12, %p9189_p11 }
  0x3a   : > { %9197 = shalt.err (!%p9194_p13)
}
  0x3b   : > { %s9198_s26 = scalar_lea.vmem %s9730_s0, 384  ;;  %p9206_p6 = scmp.lt.s32.totalorder %s9730_s0, %s9730_s0 }
  0x3c   : > { %p9199_p0 = scmp.ne.s32.totalorder %s9730_s0, %s9198_s26  ;;  %p9207_p8 = scmp.lt.s32.totalorder %s9198_s26, %s9198_s26 }
  0x3e   : > { %p9201_p1 = pnand %p9199_p0, %p9748_p7  ;;  %p9208_p9 = por %p9207_p8, %p9206_p6 }
  0x40   : > { %p9202_p4 = pneg %p9201_p1 }
  0x42   : > { %p9209_p10 = pnand %p9208_p9, %p9202_p4 }
  0x44   : > { %9212 = shalt.err (!%p9209_p10)
}
  0x45   : > { %s11820_s14 = smov 128   ;;  %s11825_s17 = smov 8  }
  0x46   : > { %8412 = dma.hbm_to_vmem [thread:$0]  (!%p9734_p5), %s11801_s5, 384, %s9730_s0, [#allocation9], %s11820_s14, %s11820_s14, %s11825_s17  }
  0x47   : > { %s9596_s20 = smov [#allocation14]   ;;  %s9213_s29 = scalar_lea.hbm %s11803_s7, 64 }
  0x48   : > { %s530_s21 = sshll.u32 %s9596_s20, 4  ;;  %p9214_p11 = scmp.ne.s32.totalorder %s11803_s7, %s9213_s29  ;;  %s531_s21 = int_to_ptr.vmem [resolvable:$true] %s530_s21 }
  0x49   : > { %p9220_p0 = scmp.lt.u32.totalorder %s9213_s29, %s11803_s7 }
  0x4a   : > { %p9216_p12 = pnand %p9214_p11, %p9748_p7 }
  0x4c   : > { %p9217_p13 = pneg %p9216_p12 }
  0x4e   : > { %p9222_p1 = pnand %p9220_p0, %p9217_p13 }
  0x50   : > { %9225 = shalt.err (!%p9222_p1)
}
  0x51   : > { %s9226_s0 = scalar_lea.vmem %s510_s19, 64  ;;  %p9234_p9 = scmp.lt.s32.totalorder %s510_s19, %s510_s19 }
  0x52   : > { %p9227_p4 = scmp.ne.s32.totalorder %s510_s19, %s9226_s0  ;;  %p9235_p10 = scmp.lt.s32.totalorder %s9226_s0, %s9226_s0 }
  0x54   : > { %p9229_p6 = pnand %p9227_p4, %p9748_p7  ;;  %p9236_p2 = por %p9235_p10, %p9234_p9 }
  0x56   : > { %p9230_p8 = pneg %p9229_p6 }
  0x58   : > { %p9237_p3 = pnand %p9236_p2, %p9230_p8 }
  0x5a   : > { %9240 = shalt.err (!%p9237_p3)
}
  0x5b   : > { %8418 = dma.hbm_to_vmem [thread:$0]  (!%p9734_p5), %s11803_s7, 64, %s510_s19, [#allocation12]  }
  0x5c   : > { %s9241_s22 = scalar_lea.hbm %s11805_s9, 1152 }
  0x5d   : > { %p9242_p11 = scmp.ne.s32.totalorder %s11805_s9, %s9241_s22  ;;  %p9248_p3 = scmp.lt.u32.totalorder %s9241_s22, %s11805_s9 }
  0x5f   : > { %p9244_p12 = pnand %p9242_p11, %p9748_p7 }
  0x61   : > { %p9245_p2 = pneg %p9244_p12 }
  0x63   : > { %p9250_p13 = pnand %p9248_p3, %p9245_p2 }
  0x65   : > { %9253 = shalt.err (!%p9250_p13)
}
  0x66   : > { %s9254_s26 = scalar_lea.vmem %s531_s21, 1152  ;;  %p9262_p6 = scmp.lt.s32.totalorder %s531_s21, %s531_s21 }
  0x67   : > { %p9255_p0 = scmp.ne.s32.totalorder %s531_s21, %s9254_s26  ;;  %p9263_p8 = scmp.lt.s32.totalorder %s9254_s26, %s9254_s26 }
  0x69   : > { %p9257_p1 = pnand %p9255_p0, %p9748_p7  ;;  %p9264_p9 = por %p9263_p8, %p9262_p6 }
  0x6b   : > { %p9258_p4 = pneg %p9257_p1 }
  0x6d   : > { %p9265_p10 = pnand %p9264_p9, %p9258_p4 }
  0x6f   : > { %9268 = shalt.err (!%p9265_p10)
}
  0x70   : > { %8424 = dma.hbm_to_vmem [thread:$0]  (!%p9734_p5), %s11805_s9, 1152, %s531_s21, [#allocation15], %s11820_s14, %s11820_s14, %s11825_s17  }
  0x71   : > { %s9597_s24 = smov [#allocation17]   ;;  %s9269_s22 = scalar_lea.hbm %s11807_s11, 768 }
  0x72   : > { %s556_s27 = sshll.u32 %s9597_s24, 4  ;;  %p9270_p11 = scmp.ne.s32.totalorder %s11807_s11, %s9269_s22  ;;  %s557_s27 = int_to_ptr.vmem [resolvable:$true] %s556_s27 }
  0x73   : > { %p9276_p3 = scmp.lt.u32.totalorder %s9269_s22, %s11807_s11 }
  0x74   : > { %p9272_p12 = pnand %p9270_p11, %p9748_p7 }
  0x76   : > { %p9273_p2 = pneg %p9272_p12 }
  0x78   : > { %p9278_p13 = pnand %p9276_p3, %p9273_p2 }
  0x7a   : > { %9281 = shalt.err (!%p9278_p13)
}
  0x7b   : > { %s9282_s21 = scalar_lea.vmem %s557_s27, 768  ;;  %p9290_p6 = scmp.lt.s32.totalorder %s557_s27, %s557_s27 }
  0x7c   : > { %p9283_p0 = scmp.ne.s32.totalorder %s557_s27, %s9282_s21  ;;  %p9291_p8 = scmp.lt.s32.totalorder %s9282_s21, %s9282_s21 }
  0x7e   : > { %p9285_p1 = pnand %p9283_p0, %p9748_p7  ;;  %p9292_p9 = por %p9291_p8, %p9290_p6 }
  0x80   : > { %p9286_p4 = pneg %p9285_p1 }
  0x82   : > { %p9293_p10 = pnand %p9292_p9, %p9286_p4 }
  0x84   : > { %9296 = shalt.err (!%p9293_p10)
}
  0x85   : > { %s11821_s26 = smov 256   ;;  %s11822_s19 = smov 16  }
  0x86   : > { %8430 = dma.hbm_to_vmem [thread:$0]  (!%p9734_p5), %s11807_s11, 768, %s557_s27, [#allocation18], %s11821_s26, %s11821_s26, %s11822_s19  }
  0x87   : > { %s9600_s3 = smov [#allocation20]   ;;  %s9297_s29 = scalar_lea.hbm %s11809_s13, 5120 }
  0x88   : > { %s582_s20 = sshll.u32 %s9600_s3, 4  ;;  %p9298_p11 = scmp.ne.s32.totalorder %s11809_s13, %s9297_s29  ;;  %s583_s20 = int_to_ptr.vmem [resolvable:$true] %s582_s20 }
  0x89   : > { %p9304_p3 = scmp.lt.u32.totalorder %s9297_s29, %s11809_s13 }
  0x8a   : > { %p9300_p12 = pnand %p9298_p11, %p9748_p7 }
  0x8c   : > { %p9301_p2 = pneg %p9300_p12 }
  0x8e   : > { %p9306_p13 = pnand %p9304_p3, %p9301_p2 }
  0x90   : > { %9309 = shalt.err (!%p9306_p13)
}
  0x91   : > { %s9310_s27 = scalar_lea.vmem %s583_s20, 5120  ;;  %p9318_p6 = scmp.lt.s32.totalorder %s583_s20, %s583_s20 }
  0x92   : > { %p9311_p0 = scmp.ne.s32.totalorder %s583_s20, %s9310_s27  ;;  %p9319_p8 = scmp.lt.s32.totalorder %s9310_s27, %s9310_s27 }
  0x94   : > { %p9313_p1 = pnand %p9311_p0, %p9748_p7  ;;  %p9320_p9 = por %p9319_p8, %p9318_p6 }
  0x96   : > { %p9314_p4 = pneg %p9313_p1 }
  0x98   : > { %p9321_p10 = pnand %p9320_p9, %p9314_p4 }
  0x9a   : > { %9324 = shalt.err (!%p9321_p10)
}
  0x9b   : > { %s11823_s0 = smov 64   ;;  %s11824_s24 = smov 4  }
  0x9c   : > { %8436 = dma.hbm_to_vmem [thread:$0]  (!%p9734_p5), %s11809_s13, 5120, %s583_s20, [#allocation21], %s11823_s0, %s11823_s0, %s11824_s24  }
  0x9d   : > { %s9603_s22 = smov [#allocation3]   ;;  %s11896_s2 = sld [smem:[#allocation78_spill]] }
  0x9e   : > { %s445_s23 = sshll.u32 %s9603_s22, 4  ;;  %s446_s23 = int_to_ptr.vmem [resolvable:$true] %s445_s23 }
  0xa3   : > { %s9325_s1 = scalar_lea.hbm %s11896_s2, 2880 }
  0xa4   : > { %p9326_p11 = scmp.ne.s32.totalorder %s11896_s2, %s9325_s1  ;;  %p9332_p3 = scmp.lt.u32.totalorder %s9325_s1, %s11896_s2 }
  0xa6   : > { %p9328_p12 = pnand %p9326_p11, %p9748_p7 }
  0xa8   : > { %p9329_p2 = pneg %p9328_p12 }
  0xaa   : > { %p9334_p13 = pnand %p9332_p3, %p9329_p2 }
  0xac   : > { %9337 = shalt.err (!%p9334_p13)
}
  0xad   : > { %s9338_s20 = scalar_lea.vmem %s446_s23, 2880  ;;  %p9346_p6 = scmp.lt.s32.totalorder %s446_s23, %s446_s23 }
  0xae   : > { %p9339_p0 = scmp.ne.s32.totalorder %s446_s23, %s9338_s20  ;;  %p9347_p8 = scmp.lt.s32.totalorder %s9338_s20, %s9338_s20 }
  0xb0   : > { %p9341_p1 = pnand %p9339_p0, %p9748_p7  ;;  %p9348_p9 = por %p9347_p8, %p9346_p6 }
  0xb2   : > { %p9342_p4 = pneg %p9341_p1 }
  0xb4   : > { %p9349_p10 = pnand %p9348_p9, %p9342_p4 }
  0xb6   : > { %9352 = shalt.err (!%p9349_p10)
}
  0xb7   : > { %s9604_s14 = smov 192   ;;  %s9605_s3 = smov 12  }
  0xb8   : > { %8403 = dma.hbm_to_vmem [thread:$0]  (!%p9734_p5), %s11896_s2, 2880, %s446_s23, [#allocation4], %s9604_s14, %s9604_s14, %s9605_s3  }
  0xb9   : > { %s9606_s22 = smov [#allocation7]   ;;  %s9353_s21 = scalar_lea.hbm %s11800_s4, 1728 }
  0xba   : > { %s471_s29 = sshll.u32 %s9606_s22, 4  ;;  %p9354_p11 = scmp.ne.s32.totalorder %s11800_s4, %s9353_s21  ;;  %s472_s29 = int_to_ptr.vmem [resolvable:$true] %s471_s29 }
  0xbb   : > { %p9360_p3 = scmp.lt.u32.totalorder %s9353_s21, %s11800_s4 }
  0xbc   : > { %p9356_p12 = pnand %p9354_p11, %p9748_p7 }
  0xbe   : > { %p9357_p2 = pneg %p9356_p12 }
  0xc0   : > { %p9362_p13 = pnand %p9360_p3, %p9357_p2 }
  0xc2   : > { %9365 = shalt.err (!%p9362_p13)
}
  0xc3   : > { %s9366_s23 = scalar_lea.vmem %s472_s29, 1728  ;;  %p9374_p6 = scmp.lt.s32.totalorder %s472_s29, %s472_s29 }
  0xc4   : > { %p9367_p0 = scmp.ne.s32.totalorder %s472_s29, %s9366_s23  ;;  %p9375_p8 = scmp.lt.s32.totalorder %s9366_s23, %s9366_s23 }
  0xc6   : > { %p9369_p1 = pnand %p9367_p0, %p9748_p7  ;;  %p9376_p9 = por %p9375_p8, %p9374_p6 }
  0xc8   : > { %p9370_p4 = pneg %p9369_p1 }
  0xca   : > { %p9377_p10 = pnand %p9376_p9, %p9370_p4 }
  0xcc   : > { %9380 = shalt.err (!%p9377_p10)
}
  0xcd   : > { %s9607_s14 = smov 576   ;;  %s9608_s3 = smov 36  }
  0xce   : > { %8409 = dma.hbm_to_vmem [thread:$0]  (!%p9734_p5), %s11800_s4, 1728, %s472_s29, [#allocation6], %s9607_s14, %s9607_s14, %s9608_s3  }
  0xcf   : > { %s9609_s26 = smov [#allocation10]   ;;  %s9610_s22 = smov [#allocation13]  }
  0xd0   : > { %s498_s19 = sshll.u32 %s9609_s26, 4  ;;  %s520_s18 = sshll.u32 %s9610_s22, 4  ;;  %s499_s19 = int_to_ptr.vmem [resolvable:$true] %s498_s19  ;;  %s521_s18 = int_to_ptr.vmem [resolvable:$true] %s520_s18 }
  0xd1   : > { %s9381_s27 = scalar_lea.hbm %s11802_s6, 256 }
  0xd2   : > { %p9382_p11 = scmp.ne.s32.totalorder %s11802_s6, %s9381_s27  ;;  %p9388_p3 = scmp.lt.u32.totalorder %s9381_s27, %s11802_s6 }
  0xd4   : > { %p9384_p12 = pnand %p9382_p11, %p9748_p7 }
  0xd6   : > { %p9385_p2 = pneg %p9384_p12 }
  0xd8   : > { %p9390_p13 = pnand %p9388_p3, %p9385_p2 }
  0xda   : > { %9393 = shalt.err (!%p9390_p13)
}
  0xdb   : > { %s9394_s29 = scalar_lea.vmem %s499_s19, 256  ;;  %p9402_p6 = scmp.lt.s32.totalorder %s499_s19, %s499_s19 }
  0xdc   : > { %p9395_p0 = scmp.ne.s32.totalorder %s499_s19, %s9394_s29  ;;  %p9403_p8 = scmp.lt.s32.totalorder %s9394_s29, %s9394_s29 }
  0xde   : > { %p9397_p1 = pnand %p9395_p0, %p9748_p7  ;;  %p9404_p9 = por %p9403_p8, %p9402_p6 }
  0xe0   : > { %p9398_p4 = pneg %p9397_p1 }
  0xe2   : > { %p9405_p10 = pnand %p9404_p9, %p9398_p4 }
  0xe4   : > { %9408 = shalt.err (!%p9405_p10)
}
  0xe5   : > { %8415 = dma.hbm_to_vmem [thread:$0]  (!%p9734_p5), %s11802_s6, 256, %s499_s19, [#allocation9]  }
  0xe6   : > { %s9409_s0 = scalar_lea.hbm %s11804_s8, 64 }
  0xe7   : > { %p9410_p11 = scmp.ne.s32.totalorder %s11804_s8, %s9409_s0  ;;  %p9416_p3 = scmp.lt.u32.totalorder %s9409_s0, %s11804_s8 }
  0xe9   : > { %p9412_p12 = pnand %p9410_p11, %p9748_p7 }
  0xeb   : > { %p9413_p2 = pneg %p9412_p12 }
  0xed   : > { %p9418_p13 = pnand %p9416_p3, %p9413_p2 }
  0xef   : > { %9421 = shalt.err (!%p9418_p13)
}
  0xf0   : > { %s9422_s21 = scalar_lea.vmem %s521_s18, 64  ;;  %p9430_p6 = scmp.lt.s32.totalorder %s521_s18, %s521_s18 }
  0xf1   : > { %p9423_p0 = scmp.ne.s32.totalorder %s521_s18, %s9422_s21  ;;  %p9431_p8 = scmp.lt.s32.totalorder %s9422_s21, %s9422_s21 }
  0xf3   : > { %p9425_p1 = pnand %p9423_p0, %p9748_p7  ;;  %p9432_p9 = por %p9431_p8, %p9430_p6 }
  0xf5   : > { %p9426_p4 = pneg %p9425_p1 }
  0xf7   : > { %p9433_p10 = pnand %p9432_p9, %p9426_p4 }
  0xf9   : > { %9436 = shalt.err (!%p9433_p10)
}
  0xfa   : > { %8421 = dma.hbm_to_vmem [thread:$0]  (!%p9734_p5), %s11804_s8, 64, %s521_s18, [#allocation12]  }
  0xfb   : > { %s9611_s20 = smov [#allocation16]   ;;  %s9612_s29 = smov [#allocation19]  }
  0xfc   : > { %s543_s23 = sshll.u32 %s9611_s20, 4  ;;  %s569_s14 = sshll.u32 %s9612_s29, 4  ;;  %s544_s23 = int_to_ptr.vmem [resolvable:$true] %s543_s23  ;;  %s570_s14 = int_to_ptr.vmem [resolvable:$true] %s569_s14 }
  0xfd   : > { %s9437_s17 = scalar_lea.hbm %s11806_s10, 7424 }
  0xfe   : > { %p9438_p11 = scmp.ne.s32.totalorder %s11806_s10, %s9437_s17  ;;  %p9444_p3 = scmp.lt.u32.totalorder %s9437_s17, %s11806_s10 }
 0x100   : > { %p9440_p12 = pnand %p9438_p11, %p9748_p7 }
 0x102   : > { %p9441_p2 = pneg %p9440_p12 }
 0x104   : > { %p9446_p13 = pnand %p9444_p3, %p9441_p2 }
 0x106   : > { %9449 = shalt.err (!%p9446_p13)
}
 0x107   : > { %s9450_s18 = scalar_lea.vmem %s544_s23, 7424  ;;  %p9458_p6 = scmp.lt.s32.totalorder %s544_s23, %s544_s23 }
 0x108   : > { %p9451_p0 = scmp.ne.s32.totalorder %s544_s23, %s9450_s18  ;;  %p9459_p8 = scmp.lt.s32.totalorder %s9450_s18, %s9450_s18 }
 0x10a   : > { %p9453_p1 = pnand %p9451_p0, %p9748_p7  ;;  %p9460_p9 = por %p9459_p8, %p9458_p6 }
 0x10c   : > { %p9454_p4 = pneg %p9453_p1 }
 0x10e   : > { %p9461_p10 = pnand %p9460_p9, %p9454_p4 }
 0x110   : > { %9464 = shalt.err (!%p9461_p10)
}
 0x111   : > { %s11897_s1 = smov 8   ;;  %s11898_s21 = smov 128  }
 0x112   : > { %8427 = dma.hbm_to_vmem [thread:$0]  (!%p9734_p5), %s11806_s10, 7424, %s544_s23, [#allocation15], %s11898_s21, %s11898_s21, %s11897_s1  }
 0x113   : > { %s9465_s3 = scalar_lea.hbm %s11808_s12, 36864 }
 0x114   : > { %p9466_p11 = scmp.ne.s32.totalorder %s11808_s12, %s9465_s3  ;;  %p9472_p3 = scmp.lt.u32.totalorder %s9465_s3, %s11808_s12 }
 0x116   : > { %p9468_p12 = pnand %p9466_p11, %p9748_p7 }
 0x118   : > { %p9469_p2 = pneg %p9468_p12 }
 0x11a   : > { %p9474_p13 = pnand %p9472_p3, %p9469_p2 }
 0x11c   : > { %9477 = shalt.err (!%p9474_p13)
}
 0x11d   : > { %s9478_s26 = scalar_lea.vmem %s570_s14, 36864  ;;  %p9486_p6 = scmp.lt.s32.totalorder %s570_s14, %s570_s14 }
 0x11e   : > { %p9479_p0 = scmp.ne.s32.totalorder %s570_s14, %s9478_s26  ;;  %p9487_p8 = scmp.lt.s32.totalorder %s9478_s26, %s9478_s26 }
 0x120   : > { %p9481_p1 = pnand %p9479_p0, %p9748_p7  ;;  %p9488_p9 = por %p9487_p8, %p9486_p6 }
 0x122   : > { %p9482_p4 = pneg %p9481_p1 }
 0x124   : > { %p9489_p10 = pnand %p9488_p9, %p9482_p4 }
 0x126   : > { %9492 = shalt.err (!%p9489_p10)
}
 0x127   : > { %s11899_s23 = smov 16   ;;  %s11900_s22 = smov 256  }
 0x128   : > { %8433 = dma.hbm_to_vmem [thread:$0]  (!%p9734_p5), %s11808_s12, 36864, %s570_s14, [#allocation18], %s11900_s22, %s11900_s22, %s11899_s23  }
 0x129   : > { %s9613_s21 = smov [#allocation22]   ;;  %s9614_s27 = smov [#allocation23]  }
 0x12a   : > { %s598_s19 = sshll.u32 %s9613_s21, 4  ;;  %s612_s20 = sshll.u32 %s9614_s27, 4  ;;  %s599_s19 = int_to_ptr.vmem [resolvable:$true] %s598_s19  ;;  %s613_s20 = int_to_ptr.vmem [resolvable:$true] %s612_s20 }
 0x12b   : > { %s9493_s2 = scalar_lea.hbm %s11811_s15, 512 }
 0x12c   : > { %p9494_p11 = scmp.ne.s32.totalorder %s11811_s15, %s9493_s2  ;;  %p9500_p3 = scmp.lt.u32.totalorder %s9493_s2, %s11811_s15 }
 0x12e   : > { %p9496_p12 = pnand %p9494_p11, %p9748_p7 }
 0x130   : > { %p9497_p2 = pneg %p9496_p12 }
 0x132   : > { %p9502_p13 = pnand %p9500_p3, %p9497_p2 }
 0x134   : > { %9505 = shalt.err (!%p9502_p13)
}
 0x135   : > { %s9506_s14 = scalar_lea.vmem %s599_s19, 512  ;;  %p9514_p6 = scmp.lt.s32.totalorder %s599_s19, %s599_s19 }
 0x136   : > { %p9507_p0 = scmp.ne.s32.totalorder %s599_s19, %s9506_s14  ;;  %p9515_p8 = scmp.lt.s32.totalorder %s9506_s14, %s9506_s14 }
 0x138   : > { %p9509_p1 = pnand %p9507_p0, %p9748_p7  ;;  %p9516_p9 = por %p9515_p8, %p9514_p6 }
 0x13a   : > { %p9510_p4 = pneg %p9509_p1 }
 0x13c   : > { %p9517_p10 = pnand %p9516_p9, %p9510_p4 }
 0x13e   : > { %9520 = shalt.err (!%p9517_p10)
}
 0x13f   : > { %s11901_s23 = smov 4   ;;  %s11902_s22 = smov 64  }
 0x140   : > { %8439 = dma.hbm_to_vmem [thread:$0]  (!%p9734_p5), %s11811_s15, 512, %s599_s19, [#allocation21], %s11902_s22, %s11902_s22, %s11901_s23  }
 0x141   : > { %s9521_s29 = scalar_lea.hbm %s11812_s16, 512 }
 0x142   : > { %p9522_p11 = scmp.ne.s32.totalorder %s11812_s16, %s9521_s29  ;;  %p9528_p3 = scmp.lt.u32.totalorder %s9521_s29, %s11812_s16 }
 0x144   : > { %p9524_p12 = pnand %p9522_p11, %p9748_p7 }
 0x146   : > { %p9525_p2 = pneg %p9524_p12 }
 0x148   : > { %p9530_p13 = pnand %p9528_p3, %p9525_p2 }
 0x14a   : > { %9533 = shalt.err (!%p9530_p13)
}
 0x14b   : > { %s9534_s24 = scalar_lea.vmem %s613_s20, 512  ;;  %p9542_p6 = scmp.lt.s32.totalorder %s613_s20, %s613_s20 }
 0x14c   : > { %p9535_p0 = scmp.ne.s32.totalorder %s613_s20, %s9534_s24  ;;  %p9543_p8 = scmp.lt.s32.totalorder %s9534_s24, %s9534_s24 }
 0x14e   : > { %p9537_p1 = pnand %p9535_p0, %p9748_p7  ;;  %p9544_p9 = por %p9543_p8, %p9542_p6 }
 0x150   : > { %p9538_p4 = pneg %p9537_p1 }
 0x152   : > { %p9545_p10 = pnand %p9544_p9, %p9538_p4 }
 0x154   : > { %9548 = shalt.err (!%p9545_p10)
}
 0x155   : > { %8442 = dma.hbm_to_vmem [thread:$0]  (!%p9734_p5), %s11812_s16, 512, %s613_s20, [#allocation24]  }
 0x156   : > { %p11903_p11 = scmp.ne.s32.totalorder %s11892_s28, 0 }
 0x158   : > { %640 = sbr.rel (%p11903_p11) target bundleno = 5042 (0x13b2), region = 88 }
 0x15f   : > { %s11904_s14 = sld [smem:[#allocation34_spill]] }
 0x165   : > { %p11905_p12 = scmp.eq.s32.totalorder %s11904_s14, 0 }
 0x167   : > { %9554 = dma.done.wait (%p11905_p12), [#allocation4], 2880   ;;  %p11906_p7 = pmov %p11905_p12 }
 0x169   : > { %9556 = vsyncadd (%p11906_p7), [#allocation4], 4294964416  ;;  %p11907_p2 = pmov %p11906_p7 }
 0x16b   : > { %9558 = dma.done.wait (%p11907_p2), [#allocation6], 5184   ;;  %p11908_p3 = pmov %p11907_p2 }
 0x16c   : > { %p11909_p13 = pmov %p11907_p2 }
 0x16d   : > { %9560 = vsyncadd (%p11908_p3), [#allocation6], 4294962112 }
 0x16e   : > { %9562 = dma.done.wait (%p11909_p13), [#allocation9], 640   ;;  %p11910_p5 = pmov %p11907_p2 }
 0x16f   : > { %p11911_p0 = pmov %p11907_p2 }
 0x170   : > { %9564 = vsyncadd (%p11910_p5), [#allocation9], 4294966656 }
 0x171   : > { %9566 = dma.done.wait (%p11911_p0), [#allocation12], 128   ;;  %p11912_p1 = pmov %p11911_p0 }
 0x172   : > { %p11913_p4 = pmov %p11911_p0 }
 0x173   : > { %9568 = vsyncadd (%p11912_p1), [#allocation12], 4294967168 }
 0x174   : > { %9570 = dma.done.wait (%p11913_p4), [#allocation15], 8576   ;;  %p11914_p6 = pmov %p11911_p0 }
 0x175   : > { %p11915_p8 = pmov %p11911_p0 }
 0x176   : > { %9572 = vsyncadd (%p11914_p6), [#allocation15], 4294958720 }
 0x177   : > { %9574 = dma.done.wait (%p11915_p8), [#allocation18], 37632   ;;  %p11916_p9 = pmov %p11911_p0 }
 0x178   : > { %p11917_p10 = pmov %p11911_p0 }
 0x179   : > { %9576 = vsyncadd (%p11916_p9), [#allocation18], 4294929664 }
 0x17a   : > { %9578 = dma.done.wait (%p11917_p10), [#allocation21], 5632   ;;  %p11918_p11 = pmov %p11911_p0 }
 0x17b   : > { %p11919_p12 = pmov %p11911_p0 }
 0x17c   : > { %9580 = vsyncadd (%p11918_p11), [#allocation21], 4294961664 }
 0x17d   : > { %9582 = dma.done.wait (%p11919_p12), [#allocation24], 512   ;;  %p11920_p7 = pmov %p11911_p0 }
 0x17e   : > { %p747_p2 = scmp.lt.s32.totalorder %s11904_s14, 1  ;;  %v9615_v0 = vmov 0.0   ;;  %s11921_s23 = sld [smem:[#allocation77_spill]]  ;;  %v10085_v4 = vld [vmem:[#allocation14 + $0x1] ss:$0 sm:$0xff]  ;;  %vm1019_vm0 = vcmask 850944  }
 0x17f   : > { %9584 = vsyncadd (%p11920_p7), [#allocation24], 4294966784  ;;  %761 = vst [vmem:[#allocation2] sm:$0xff] %v9615_v0  ;;  %s11922_s21 = sld [smem:[#allocation76_spill]]  ;;  %v7107_v9 = vld [vmem:[#allocation14] ss:$0 sm:$0xff] }
 0x180   : > { %762 = vst [vmem:[#allocation2 + $0x8] sm:$0xff] %v9615_v0  ;;  %763 = vst [vmem:[#allocation2 + $0x10] sm:$0xff] %v9615_v0  ;;  %s12108_s14 = smov (!%p747_p2, %s11904_s14), 1  ;;  %v10095_v10 = vld [vmem:[#allocation14 + $0x2] ss:$0 sm:$0xff]  ;;  %vm1044_vm1 = vcmask 1043456  }
 0x181   : > { %764 = vst [vmem:[#allocation2 + $0x18] sm:$0xff] %v9615_v0  ;;  %765 = vst [vmem:[#allocation2 + $0x20] sm:$0xff] %v9615_v0  ;;  %s8343_s28 = smul.u32 72, %s12108_s14  ;;  %s7105_s30 = sshll.u32 %s12108_s14, 3  ;;  %v10113_v22 = vld [vmem:[#allocation14 + $0x3] ss:$0 sm:$0xff] }
 0x182   : > { %766 = vst [vmem:[#allocation2 + $0x28] sm:$0xff] %v9615_v0  ;;  %767 = vst [vmem:[#allocation2 + $0x30] sm:$0xff] %v9615_v0  ;;  %v10126_v32 = vld [vmem:[#allocation14 + $0x4] ss:$0 sm:$0xff]  ;;  %v8517_v43 = vld [vmem:[#allocation3 + $0x4] ss:$12 sps:$4 sm:$0xff]  }
 0x183   : > { %768 = vst [vmem:[#allocation2 + $0x38] sm:$0xff] %v9615_v0  ;;  %1080 = vmatprep.mubr.bf16.mxu0 %v8517_v43  ;;  %v8518_v53 = vld [vmem:[#allocation3 + $0x8] ss:$12 sps:$4 sm:$0xff]   ;;  %v8541_v43 = vld [vmem:[#allocation3 + $0x90] ss:$12 sps:$4 sm:$0xff]   ;;  %vm1275_vm2 = vcmask 1041408  }
 0x184   : > { %s10075_s22 = scalar_lea.vmem %s11921_s23, %s7105_s30  ;;  %8130 = vmatprep.mubr.msk.bf16.mxu1 %vm1019_vm0, %v8518_v53  ;;  %vm1250_vm3 = vcmask 31744   ;;  %vm1750_vm4 = vcmask 654336   ;;  %vm9617_vm5 = vmmov 0   ;;  %vm2004_vm6 = vcmask 261120   ;;  %s12104_s2 = sld [smem:[#allocation80_spill]] }
 0x185   : > { %s751_s27 = scalar_lea.vmem %s11922_s21, %s8343_s28  ;;  %v770_v1 = vld [vmem:[%s10075_s22] sm:$0xff]  ;;  %vm2490_vm7 = vcmask 457728   ;;  %vm2928_vm8 = vcmask 719872   ;;  %vm3021_vm9 = vcmask 523264   ;;  %vm3292_vm10 = vcmask 785408   ;;  %s12105_s17 = sld [smem:[#allocation81_spill]] }
 0x186   : > { %v10081_v2 = vld [vmem:[%s751_s27 + $0x38] sm:$0xff]  ;;  %v10083_v3 = vld [vmem:[%s751_s27 + $0x40] sm:$0xff]  ;;  %771 = vst [vmem:[#allocation2 + $0x40] sm:$0xff] %v770_v1  ;;  %v10089_v6 = vld [vmem:[%s751_s27 + $0x8] sm:$0xff]  ;;  %vm3518_vm11 = vcmask 588800   ;;  %vm3684_vm12 = vcmask 64512  }
 0x187   : > { %v10087_v5 = vld [vmem:[%s751_s27] sm:$0xff]  ;;  %v807_v7 = vmul.f32 %v10085_v4, %v10081_v2  ;;  %v808_v8 = vmul.f32 %v10085_v4, %v10083_v3  ;;  %v10097_v11 = vld [vmem:[%s751_s27 + $0x10] sm:$0xff]  ;;  %v787_v13 = vmul.f32 %v7107_v9, %v10089_v6  ;;  %v815_v15 = vmul.f32 %v10095_v10, %v10089_v6  ;;  %v10105_v16 = vld [vmem:[%s751_s27 + $0x18] sm:$0xff] }
 0x188   : > { %v786_v12 = vmul.f32 %v7107_v9, %v10087_v5  ;;  %v814_v14 = vmul.f32 %v10095_v10, %v10087_v5  ;;  %v10107_v17 = vld [vmem:[%s751_s27 + $0x28] sm:$0xff]  ;;  %v10109_v18 = vld [vmem:[%s751_s27 + $0x30] sm:$0xff]  ;;  %v788_v20 = vmul.f32 %v7107_v9, %v10097_v11  ;;  %v789_v21 = vmul.f32 %v7107_v9, %v10105_v16  ;;  %v10117_v24 = vld [vmem:[%s751_s27 + $0x20] sm:$0xff] }
 0x189   : > { %v889_v19 = vpack.c.bf16 %v808_v8, %v807_v7  ;;  %v816_v23 = vmul.f32 %v10095_v10, %v10097_v11  ;;  %v833_v27 = vmul.f32 %v10113_v22, %v10107_v17  ;;  %v834_v28 = vmul.f32 %v10113_v22, %v10109_v18 }
 0x18a   : > { %v881_v25 = vpack.c.bf16 %v787_v13, %v786_v12  ;;  %v890_v26 = vpack.c.bf16 %v815_v15, %v814_v14  ;;  %v882_v29 = vpack.c.bf16 %v789_v21, %v788_v20  ;;  %v817_v30 = vmul.f32 %v10095_v10, %v10105_v16 }
 0x18b   : > { %7677 = vmatprep.subr.bf16.mxu0 %v889_v19  ;;  %v790_v31 = vmul.f32 %v7107_v9, %v10117_v24  ;;  %v897_v33 = vpack.c.bf16 %v834_v28, %v833_v27  ;;  %v791_v34 = vmul.f32 %v7107_v9, %v10107_v17  ;;  %v835_v35 = vmul.f32 %v10113_v22, %v10081_v2  ;;  %v8526_v27 = vld [vmem:[#allocation3 + $0x38] ss:$12 sps:$4 sm:$0xff]   ;;  %v8520_v28 = vld [vmem:[#allocation3 + $0x1c] ss:$12 sps:$4 sm:$0xff]   ;;  %s759_s0 = scalar_lea.vmem %s12105_s17, %s7105_s30 }
 0x18c   : > { %7678 = vmatpush3.bf16.msra.mxu0 %v881_v25  ;;  %v836_v36 = vmul.f32 %v10113_v22, %v10083_v3  ;;  %v891_v37 = vpack.c.bf16 %v817_v30, %v816_v23  ;;  %v818_v38 = vmul.f32 %v10095_v10, %v10117_v24  ;;  %v819_v39 = vmul.f32 %v10095_v10, %v10107_v17  ;;  %v8523_v30 = vld [vmem:[#allocation3 + $0x34] ss:$12 sps:$4 sm:$0xff]  }
 0x18d   : > { %7679 = vmatprep.subr.bf16.mxu0 %v890_v26  ;;  %8116 = vmatprep.subr.bf16.mxu1 %v897_v33  ;;  %v842_v41 = vmul.f32 %v10126_v32, %v10087_v5  ;;  %v843_v42 = vmul.f32 %v10126_v32, %v10089_v6  ;;  %v792_v44 = vmul.f32 %v7107_v9, %v10109_v18 }
 0x18e   : > { %v898_v40 = vpack.c.bf16 %v836_v36, %v835_v35  ;;  %8117 = vmatpush3.bf16.msra.mxu1 %v897_v33  ;;  %v793_v45 = vmul.f32 %v7107_v9, %v10081_v2  ;;  %v883_v46 = vpack.c.bf16 %v791_v34, %v790_v31  ;;  %v844_v48 = vmul.f32 %v10126_v32, %v10097_v11  ;;  %v8535_v31 = vld [vmem:[#allocation3 + $0x80] ss:$12 sps:$4 sm:$0xff]   ;;  %v8542_v33 = vld [vmem:[#allocation3 + $0x98] ss:$12 sps:$4 sm:$0xff]   ;;  %v8543_v35 = vld [vmem:[#allocation3 + $0xb0] ss:$0 sps:$4 sm:$0xff]  }
 0x18f   : > { %v899_v47 = vpack.c.bf16 %v843_v42, %v842_v41  ;;  %v892_v49 = vpack.c.bf16 %v819_v39, %v818_v38  ;;  %v820_v50 = vmul.f32 %v10095_v10, %v10109_v18  ;;  %v821_v51 = vmul.f32 %v10095_v10, %v10081_v2  ;;  %v8528_v34 = vld [vmem:[#allocation3 + $0x4c] ss:$12 sps:$4 sm:$0xff]   ;;  %v8530_v36 = vld [vmem:[#allocation3 + $0x48] ss:$12 sps:$4 sm:$0xff]  }
 0x190   : > { %7680 = vmatpush3.bf16.msra.mxu0 %v882_v29  ;;  %8118 = vmatprep.subr.bf16.mxu1 %v898_v40  ;;  %v845_v52 = vmul.f32 %v10126_v32, %v10105_v16  ;;  %v884_v54 = vpack.c.bf16 %v793_v45, %v792_v44  ;;  %v794_v55 = vmul.f32 %v7107_v9, %v10083_v3  ;;  %v8534_v29 = vld [vmem:[#allocation3 + $0x68] ss:$12 sps:$4 sm:$0xff]   ;;  %v8533_v38 = vld [vmem:[#allocation3 + $0x60] ss:$12 sps:$4 sm:$0xff]  }
 0x191   : > { %7681 = vmatprep.subr.bf16.mxu0 %v891_v37  ;;  %v800_v56 = vmul.f32 %v10085_v4, %v10087_v5  ;;  %v846_v58 = vmul.f32 %v10126_v32, %v10117_v24  ;;  %v847_v59 = vmul.f32 %v10126_v32, %v10107_v17  ;;  %v893_v60 = vpack.c.bf16 %v821_v51, %v820_v50  ;;  %v8531_v37 = vld [vmem:[#allocation3 + $0x64] ss:$12 sps:$4 sm:$0xff]   ;;  %v8536_v39 = vld [vmem:[#allocation3 + $0x7c] ss:$12 sps:$4 sm:$0xff]   ;;  %v8539_v41 = vld [vmem:[#allocation3 + $0x94] ss:$12 sps:$4 sm:$0xff]  }
 0x192   : > { %8119 = vmatpush3.bf16.msra.mxu1 %v898_v40  ;;  %v900_v57 = vpack.c.bf16 %v845_v52, %v844_v48  ;;  %v822_v61 = vmul.f32 %v10095_v10, %v10083_v3  ;;  %v828_v62 = vmul.f32 %v10113_v22, %v10087_v5  ;;  %v801_v0 = vmul.f32 %v10085_v4, %v10089_v6  ;;  %v8538_v40 = vld [vmem:[#allocation3 + $0x78] ss:$12 sps:$4 sm:$0xff]   ;;  %v879_v42 = vld [vmem:[#allocation3 + $0xa8] sm:$0xff] }
 0x193   : > { %8120 = vmatprep.subr.bf16.mxu1 %v899_v47  ;;  %v885_v63 = vpack.c.bf16 %v800_v56, %v794_v55  ;;  %v802_v1 = vmul.f32 %v10085_v4, %v10097_v11  ;;  %v901_v7 = vpack.c.bf16 %v847_v59, %v846_v58  ;;  %v848_v8 = vmul.f32 %v10126_v32, %v10109_v18 }
 0x194   : > { %7682 = vmatpush3.bf16.msra.mxu0 %v883_v46  ;;  %v849_v9 = vmul.f32 %v10126_v32, %v10081_v2  ;;  %v894_v5 = vpack.c.bf16 %v828_v62, %v822_v61  ;;  %v829_v10 = vmul.f32 %v10113_v22, %v10089_v6  ;;  %v830_v12 = vmul.f32 %v10113_v22, %v10097_v11  ;;  %v1248_v46 = vld [vmem:[#allocation16] sm:$0x3] }
 0x195   : > { %7683 = vmatprep.subr.bf16.mxu0 %v892_v49  ;;  %v886_v13 = vpack.c.bf16 %v802_v1, %v801_v0  ;;  %v803_v14 = vmul.f32 %v10085_v4, %v10105_v16  ;;  %v804_v15 = vmul.f32 %v10085_v4, %v10117_v24  ;;  %v850_v2 = vmul.f32 %v10126_v32, %v10083_v3  ;;  %v8525_v32 = vld [vmem:[#allocation3 + $0x30] ss:$12 sps:$4 sm:$0xff]  }
 0x196   : > { %8121 = vmatpush3.bf16.msra.mxu1 %v899_v47  ;;  %v902_v19 = vpack.c.bf16 %v849_v9, %v848_v8  ;;  %v895_v20 = vpack.c.bf16 %v830_v12, %v829_v10  ;;  %v831_v6 = vmul.f32 %v10113_v22, %v10105_v16  ;;  %v832_v11 = vmul.f32 %v10113_v22, %v10117_v24  ;;  %v8519_v24 = vld [vmem:[#allocation3 + $0x20] ss:$12 sps:$4 sm:$0xff]  }
 0x197   : > { %8122 = vmatprep.subr.bf16.mxu1 %v900_v57  ;;  %v805_v21 = vmul.f32 %v10085_v4, %v10107_v17  ;;  %v887_v23 = vpack.c.bf16 %v804_v15, %v803_v14  ;;  %v806_v25 = vmul.f32 %v10085_v4, %v10109_v18  ;;  %v903_v26 = vpack.c.bf16 %v850_v2, %v850_v2  ;;  %v8515_v17 = vld [vmem:[#allocation3] ss:$12 sps:$4 sm:$0xff]   ;;  %v8527_v4 = vld [vmem:[#allocation3 + $0x50] ss:$12 sps:$4 sm:$0xff]   ;;  %v8522_v18 = vld [vmem:[#allocation3 + $0x18] ss:$12 sps:$4 sm:$0xff]  }
 0x198   : > { %7684 = vmatpush3.bf16.msra.mxu0 %v884_v54  ;;  %v896_v3 = vpack.c.bf16 %v832_v11, %v831_v6  ;;  %v7134_v44 = vcombine.high %v879_v42, %v879_v42  ;;  %v7133_v45 = vcombine.low %v879_v42, %v879_v42  ;;  %v1277_v47 = vsel %vm1275_vm2, %v1248_v46, 0 }
 0x199   : > { %7685 = vmatprep.subr.bf16.mxu0 %v893_v60  ;;  %v888_v16 = vpack.c.bf16 %v806_v25, %v805_v21  ;;  %v1046_v22 = vsel %vm1044_vm1, %v903_v26, 0 }
 0x19a   : > { %8123 = vmatpush3.bf16.msra.mxu1 %v900_v57 }
 0x19b   : > { %8124 = vmatprep.subr.bf16.mxu1 %v901_v7 }
 0x19c   : > { %7686 = vmatpush3.bf16.msra.mxu0 %v885_v63 }
 0x19d   : > { %7687 = vmatprep.subr.bf16.mxu0 %v894_v5 }
 0x19e   : > { %8125 = vmatpush3.bf16.msra.mxu1 %v901_v7 }
 0x19f   : > { %8126 = vmatprep.subr.bf16.mxu1 %v902_v19 }
 0x1a0   : > { %7688 = vmatpush3.bf16.msra.mxu0 %v886_v13 }
 0x1a1   : > { %7689 = vmatprep.subr.bf16.mxu0 %v895_v20 }
 0x1a2   : > { %8127 = vmatpush3.bf16.msra.mxu1 %v902_v19 }
 0x1a3   : > { %8340 = vmatprep.subr.msk.bf16.mxu1 %vm1044_vm1, %v903_v26 }
 0x1a4   : > { %7690 = vmatpush3.bf16.msra.mxu0 %v887_v23 }
 0x1a5   : > { %7691 = vmatprep.subr.bf16.mxu0 %v896_v3 }
 0x1a6   : > { %8129 = vmatpush3.bf16.msra.mxu1 %v1046_v22 }
 0x1a7   : > { %8341 = vmatprep.subr.msk.bf16.mxu1 %vm1275_vm2, %v1248_v46 }
 0x1a8   : > { %7692 = vmatpush3.bf16.msra.mxu0 %v888_v16 }
 0x1a9   : > { %8131 = vmatmul.mubr.msk.bf16.vlgmr.msra.gmra.mrb[0].mxu1 %vm1019_vm0, %v8519_v24 }
 0x1aa   : > { %8134 = vmatprep.mubr.msk.bf16.mxu1 %vm1019_vm0, %v8526_v27  ;;  %8147 = vmatpush3.bf16.msra.mxu1 %v1277_v47 }
 0x1ab   : > { %1081 = vmatmul.mubr.bf16.vlgmr.msra.gmra.mrb[0].mxu0 %v8515_v17 }
 0x1ac   : > { %1088 = vmatprep.mubr.bf16.mxu0 %v8520_v28 }
 0x1b1   : > { %8135 = vmatmul.mubr.msk.bf16.gmra.mrb[4].mxu1 %vm1019_vm0, %v8527_v4 }
 0x1b2   : > { %8138 = vmatprep.mubr.msk.bf16.mxu1 %vm1019_vm0, %v8534_v29 }
 0x1b3   : > { %1089 = vmatmul.mubr.bf16.gmra.mrb[4].mxu0 %v8522_v18 }
 0x1b4   : > { %1096 = vmatprep.mubr.bf16.mxu0 %v8523_v30 }
 0x1b9   : > { %8139 = vmatmul.mubr.msk.bf16.gmra.mrb[8].mxu1 %vm1019_vm0, %v8535_v31 }
 0x1ba   : > { %8142 = vmatprep.mubr.msk.bf16.mxu1 %vm1019_vm0, %v8542_v33 }
 0x1bb   : > { %1097 = vmatmul.mubr.bf16.gmra.mrb[8].mxu0 %v8525_v32 }
 0x1bc   : > { %1104 = vmatprep.mubr.bf16.mxu0 %v8528_v34 }
 0x1c1   : > { %8143 = vmatmul.mubr.msk.bf16.gmra.mrb[12].mxu1 %vm1019_vm0, %v8543_v35 }
 0x1c3   : > { %1105 = vmatmul.mubr.bf16.gmra.mrb[12].mxu0 %v8530_v36 }
 0x1c4   : > { %1112 = vmatprep.mubr.bf16.mxu0 %v8531_v37 }
 0x1cb   : > { %1113 = vmatmul.mubr.bf16.gmra.mrb[16].mxu0 %v8533_v38 }
 0x1cc   : > { %1120 = vmatprep.mubr.bf16.mxu0 %v8536_v39 }
 0x1d3   : > { %1121 = vmatmul.mubr.bf16.gmra.mrb[20].mxu0 %v8538_v40 }
 0x1d4   : > { %1128 = vmatprep.mubr.bf16.mxu0 %v8539_v41 }
 0x1db   : > { %1129 = vmatmul.mubr.bf16.gmra.mrb[24].mxu0 %v8541_v43 }
 0x1dc   : > { %1136 = vmatprep.mubr.bf16.mxu0 %v7134_v44 }
 0x1e3   : > { %1137 = vmatmul.mubr.bf16.gmra.mrb[28].mxu0 %v7133_v45 }
 0x27c   : > { %v8132_v48 = vpop.f32.mrb[0].mxu1 }
 0x27d   : > { %v1178_v50 = vpop.f32.mrb[1].mxu1 }
 0x27e   : > { %v7693_v49 = vpop.f32.mrb[0].mxu0  ;;  %v8133_v52 = vpop.f32.mrb[2].mxu1 }
 0x27f   : > { %v7694_v51 = vpop.f32.mrb[1].mxu0  ;;  %v1181_v55 = vpop.f32.mrb[3].mxu1 }
 0x280   : > { %v7695_v53 = vadd.f32 %v7694_v51, %v7693_v49  ;;  %v7696_v54 = vpop.f32.mrb[2].mxu0 }
 0x281   : > { %v7697_v56 = vpop.f32.mrb[3].mxu0 }
 0x282   : > { %v7698_v57 = vadd.f32 %v7697_v56, %v7696_v54  ;;  %v1179_v58 = vadd.f32 %v7695_v53, %v1178_v50 }
 0x284   : > { %v1182_v59 = vadd.f32 %v7698_v57, %v1181_v55  ;;  %v8136_v60 = vpop.f32.mrb[4].mxu1 }
 0x285   : > { %v1194_v63 = vpop.f32.mrb[5].mxu1 }
 0x286   : > { %v1240_v61 = vpack.c.bf16 %v1182_v59, %v1179_v58  ;;  %v7699_v62 = vpop.f32.mrb[4].mxu0  ;;  %v8137_v1 = vpop.f32.mrb[6].mxu1 }
 0x287   : > { %v7700_v0 = vpop.f32.mrb[5].mxu0  ;;  %v1197_v9 = vpop.f32.mrb[7].mxu1 }
 0x288   : > { %v7701_v7 = vadd.f32 %v7700_v0, %v7699_v62  ;;  %v7702_v8 = vpop.f32.mrb[6].mxu0  ;;  %8148 = vmatprep.mubr.msk.bf16.mxu1 %vm1250_vm3, %v1240_v61 }
 0x289   : > { %v7703_v5 = vpop.f32.mrb[7].mxu0 }
 0x28a   : > { %v1187_v10 = vadd.f32 %v8132_v48, %v7701_v7  ;;  %v7704_v12 = vadd.f32 %v7703_v5, %v7702_v8 }
 0x28c   : > { %v1190_v13 = vadd.f32 %v8133_v52, %v7704_v12  ;;  %v8140_v14 = vpop.f32.mrb[8].mxu1  ;;  %v8551_v12 = vld [vmem:[#allocation5 + $0xc] ss:$24 sps:$4 sm:$0xff]  }
 0x28d   : > { %v1210_v2 = vpop.f32.mrb[9].mxu1  ;;  %1870 = vmatprep.mubr.bf16.mxu0 %v8551_v12 }
 0x28e   : > { %v1241_v15 = vpack.c.bf16 %v1190_v13, %v1187_v10  ;;  %v7705_v19 = vpop.f32.mrb[8].mxu0  ;;  %v8141_v6 = vpop.f32.mrb[10].mxu1  ;;  %v8548_v10 = vld [vmem:[#allocation5 + $0x4] ss:$24 sps:$4 sm:$0xff]   ;;  %v11826_v13 = vmov 0  }
 0x28f   : > { %v7706_v20 = vpop.f32.mrb[9].mxu0  ;;  %v1213_v23 = vpop.f32.mrb[11].mxu1  ;;  %8511 = vset.pattern.permute.xlu0 %v11826_v13 }
 0x290   : > { %v7707_v11 = vadd.f32 %v7706_v20, %v7705_v19  ;;  %v7708_v21 = vpop.f32.mrb[10].mxu0  ;;  %8149 = vmatmul.mubr.msk.bf16.vlgmr.msra.gmra.mrb[16].mxu1 %vm1250_vm3, %v1241_v15  ;;  %v10210_v20 = vld [vmem:[#allocation17 + $0x1] ss:$0 sm:$0xff] }
 0x291   : > { %v7709_v25 = vpop.f32.mrb[11].mxu0 }
 0x292   : > { %v7710_v26 = vadd.f32 %v7709_v25, %v7708_v21  ;;  %v1195_v3 = vadd.f32 %v7707_v11, %v1194_v63 }
 0x294   : > { %v1198_v16 = vadd.f32 %v7710_v26, %v1197_v9  ;;  %v8144_v22 = vpop.f32.mrb[12].mxu1  ;;  %v10214_v26 = vld [vmem:[#allocation17 + $0x2] ss:$0 sm:$0xff] }
 0x295   : > { %v1226_v27 = vpop.f32.mrb[13].mxu1 }
 0x296   : > { %v1242_v24 = vpack.c.bf16 %v1198_v16, %v1195_v3  ;;  %v7711_v17 = vpop.f32.mrb[12].mxu0  ;;  %v8145_v4 = vpop.f32.mrb[14].mxu1 }
 0x297   : > { %v7712_v28 = vpop.f32.mrb[13].mxu0  ;;  %v1229_v30 = vpop.f32.mrb[15].mxu1 }
 0x298   : > { %v7713_v18 = vadd.f32 %v7712_v28, %v7711_v17  ;;  %v7714_v29 = vpop.f32.mrb[14].mxu0  ;;  %8152 = vmatprep.mubr.msk.bf16.mxu1 %vm1250_vm3, %v1242_v24  ;;  %v10219_v28 = vld [vmem:[#allocation14 + $0x6] ss:$0 sm:$0xff] }
 0x299   : > { %v7715_v31 = vpop.f32.mrb[15].mxu0 }
 0x29a   : > { %v1203_v32 = vadd.f32 %v8136_v60, %v7713_v18  ;;  %v7716_v33 = vadd.f32 %v7715_v31, %v7714_v29  ;;  %v10223_v29 = vld [vmem:[#allocation14 + $0x5] ss:$0 sm:$0xff] }
 0x29c   : > { %v1206_v34 = vadd.f32 %v8137_v1, %v7716_v33  ;;  %v10231_v33 = vld [vmem:[#allocation14 + $0x9] ss:$0 sm:$0xff] }
 0x29e   : > { %v1243_v35 = vpack.c.bf16 %v1206_v34, %v1203_v32  ;;  %v7717_v36 = vpop.f32.mrb[16].mxu0 }
 0x29f   : > { %v7718_v37 = vpop.f32.mrb[17].mxu0 }
 0x2a0   : > { %v7719_v38 = vadd.f32 %v7718_v37, %v7717_v36  ;;  %v7720_v39 = vpop.f32.mrb[18].mxu0  ;;  %8153 = vmatmul.mubr.msk.bf16.gmra.mrb[20].mxu1 %vm1250_vm3, %v1243_v35 }
 0x2a1   : > { %v7721_v40 = vpop.f32.mrb[19].mxu0 }
 0x2a2   : > { %v7722_v41 = vadd.f32 %v7721_v40, %v7720_v39  ;;  %v1211_v42 = vadd.f32 %v7719_v38, %v1210_v2 }
 0x2a4   : > { %v1214_v43 = vadd.f32 %v7722_v41, %v1213_v23 }
 0x2a6   : > { %v1244_v44 = vpack.c.bf16 %v1214_v43, %v1211_v42  ;;  %v7723_v45 = vpop.f32.mrb[20].mxu0 }
 0x2a7   : > { %v7724_v46 = vpop.f32.mrb[21].mxu0 }
 0x2a8   : > { %v7725_v47 = vadd.f32 %v7724_v46, %v7723_v45  ;;  %v7726_v48 = vpop.f32.mrb[22].mxu0  ;;  %8156 = vmatprep.mubr.msk.bf16.mxu1 %vm1250_vm3, %v1244_v44  ;;  %v10260_v46 = vld [vmem:[#allocation14 + $0x8] ss:$0 sm:$0xff] }
 0x2a9   : > { %v7727_v49 = vpop.f32.mrb[23].mxu0 }
 0x2aa   : > { %v1219_v50 = vadd.f32 %v8140_v14, %v7725_v47  ;;  %v7728_v51 = vadd.f32 %v7727_v49, %v7726_v48  ;;  %v10207_v14 = vld [vmem:[#allocation17] ss:$0 sm:$0xff] }
 0x2ac   : > { %v1222_v52 = vadd.f32 %v8141_v6, %v7728_v51  ;;  %v10272_v51 = vld [vmem:[#allocation14 + $0xa] ss:$0 sm:$0xff] }
 0x2ae   : > { %v1245_v53 = vpack.c.bf16 %v1222_v52, %v1219_v50  ;;  %v7729_v54 = vpop.f32.mrb[24].mxu0 }
 0x2af   : > { %v7730_v55 = vpop.f32.mrb[25].mxu0 }
 0x2b0   : > { %v7731_v56 = vadd.f32 %v7730_v55, %v7729_v54  ;;  %v7732_v57 = vpop.f32.mrb[26].mxu0  ;;  %8157 = vmatmul.mubr.msk.bf16.gmra.mrb[24].mxu1 %vm1250_vm3, %v1245_v53 }
 0x2b1   : > { %v7733_v58 = vpop.f32.mrb[27].mxu0 }
 0x2b2   : > { %v7734_v59 = vadd.f32 %v7733_v58, %v7732_v57  ;;  %v1227_v60 = vadd.f32 %v7731_v56, %v1226_v27 }
 0x2b4   : > { %v1230_v61 = vadd.f32 %v7734_v59, %v1229_v30  ;;  %v10225_v30 = vld [vmem:[#allocation14 + $0x7] ss:$0 sm:$0xff] }
 0x2b6   : > { %v1246_v62 = vpack.c.bf16 %v1230_v61, %v1227_v60  ;;  %v7735_v63 = vpop.f32.mrb[28].mxu0 }
 0x2b7   : > { %v7736_v0 = vpop.f32.mrb[29].mxu0 }
 0x2b8   : > { %v7737_v1 = vadd.f32 %v7736_v0, %v7735_v63  ;;  %v7738_v7 = vpop.f32.mrb[30].mxu0  ;;  %8160 = vmatprep.mubr.msk.bf16.mxu1 %vm1250_vm3, %v1246_v62 }
 0x2b9   : > { %v7739_v8 = vpop.f32.mrb[31].mxu0 }
 0x2ba   : > { %v1235_v9 = vadd.f32 %v8144_v22, %v7737_v1 }
 0x2bc   : > { %v1247_v5 = vpack.c.bf16 %v1235_v9, %v1235_v9 }
 0x2be   : > { %8161 = vmatmul.mubr.msk.bf16.gmra.mrb[28].mxu1 %vm1250_vm3, %v1247_v5 }
 0x2bf   : > { %1798 = vmatprep.mubr.bf16.mxu1 %v8548_v10 }
 0x363   : > { %v8150_v15 = vpop.f32.mrb[16].mxu1 }
 0x364   : > { %v1322_v19 = vadd.f32 %v8150_v15, %v10207_v14  ;;  %v1313_v2 = vpop.f32.mrb[17].mxu1 }
 0x365   : > { %v1314_v6 = vadd.f32 %v1313_v2, %v10207_v14  ;;  %v8151_v11 = vpop.f32.mrb[18].mxu1 }
 0x366   : > { %v1377_v21 = vmax.f32 %v1322_v19, 0.0  ;;  %v1325_v23 = vadd.f32 %v8151_v11, %v10207_v14  ;;  %v1316_v25 = vpop.f32.mrb[19].mxu1 }
 0x367   : > { %v1375_v3 = vmax.f32 %v1314_v6, 0.0  ;;  %v1317_v16 = vadd.f32 %v1316_v25, %v10207_v14 }
 0x368   : > { %v1393_v22 = vmul.f32 %v10210_v20, %v1377_v21  ;;  %v1378_v24 = vmax.f32 %v1325_v23, 0.0 }
 0x369   : > { %v1391_v17 = vmul.f32 %v10210_v20, %v1375_v3  ;;  %v1376_v27 = vmax.f32 %v1317_v16, 0.0 }
 0x36a   : > { %v1409_v4 = vadd.f32 %v10214_v26, %v1393_v22  ;;  %v1394_v18 = vmul.f32 %v10210_v20, %v1378_v24 }
 0x36b   : > { %v10228_v31 = vadd.f32 %v10214_v26, %v1391_v17  ;;  %v1392_v32 = vmul.f32 %v10210_v20, %v1376_v27 }
 0x36c   : > { %v1410_v34 = vadd.f32 %v10214_v26, %v1394_v18  ;;  %v1449_v35 = vmul.f32 %v10219_v28, %v1409_v4  ;;  %v10239_v38 = vmul.f32 %v10223_v29, %v1409_v4  ;;  %v10242_v39 = vmul.f32 %v10225_v30, %v1409_v4 }
 0x36d   : > { %v1408_v36 = vadd.f32 %v10214_v26, %v1392_v32  ;;  %v1427_v37 = vmul.f32 %v10223_v29, %v10228_v31  ;;  %v10252_v42 = vmul.f32 %v10225_v30, %v10228_v31  ;;  %v10256_v43 = vmul.f32 %v10231_v33, %v10228_v31 }
 0x36e   : > { %v10245_v40 = vmul.f32 %v10223_v29, %v1410_v34  ;;  %v10248_v41 = vmul.f32 %v10225_v30, %v1410_v34  ;;  %v10279_v56 = vmul.f32 %v10231_v33, %v1409_v4  ;;  %v10282_v57 = vmul.f32 %v10231_v33, %v1410_v34 }
 0x36f   : > { %v1448_v44 = vmul.f32 %v10219_v28, %v1408_v36  ;;  %v1428_v45 = vmul.f32 %v10223_v29, %v1408_v36  ;;  %v10263_v47 = vmul.f32 %v10225_v30, %v1408_v36  ;;  %v10266_v48 = vmul.f32 %v10231_v33, %v1408_v36 }
 0x370   : > { %v1570_v49 = vpack.c.bf16 %v10245_v40, %v10239_v38  ;;  %v1585_v50 = vpack.c.bf16 %v10248_v41, %v10242_v39  ;;  %v10285_v58 = vmul.f32 %v10260_v46, %v1408_v36  ;;  %v10288_v59 = vmul.f32 %v10260_v46, %v1409_v4 }
 0x371   : > { %v1577_v52 = vpack.c.bf16 %v1449_v35, %v1448_v44  ;;  %v1569_v53 = vpack.c.bf16 %v1428_v45, %v1427_v37  ;;  %v10291_v61 = vmul.f32 %v10272_v51, %v1408_v36  ;;  %v10294_v62 = vmul.f32 %v10272_v51, %v1409_v4 }
 0x372   : > { %v1450_v24 = vmul.f32 %v10219_v28, %v1410_v34  ;;  %v1490_v27 = vmul.f32 %v10260_v46, %v1410_v34  ;;  %v10319_v18 = vmul.f32 %v10272_v51, %v1410_v34 }
 0x373   : > { %v8154_v60 = vpop.f32.mrb[20].mxu1  ;;  %7765 = vmatprep.subr.bf16.mxu1 %v1577_v52 }
 0x374   : > { %v1338_v63 = vadd.f32 %v8154_v60, %v10207_v14  ;;  %v1329_v0 = vpop.f32.mrb[21].mxu1  ;;  %7766 = vmatpush3.bf16.msra.mxu1 %v1569_v53 }
 0x375   : > { %v1330_v8 = vadd.f32 %v1329_v0, %v10207_v14  ;;  %v8155_v9 = vpop.f32.mrb[22].mxu1 }
 0x376   : > { %v1381_v10 = vmax.f32 %v1338_v63, 0.0  ;;  %v1341_v12 = vadd.f32 %v8155_v9, %v10207_v14  ;;  %v1332_v15 = vpop.f32.mrb[23].mxu1 }
 0x377   : > { %v1379_v19 = vmax.f32 %v1330_v8, 0.0  ;;  %v1333_v2 = vadd.f32 %v1332_v15, %v10207_v14 }
 0x378   : > { %v1397_v6 = vmul.f32 %v10210_v20, %v1381_v10  ;;  %v1382_v11 = vmax.f32 %v1341_v12, 0.0 }
 0x379   : > { %v1395_v21 = vmul.f32 %v10210_v20, %v1379_v19  ;;  %v1380_v23 = vmax.f32 %v1333_v2, 0.0 }
 0x37a   : > { %v1413_v25 = vadd.f32 %v10214_v26, %v1397_v6  ;;  %v1398_v3 = vmul.f32 %v10210_v20, %v1382_v11 }
 0x37b   : > { %v1411_v16 = vadd.f32 %v10214_v26, %v1395_v21  ;;  %v1396_v22 = vmul.f32 %v10210_v20, %v1380_v23 }
 0x37c   : > { %v10314_v17 = vadd.f32 %v10214_v26, %v1398_v3  ;;  %v1453_v4 = vmul.f32 %v10219_v28, %v1413_v25  ;;  %v1493_v37 = vmul.f32 %v10260_v46, %v1413_v25  ;;  %v10328_v40 = vmul.f32 %v10223_v29, %v1413_v25 }
 0x37d   : > { %v1412_v32 = vadd.f32 %v10214_v26, %v1396_v22  ;;  %v1451_v35 = vmul.f32 %v10219_v28, %v1411_v16  ;;  %v1491_v36 = vmul.f32 %v10260_v46, %v1411_v16  ;;  %v1431_v38 = vmul.f32 %v10223_v29, %v1411_v16 }
 0x37e   : > { %v1471_v39 = vmul.f32 %v10225_v30, %v1411_v16  ;;  %v10332_v41 = vmul.f32 %v10223_v29, %v10314_v17  ;;  %v10341_v0 = vmul.f32 %v10225_v30, %v1413_v25  ;;  %v10345_v10 = vmul.f32 %v10225_v30, %v10314_v17 }
 0x37f   : > { %v1578_v34 = vpack.c.bf16 %v1451_v35, %v1450_v24  ;;  %v1593_v44 = vpack.c.bf16 %v1491_v36, %v1490_v27  ;;  %v1452_v45 = vmul.f32 %v10219_v28, %v1412_v32  ;;  %v1492_v52 = vmul.f32 %v10260_v46, %v1412_v32 }
 0x380   : > { %v1432_v53 = vmul.f32 %v10223_v29, %v1412_v32  ;;  %v1472_v60 = vmul.f32 %v10225_v30, %v1412_v32  ;;  %v1572_v63 = vpack.c.bf16 %v10332_v41, %v10328_v40  ;;  %v10348_v19 = vmul.f32 %v10231_v33, %v1411_v16 }
 0x381   : > { %7767 = vmatprep.subr.bf16.mxu1 %v1578_v34  ;;  %7811 = vmatprep.subr.bf16.mxu0 %v1593_v44  ;;  %v1579_v8 = vpack.c.bf16 %v1453_v4, %v1452_v45  ;;  %v1594_v9 = vpack.c.bf16 %v1493_v37, %v1492_v52  ;;  %v1587_v6 = vpack.c.bf16 %v10345_v10, %v10341_v0 }
 0x382   : > { %7768 = vmatpush3.bf16.msra.mxu1 %v1570_v49  ;;  %7812 = vmatpush3.bf16.msra.mxu0 %v1585_v50  ;;  %v1571_v12 = vpack.c.bf16 %v1432_v53, %v1431_v38  ;;  %v1586_v15 = vpack.c.bf16 %v1472_v60, %v1471_v39  ;;  %v10353_v11 = vmul.f32 %v10231_v33, %v1412_v32 }
 0x383   : > { %v8158_v2 = vpop.f32.mrb[24].mxu1  ;;  %7769 = vmatprep.subr.bf16.mxu1 %v1579_v8  ;;  %7813 = vmatprep.subr.bf16.mxu0 %v1594_v9  ;;  %v10356_v21 = vmul.f32 %v10231_v33, %v1413_v25  ;;  %v10361_v23 = vmul.f32 %v10231_v33, %v10314_v17  ;;  %v10364_v3 = vmul.f32 %v10272_v51, %v1411_v16 }
 0x384   : > { %v1354_v49 = vadd.f32 %v8158_v2, %v10207_v14  ;;  %v1345_v50 = vpop.f32.mrb[25].mxu1  ;;  %v10367_v22 = vmul.f32 %v10272_v51, %v1412_v32  ;;  %v10373_v35 = vmul.f32 %v10272_v51, %v1413_v25  ;;  %v10389_v8 = vmul.f32 %v10219_v28, %v10228_v31 }
 0x385   : > { %v1346_v24 = vadd.f32 %v1345_v50, %v10207_v14  ;;  %v8159_v27 = vpop.f32.mrb[26].mxu1 }
 0x386   : > { %v1385_v36 = vmax.f32 %v1354_v49, 0.0  ;;  %v1357_v37 = vadd.f32 %v8159_v27, %v10207_v14  ;;  %v1348_v38 = vpop.f32.mrb[27].mxu1  ;;  %7770 = vmatpush3.bf16.msra.mxu1 %v1571_v12  ;;  %7814 = vmatpush3.bf16.msra.mxu0 %v1586_v15  ;;  %v1454_v12 = vmul.f32 %v10219_v28, %v10314_v17  ;;  %v10397_v15 = vmul.f32 %v10260_v46, %v10228_v31 }
 0x387   : > { %v1383_v39 = vmax.f32 %v1346_v24, 0.0  ;;  %v1349_v34 = vadd.f32 %v1348_v38, %v10207_v14  ;;  %v1494_v49 = vmul.f32 %v10260_v46, %v10314_v17  ;;  %v10407_v24 = vmul.f32 %v10272_v51, %v10314_v17 }
 0x388   : > { %v1401_v25 = vmul.f32 %v10210_v20, %v1385_v36  ;;  %v1386_v45 = vmax.f32 %v1357_v37, 0.0 }
 0x389   : > { %v1399_v52 = vmul.f32 %v10210_v20, %v1383_v39  ;;  %v1384_v53 = vmax.f32 %v1349_v34, 0.0 }
 0x38a   : > { %v1417_v60 = vadd.f32 %v10214_v26, %v1401_v25  ;;  %v1402_v0 = vmul.f32 %v10210_v20, %v1386_v45 }
 0x38b   : > { %v1415_v9 = vadd.f32 %v10214_v26, %v1399_v52  ;;  %v1400_v10 = vmul.f32 %v10210_v20, %v1384_v53 }
 0x38c   : > { %v10400_v2 = vadd.f32 %v10214_v26, %v1402_v0  ;;  %v1457_v50 = vmul.f32 %v10219_v28, %v1417_v60  ;;  %v1497_v38 = vmul.f32 %v10260_v46, %v1417_v60  ;;  %v10416_v25 = vmul.f32 %v10223_v29, %v1417_v60 }
 0x38d   : > { %v1416_v27 = vadd.f32 %v10214_v26, %v1400_v10  ;;  %v1455_v36 = vmul.f32 %v10219_v28, %v1415_v9  ;;  %v1495_v37 = vmul.f32 %v10260_v46, %v1415_v9  ;;  %v1435_v39 = vmul.f32 %v10223_v29, %v1415_v9 }
 0x38e   : > { %v1475_v34 = vmul.f32 %v10225_v30, %v1415_v9  ;;  %v10420_v45 = vmul.f32 %v10223_v29, %v10400_v2  ;;  %v10429_v5 = vmul.f32 %v10225_v30, %v1417_v60  ;;  %v10449_v40 = vmul.f32 %v10231_v33, %v1417_v60 }
 0x38f   : > { %v1580_v17 = vpack.c.bf16 %v1455_v36, %v1454_v12  ;;  %v1595_v52 = vpack.c.bf16 %v1495_v37, %v1494_v49  ;;  %v1456_v53 = vmul.f32 %v10219_v28, %v1416_v27  ;;  %v1496_v0 = vmul.f32 %v10260_v46, %v1416_v27 }
 0x390   : > { %v1436_v10 = vmul.f32 %v10223_v29, %v1416_v27  ;;  %v1476_v44 = vmul.f32 %v10225_v30, %v1416_v27  ;;  %v1574_v32 = vpack.c.bf16 %v10420_v45, %v10416_v25  ;;  %v10433_v49 = vmul.f32 %v10225_v30, %v10400_v2  ;;  %v8546_v25 = vld [vmem:[#allocation5] ss:$24 sps:$4 sm:$0xff]  }
 0x391   : > { %v8162_v16 = vpop.f32.mrb[28].mxu1  ;;  %7771 = vmatprep.subr.bf16.mxu1 %v1580_v17  ;;  %7815 = vmatprep.subr.bf16.mxu0 %v1595_v52  ;;  %v1581_v4 = vpack.c.bf16 %v1457_v50, %v1456_v53  ;;  %v1596_v12 = vpack.c.bf16 %v1497_v38, %v1496_v0  ;;  %v10443_v38 = vmul.f32 %v10231_v33, %v1415_v9  ;;  %v11926_v45 = vmov 0  }
 0x392   : > { %v1370_v36 = vadd.f32 %v8162_v16, %v10207_v14  ;;  %v1361_v37 = vpop.f32.mrb[29].mxu1  ;;  %7772 = vmatpush3.bf16.msra.mxu1 %v1572_v63  ;;  %7816 = vmatpush3.bf16.msra.mxu0 %v1587_v6  ;;  %v1573_v7 = vpack.c.bf16 %v1436_v10, %v1435_v39  ;;  %v1588_v13 = vpack.c.bf16 %v1476_v44, %v1475_v34 }
 0x393   : > { %v1362_v1 = vadd.f32 %v1361_v37, %v10207_v14  ;;  %v8163_v17 = vpop.f32.mrb[30].mxu1  ;;  %7773 = vmatprep.subr.bf16.mxu1 %v1581_v4  ;;  %7817 = vmatprep.subr.bf16.mxu0 %v1596_v12  ;;  %v1589_v50 = vpack.c.bf16 %v10433_v49, %v10429_v5  ;;  %v10446_v53 = vmul.f32 %v10231_v33, %v1416_v27 }
 0x394   : > { %v1389_v16 = vmax.f32 %v1370_v36, 0.0  ;;  %v1364_v52 = vpop.f32.mrb[31].mxu1  ;;  %v10453_v41 = vmul.f32 %v10231_v33, %v10400_v2  ;;  %v10457_v5 = vmul.f32 %v10272_v51, %v1415_v9  ;;  %v10460_v4 = vmul.f32 %v10272_v51, %v1416_v27 }
 0x395   : > { %v1387_v63 = vmax.f32 %v1362_v1, 0.0  ;;  %v1365_v6 = vadd.f32 %v1364_v52, %v10207_v14  ;;  %v10471_v9 = vmul.f32 %v10272_v51, %v1417_v60  ;;  %v10480_v10 = vmul.f32 %v10272_v51, %v10228_v31 }
 0x396   : > { %v1405_v44 = vmul.f32 %v10210_v20, %v1389_v16  ;;  %7774 = vmatpush3.bf16.msra.mxu1 %v1573_v7  ;;  %7818 = vmatpush3.bf16.msra.mxu0 %v1588_v13  ;;  %v1458_v13 = vmul.f32 %v10219_v28, %v10400_v2  ;;  %v1498_v7 = vmul.f32 %v10260_v46, %v10400_v2 }
 0x397   : > { %v1403_v1 = vmul.f32 %v10210_v20, %v1387_v63  ;;  %v1388_v0 = vmax.f32 %v1365_v6, 0.0  ;;  %v10488_v36 = vmul.f32 %v10272_v51, %v10400_v2 }
 0x398   : > { %v1421_v27 = vadd.f32 %v10214_v26, %v1405_v44 }
 0x399   : > { %v1419_v12 = vadd.f32 %v10214_v26, %v1403_v1  ;;  %v1404_v49 = vmul.f32 %v10210_v20, %v1388_v0 }
 0x39a   : > { %v1461_v37 = vmul.f32 %v10219_v28, %v1421_v27  ;;  %v1501_v17 = vmul.f32 %v10260_v46, %v1421_v27  ;;  %v1441_v16 = vmul.f32 %v10223_v29, %v1421_v27  ;;  %v1481_v31 = vmul.f32 %v10225_v30, %v1421_v27 }
 0x39b   : > { %v1420_v52 = vadd.f32 %v10214_v26, %v1404_v49  ;;  %v1459_v63 = vmul.f32 %v10219_v28, %v1419_v12  ;;  %v1499_v20 = vmul.f32 %v10260_v46, %v1419_v12  ;;  %v1439_v6 = vmul.f32 %v10223_v29, %v1419_v12 }
 0x39c   : > { %v1479_v44 = vmul.f32 %v10225_v30, %v1419_v12  ;;  %v1576_v2 = vpack.c.bf16 %v10389_v8, %v1441_v16  ;;  %v1591_v1 = vpack.c.bf16 %v10397_v15, %v1481_v31  ;;  %v10502_v0 = vmul.f32 %v10231_v33, %v1419_v12  ;;  %v8576_v31 = vld [vmem:[#allocation5 + $0x14] ss:$24 sps:$4 sm:$0xff]  }
 0x39d   : > { %v1582_v60 = vpack.c.bf16 %v1459_v63, %v1458_v13  ;;  %v1597_v14 = vpack.c.bf16 %v1499_v20, %v1498_v7  ;;  %v1460_v34 = vmul.f32 %v10219_v28, %v1420_v52  ;;  %v1500_v26 = vmul.f32 %v10260_v46, %v1420_v52  ;;  %v8563_v7 = vld [vmem:[#allocation5 + $0x68] ss:$24 sps:$4 sm:$0xff]  }
 0x39e   : > { %v1440_v49 = vmul.f32 %v10223_v29, %v1420_v52  ;;  %v1480_v39 = vmul.f32 %v10225_v30, %v1420_v52  ;;  %v1520_v55 = vmul.f32 %v10231_v33, %v1420_v52  ;;  %v10510_v54 = vmul.f32 %v10231_v33, %v1421_v27 }
 0x39f   : > { %7775 = vmatprep.subr.bf16.mxu1 %v1582_v60  ;;  %7819 = vmatprep.subr.bf16.mxu0 %v1597_v14  ;;  %v1583_v8 = vpack.c.bf16 %v1461_v37, %v1460_v34  ;;  %v1598_v15 = vpack.c.bf16 %v1501_v17, %v1500_v26  ;;  %v10513_v13 = vmul.f32 %v10272_v51, %v1419_v12 }
 0x3a0   : > { %7776 = vmatpush3.bf16.msra.mxu1 %v1574_v32  ;;  %7820 = vmatpush3.bf16.msra.mxu0 %v1589_v50  ;;  %v1575_v28 = vpack.c.bf16 %v1440_v49, %v1439_v6  ;;  %v1590_v29 = vpack.c.bf16 %v1480_v39, %v1479_v44  ;;  %v1605_v30 = vpack.c.bf16 %v1520_v55, %v10502_v0  ;;  %v8552_v50 = vld [vmem:[#allocation5 + $0x34] ss:$24 sps:$4 sm:$0xff]   ;;  %v8549_v39 = vld [vmem:[#allocation5 + $0x8] ss:$24 sps:$4 sm:$0xff]   ;;  %v8589_v44 = vld [vmem:[#allocation16 + $0x20] ss:$8 sps:$4 sm:$0xff]  }
 0x3a1   : > { %7777 = vmatprep.subr.bf16.mxu1 %v1583_v8  ;;  %7821 = vmatprep.subr.bf16.mxu0 %v1598_v15  ;;  %v1606_v33 = vpack.c.bf16 %v10480_v10, %v10510_v54  ;;  %v1612_v46 = vpack.c.bf16 %v10513_v13, %v10488_v36  ;;  %v10524_v34 = vmul.f32 %v10272_v51, %v1420_v52  ;;  %v8568_v10 = vld [vmem:[#allocation5 + $0x90] ss:$24 sps:$4 sm:$0xff]   ;;  %v8585_v36 = vld [vmem:[#allocation5 + $0xa0] ss:$24 sps:$4 sm:$0xff]   ;;  %v8588_v6 = vld [vmem:[#allocation16 + $0x10] ss:$8 sps:$4 sm:$0xff]  }
 0x3a2   : > { %v10527_v14 = vmul.f32 %v10272_v51, %v1421_v27  ;;  %v11923_v55 = vpack.c.bf16 %v10263_v47, %v10252_v42  ;;  %v11924_v54 = vpack.c.bf16 %v10266_v48, %v10256_v43  ;;  %v11925_v51 = vpack.c.bf16 %v10282_v57, %v10279_v56  ;;  %v8554_v47 = vld [vmem:[#allocation5 + $0x3c] ss:$24 sps:$4 sm:$0xff]   ;;  %v10548_v48 = vld [vmem:[#allocation2] sm:$0xff]  ;;  %v8562_v27 = vld [vmem:[#allocation5 + $0x60] ss:$24 sps:$4 sm:$0xff]  }
 0x3a3   : > { %v11927_v42 = vpack.c.bf16 %v10288_v59, %v10285_v58  ;;  %v11928_v43 = vpack.c.bf16 %v10353_v11, %v10348_v19  ;;  %v8556_v56 = vld [vmem:[#allocation5 + $0x30] ss:$24 sps:$4 sm:$0xff]   ;;  %v11929_v57 = vpack.c.bf16 %v10361_v23, %v10356_v21  ;;  %v8558_v58 = vld [vmem:[#allocation5 + $0x64] ss:$24 sps:$4 sm:$0xff]   ;;  %v11930_v19 = vpack.c.bf16 %v10446_v53, %v10443_v38  ;;  %v8564_v23 = vld [vmem:[#allocation5 + $0x94] ss:$24 sps:$4 sm:$0xff]  }
 0x3a4   : > { %7778 = vmatpush3.bf16.msra.mxu1 %v1575_v28  ;;  %7822 = vmatpush3.bf16.msra.mxu0 %v1590_v29  ;;  %v1613_v32 = vpack.c.bf16 %v10527_v14, %v10524_v34  ;;  %v8557_v59 = vld [vmem:[#allocation5 + $0x38] ss:$24 sps:$4 sm:$0xff]   ;;  %v8560_v11 = vld [vmem:[#allocation5 + $0x6c] ss:$24 sps:$4 sm:$0xff]   ;;  %v11931_v21 = vpack.c.bf16 %v10453_v41, %v10449_v40  ;;  %v8566_v38 = vld [vmem:[#allocation5 + $0x9c] ss:$24 sps:$4 sm:$0xff]   ;;  %v11932_v60 = vpack.c.bf16 %v10294_v62, %v10291_v61 }
 0x3a5   : > { %7779 = vmatprep.subr.bf16.mxu1 %v11923_v55  ;;  %7823 = vmatprep.subr.bf16.mxu0 %v11924_v54  ;;  %v1566_v53 = vld [vmem:[#allocation5 + $0xc0] sm:$0xff]  ;;  %v1567_v40 = vld [vmem:[#allocation5 + $0xc8] sm:$0xff]  ;;  %v8569_v41 = vld [vmem:[#allocation5 + $0x98] ss:$24 sps:$4 sm:$0xff]   ;;  %v11933_v16 = vpack.c.bf16 %v10364_v3, %v10319_v18  ;;  %v11934_v61 = vpack.c.bf16 %v10373_v35, %v10367_v22  ;;  %v11935_v62 = vpack.c.bf16 %v10457_v5, %v10407_v24 }
 0x3a6   : > { %v7183_v12 = vcombine.high %v1566_v53, %v1566_v53  ;;  %v7185_v37 = vcombine.high %v1567_v40, %v1567_v40  ;;  %v7182_v17 = vcombine.low %v1566_v53, %v1566_v53  ;;  %v7184_v52 = vcombine.low %v1567_v40, %v1567_v40  ;;  %v8574_v3 = vld [vmem:[#allocation5 + $0x10] ss:$24 sps:$4 sm:$0xff]   ;;  %v8577_v22 = vld [vmem:[#allocation5 + $0x44] ss:$24 sps:$4 sm:$0xff]   ;;  %v8579_v35 = vld [vmem:[#allocation5 + $0x40] ss:$24 sps:$4 sm:$0xff]  }
 0x3a7   : > { %v11936_v18 = vpack.c.bf16 %v10471_v9, %v10460_v4  ;;  %v8580_v24 = vld [vmem:[#allocation5 + $0x74] ss:$24 sps:$4 sm:$0xff]   ;;  %v8582_v5 = vld [vmem:[#allocation5 + $0x70] ss:$24 sps:$4 sm:$0xff]   ;;  %v8583_v4 = vld [vmem:[#allocation5 + $0xa4] ss:$24 sps:$4 sm:$0xff]  }
 0x3a8   : > { %7780 = vmatpush3.bf16.msra.mxu1 %v1576_v2  ;;  %7824 = vmatpush3.bf16.msra.mxu0 %v1591_v1  ;;  %v1568_v9 = vld [vmem:[#allocation5 + $0xd0] sm:$0xff] }
 0x3a9   : > { %7825 = vmatprep.subr.bf16.mxu0 %v11925_v51  ;;  %1910 = vmatprep.subr.bf16.mxu1 %v11926_v45  ;;  %v7187_v63 = vcombine.high %v1568_v9, %v1568_v9  ;;  %v7186_v20 = vcombine.low %v1568_v9, %v1568_v9 }
 0x3ab   : > { %1799 = vmatmul.mubr.bf16.vlgmr.msra.gmra.mrb[32].mxu1 %v8546_v25 }
 0x3ac   : > { %7826 = vmatpush3.bf16.msra.mxu0 %v11927_v42  ;;  %1911 = vmatpush1.bf16.msra.mxu1 %v11928_v43 }
 0x3ad   : > { %1912 = vmatprep.subr.bf16.mxu1 %v11926_v45  ;;  %1806 = vmatprep.mubr.bf16.mxu1 %v8552_v50 }
 0x3ae   : > { %8164 = vmatprep.subr.bf16.mxu0 %v10548_v48 }
 0x3af   : > { %1871 = vmatmul.mubr.bf16.vlgmr.msra.gmra.mrb[32].mxu0 %v8549_v39 }
 0x3b0   : > { %1913 = vmatpush1.bf16.msra.mxu1 %v11929_v57  ;;  %1878 = vmatprep.mubr.bf16.mxu0 %v8554_v47 }
 0x3b1   : > { %1914 = vmatprep.subr.bf16.mxu1 %v11926_v45  ;;  %8165 = vmatpush3.bf16.msra.mxu0 %v8588_v6 }
 0x3b2   : > { %8166 = vmatprep.subr.bf16.mxu0 %v10548_v48 }
 0x3b3   : > { %1807 = vmatmul.mubr.bf16.gmra.mrb[36].mxu1 %v8556_v56 }
 0x3b4   : > { %1915 = vmatpush1.bf16.msra.mxu1 %v11930_v19  ;;  %1814 = vmatprep.mubr.bf16.mxu1 %v8558_v58 }
 0x3b5   : > { %1916 = vmatprep.subr.bf16.mxu1 %v11926_v45  ;;  %8167 = vmatpush3.bf16.msra.mxu0 %v8589_v44 }
 0x3b7   : > { %1879 = vmatmul.mubr.bf16.gmra.mrb[36].mxu0 %v8557_v59 }
 0x3b8   : > { %1917 = vmatpush1.bf16.msra.mxu1 %v11931_v21  ;;  %1886 = vmatprep.mubr.bf16.mxu0 %v8560_v11 }
 0x3b9   : > { %1918 = vmatprep.subr.bf16.mxu1 %v11926_v45 }
 0x3bb   : > { %1815 = vmatmul.mubr.bf16.gmra.mrb[40].mxu1 %v8562_v27 }
 0x3bc   : > { %1919 = vmatpush1.bf16.msra.mxu1 %v1605_v30  ;;  %1822 = vmatprep.mubr.bf16.mxu1 %v8564_v23 }
 0x3bd   : > { %1920 = vmatprep.subr.bf16.mxu1 %v11926_v45 }
 0x3bf   : > { %1887 = vmatmul.mubr.bf16.gmra.mrb[40].mxu0 %v8563_v7 }
 0x3c0   : > { %1921 = vmatpush1.bf16.msra.mxu1 %v1606_v33  ;;  %1894 = vmatprep.mubr.bf16.mxu0 %v8566_v38 }
 0x3c1   : > { %1922 = vmatprep.subr.bf16.mxu1 %v11926_v45 }
 0x3c3   : > { %1823 = vmatmul.mubr.bf16.gmra.mrb[44].mxu1 %v8568_v10 }
 0x3c4   : > { %1923 = vmatpush1.bf16.msra.mxu1 %v11932_v60  ;;  %1830 = vmatprep.mubr.bf16.mxu1 %v7183_v12 }
 0x3c5   : > { %1924 = vmatprep.subr.bf16.mxu1 %v11926_v45 }
 0x3c7   : > { %1895 = vmatmul.mubr.bf16.gmra.mrb[44].mxu0 %v8569_v41 }
 0x3c8   : > { %1925 = vmatpush1.bf16.msra.mxu1 %v11933_v16  ;;  %1902 = vmatprep.mubr.bf16.mxu0 %v7185_v37 }
 0x3c9   : > { %1926 = vmatprep.subr.bf16.mxu1 %v11926_v45 }
 0x3cb   : > { %1831 = vmatmul.mubr.bf16.gmra.mrb[48].mxu1 %v7182_v17 }
 0x3cc   : > { %1927 = vmatpush1.bf16.msra.mxu1 %v11934_v61  ;;  %7188 = vmatprep.mubr.msk.bf16.mxu1 %vm1750_vm4, %v8576_v31 }
 0x3cd   : > { %1928 = vmatprep.subr.bf16.mxu1 %v11926_v45 }
 0x3cf   : > { %1903 = vmatmul.mubr.bf16.gmra.mrb[48].mxu0 %v7184_v52 }
 0x3d0   : > { %1929 = vmatpush1.bf16.msra.mxu1 %v11935_v62  ;;  %8168 = vmatprep.mubr.msk.bf16.mxu0 %vm9617_vm5, %v10548_v48 }
 0x3d1   : > { %1930 = vmatprep.subr.bf16.mxu1 %v11926_v45 }
 0x3d4   : > { %1931 = vmatpush1.bf16.msra.mxu1 %v11936_v18 }
 0x3d5   : > { %1932 = vmatprep.subr.bf16.mxu1 %v11926_v45 }
 0x3d8   : > { %1933 = vmatpush1.bf16.msra.mxu1 %v1612_v46 }
 0x3d9   : > { %1934 = vmatprep.subr.bf16.mxu1 %v11926_v45 }
 0x3dc   : > { %1935 = vmatpush1.bf16.msra.mxu1 %v1613_v32 }
 0x3df   : > { %1943 = vmatmul.mubr.bf16.vlgmr.msra.gmra.mrb[52].mxu1 %v8574_v3 }
 0x3e0   : > { %7189 = vmatprep.mubr.msk.bf16.mxu1 %vm1750_vm4, %v8577_v22 }
 0x3e7   : > { %1951 = vmatmul.mubr.bf16.gmra.mrb[56].mxu1 %v8579_v35 }
 0x3e8   : > { %7190 = vmatprep.mubr.msk.bf16.mxu1 %vm1750_vm4, %v8580_v24 }
 0x3ef   : > { %1959 = vmatmul.mubr.bf16.gmra.mrb[60].mxu1 %v8582_v5 }
 0x3f0   : > { %7191 = vmatprep.mubr.msk.bf16.mxu1 %vm1750_vm4, %v8583_v4 }
 0x3f7   : > { %1967 = vmatmul.mubr.bf16.gmra.mrb[64].mxu1 %v8585_v36 }
 0x3f8   : > { %7192 = vmatprep.mubr.msk.bf16.mxu1 %vm1750_vm4, %v7187_v63 }
 0x3ff   : > { %1975 = vmatmul.mubr.bf16.gmra.mrb[68].mxu1 %v7186_v20 }
 0x47e   : > { %v7781_v2 = vpop.f32.mrb[32].mxu1 }
 0x47f   : > { %v7782_v1 = vpop.f32.mrb[33].mxu1 }
 0x480   : > { %v7783_v0 = vadd.f32 %v7782_v1, %v7781_v2  ;;  %v7784_v26 = vpop.f32.mrb[34].mxu1 }
 0x481   : > { %v7785_v49 = vpop.f32.mrb[35].mxu1 }
 0x482   : > { %v7786_v8 = vadd.f32 %v7785_v49, %v7784_v26  ;;  %v7827_v15 = vpop.f32.mrb[32].mxu0 }
 0x483   : > { %v7828_v13 = vpop.f32.mrb[33].mxu0 }
 0x484   : > { %v7829_v28 = vadd.f32 %v7828_v13, %v7827_v15  ;;  %v7830_v29 = vpop.f32.mrb[34].mxu0 }
 0x485   : > { %v7831_v30 = vpop.f32.mrb[35].mxu0 }
 0x486   : > { %v7832_v33 = vadd.f32 %v7831_v30, %v7830_v29  ;;  %v7787_v46 = vpop.f32.mrb[36].mxu1  ;;  %v1873_v34 = vadd.f32 %v7829_v28, %v7783_v0 }
 0x487   : > { %v7788_v14 = vpop.f32.mrb[37].mxu1 }
 0x488   : > { %v7789_v32 = vadd.f32 %v7788_v14, %v7787_v46  ;;  %v7790_v55 = vpop.f32.mrb[38].mxu1  ;;  %v1876_v54 = vadd.f32 %v7832_v33, %v7786_v8 }
 0x489   : > { %v7791_v25 = vpop.f32.mrb[39].mxu1 }
 0x48a   : > { %v7833_v51 = vpop.f32.mrb[36].mxu0  ;;  %v7792_v50 = vadd.f32 %v7791_v25, %v7790_v55 }
 0x48b   : > { %v7834_v39 = vpop.f32.mrb[37].mxu0 }
 0x48c   : > { %v7835_v42 = vadd.f32 %v7834_v39, %v7833_v51  ;;  %v7836_v43 = vpop.f32.mrb[38].mxu0 }
 0x48d   : > { %v7837_v47 = vpop.f32.mrb[39].mxu0 }
 0x48e   : > { %v7838_v56 = vadd.f32 %v7837_v47, %v7836_v43  ;;  %v7793_v57 = vpop.f32.mrb[40].mxu1  ;;  %v1881_v58 = vadd.f32 %v7835_v42, %v7789_v32 }
 0x48f   : > { %v7794_v59 = vpop.f32.mrb[41].mxu1 }
 0x490   : > { %v7795_v19 = vadd.f32 %v7794_v59, %v7793_v57  ;;  %v7796_v11 = vpop.f32.mrb[42].mxu1  ;;  %v1884_v27 = vadd.f32 %v7838_v56, %v7792_v50 }
 0x491   : > { %v7797_v21 = vpop.f32.mrb[43].mxu1 }
 0x492   : > { %v7839_v23 = vpop.f32.mrb[40].mxu0  ;;  %v7798_v7 = vadd.f32 %v7797_v21, %v7796_v11 }
 0x493   : > { %v7840_v38 = vpop.f32.mrb[41].mxu0 }
 0x494   : > { %v7841_v53 = vadd.f32 %v7840_v38, %v7839_v23  ;;  %v7842_v10 = vpop.f32.mrb[42].mxu0 }
 0x495   : > { %v7843_v12 = vpop.f32.mrb[43].mxu0 }
 0x496   : > { %v7844_v40 = vadd.f32 %v7843_v12, %v7842_v10  ;;  %v7799_v41 = vpop.f32.mrb[44].mxu1  ;;  %v1889_v60 = vadd.f32 %v7841_v53, %v7795_v19 }
 0x497   : > { %v7800_v37 = vpop.f32.mrb[45].mxu1 }
 0x498   : > { %v7801_v17 = vadd.f32 %v7800_v37, %v7799_v41  ;;  %v7802_v16 = vpop.f32.mrb[46].mxu1  ;;  %v1892_v31 = vadd.f32 %v7844_v40, %v7798_v7  ;;  %v8592_v40 = vld [vmem:[#allocation7 + $0xc] ss:$36 sps:$4 sm:$0xff]   ;;  %v8595_v41 = vld [vmem:[#allocation7 + $0x4] ss:$36 sps:$4 sm:$0xff]  }
 0x499   : > { %v7803_v52 = vpop.f32.mrb[47].mxu1  ;;  %2580 = vmatprep.mubr.bf16.mxu1 %v8592_v40 }
 0x49a   : > { %v7845_v61 = vpop.f32.mrb[44].mxu0  ;;  %v7804_v62 = vadd.f32 %v7803_v52, %v7802_v16 }
 0x49b   : > { %v7846_v18 = vpop.f32.mrb[45].mxu0 }
 0x49c   : > { %v7847_v3 = vadd.f32 %v7846_v18, %v7845_v61  ;;  %v7848_v22 = vpop.f32.mrb[46].mxu0  ;;  %v10619_v18 = vld [vmem:[#allocation17 + $0x5] ss:$0 sm:$0xff] }
 0x49d   : > { %v7849_v35 = vpop.f32.mrb[47].mxu0 }
 0x49e   : > { %v7850_v24 = vadd.f32 %v7849_v35, %v7848_v22  ;;  %v7805_v5 = vpop.f32.mrb[48].mxu1  ;;  %v1897_v4 = vadd.f32 %v7847_v3, %v7801_v17  ;;  %v10622_v35 = vld [vmem:[#allocation14 + $0xe] ss:$0 sm:$0xff] }
 0x49f   : > { %v7806_v9 = vpop.f32.mrb[49].mxu1 }
 0x4a0   : > { %v7807_v36 = vadd.f32 %v7806_v9, %v7805_v5  ;;  %v7808_v63 = vpop.f32.mrb[50].mxu1  ;;  %v1900_v20 = vadd.f32 %v7850_v24, %v7804_v62  ;;  %v10624_v24 = vld [vmem:[#allocation14 + $0xb] ss:$0 sm:$0xff]  ;;  %v10626_v5 = vld [vmem:[#allocation14 + $0xd] ss:$0 sm:$0xff] }
 0x4a1   : > { %v7809_v6 = vpop.f32.mrb[51].mxu1  ;;  %v10634_v63 = vld [vmem:[#allocation14 + $0xf] ss:$0 sm:$0xff] }
 0x4a2   : > { %v7851_v44 = vpop.f32.mrb[48].mxu0 }
 0x4a3   : > { %v7852_v2 = vpop.f32.mrb[49].mxu0 }
 0x4a4   : > { %v7853_v1 = vadd.f32 %v7852_v2, %v7851_v44  ;;  %v7854_v0 = vpop.f32.mrb[50].mxu0 }
 0x4a5   : > { %v7855_v26 = vpop.f32.mrb[51].mxu0  ;;  %v10642_v0 = vld [vmem:[#allocation14 + $0x10] ss:$0 sm:$0xff] }
 0x4a6   : > { %v1905_v49 = vadd.f32 %v7853_v1, %v7807_v36  ;;  %v10632_v36 = vld [vmem:[#allocation14 + $0xc] ss:$0 sm:$0xff] }
 0x4b2   : > { %v1944_v8 = vpop.f32.mrb[52].mxu1 }
 0x4b3   : > { %v1945_v15 = vadd.f32 %v1944_v8, %v1873_v34  ;;  %v1946_v13 = vpop.f32.mrb[53].mxu1 }
 0x4b4   : > { %v1947_v28 = vpop.f32.mrb[54].mxu1 }
 0x4b5   : > { %v1948_v29 = vadd.f32 %v1947_v28, %v1876_v54  ;;  %v1949_v30 = vpop.f32.mrb[55].mxu1 }
 0x4b7   : > { %v1982_v33 = vpack.c.bf16 %v1948_v29, %v1945_v15 }
 0x4b9   : > { %8169 = vmatmul.mubr.msk.bf16.vlgmr.msra.gmra.mrb[52].mxu0 %vm2004_vm6, %v1982_v33 }
 0x4ba   : > { %v1952_v46 = vpop.f32.mrb[56].mxu1  ;;  %8172 = vmatprep.mubr.msk.bf16.mxu0 %vm9617_vm5, %v10548_v48 }
 0x4bb   : > { %v1953_v14 = vadd.f32 %v1952_v46, %v1881_v58  ;;  %v1954_v32 = vpop.f32.mrb[57].mxu1 }
 0x4bc   : > { %v1955_v55 = vpop.f32.mrb[58].mxu1 }
 0x4bd   : > { %v1956_v25 = vadd.f32 %v1955_v55, %v1884_v27  ;;  %v1957_v51 = vpop.f32.mrb[59].mxu1  ;;  %v10677_v55 = vld [vmem:[#allocation14 + $0x12] ss:$0 sm:$0xff] }
 0x4bf   : > { %v1983_v50 = vpack.c.bf16 %v1956_v25, %v1953_v14 }
 0x4c1   : > { %8173 = vmatmul.mubr.msk.bf16.gmra.mrb[56].mxu0 %vm2004_vm6, %v1983_v50 }
 0x4c2   : > { %v1960_v34 = vpop.f32.mrb[60].mxu1  ;;  %8176 = vmatprep.mubr.msk.bf16.mxu0 %vm9617_vm5, %v10548_v48 }
 0x4c3   : > { %v1961_v54 = vadd.f32 %v1960_v34, %v1889_v60  ;;  %v1962_v39 = vpop.f32.mrb[61].mxu1  ;;  %v10613_v60 = vld [vmem:[#allocation17 + $0x3] ss:$0 sm:$0xff] }
 0x4c4   : > { %v1963_v42 = vpop.f32.mrb[62].mxu1 }
 0x4c5   : > { %v1964_v43 = vadd.f32 %v1963_v42, %v1892_v31  ;;  %v1965_v47 = vpop.f32.mrb[63].mxu1  ;;  %v10616_v31 = vld [vmem:[#allocation17 + $0x4] ss:$0 sm:$0xff] }
 0x4c7   : > { %v1984_v56 = vpack.c.bf16 %v1964_v43, %v1961_v54  ;;  %v10695_v54 = vld [vmem:[#allocation14 + $0x14] ss:$0 sm:$0xff] }
 0x4c9   : > { %8177 = vmatmul.mubr.msk.bf16.gmra.mrb[60].mxu0 %vm2004_vm6, %v1984_v56  ;;  %v10702_v56 = vld [vmem:[#allocation14 + $0x16] ss:$0 sm:$0xff] }
 0x4ca   : > { %v1968_v57 = vpop.f32.mrb[64].mxu1  ;;  %8180 = vmatprep.mubr.msk.bf16.mxu0 %vm9617_vm5, %v10548_v48 }
 0x4cb   : > { %v1969_v58 = vadd.f32 %v1968_v57, %v1897_v4  ;;  %v1970_v59 = vpop.f32.mrb[65].mxu1  ;;  %v10704_v57 = vld [vmem:[#allocation14 + $0x18] ss:$0 sm:$0xff] }
 0x4cc   : > { %v1971_v19 = vpop.f32.mrb[66].mxu1 }
 0x4cd   : > { %v1972_v11 = vadd.f32 %v1971_v19, %v1900_v20  ;;  %v1973_v27 = vpop.f32.mrb[67].mxu1  ;;  %v10636_v20 = vld [vmem:[#allocation14 + $0x11] ss:$0 sm:$0xff] }
 0x4cf   : > { %v1985_v21 = vpack.c.bf16 %v1972_v11, %v1969_v58 }
 0x4d1   : > { %8181 = vmatmul.mubr.msk.bf16.gmra.mrb[64].mxu0 %vm2004_vm6, %v1985_v21 }
 0x4d2   : > { %v1976_v23 = vpop.f32.mrb[68].mxu1  ;;  %8184 = vmatprep.mubr.msk.bf16.mxu0 %vm9617_vm5, %v10548_v48 }
 0x4d3   : > { %v1977_v7 = vadd.f32 %v1976_v23, %v1905_v49  ;;  %v1978_v38 = vpop.f32.mrb[69].mxu1 }
 0x4d4   : > { %v1979_v53 = vpop.f32.mrb[70].mxu1 }
 0x4d5   : > { %v1980_v10 = vpop.f32.mrb[71].mxu1  ;;  %v1986_v12 = vpack.c.bf16 %v1977_v7, %v1977_v7 }
 0x4d9   : > { %8185 = vmatmul.mubr.msk.bf16.gmra.mrb[68].mxu0 %vm2004_vm6, %v1986_v12 }
 0x4da   : > { %2532 = vmatprep.mubr.bf16.mxu0 %v8595_v41 }
 0x58c   : > { %v2054_v37 = vpop.f32.mrb[52].mxu0 }
 0x58d   : > { %v2055_v17 = vadd.f32 %v2054_v37, %v10613_v60  ;;  %v8170_v16 = vpop.f32.mrb[53].mxu0 }
 0x58e   : > { %v2057_v48 = vpop.f32.mrb[54].mxu0 }
 0x58f   : > { %v2092_v52 = vmax.f32 %v2055_v17, 0.0  ;;  %v2058_v61 = vadd.f32 %v2057_v48, %v10613_v60  ;;  %v8171_v62 = vpop.f32.mrb[55].mxu0 }
 0x591   : > { %v2102_v3 = vmul.f32 %v10616_v31, %v2092_v52  ;;  %v2093_v22 = vmax.f32 %v2058_v61, 0.0 }
 0x593   : > { %v10629_v4 = vadd.f32 %v10619_v18, %v2102_v3  ;;  %v2103_v9 = vmul.f32 %v10616_v31, %v2093_v22 }
 0x594   : > { %v2062_v6 = vpop.f32.mrb[56].mxu0 }
 0x595   : > { %11937 = vst [vmem:[#allocation35_spill] sm:$0xff] %v10629_v4  ;;  %v10639_v44 = vadd.f32 %v10619_v18, %v2103_v9  ;;  %v2063_v2 = vadd.f32 %v2062_v6, %v10613_v60  ;;  %v8174_v1 = vpop.f32.mrb[57].mxu0  ;;  %v10646_v26 = vmul.f32 %v10624_v24, %v10629_v4  ;;  %v10650_v49 = vmul.f32 %v10626_v5, %v10629_v4 }
 0x596   : > { %v2065_v8 = vpop.f32.mrb[58].mxu0  ;;  %v10654_v15 = vmul.f32 %v10634_v63, %v10629_v4  ;;  %v10658_v13 = vmul.f32 %v10636_v20, %v10629_v4  ;;  %v10662_v28 = vmul.f32 %v10632_v36, %v10629_v4  ;;  %v10666_v29 = vmul.f32 %v10622_v35, %v10629_v4 }
 0x597   : > { %v2094_v30 = vmax.f32 %v2063_v2, 0.0  ;;  %v2066_v33 = vadd.f32 %v2065_v8, %v10613_v60  ;;  %v8175_v46 = vpop.f32.mrb[59].mxu0  ;;  %v10671_v14 = vmul.f32 %v10624_v24, %v10639_v44  ;;  %v10675_v32 = vmul.f32 %v10626_v5, %v10639_v44 }
 0x598   : > { %v10681_v25 = vmul.f32 %v10634_v63, %v10639_v44  ;;  %v10685_v51 = vmul.f32 %v10636_v20, %v10639_v44  ;;  %v10689_v50 = vmul.f32 %v10642_v0, %v10629_v4  ;;  %v10693_v34 = vmul.f32 %v10632_v36, %v10639_v44 }
 0x599   : > { %v2104_v39 = vmul.f32 %v10616_v31, %v2094_v30  ;;  %v2095_v42 = vmax.f32 %v2066_v33, 0.0  ;;  %v10712_v19 = vmul.f32 %v10677_v55, %v10629_v4  ;;  %v10716_v11 = vmul.f32 %v10622_v35, %v10639_v44 }
 0x59a   : > { %11938 = vst [vmem:[#allocation36_spill] sm:$0xff] %v10693_v34  ;;  %v10724_v23 = vmul.f32 %v10642_v0, %v10639_v44  ;;  %v10728_v7 = vmul.f32 %v10695_v54, %v10629_v4  ;;  %v10732_v53 = vmul.f32 %v10702_v56, %v10629_v4  ;;  %v10736_v10 = vmul.f32 %v10677_v55, %v10639_v44 }
 0x59b   : > { %11939 = vst [vmem:[#allocation37_spill] sm:$0xff] %v10716_v11  ;;  %v10719_v27 = vadd.f32 %v10619_v18, %v2104_v39  ;;  %v2105_v21 = vmul.f32 %v10616_v31, %v2095_v42  ;;  %v10740_v12 = vmul.f32 %v10704_v57, %v10629_v4  ;;  %v10744_v40 = vmul.f32 %v10695_v54, %v10639_v44 }
 0x59c   : > { %11940 = vst [vmem:[#allocation38_spill] sm:$0xff] %v10724_v23  ;;  %v2070_v38 = vpop.f32.mrb[60].mxu0  ;;  %11941 = vst [vmem:[#allocation39_spill] sm:$0xff] %v10736_v10 }
 0x59d   : > { %11942 = vst [vmem:[#allocation40_spill] sm:$0xff] %v10744_v40  ;;  %v10747_v41 = vadd.f32 %v10619_v18, %v2105_v21  ;;  %v2071_v37 = vadd.f32 %v2070_v38, %v10613_v60  ;;  %v8178_v17 = vpop.f32.mrb[61].mxu0  ;;  %v10752_v16 = vmul.f32 %v10624_v24, %v10719_v27  ;;  %v10756_v48 = vmul.f32 %v10626_v5, %v10719_v27 }
 0x59e   : > { %v2073_v52 = vpop.f32.mrb[62].mxu0  ;;  %v10760_v61 = vmul.f32 %v10634_v63, %v10719_v27  ;;  %v10764_v62 = vmul.f32 %v10636_v20, %v10719_v27  ;;  %v10768_v3 = vmul.f32 %v10632_v36, %v10719_v27  ;;  %v10772_v22 = vmul.f32 %v10622_v35, %v10719_v27 }
 0x59f   : > { %11943 = vst [vmem:[#allocation41_spill] sm:$0xff] %v10756_v48  ;;  %v2096_v9 = vmax.f32 %v2071_v37, 0.0  ;;  %v2074_v6 = vadd.f32 %v2073_v52, %v10613_v60  ;;  %v8179_v2 = vpop.f32.mrb[63].mxu0  ;;  %v2199_v1 = vmul.f32 %v10642_v0, %v10747_v41  ;;  %v10779_v8 = vmul.f32 %v10624_v24, %v10747_v41 }
 0x5a0   : > { %11944 = vst [vmem:[#allocation42_spill] sm:$0xff] %v10760_v61  ;;  %11945 = vst [vmem:[#allocation43_spill] sm:$0xff] %v10764_v62  ;;  %v10783_v30 = vmul.f32 %v10626_v5, %v10747_v41  ;;  %v10787_v33 = vmul.f32 %v10634_v63, %v10747_v41  ;;  %v10791_v46 = vmul.f32 %v10636_v20, %v10747_v41  ;;  %v10886_v61 = vld [vmem:[#allocation14 + $0x17] ss:$0 sm:$0xff] }
 0x5a1   : > { %11946 = vst [vmem:[#allocation44_spill] sm:$0xff] %v10768_v3  ;;  %11947 = vst [vmem:[#allocation45_spill] sm:$0xff] %v10772_v22  ;;  %v2106_v42 = vmul.f32 %v10616_v31, %v2096_v9  ;;  %v2097_v21 = vmax.f32 %v2074_v6, 0.0  ;;  %v10808_v39 = vmul.f32 %v10642_v0, %v10719_v27  ;;  %v10816_v37 = vmul.f32 %v10632_v36, %v10747_v41 }
 0x5a2   : > { %11948 = vst [vmem:[#allocation46_spill] sm:$0xff] %v10787_v33  ;;  %11949 = vst [vmem:[#allocation47_spill] sm:$0xff] %v10791_v46  ;;  %v10820_v17 = vmul.f32 %v10622_v35, %v10747_v41  ;;  %v10826_v59 = vmul.f32 %v10677_v55, %v10719_v27 }
 0x5a3   : > { %11950 = vst [vmem:[#allocation48_spill] sm:$0xff] %v10808_v39  ;;  %v10811_v9 = vadd.f32 %v10619_v18, %v2106_v42  ;;  %v2107_v6 = vmul.f32 %v10616_v31, %v2097_v21  ;;  %11951 = vst [vmem:[#allocation49_spill] sm:$0xff] %v10816_v37  ;;  %v10830_v42 = vmul.f32 %v10695_v54, %v10719_v27 }
 0x5a4   : > { %11952 = vst [vmem:[#allocation50_spill] sm:$0xff] %v10820_v17  ;;  %v2078_v52 = vpop.f32.mrb[64].mxu0  ;;  %11953 = vst [vmem:[#allocation51_spill] sm:$0xff] %v10826_v59  ;;  %v10834_v21 = vmul.f32 %v10702_v56, %v10639_v44 }
 0x5a5   : > { %11954 = vst [vmem:[#allocation52_spill] sm:$0xff] %v10830_v42  ;;  %v10837_v38 = vadd.f32 %v10619_v18, %v2107_v6  ;;  %v2079_v58 = vadd.f32 %v2078_v52, %v10613_v60  ;;  %v8182_v47 = vpop.f32.mrb[65].mxu0  ;;  %v2200_v2 = vmul.f32 %v10642_v0, %v10811_v9  ;;  %v10844_v43 = vmul.f32 %v10624_v24, %v10811_v9 }
 0x5a6   : > { %v2081_v45 = vpop.f32.mrb[66].mxu0  ;;  %v10848_v23 = vmul.f32 %v10626_v5, %v10811_v9  ;;  %v10852_v39 = vmul.f32 %v10634_v63, %v10811_v9  ;;  %v10856_v52 = vmul.f32 %v10636_v20, %v10811_v9  ;;  %v10860_v47 = vmul.f32 %v10632_v36, %v10811_v9 }
 0x5a7   : > { %11955 = vst [vmem:[#allocation53_spill] sm:$0xff] %v10844_v43  ;;  %v2098_v6 = vmax.f32 %v2079_v58, 0.0  ;;  %v2082_v11 = vadd.f32 %v2081_v45, %v10613_v60  ;;  %v8183_v22 = vpop.f32.mrb[67].mxu0  ;;  %v2370_v34 = vpack.c.bf16 %v2200_v2, %v2199_v1  ;;  %v2173_v3 = vmul.f32 %v10622_v35, %v10837_v38 }
 0x5a8   : > { %11956 = vst [vmem:[#allocation54_spill] sm:$0xff] %v10848_v23  ;;  %11957 = vst [vmem:[#allocation55_spill] sm:$0xff] %v10852_v39  ;;  %v2201_v4 = vmul.f32 %v10642_v0, %v10837_v38  ;;  %v10869_v62 = vmul.f32 %v10624_v24, %v10837_v38  ;;  %v10873_v46 = vmul.f32 %v10626_v5, %v10837_v38 }
 0x5a9   : > { %11958 = vst [vmem:[#allocation56_spill] sm:$0xff] %v10856_v52  ;;  %11959 = vst [vmem:[#allocation57_spill] sm:$0xff] %v10860_v47  ;;  %v10877_v58 = vmul.f32 %v10634_v63, %v10837_v38  ;;  %v2108_v45 = vmul.f32 %v10616_v31, %v2098_v6  ;;  %v2099_v22 = vmax.f32 %v2082_v11, 0.0  ;;  %7892 = vmatprep.subr.bf16.mxu1 %v2370_v34 }
 0x5aa   : > { %11960 = vst [vmem:[#allocation58_spill] sm:$0xff] %v10869_v62  ;;  %11961 = vst [vmem:[#allocation59_spill] sm:$0xff] %v10873_v46  ;;  %v10882_v1 = vmul.f32 %v10636_v20, %v10837_v38  ;;  %v10896_v34 = vmul.f32 %v10886_v61, %v10811_v9  ;;  %v10906_v33 = vmul.f32 %v10886_v61, %v10837_v38 }
 0x5ab   : > { %11962 = vst [vmem:[#allocation60_spill] sm:$0xff] %v10877_v58  ;;  %v10899_v11 = vadd.f32 %v10619_v18, %v2108_v45  ;;  %v2109_v2 = vmul.f32 %v10616_v31, %v2099_v22  ;;  %v10910_v6 = vmul.f32 %v10622_v35, %v10811_v9  ;;  %v10914_v47 = vmul.f32 %v10632_v36, %v10837_v38 }
 0x5ac   : > { %11963 = vst [vmem:[#allocation61_spill] sm:$0xff] %v10882_v1  ;;  %11964 = vst [vmem:[#allocation62_spill] sm:$0xff] %v10896_v34  ;;  %v2086_v48 = vpop.f32.mrb[68].mxu0 }
 0x5ad   : > { %11965 = vst [vmem:[#allocation63_spill] sm:$0xff] %v10906_v33  ;;  %11966 = vst [vmem:[#allocation64_spill] sm:$0xff] %v10910_v6  ;;  %v10921_v37 = vadd.f32 %v10619_v18, %v2109_v2  ;;  %v2087_v52 = vadd.f32 %v2086_v48, %v10613_v60  ;;  %v8186_v1 = vpop.f32.mrb[69].mxu0  ;;  %v2174_v39 = vmul.f32 %v10622_v35, %v10899_v11 }
 0x5ae   : > { %v2202_v58 = vmul.f32 %v10642_v0, %v10899_v11  ;;  %v2089_v23 = vpop.f32.mrb[70].mxu0  ;;  %v10930_v46 = vmul.f32 %v10624_v24, %v10899_v11  ;;  %v10934_v22 = vmul.f32 %v10626_v5, %v10899_v11  ;;  %v10938_v2 = vmul.f32 %v10634_v63, %v10899_v11 }
 0x5af   : > { %v10942_v60 = vmul.f32 %v10636_v20, %v10899_v11  ;;  %v2100_v48 = vmax.f32 %v2087_v52, 0.0  ;;  %v8187_v1 = vpop.f32.mrb[71].mxu0  ;;  %v2362_v45 = vpack.c.bf16 %v2174_v39, %v2173_v3  ;;  %v2147_v40 = vmul.f32 %v10632_v36, %v10921_v37 }
 0x5b0   : > { %11967 = vst [vmem:[#allocation65_spill] sm:$0xff] %v10938_v2  ;;  %v2371_v23 = vpack.c.bf16 %v2202_v58, %v2201_v4  ;;  %v2175_v42 = vmul.f32 %v10622_v35, %v10921_v37  ;;  %v2203_v10 = vmul.f32 %v10642_v0, %v10921_v37  ;;  %v10952_v59 = vmul.f32 %v10624_v24, %v10921_v37  ;;  %v10969_v58 = vld [vmem:[#allocation14 + $0x15] ss:$0 sm:$0xff]  ;;  %v11982_v2 = vld [vmem:[#allocation41_spill] sm:$0xff] }
 0x5b1   : > { %11968 = vst [vmem:[#allocation66_spill] sm:$0xff] %v10942_v60  ;;  %v10956_v43 = vmul.f32 %v10626_v5, %v10921_v37  ;;  %v2110_v3 = vmul.f32 %v10616_v31, %v2100_v48  ;;  %7893 = vmatpush3.bf16.msra.mxu1 %v2362_v45  ;;  %v10961_v4 = vmul.f32 %v10634_v63, %v10921_v37 }
 0x5b2   : > { %v10965_v39 = vmul.f32 %v10636_v20, %v10921_v37  ;;  %7894 = vmatprep.subr.bf16.mxu1 %v2371_v23  ;;  %v10979_v48 = vmul.f32 %v10969_v58, %v10899_v11  ;;  %v10990_v1 = vmul.f32 %v10969_v58, %v10921_v37  ;;  %v10994_v45 = vmul.f32 %v10632_v36, %v10899_v11 }
 0x5b3   : > { %11969 = vst [vmem:[#allocation67_spill] sm:$0xff] %v10961_v4  ;;  %v10982_v62 = vadd.f32 %v10619_v18, %v2110_v3  ;;  %v10998_v31 = vmul.f32 %v10886_v61, %v10899_v11  ;;  %v11002_v18 = vmul.f32 %v10886_v61, %v10921_v37  ;;  %v11006_v3 = vmul.f32 %v10702_v56, %v10719_v27  ;;  %v11042_v4 = vld [vmem:[#allocation14 + $0x13] ss:$0 sm:$0xff] }
 0x5b4   : > { %11970 = vst [vmem:[#allocation68_spill] sm:$0xff] %v10965_v39 }
 0x5b5   : > { %11971 = vst [vmem:[#allocation69_spill] sm:$0xff] %v10982_v62  ;;  %v2148_v23 = vmul.f32 %v10632_v36, %v10982_v62  ;;  %v2176_v52 = vmul.f32 %v10622_v35, %v10982_v62  ;;  %v2204_v17 = vmul.f32 %v10642_v0, %v10982_v62  ;;  %v11016_v6 = vmul.f32 %v10624_v24, %v10982_v62 }
 0x5b6   : > { %v11020_v34 = vmul.f32 %v10626_v5, %v10982_v62  ;;  %v11024_v33 = vmul.f32 %v10634_v63, %v10982_v62  ;;  %v11028_v36 = vmul.f32 %v10636_v20, %v10982_v62  ;;  %v11111_v20 = vmul.f32 %v10677_v55, %v10837_v38 }
 0x5b7   : > { %v2354_v0 = vpack.c.bf16 %v2148_v23, %v2147_v40  ;;  %v2363_v60 = vpack.c.bf16 %v2176_v52, %v2175_v42  ;;  %v2372_v39 = vpack.c.bf16 %v2204_v17, %v2203_v10  ;;  %v11048_v40 = vmul.f32 %v11042_v4, %v10982_v62 }
 0x5b8   : > { %v11052_v17 = vmul.f32 %v10969_v58, %v10982_v62  ;;  %v11972_v42 = vpack.c.bf16 %v10671_v14, %v10646_v26  ;;  %v11059_v52 = vmul.f32 %v10886_v61, %v10982_v62  ;;  %v11065_v23 = vmul.f32 %v10677_v55, %v10747_v41  ;;  %11978 = vst [vmem:[#allocation73_spill] sm:$0xff] %v11111_v20  ;;  %v11990_v20 = vld [vmem:[#allocation58_spill] sm:$0xff] }
 0x5b9   : > { %7864 = vmatprep.subr.bf16.mxu0 %v2354_v0  ;;  %7895 = vmatpush3.bf16.msra.mxu1 %v2363_v60  ;;  %v11973_v0 = vpack.c.bf16 %v10675_v32, %v10650_v49  ;;  %v11086_v49 = vmul.f32 %v10704_v57, %v10719_v27  ;;  %v11090_v32 = vmul.f32 %v10695_v54, %v10747_v41 }
 0x5ba   : > { %7865 = vmatpush3.bf16.msra.mxu0 %v11972_v42  ;;  %7896 = vmatprep.subr.bf16.mxu1 %v2372_v39  ;;  %v11076_v39 = vmul.f32 %v10677_v55, %v10811_v9  ;;  %v11080_v42 = vmul.f32 %v10704_v57, %v10639_v44  ;;  %v11975_v14 = vpack.c.bf16 %v10681_v25, %v10654_v15 }
 0x5bb   : > { %7866 = vmatprep.subr.bf16.mxu0 %v11973_v0  ;;  %11974 = vst [vmem:[#allocation70_spill] sm:$0xff] %v11090_v32  ;;  %v11094_v0 = vmul.f32 %v10695_v54, %v10811_v9  ;;  %v11103_v60 = vmul.f32 %v10702_v56, %v10747_v41  ;;  %v11107_v10 = vmul.f32 %v10702_v56, %v10811_v9 }
 0x5bc   : > { %v11979_v35 = vpack.c.bf16 %v10779_v8, %v10752_v16  ;;  %v11980_v15 = vpack.c.bf16 %v10685_v51, %v10658_v13  ;;  %v11125_v26 = vmul.f32 %v10677_v55, %v10899_v11  ;;  %v11983_v63 = vpack.c.bf16 %v10783_v30, %v11982_v2  ;;  %v11987_v16 = vld [vmem:[#allocation42_spill] sm:$0xff] }
 0x5bd   : > { %7897 = vmatpush3.bf16.msra.mxu1 %v11975_v14  ;;  %11976 = vst [vmem:[#allocation71_spill] sm:$0xff] %v11103_v60  ;;  %11977 = vst [vmem:[#allocation72_spill] sm:$0xff] %v11107_v10  ;;  %v11134_v13 = vmul.f32 %v10704_v57, %v10747_v41  ;;  %v11138_v51 = vmul.f32 %v10704_v57, %v10811_v9  ;;  %v11142_v8 = vmul.f32 %v10695_v54, %v10837_v38  ;;  %v11998_v10 = vld [vmem:[#allocation54_spill] sm:$0xff] }
 0x5be   : > { %7867 = vmatpush3.bf16.msra.mxu0 %v11979_v35  ;;  %7898 = vmatprep.subr.bf16.mxu1 %v11980_v15  ;;  %11981 = vst [vmem:[#allocation74_spill] sm:$0xff] %v11125_v26  ;;  %v11148_v30 = vmul.f32 %v10695_v54, %v10899_v11  ;;  %v11152_v2 = vmul.f32 %v10702_v56, %v10837_v38  ;;  %v11986_v15 = vld [vmem:[#allocation46_spill] sm:$0xff]  ;;  %v11991_v26 = vld [vmem:[#allocation53_spill] sm:$0xff] }
 0x5bf   : > { %7868 = vmatprep.subr.bf16.mxu0 %v11983_v63  ;;  %11984 = vst [vmem:[#allocation41_spill] sm:$0xff] %v11134_v13  ;;  %11985 = vst [vmem:[#allocation75_spill] sm:$0xff] %v11138_v51  ;;  %v11156_v63 = vmul.f32 %v10702_v56, %v10899_v11  ;;  %v11988_v14 = vpack.c.bf16 %v11986_v15, %v11987_v16  ;;  %v11165_v35 = vmul.f32 %v10677_v55, %v10921_v37  ;;  %v11994_v16 = vld [vmem:[#allocation43_spill] sm:$0xff] }
 0x5c0   : > { %v11169_v5 = vmul.f32 %v10677_v55, %v10982_v62  ;;  %v11173_v24 = vmul.f32 %v10704_v57, %v10837_v38  ;;  %v11992_v60 = vpack.c.bf16 %v11990_v20, %v11991_v26  ;;  %v11187_v55 = vmul.f32 %v10704_v57, %v10899_v11  ;;  %v11997_v51 = vld [vmem:[#allocation59_spill] sm:$0xff] }
 0x5c1   : > { %7899 = vmatpush3.bf16.msra.mxu1 %v11988_v14  ;;  %v11993_v14 = vld [vmem:[#allocation47_spill] sm:$0xff]  ;;  %v11999_v32 = vpack.c.bf16 %v11997_v51, %v11998_v10  ;;  %v11200_v26 = vmul.f32 %v10695_v54, %v10982_v62  ;;  %v11210_v10 = vmul.f32 %v10702_v56, %v10982_v62 }
 0x5c2   : > { %11989 = vst [vmem:[#allocation46_spill] sm:$0xff] %v11173_v24  ;;  %7869 = vmatpush3.bf16.msra.mxu0 %v11992_v60  ;;  %v11995_v15 = vpack.c.bf16 %v11993_v14, %v11994_v16  ;;  %11996 = vst [vmem:[#allocation42_spill] sm:$0xff] %v11187_v55  ;;  %v11196_v60 = vmul.f32 %v10695_v54, %v10921_v37  ;;  %v11204_v14 = vmul.f32 %v10702_v56, %v10921_v37  ;;  %v12003_v54 = vld [vmem:[#allocation60_spill] sm:$0xff]  ;;  %v12004_v20 = vld [vmem:[#allocation55_spill] sm:$0xff] }
 0x5c3   : > { %7870 = vmatprep.subr.bf16.mxu0 %v11999_v32  ;;  %12001 = vst [vmem:[#allocation53_spill] sm:$0xff] %v11200_v26  ;;  %v12002_v32 = vld [vmem:[#allocation35_spill] sm:$0xff]  ;;  %v12005_v13 = vpack.c.bf16 %v12003_v54, %v12004_v20  ;;  %v11227_v16 = vmul.f32 %v10704_v57, %v10921_v37  ;;  %v11231_v56 = vmul.f32 %v10704_v57, %v10982_v62  ;;  %v11237_v55 = vld [vmem:[#allocation14 + $0x19] ss:$0 sm:$0xff]  ;;  %v12010_v54 = vld [vmem:[#allocation56_spill] sm:$0xff] }
 0x5c4   : > { %7900 = vmatprep.subr.bf16.mxu1 %v11995_v15  ;;  %12000 = vst [vmem:[#allocation58_spill] sm:$0xff] %v11196_v60  ;;  %v11214_v51 = vmul.f32 %v11042_v4, %v12002_v32  ;;  %v11218_v15 = vmul.f32 %v11042_v4, %v10639_v44  ;;  %v11235_v24 = vmul.f32 %v10969_v58, %v12002_v32  ;;  %12007 = vst [vmem:[#allocation43_spill] sm:$0xff] %v11237_v55  ;;  %v12009_v20 = vld [vmem:[#allocation61_spill] sm:$0xff]  ;;  %v12028_v60 = vld [vmem:[#allocation36_spill] sm:$0xff] }
 0x5c5   : > { %7901 = vmatpush3.bf16.msra.mxu1 %v12005_v13  ;;  %v12008_v13 = vpack.c.bf16 %v10952_v59, %v10930_v46  ;;  %v12011_v25 = vpack.c.bf16 %v12009_v20, %v12010_v54  ;;  %v11251_v62 = vmul.f32 %v10969_v58, %v10639_v44  ;;  %v12013_v26 = vpack.c.bf16 %v10956_v43, %v10934_v22  ;;  %v12016_v54 = vld [vmem:[#allocation67_spill] sm:$0xff]  ;;  %v12017_v59 = vld [vmem:[#allocation65_spill] sm:$0xff] }
 0x5c6   : > { %12006 = vst [vmem:[#allocation47_spill] sm:$0xff] %v11235_v24  ;;  %v11260_v46 = vmul.f32 %v10886_v61, %v12002_v32  ;;  %v11274_v43 = vmul.f32 %v11042_v4, %v10747_v41  ;;  %v11278_v22 = vmul.f32 %v11237_v55, %v12002_v32  ;;  %v12018_v57 = vpack.c.bf16 %v12016_v54, %v12017_v59  ;;  %v12021_v59 = vld [vmem:[#allocation66_spill] sm:$0xff] }
 0x5c7   : > { %7871 = vmatpush3.bf16.msra.mxu0 %v12008_v13  ;;  %7902 = vmatprep.subr.bf16.mxu1 %v12011_v25  ;;  %12012 = vst [vmem:[#allocation59_spill] sm:$0xff] %v11251_v62  ;;  %v11264_v25 = vmul.f32 %v10886_v61, %v10639_v44  ;;  %v11268_v13 = vmul.f32 %v11042_v4, %v10719_v27 }
 0x5c8   : > { %7872 = vmatprep.subr.bf16.mxu0 %v12013_v26  ;;  %12014 = vst [vmem:[#allocation54_spill] sm:$0xff] %v11260_v46  ;;  %v11282_v26 = vmul.f32 %v11237_v55, %v10639_v44  ;;  %v11291_v20 = vmul.f32 %v10969_v58, %v10719_v27  ;;  %v11295_v24 = vmul.f32 %v10969_v58, %v10747_v41  ;;  %v12027_v46 = vld [vmem:[#allocation44_spill] sm:$0xff] }
 0x5c9   : > { %12015 = vst [vmem:[#allocation35_spill] sm:$0xff] %v11264_v25  ;;  %7903 = vmatpush3.bf16.msra.mxu1 %v12018_v57  ;;  %v11299_v32 = vmul.f32 %v10886_v61, %v10719_v27  ;;  %v12019_v44 = vpack.c.bf16 %v10662_v28, %v11016_v6  ;;  %v12020_v57 = vld [vmem:[#allocation68_spill] sm:$0xff]  ;;  %v11313_v25 = vmul.f32 %v10886_v61, %v10747_v41 }
 0x5ca   : > { %v12022_v54 = vpack.c.bf16 %v12020_v57, %v12021_v59  ;;  %v12023_v62 = vpack.c.bf16 %v10666_v29, %v11020_v34  ;;  %v11322_v6 = vmul.f32 %v11042_v4, %v10811_v9  ;;  %v11330_v57 = vmul.f32 %v10969_v58, %v10811_v9 }
 0x5cb   : > { %7873 = vmatpush3.bf16.msra.mxu0 %v12019_v44  ;;  %v11326_v44 = vmul.f32 %v11042_v4, %v10837_v38  ;;  %v11336_v29 = vmul.f32 %v10969_v58, %v10837_v38  ;;  %v11344_v34 = vmul.f32 %v11042_v4, %v10921_v37  ;;  %v12026_v59 = vpack.c.bf16 %v10689_v50, %v11024_v33  ;;  %v2342_v33 = vld [vmem:[#allocation7 + $0x50] sm:$0xff] }
 0x5cc   : > { %7904 = vmatprep.subr.bf16.mxu1 %v12022_v54  ;;  %7874 = vmatprep.subr.bf16.mxu0 %v12023_v62  ;;  %12024 = vst [vmem:[#allocation60_spill] sm:$0xff] %v11322_v6  ;;  %v11340_v62 = vmul.f32 %v11042_v4, %v10899_v11  ;;  %v2324_v61 = vmul.f32 %v11237_v55, %v10719_v27  ;;  %v12031_v54 = vld [vmem:[#allocation45_spill] sm:$0xff]  ;;  %v12036_v27 = vld [vmem:[#allocation38_spill] sm:$0xff] }
 0x5cd   : > { %7905 = vmatpush3.bf16.msra.mxu1 %v12026_v59  ;;  %v2325_v58 = vmul.f32 %v11237_v55, %v10747_v41  ;;  %v2326_v28 = vmul.f32 %v11237_v55, %v10811_v9  ;;  %v12029_v4 = vpack.c.bf16 %v12027_v46, %v12028_v60  ;;  %v12030_v50 = vpack.c.bf16 %v10712_v19, %v11028_v36  ;;  %v12032_v9 = vld [vmem:[#allocation37_spill] sm:$0xff]  ;;  %v8590_v46 = vld [vmem:[#allocation7 + $0x8] ss:$36 sps:$4 sm:$0xff]  }
 0x5ce   : > { %12025 = vst [vmem:[#allocation55_spill] sm:$0xff] %v11340_v62  ;;  %v2327_v41 = vmul.f32 %v11237_v55, %v10837_v38  ;;  %v12033_v6 = vpack.c.bf16 %v12031_v54, %v12032_v9  ;;  %v2328_v19 = vmul.f32 %v11237_v55, %v10899_v11  ;;  %v2329_v36 = vmul.f32 %v11237_v55, %v10921_v37  ;;  %v12038_v54 = vld [vmem:[#allocation57_spill] sm:$0xff]  ;;  %v12042_v9 = vld [vmem:[#allocation62_spill] sm:$0xff] }
 0x5cf   : > { %7875 = vmatpush3.bf16.msra.mxu0 %v12029_v4  ;;  %7906 = vmatprep.subr.bf16.mxu1 %v12030_v50  ;;  %v11372_v60 = vpack.c.bf16 %v2325_v58, %v2324_v61  ;;  %v12035_v50 = vld [vmem:[#allocation48_spill] sm:$0xff]  ;;  %v7227_v38 = vcombine.high %v2342_v33, %v2342_v33  ;;  %v12041_v58 = vld [vmem:[#allocation63_spill] sm:$0xff]  ;;  %v12045_v37 = vld [vmem:[#allocation50_spill] sm:$0xff] }
 0x5d0   : > { %7876 = vmatprep.subr.bf16.mxu0 %v12033_v6  ;;  %v11378_v4 = vpack.c.bf16 %v2327_v41, %v2326_v28  ;;  %v12037_v59 = vpack.c.bf16 %v12035_v50, %v12036_v27  ;;  %v11383_v62 = vpack.c.bf16 %v2329_v36, %v2328_v19  ;;  %v12039_v6 = vld [vmem:[#allocation49_spill] sm:$0xff]  ;;  %v12043_v11 = vpack.c.bf16 %v12041_v58, %v12042_v9  ;;  %v2341_v28 = vld [vmem:[#allocation7 + $0x48] sm:$0xff]  ;;  %v8593_v27 = vld [vmem:[#allocation7] ss:$36 sps:$4 sm:$0xff]  }
 0x5d1   : > { %12034 = vst [vmem:[#allocation61_spill] sm:$0xff] %v11372_v60  ;;  %v12040_v61 = vpack.c.bf16 %v12038_v54, %v12039_v6  ;;  %v12044_v60 = vld [vmem:[#allocation64_spill] sm:$0xff]  ;;  %v12048_v41 = vpack.c.bf16 %v10994_v45, %v10914_v47  ;;  %v12049_v19 = vpack.c.bf16 %v11002_v18, %v10998_v31  ;;  %v7226_v36 = vcombine.low %v2342_v33, %v2342_v33  ;;  %v12053_v50 = vld [vmem:[#allocation39_spill] sm:$0xff] }
 0x5d2   : > { %7907 = vmatpush3.bf16.msra.mxu1 %v12037_v59  ;;  %v12046_v55 = vpack.c.bf16 %v12044_v60, %v12045_v37  ;;  %v12047_v59 = vpack.c.bf16 %v10990_v1, %v10979_v48  ;;  %v12050_v60 = vpack.c.bf16 %v10728_v7, %v11048_v40  ;;  %v12051_v1 = vpack.c.bf16 %v10732_v53, %v11052_v17  ;;  %v8605_v48 = vld [vmem:[#allocation7 + $0x1c] ss:$36 sps:$4 sm:$0xff]   ;;  %v12056_v45 = vld [vmem:[#allocation52_spill] sm:$0xff]  ;;  %v12065_v6 = vld [vmem:[#allocation71_spill] sm:$0xff] }
 0x5d3   : > { %7877 = vmatpush3.bf16.msra.mxu0 %v12040_v61  ;;  %7948 = vmatprep.subr.bf16.mxu1 %v12043_v11  ;;  %v12055_v31 = vpack.c.bf16 %v10740_v12, %v11059_v52  ;;  %v12057_v18 = vld [vmem:[#allocation40_spill] sm:$0xff]  ;;  %v12059_v53 = vpack.c.bf16 %v11006_v3, %v10834_v21  ;;  %v7224_v40 = vcombine.low %v2341_v28, %v2341_v28  ;;  %v12062_v52 = vld [vmem:[#allocation70_spill] sm:$0xff]  ;;  %v12068_v3 = vld [vmem:[#allocation73_spill] sm:$0xff] }
 0x5d4   : > { %7878 = vmatprep.subr.bf16.mxu0 %v12046_v55  ;;  %v7225_v55 = vcombine.high %v2341_v28, %v2341_v28  ;;  %v12058_v7 = vpack.c.bf16 %v12056_v45, %v12057_v18  ;;  %v12060_v17 = vpack.c.bf16 %v11076_v39, %v11065_v23  ;;  %v12061_v12 = vpack.c.bf16 %v11086_v49, %v11080_v42  ;;  %v12064_v54 = vld [vmem:[#allocation72_spill] sm:$0xff]  ;;  %v12067_v21 = vld [vmem:[#allocation74_spill] sm:$0xff]  ;;  %v12070_v23 = vld [vmem:[#allocation75_spill] sm:$0xff] }
 0x5d5   : > { %2581 = vmatmul.mubr.bf16.vlgmr.msra.gmra.mrb[72].mxu1 %v8590_v46  ;;  %v12052_v46 = vld [vmem:[#allocation51_spill] sm:$0xff]  ;;  %v12063_v33 = vpack.c.bf16 %v11094_v0, %v12062_v52  ;;  %v12066_v61 = vpack.c.bf16 %v12064_v54, %v12065_v6  ;;  %v12069_v58 = vpack.c.bf16 %v12067_v21, %v12068_v3  ;;  %v12071_v39 = vld [vmem:[#allocation41_spill] sm:$0xff]  ;;  %v12073_v42 = vpack.c.bf16 %v11148_v30, %v11142_v8  ;;  %v12076_v11 = vld [vmem:[#allocation42_spill] sm:$0xff] }
 0x5d6   : > { %7949 = vmatpush3.bf16.msra.mxu1 %v12047_v59  ;;  %2588 = vmatprep.mubr.bf16.mxu1 %v7227_v38  ;;  %v12054_v47 = vpack.c.bf16 %v12052_v46, %v12053_v50  ;;  %v8602_v38 = vld [vmem:[#allocation7 + $0x14] ss:$36 sps:$4 sm:$0xff]   ;;  %v12072_v9 = vpack.c.bf16 %v12070_v23, %v12071_v39  ;;  %v12074_v49 = vpack.c.bf16 %v11156_v63, %v11152_v2  ;;  %v12077_v37 = vld [vmem:[#allocation46_spill] sm:$0xff]  ;;  %v12086_v2 = vld [vmem:[#allocation47_spill] sm:$0xff] }
 0x5d7   : > { %7879 = vmatpush3.bf16.msra.mxu0 %v12048_v41  ;;  %7950 = vmatprep.subr.bf16.mxu1 %v12049_v19  ;;  %v12075_v0 = vpack.c.bf16 %v11169_v5, %v11165_v35  ;;  %v12078_v28 = vpack.c.bf16 %v12076_v11, %v12077_v37  ;;  %v12079_v59 = vld [vmem:[#allocation53_spill] sm:$0xff]  ;;  %v12082_v8 = vpack.c.bf16 %v11210_v10, %v11204_v14  ;;  %v12085_v35 = vld [vmem:[#allocation59_spill] sm:$0xff] }
 0x5d8   : > { %7920 = vmatprep.subr.bf16.mxu0 %v12050_v60  ;;  %v12083_v30 = vpack.c.bf16 %v11218_v15, %v11214_v51  ;;  %v12084_v5 = vpack.c.bf16 %v11231_v56, %v11227_v16  ;;  %v12087_v63 = vpack.c.bf16 %v12085_v35, %v12086_v2  ;;  %v12088_v19 = vld [vmem:[#allocation35_spill] sm:$0xff]  ;;  %v12089_v60 = vld [vmem:[#allocation54_spill] sm:$0xff]  ;;  %v12091_v14 = vpack.c.bf16 %v11274_v43, %v11268_v13 }
 0x5d9   : > { %v12092_v10 = vpack.c.bf16 %v11282_v26, %v11278_v22  ;;  %v2344_v51 = vld [vmem:[#allocation7 + $0x60] sm:$0xff]  ;;  %v12093_v16 = vpack.c.bf16 %v11295_v24, %v11291_v20  ;;  %v8603_v15 = vld [vmem:[#allocation7 + $0x18] ss:$36 sps:$4 sm:$0xff]   ;;  %v12094_v56 = vpack.c.bf16 %v11313_v25, %v11299_v32  ;;  %v12097_v13 = vmov 0   ;;  %v8600_v24 = vld [vmem:[#allocation7 + $0x10] ss:$36 sps:$4 sm:$0xff]  }
 0x5da   : > { %7951 = vmatpush3.bf16.msra.mxu1 %v12051_v1  ;;  %2533 = vmatmul.mubr.bf16.vlgmr.msra.gmra.mrb[72].mxu0 %v8593_v27  ;;  %v12080_v27 = vld [vmem:[#allocation58_spill] sm:$0xff]  ;;  %v12095_v1 = vld [vmem:[#allocation60_spill] sm:$0xff]  ;;  %v12098_v43 = vpack.c.bf16 %v11336_v29, %v11330_v57  ;;  %v12099_v20 = vld [vmem:[#allocation55_spill] sm:$0xff]  ;;  %v7230_v46 = vcombine.low %v2344_v51, %v2344_v51 }
 0x5db   : > { %7921 = vmatpush3.bf16.msra.mxu0 %v12054_v47  ;;  %7952 = vmatprep.subr.bf16.mxu1 %v12055_v31  ;;  %v12081_v41 = vpack.c.bf16 %v12079_v59, %v12080_v27  ;;  %v2343_v22 = vld [vmem:[#allocation7 + $0x58] sm:$0xff]  ;;  %v12100_v26 = vpack.c.bf16 %v11344_v34, %v12099_v20  ;;  %v12103_v29 = vld [vmem:[#allocation43_spill] sm:$0xff] }
 0x5dc   : > { %7922 = vmatprep.subr.bf16.mxu0 %v12058_v7  ;;  %2540 = vmatprep.mubr.bf16.mxu0 %v7225_v55  ;;  %v12090_v55 = vpack.c.bf16 %v12088_v19, %v12089_v60  ;;  %v7229_v25 = vcombine.high %v2343_v22, %v2343_v22  ;;  %v12101_v32 = vld [vmem:[#allocation61_spill] sm:$0xff]  ;;  %v8610_v47 = vld [vmem:[#allocation7 + $0x20] ss:$36 sps:$4 sm:$0xff]   ;;  %v8611_v45 = vld [vmem:[#allocation7 + $0x68] ss:$0 sps:$4 sm:$0xff]  }
 0x5dd   : > { %2589 = vmatmul.mubr.bf16.gmra.mrb[76].mxu1 %v7226_v36  ;;  %v7231_v36 = vcombine.high %v2344_v51, %v2344_v51  ;;  %v12102_v57 = vld [vmem:[#allocation69_spill] sm:$0xff] }
 0x5de   : > { %7953 = vmatpush3.bf16.msra.mxu1 %v12059_v53  ;;  %2676 = vmatprep.mubr.bf16.mxu1 %v8605_v48  ;;  %v12096_v48 = vpack.c.bf16 %v11326_v44, %v12095_v1  ;;  %v7228_v44 = vcombine.low %v2343_v22, %v2343_v22  ;;  %v2330_v50 = vmul.f32 %v12103_v29, %v12102_v57  ;;  %v8612_v18 = vld [vmem:[#allocation16 + $0x30] ss:$8 sps:$4 sm:$0xff]  }
 0x5df   : > { %7923 = vmatpush3.bf16.msra.mxu0 %v12060_v17  ;;  %7954 = vmatprep.subr.bf16.mxu1 %v12061_v12 }
 0x5e0   : > { %7924 = vmatprep.subr.bf16.mxu0 %v12063_v33  ;;  %v2413_v34 = vpack.c.bf16 %v2330_v50, %v2330_v50 }
 0x5e2   : > { %7955 = vmatpush3.bf16.msra.mxu1 %v12066_v61  ;;  %2541 = vmatmul.mubr.bf16.gmra.mrb[76].mxu0 %v7224_v40  ;;  %v2498_v31 = vsel %vm1044_vm1, %v2413_v34, 0 }
 0x5e3   : > { %7925 = vmatpush3.bf16.msra.mxu0 %v12069_v58  ;;  %7956 = vmatprep.subr.bf16.mxu1 %v12072_v9 }
 0x5e4   : > { %7926 = vmatprep.subr.bf16.mxu0 %v12073_v42  ;;  %2628 = vmatprep.mubr.bf16.mxu0 %v8602_v38 }
 0x5e6   : > { %7957 = vmatpush3.bf16.msra.mxu1 %v12074_v49 }
 0x5e7   : > { %7927 = vmatpush3.bf16.msra.mxu0 %v12075_v0  ;;  %7958 = vmatprep.subr.bf16.mxu1 %v12078_v28 }
 0x5e8   : > { %7928 = vmatprep.subr.bf16.mxu0 %v12081_v41 }
 0x5ea   : > { %7959 = vmatpush3.bf16.msra.mxu1 %v12082_v8 }
 0x5eb   : > { %7929 = vmatpush3.bf16.msra.mxu0 %v12083_v30  ;;  %7960 = vmatprep.subr.bf16.mxu1 %v12084_v5 }
 0x5ec   : > { %7930 = vmatprep.subr.bf16.mxu0 %v12087_v63 }
 0x5ee   : > { %7961 = vmatpush3.bf16.msra.mxu1 %v12090_v55 }
 0x5ef   : > { %7931 = vmatpush3.bf16.msra.mxu0 %v12091_v14  ;;  %7962 = vmatprep.subr.bf16.mxu1 %v12092_v10 }
 0x5f0   : > { %7932 = vmatprep.subr.bf16.mxu0 %v12093_v16 }
 0x5f2   : > { %7963 = vmatpush3.bf16.msra.mxu1 %v12094_v56 }
 0x5f3   : > { %7933 = vmatpush3.bf16.msra.mxu0 %v12096_v48  ;;  %2938 = vmatprep.subr.bf16.mxu1 %v12097_v13 }
 0x5f4   : > { %7934 = vmatprep.subr.bf16.mxu0 %v12098_v43 }
 0x5f5   : > { %2677 = vmatmul.mubr.bf16.vlgmr.msra.gmra.mrb[80].mxu1 %v8603_v15 }
 0x5f6   : > { %2684 = vmatprep.mubr.bf16.mxu1 %v7231_v36 }
 0x5f7   : > { %7935 = vmatpush3.bf16.msra.mxu0 %v12100_v26 }
 0x5f8   : > { %8188 = vmatprep.subr.bf16.mxu0 %v12101_v32 }
 0x5fa   : > { %2629 = vmatmul.mubr.bf16.vlgmr.msra.gmra.mrb[80].mxu0 %v8600_v24 }
 0x5fb   : > { %8189 = vmatpush3.bf16.msra.mxu0 %v12101_v32  ;;  %2636 = vmatprep.mubr.bf16.mxu0 %v7229_v25 }
 0x5fc   : > { %8190 = vmatprep.subr.bf16.mxu0 %v11378_v4 }
 0x5fd   : > { %2685 = vmatmul.mubr.bf16.gmra.mrb[84].mxu1 %v7230_v46 }
 0x5ff   : > { %8191 = vmatpush3.bf16.msra.mxu0 %v11378_v4  ;;  %v8613_v4 = vld [vmem:[#allocation16 + $0x40] ss:$8 sps:$4 sm:$0xff]  }
 0x600   : > { %8192 = vmatprep.subr.bf16.mxu0 %v11383_v62 }
 0x602   : > { %2637 = vmatmul.mubr.bf16.gmra.mrb[84].mxu0 %v7228_v44 }
 0x603   : > { %8193 = vmatpush3.bf16.msra.mxu0 %v11383_v62  ;;  %8196 = vmatprep.mubr.msk.bf16.mxu0 %vm2490_vm7, %v8610_v47 }
 0x604   : > { %8342 = vmatprep.subr.msk.bf16.mxu0 %vm1044_vm1, %v2413_v34 }
 0x607   : > { %8195 = vmatpush3.bf16.msra.mxu0 %v2498_v31 }
 0x608   : > { %8200 = vmatprep.subr.bf16.mxu0 %v8612_v18 }
 0x60a   : > { %8197 = vmatmul.mubr.msk.bf16.vlgmr.msra.gmra.mrb[88].mxu0 %vm2490_vm7, %v8611_v45 }
 0x60b   : > { %8201 = vmatpush3.bf16.msra.mxu0 %v8612_v18 }
 0x60c   : > { %8202 = vmatprep.subr.bf16.mxu0 %v8613_v4 }
 0x60f   : > { %8203 = vmatpush3.bf16.msra.mxu0 %v8613_v4  ;;  %v8616_v4 = vld [vmem:[#allocation8 + $0x4] ss:$8 sps:$4 sm:$0xff]  }
 0x610   : > { %7252 = vmatprep.mubr.msk.bf16.mxu1 %vm2928_vm8, %v8616_v4 }
 0x6a8   : > { %v7908_v7 = vpop.f32.mrb[72].mxu1 }
 0x6a9   : > { %v7909_v53 = vpop.f32.mrb[73].mxu1 }
 0x6aa   : > { %v7910_v40 = vadd.f32 %v7909_v53, %v7908_v7  ;;  %v7911_v17 = vpop.f32.mrb[74].mxu1  ;;  %v8619_v7 = vld [vmem:[#allocation16 + $0x50] ss:$8 sps:$4 sm:$0xff]   ;;  %v8620_v53 = vld [vmem:[#allocation16 + $0x60] ss:$8 sps:$4 sm:$0xff]  }
 0x6ab   : > { %v7912_v12 = vpop.f32.mrb[75].mxu1  ;;  %8208 = vmatprep.subr.bf16.mxu0 %v8619_v7 }
 0x6ac   : > { %v7913_v62 = vadd.f32 %v7912_v12, %v7911_v17 }
 0x6ad   : > { %v7880_v52 = vpop.f32.mrb[72].mxu0 }
 0x6ae   : > { %v7881_v33 = vpop.f32.mrb[73].mxu0 }
 0x6af   : > { %v7882_v38 = vadd.f32 %v7881_v33, %v7880_v52  ;;  %v7883_v54 = vpop.f32.mrb[74].mxu0  ;;  %v2816_v52 = vld [vmem:[#allocation17 + $0x7] ss:$0 sm:$0xff] }
 0x6b0   : > { %v7884_v6 = vpop.f32.mrb[75].mxu0  ;;  %v7914_v61 = vpop.f32.mrb[76].mxu1 }
 0x6b1   : > { %v2583_v21 = vadd.f32 %v7910_v40, %v7882_v38  ;;  %v7885_v3 = vadd.f32 %v7884_v6, %v7883_v54  ;;  %v7915_v58 = vpop.f32.mrb[77].mxu1  ;;  %v2746_v40 = vld [vmem:[#allocation17 + $0x6] ss:$0 sm:$0xff] }
 0x6b2   : > { %v7916_v23 = vadd.f32 %v7915_v58, %v7914_v61  ;;  %v7917_v39 = vpop.f32.mrb[78].mxu1  ;;  %v2820_v61 = vld [vmem:[#allocation17 + $0x10] ss:$0 sm:$0xff] }
 0x6b3   : > { %v2586_v9 = vadd.f32 %v7913_v62, %v7885_v3  ;;  %v7918_v42 = vpop.f32.mrb[79].mxu1  ;;  %v7240_v39 = vld [vmem:[#allocation14 + $0x1b] ss:$0 sm:$0xff] }
 0x6b5   : > { %v7886_v49 = vpop.f32.mrb[76].mxu0 }
 0x6b6   : > { %v7887_v0 = vpop.f32.mrb[77].mxu0 }
 0x6b7   : > { %v7888_v11 = vadd.f32 %v7887_v0, %v7886_v49  ;;  %v7889_v37 = vpop.f32.mrb[78].mxu0  ;;  %v7241_v49 = vld [vmem:[#allocation14 + $0x1c] ss:$0 sm:$0xff]  ;;  %v7242_v0 = vld [vmem:[#allocation14 + $0x1d] ss:$0 sm:$0xff] }
 0x6b8   : > { %v7890_v28 = vpop.f32.mrb[79].mxu0 }
 0x6b9   : > { %v2591_v59 = vadd.f32 %v7916_v23, %v7888_v11  ;;  %v7239_v23 = vld [vmem:[#allocation14 + $0x1a] ss:$0 sm:$0xff] }
 0x6c8   : > { %v7964_v27 = vpop.f32.mrb[80].mxu1 }
 0x6c9   : > { %v7965_v41 = vpop.f32.mrb[81].mxu1 }
 0x6ca   : > { %v7966_v8 = vadd.f32 %v7965_v41, %v7964_v27  ;;  %v7967_v30 = vpop.f32.mrb[82].mxu1  ;;  %v7244_v27 = vld [vmem:[#allocation14 + $0x1f] ss:$0 sm:$0xff] }
 0x6cb   : > { %v7968_v5 = vpop.f32.mrb[83].mxu1 }
 0x6cc   : > { %v7969_v35 = vadd.f32 %v7968_v5, %v7967_v30 }
 0x6cd   : > { %v7936_v2 = vpop.f32.mrb[80].mxu0 }
 0x6ce   : > { %v7937_v63 = vpop.f32.mrb[81].mxu0 }
 0x6cf   : > { %v7938_v19 = vadd.f32 %v7937_v63, %v7936_v2  ;;  %v7939_v60 = vpop.f32.mrb[82].mxu0 }
 0x6d0   : > { %v7940_v55 = vpop.f32.mrb[83].mxu0  ;;  %v7970_v14 = vpop.f32.mrb[84].mxu1 }
 0x6d1   : > { %v2631_v10 = vadd.f32 %v7938_v19, %v2583_v21  ;;  %v7941_v51 = vadd.f32 %v7940_v55, %v7939_v60  ;;  %v7971_v16 = vpop.f32.mrb[85].mxu1 }
 0x6d2   : > { %v7972_v15 = vadd.f32 %v7971_v16, %v7970_v14  ;;  %v7973_v56 = vpop.f32.mrb[86].mxu1 }
 0x6d3   : > { %v2634_v36 = vadd.f32 %v7941_v51, %v2586_v9  ;;  %v2679_v1 = vadd.f32 %v7966_v8, %v2631_v10  ;;  %v7974_v48 = vpop.f32.mrb[87].mxu1 }
 0x6d5   : > { %v7942_v43 = vpop.f32.mrb[84].mxu0  ;;  %v2682_v22 = vadd.f32 %v7969_v35, %v2634_v36  ;;  %v7245_v36 = vld [vmem:[#allocation14 + $0x20] ss:$0 sm:$0xff] }
 0x6d6   : > { %v7943_v24 = vpop.f32.mrb[85].mxu0 }
 0x6d7   : > { %v7944_v20 = vadd.f32 %v7943_v24, %v7942_v43  ;;  %v7945_v26 = vpop.f32.mrb[86].mxu0  ;;  %v7246_v24 = vld [vmem:[#allocation14 + $0x21] ss:$0 sm:$0xff] }
 0x6d8   : > { %v7946_v25 = vpop.f32.mrb[87].mxu0 }
 0x6d9   : > { %v2639_v32 = vadd.f32 %v7944_v20, %v2591_v59  ;;  %v7243_v59 = vld [vmem:[#allocation14 + $0x1e] ss:$0 sm:$0xff] }
 0x6db   : > { %v2687_v46 = vadd.f32 %v7972_v15, %v2639_v32 }
 0x6dd   : > { %v8198_v44 = vpop.f32.mrb[88].mxu0 }
 0x6de   : > { %v2735_v57 = vadd.f32 %v8198_v44, %v2687_v46  ;;  %v2726_v29 = vpop.f32.mrb[89].mxu0  ;;  %v7247_v46 = vld [vmem:[#allocation14 + $0x22] ss:$0 sm:$0xff] }
 0x6df   : > { %v2727_v50 = vadd.f32 %v2726_v29, %v2679_v1  ;;  %v8199_v47 = vpop.f32.mrb[90].mxu0 }
 0x6e0   : > { %v2729_v34 = vpop.f32.mrb[91].mxu0  ;;  %v2741_v18 = vpack.c.bf16 %v2735_v57, %v2735_v57 }
 0x6e1   : > { %v2730_v31 = vadd.f32 %v2729_v34, %v2682_v22 }
 0x6e3   : > { %v2740_v45 = vpack.c.bf16 %v2730_v31, %v2727_v50 }
 0x6e5   : > { %8204 = vmatprep.mubr.msk.bf16.mxu0 %vm2004_vm6, %v2740_v45 }
 0x6e6   : > { %8205 = vmatmul.mubr.msk.bf16.vlgmr.msra.gmra.mrb[92].mxu0 %vm2004_vm6, %v2741_v18 }
 0x6e7   : > { %8209 = vmatpush3.bf16.msra.mxu0 %v8619_v7 }
 0x6e8   : > { %8210 = vmatprep.subr.bf16.mxu0 %v8620_v53 }
 0x6eb   : > { %8211 = vmatpush3.bf16.msra.mxu0 %v8620_v53 }
 0x7b9   : > { %v8206_v17 = vpop.f32.mrb[92].mxu0 }
 0x7ba   : > { %v2808_v12 = vadd.f32 %v8206_v17, %v2746_v40  ;;  %v2799_v62 = vpop.f32.mrb[93].mxu0 }
 0x7bb   : > { %v2800_v33 = vadd.f32 %v2799_v62, %v2746_v40  ;;  %v8207_v38 = vpop.f32.mrb[94].mxu0 }
 0x7bc   : > { %v2815_v54 = vmax.f32 %v2808_v12, 0.0  ;;  %v2802_v6 = vpop.f32.mrb[95].mxu0  ;;  %v2898_v38 = vld [vmem:[#allocation8 + $0x10] sm:$0xff] }
 0x7bd   : > { %v2813_v21 = vmax.f32 %v2800_v33, 0.0  ;;  %v2803_v3 = vadd.f32 %v2802_v6, %v2746_v40  ;;  %v8614_v6 = vld [vmem:[#allocation8] ss:$8 sps:$4 sm:$0xff]  }
 0x7be   : > { %v2819_v58 = vmul.f32 %v2816_v52, %v2815_v54 }
 0x7bf   : > { %v2817_v9 = vmul.f32 %v2816_v52, %v2813_v21  ;;  %v2814_v42 = vmax.f32 %v2803_v3, 0.0  ;;  %v7250_v21 = vcombine.low %v2898_v38, %v2898_v38  ;;  %v8621_v3 = vld [vmem:[#allocation16 + $0x70] ss:$8 sps:$4 sm:$0xff]  }
 0x7c0   : > { %v11504_v11 = vadd.f32 %v2820_v61, %v2819_v58  ;;  %8212 = vmatprep.subr.bf16.mxu0 %v8621_v3  ;;  %v8622_v58 = vld [vmem:[#allocation16 + $0x80] ss:$8 sps:$4 sm:$0xff]  }
 0x7c1   : > { %v2821_v37 = vadd.f32 %v2820_v61, %v2817_v9  ;;  %v2818_v28 = vmul.f32 %v2816_v52, %v2814_v42  ;;  %8213 = vmatpush3.bf16.msra.mxu0 %v8621_v3  ;;  %v7262_v3 = vld [vmem:[#allocation14 + $0x25] ss:$0 sm:$0xff] }
 0x7c2   : > { %v2831_v41 = vmul.f32 %v7239_v23, %v11504_v11  ;;  %v2839_v8 = vmul.f32 %v7240_v39, %v11504_v11  ;;  %v2847_v30 = vmul.f32 %v7241_v49, %v11504_v11  ;;  %v2855_v5 = vmul.f32 %v7242_v0, %v11504_v11  ;;  %8214 = vmatprep.subr.bf16.mxu0 %v8622_v58 }
 0x7c3   : > { %v2822_v35 = vadd.f32 %v2820_v61, %v2818_v28  ;;  %v2829_v2 = vmul.f32 %v7239_v23, %v2821_v37  ;;  %v2837_v63 = vmul.f32 %v7240_v39, %v2821_v37  ;;  %v2845_v19 = vmul.f32 %v7241_v49, %v2821_v37 }
 0x7c4   : > { %v2853_v60 = vmul.f32 %v7242_v0, %v2821_v37  ;;  %v2861_v55 = vmul.f32 %v7243_v59, %v2821_v37  ;;  %v2863_v14 = vmul.f32 %v7243_v59, %v11504_v11  ;;  %v2869_v10 = vmul.f32 %v7244_v27, %v2821_v37 }
 0x7c5   : > { %v2830_v51 = vmul.f32 %v7239_v23, %v2822_v35  ;;  %v2900_v16 = vpack.c.bf16 %v2837_v63, %v2831_v41  ;;  %v2838_v15 = vmul.f32 %v7240_v39, %v2822_v35  ;;  %v2846_v56 = vmul.f32 %v7241_v49, %v2822_v35  ;;  %8215 = vmatpush3.bf16.msra.mxu0 %v8622_v58 }
 0x7c6   : > { %v2903_v1 = vpack.c.bf16 %v2853_v60, %v2847_v30  ;;  %v2854_v48 = vmul.f32 %v7242_v0, %v2822_v35  ;;  %v2862_v43 = vmul.f32 %v7243_v59, %v2822_v35  ;;  %v2906_v22 = vpack.c.bf16 %v2869_v10, %v2863_v14 }
 0x7c7   : > { %v2899_v20 = vpack.c.bf16 %v2830_v51, %v2829_v2  ;;  %v2901_v26 = vpack.c.bf16 %v2839_v8, %v2838_v15  ;;  %v2902_v25 = vpack.c.bf16 %v2846_v56, %v2845_v19  ;;  %v2870_v32 = vmul.f32 %v7244_v27, %v2822_v35  ;;  %v11537_v8 = vld [vmem:[#allocation10 + $0x8] sm:$0xff]  ;;  %v3079_v19 = vld [vmem:[#allocation17 + $0x12] ss:$0 sm:$0xff]  ;;  %v3083_v51 = vld [vmem:[#allocation17 + $0x13] ss:$0 sm:$0xff] }
 0x7c8   : > { %v2904_v44 = vpack.c.bf16 %v2855_v5, %v2854_v48  ;;  %v2905_v57 = vpack.c.bf16 %v2862_v43, %v2861_v55  ;;  %v2871_v29 = vmul.f32 %v7244_v27, %v11504_v11  ;;  %v2877_v50 = vmul.f32 %v7245_v36, %v2821_v37  ;;  %v11533_v27 = vld [vmem:[#allocation10] sm:$0xff] }
 0x7c9   : > { %2939 = vmatpush1.bf16.msra.mxu1 %v2899_v20  ;;  %v2878_v47 = vmul.f32 %v7245_v36, %v2822_v35  ;;  %v2879_v34 = vmul.f32 %v7245_v36, %v11504_v11  ;;  %v2885_v31 = vmul.f32 %v7246_v24, %v2821_v37  ;;  %v2886_v45 = vmul.f32 %v7246_v24, %v2822_v35  ;;  %v2996_v5 = vld [vmem:[#allocation17 + $0x11] ss:$0 sm:$0xff]  ;;  %v11541_v36 = vld [vmem:[#allocation14 + $0x2d] ss:$0 sm:$0xff] }
 0x7ca   : > { %2940 = vmatprep.subr.bf16.mxu1 %v12097_v13  ;;  %v2907_v18 = vpack.c.bf16 %v2871_v29, %v2870_v32  ;;  %v2887_v4 = vmul.f32 %v7246_v24, %v11504_v11  ;;  %v2893_v7 = vmul.f32 %v7247_v46, %v2821_v37  ;;  %v2894_v53 = vmul.f32 %v7247_v46, %v2822_v35  ;;  %v7260_v24 = vld [vmem:[#allocation14 + $0x23] ss:$0 sm:$0xff] }
 0x7cb   : > { %v2908_v40 = vpack.c.bf16 %v2878_v47, %v2877_v50  ;;  %v2909_v17 = vpack.c.bf16 %v2885_v31, %v2879_v34  ;;  %v2895_v52 = vmul.f32 %v7247_v46, %v11504_v11  ;;  %v7251_v61 = vcombine.high %v2898_v38, %v2898_v38  ;;  %v7261_v46 = vld [vmem:[#allocation14 + $0x24] ss:$0 sm:$0xff] }
 0x7cc   : > { %v2910_v12 = vpack.c.bf16 %v2887_v4, %v2886_v45  ;;  %v2911_v62 = vpack.c.bf16 %v2894_v53, %v2893_v7  ;;  %v7281_v41 = vcombine.high %v11533_v27, %v11533_v27  ;;  %v7283_v30 = vcombine.high %v11537_v8, %v11537_v8 }
 0x7cd   : > { %2941 = vmatpush1.bf16.msra.mxu1 %v2900_v16  ;;  %v2912_v33 = vpack.c.bf16 %v2895_v52, %v2895_v52 }
 0x7ce   : > { %2942 = vmatprep.subr.bf16.mxu1 %v12097_v13 }
 0x7cf   : > { %v2936_v54 = vsel %vm1044_vm1, %v2912_v33, 0 }
 0x7d1   : > { %2943 = vmatpush1.bf16.msra.mxu1 %v2901_v26  ;;  %v7266_v26 = vld [vmem:[#allocation14 + $0x29] ss:$0 sm:$0xff] }
 0x7d2   : > { %2944 = vmatprep.subr.bf16.mxu1 %v12097_v13 }
 0x7d5   : > { %2945 = vmatpush1.bf16.msra.mxu1 %v2902_v25 }
 0x7d6   : > { %2946 = vmatprep.subr.bf16.mxu1 %v12097_v13 }
 0x7d9   : > { %2947 = vmatpush1.bf16.msra.mxu1 %v2903_v1  ;;  %v7271_v1 = vld [vmem:[#allocation14 + $0x2e] ss:$0 sm:$0xff] }
 0x7da   : > { %2948 = vmatprep.subr.bf16.mxu1 %v12097_v13 }
 0x7dd   : > { %2949 = vmatpush1.bf16.msra.mxu1 %v2904_v44  ;;  %v7267_v44 = vld [vmem:[#allocation14 + $0x2a] ss:$0 sm:$0xff] }
 0x7de   : > { %2950 = vmatprep.subr.bf16.mxu1 %v12097_v13 }
 0x7e1   : > { %2951 = vmatpush1.bf16.msra.mxu1 %v2905_v57  ;;  %v7272_v57 = vld [vmem:[#allocation14 + $0x2f] ss:$0 sm:$0xff] }
 0x7e2   : > { %2952 = vmatprep.subr.bf16.mxu1 %v12097_v13 }
 0x7e5   : > { %2953 = vmatpush1.bf16.msra.mxu1 %v2906_v22  ;;  %v11543_v22 = vld [vmem:[#allocation14 + $0x28] ss:$0 sm:$0xff] }
 0x7e6   : > { %2954 = vmatprep.subr.bf16.mxu1 %v12097_v13 }
 0x7e9   : > { %2955 = vmatpush1.bf16.msra.mxu1 %v2907_v18 }
 0x7ea   : > { %2956 = vmatprep.subr.bf16.mxu1 %v12097_v13 }
 0x7ed   : > { %2957 = vmatpush1.bf16.msra.mxu1 %v2908_v40 }
 0x7ee   : > { %2958 = vmatprep.subr.bf16.mxu1 %v12097_v13 }
 0x7f1   : > { %2959 = vmatpush1.bf16.msra.mxu1 %v2909_v17 }
 0x7f2   : > { %2960 = vmatprep.subr.bf16.mxu1 %v12097_v13 }
 0x7f5   : > { %2961 = vmatpush1.bf16.msra.mxu1 %v2910_v12 }
 0x7f6   : > { %2962 = vmatprep.subr.bf16.mxu1 %v12097_v13 }
 0x7f9   : > { %2963 = vmatpush1.bf16.msra.mxu1 %v2911_v62 }
 0x7fa   : > { %2964 = vmatprep.subr.bf16.mxu1 %v12097_v13 }
 0x7fd   : > { %2965 = vmatpush1.bf16.msra.mxu1 %v2936_v54 }
 0x7fe   : > { %3336 = vmatprep.subr.bf16.mxu1 %v12097_v13 }
 0x800   : > { %2971 = vmatmul.mubr.bf16.vlgmr.msra.gmra.mrb[88].mxu1 %v8614_v6 }
 0x801   : > { %7253 = vmatprep.mubr.msk.bf16.mxu1 %vm2928_vm8, %v7251_v61 }
 0x808   : > { %2979 = vmatmul.mubr.bf16.gmra.mrb[92].mxu1 %v7250_v21  ;;  %v7273_v21 = vld [vmem:[#allocation14 + $0x30] ss:$0 sm:$0xff] }
 0x809   : > { %7284 = vmatprep.mubr.msk.bf16.mxu1 %vm3292_vm10, %v7283_v30 }
 0x8d3   : > { %v2972_v23 = vpop.f32.mrb[88].mxu1 }
 0x8d4   : > { %v2974_v39 = vpop.f32.mrb[89].mxu1 }
 0x8d5   : > { %v2975_v9 = vpop.f32.mrb[90].mxu1 }
 0x8d6   : > { %v2986_v42 = vpack.c.bf16 %v2975_v9, %v2972_v23  ;;  %v2977_v49 = vpop.f32.mrb[91].mxu1 }
 0x8d8   : > { %8216 = vmatprep.mubr.msk.bf16.mxu0 %vm3021_vm9, %v2986_v42  ;;  %v7268_v42 = vld [vmem:[#allocation14 + $0x2b] ss:$0 sm:$0xff] }
 0x8db   : > { %v2980_v0 = vpop.f32.mrb[92].mxu1 }
 0x8dc   : > { %v2987_v11 = vpack.c.bf16 %v2980_v0, %v2980_v0  ;;  %v2982_v37 = vpop.f32.mrb[93].mxu1 }
 0x8dd   : > { %v2983_v28 = vpop.f32.mrb[94].mxu1 }
 0x8de   : > { %v2984_v59 = vpop.f32.mrb[95].mxu1  ;;  %8217 = vmatmul.mubr.msk.bf16.vlgmr.msra.gmra.mrb[96].mxu0 %vm3021_vm9, %v2987_v11 }
 0x8df   : > { %3328 = vmatprep.mubr.bf16.mxu0 %v7281_v41 }
 0x9b1   : > { %v8218_v35 = vpop.f32.mrb[96].mxu0 }
 0x9b2   : > { %v3071_v2 = vadd.f32 %v8218_v35, %v2996_v5  ;;  %v3062_v63 = vpop.f32.mrb[97].mxu0 }
 0x9b3   : > { %v3063_v60 = vadd.f32 %v3062_v63, %v2996_v5  ;;  %v8219_v55 = vpop.f32.mrb[98].mxu0 }
 0x9b4   : > { %v3078_v14 = vmax.f32 %v3071_v2, 0.0  ;;  %v3065_v10 = vpop.f32.mrb[99].mxu0  ;;  %v7274_v55 = vld [vmem:[#allocation14 + $0x31] ss:$0 sm:$0xff] }
 0x9b5   : > { %v3076_v16 = vmax.f32 %v3063_v60, 0.0  ;;  %v3066_v15 = vadd.f32 %v3065_v10, %v2996_v5  ;;  %v7269_v60 = vld [vmem:[#allocation14 + $0x2c] ss:$0 sm:$0xff] }
 0x9b6   : > { %v3082_v56 = vmul.f32 %v3079_v19, %v3078_v14 }
 0x9b7   : > { %v3080_v48 = vmul.f32 %v3079_v19, %v3076_v16  ;;  %v3077_v43 = vmax.f32 %v3066_v15, 0.0 }
 0x9b8   : > { %v11545_v20 = vadd.f32 %v3083_v51, %v3082_v56 }
 0x9b9   : > { %v11547_v25 = vadd.f32 %v3083_v51, %v3080_v48  ;;  %v3081_v32 = vmul.f32 %v3079_v19, %v3077_v43  ;;  %v7263_v19 = vld [vmem:[#allocation14 + $0x26] ss:$0 sm:$0xff] }
 0x9ba   : > { %v3174_v29 = vmul.f32 %v11541_v36, %v11545_v20  ;;  %v3134_v50 = vmul.f32 %v11543_v22, %v11545_v20  ;;  %v3182_v47 = vmul.f32 %v7271_v1, %v11545_v20  ;;  %v3094_v34 = vmul.f32 %v7260_v24, %v11545_v20 }
 0x9bb   : > { %v11555_v31 = vadd.f32 %v3083_v51, %v3081_v32  ;;  %v3180_v45 = vmul.f32 %v7271_v1, %v11547_v25  ;;  %v3092_v18 = vmul.f32 %v7260_v24, %v11547_v25  ;;  %v3140_v4 = vmul.f32 %v7266_v26, %v11547_v25 }
 0x9bc   : > { %v3100_v7 = vmul.f32 %v7261_v46, %v11547_v25  ;;  %v3142_v53 = vmul.f32 %v7266_v26, %v11545_v20  ;;  %v3148_v40 = vmul.f32 %v7267_v44, %v11547_v25  ;;  %v3188_v17 = vmul.f32 %v7272_v57, %v11547_v25 }
 0x9bd   : > { %v3265_v12 = vpack.c.bf16 %v3180_v45, %v3174_v29  ;;  %v3133_v62 = vmul.f32 %v11543_v22, %v11555_v31  ;;  %v3093_v52 = vmul.f32 %v7260_v24, %v11555_v31  ;;  %v3141_v33 = vmul.f32 %v7266_v26, %v11555_v31  ;;  %v7275_v29 = vld [vmem:[#allocation14 + $0x32] ss:$0 sm:$0xff] }
 0x9be   : > { %v3181_v38 = vmul.f32 %v7271_v1, %v11555_v31  ;;  %v3250_v54 = vpack.c.bf16 %v3100_v7, %v3094_v34  ;;  %v3259_v6 = vpack.c.bf16 %v3148_v40, %v3142_v53  ;;  %v3189_v61 = vmul.f32 %v7272_v57, %v11555_v31 }
 0x9bf   : > { %3337 = vmatpush1.bf16.msra.mxu1 %v3265_v12  ;;  %v3257_v58 = vpack.c.bf16 %v3134_v50, %v3133_v62  ;;  %v3249_v23 = vpack.c.bf16 %v3093_v52, %v3092_v18  ;;  %v3258_v39 = vpack.c.bf16 %v3141_v33, %v3140_v4  ;;  %v3101_v9 = vmul.f32 %v7261_v46, %v11555_v31  ;;  %v7264_v50 = vld [vmem:[#allocation14 + $0x27] ss:$0 sm:$0xff]  ;;  %v7276_v52 = vld [vmem:[#allocation14 + $0x33] ss:$0 sm:$0xff] }
 0x9c0   : > { %3338 = vmatprep.subr.bf16.mxu1 %v12097_v13  ;;  %v3266_v49 = vpack.c.bf16 %v3182_v47, %v3181_v38  ;;  %v3267_v0 = vpack.c.bf16 %v3189_v61, %v3188_v17  ;;  %v3102_v11 = vmul.f32 %v7261_v46, %v11545_v20  ;;  %v3149_v37 = vmul.f32 %v7267_v44, %v11555_v31  ;;  %v7277_v61 = vld [vmem:[#allocation14 + $0x34] ss:$0 sm:$0xff] }
 0x9c1   : > { %7992 = vmatprep.subr.bf16.mxu0 %v3257_v58  ;;  %v3150_v28 = vmul.f32 %v7267_v44, %v11545_v20  ;;  %v3190_v59 = vmul.f32 %v7272_v57, %v11545_v20  ;;  %v3196_v41 = vmul.f32 %v7273_v21, %v11547_v25  ;;  %v11578_v30 = vmul.f32 %v7262_v3, %v11547_v25 }
 0x9c2   : > { %7993 = vmatpush3.bf16.msra.mxu0 %v3249_v23  ;;  %v3251_v5 = vpack.c.bf16 %v3102_v11, %v3101_v9  ;;  %v11581_v35 = vmul.f32 %v7262_v3, %v11555_v31  ;;  %v11584_v2 = vmul.f32 %v7268_v42, %v11547_v25  ;;  %v11587_v63 = vmul.f32 %v7268_v42, %v11555_v31  ;;  %v7278_v23 = vld [vmem:[#allocation14 + $0x35] ss:$0 sm:$0xff] }
 0x9c3   : > { %7994 = vmatprep.subr.bf16.mxu0 %v3258_v39  ;;  %3339 = vmatpush1.bf16.msra.mxu1 %v3266_v49  ;;  %v3260_v14 = vpack.c.bf16 %v3150_v28, %v3149_v37  ;;  %v3268_v10 = vpack.c.bf16 %v3196_v41, %v3190_v59  ;;  %v3197_v51 = vmul.f32 %v7273_v21, %v11555_v31  ;;  %v7279_v28 = vld [vmem:[#allocation14 + $0x36] ss:$0 sm:$0xff] }
 0x9c4   : > { %3340 = vmatprep.subr.bf16.mxu1 %v12097_v13  ;;  %v3252_v16 = vpack.c.bf16 %v11581_v35, %v11578_v30  ;;  %v3261_v15 = vpack.c.bf16 %v11587_v63, %v11584_v2  ;;  %v3198_v56 = vmul.f32 %v7273_v21, %v11545_v20  ;;  %v11597_v1 = vmul.f32 %v7262_v3, %v11545_v20 }
 0x9c5   : > { %v11600_v48 = vmul.f32 %v7263_v19, %v11547_v25  ;;  %v11603_v43 = vmul.f32 %v7268_v42, %v11545_v20  ;;  %v11606_v24 = vmul.f32 %v7269_v60, %v11547_v25  ;;  %v11609_v26 = vmul.f32 %v7274_v55, %v11547_v25 }
 0x9c6   : > { %7995 = vmatpush3.bf16.msra.mxu0 %v3250_v54  ;;  %v3269_v32 = vpack.c.bf16 %v3198_v56, %v3197_v51  ;;  %v3205_v46 = vmul.f32 %v7274_v55, %v11555_v31  ;;  %v11613_v44 = vmul.f32 %v7263_v19, %v11555_v31  ;;  %v3118_v57 = vmul.f32 %v7263_v19, %v11545_v20  ;;  %v8630_v56 = vld [vmem:[#allocation16 + $0xc0] ss:$8 sps:$4 sm:$0xff]  }
 0x9c7   : > { %7996 = vmatprep.subr.bf16.mxu0 %v3259_v6  ;;  %3341 = vmatpush1.bf16.msra.mxu1 %v3267_v0  ;;  %v3253_v47 = vpack.c.bf16 %v11600_v48, %v11597_v1  ;;  %v3262_v34 = vpack.c.bf16 %v11606_v24, %v11603_v43  ;;  %v3165_v45 = vmul.f32 %v7269_v60, %v11555_v31 }
 0x9c8   : > { %3342 = vmatprep.subr.bf16.mxu1 %v12097_v13  ;;  %v3270_v18 = vpack.c.bf16 %v3205_v46, %v11609_v26  ;;  %v3254_v4 = vpack.c.bf16 %v3118_v57, %v11613_v44  ;;  %v3166_v7 = vmul.f32 %v7269_v60, %v11545_v20  ;;  %v3206_v53 = vmul.f32 %v7274_v55, %v11545_v20 }
 0x9c9   : > { %v3212_v40 = vmul.f32 %v7275_v29, %v11547_v25  ;;  %v3124_v17 = vmul.f32 %v7264_v50, %v11547_v25  ;;  %v3125_v12 = vmul.f32 %v7264_v50, %v11555_v31  ;;  %v3172_v62 = vmul.f32 %v11541_v36, %v11547_v25 }
 0x9ca   : > { %7997 = vmatpush3.bf16.msra.mxu0 %v3251_v5  ;;  %v3263_v33 = vpack.c.bf16 %v3166_v7, %v3165_v45  ;;  %v3173_v38 = vmul.f32 %v11541_v36, %v11555_v31  ;;  %v3213_v54 = vmul.f32 %v7275_v29, %v11555_v31  ;;  %v3214_v6 = vmul.f32 %v7275_v29, %v11545_v20 }
 0x9cb   : > { %7998 = vmatprep.subr.bf16.mxu0 %v3260_v14  ;;  %3343 = vmatpush1.bf16.msra.mxu1 %v3268_v10  ;;  %v3271_v21 = vpack.c.bf16 %v3212_v40, %v3206_v53  ;;  %v3255_v3 = vpack.c.bf16 %v3125_v12, %v3124_v17  ;;  %v3126_v58 = vmul.f32 %v7264_v50, %v11545_v20  ;;  %v3385_v50 = vld [vmem:[#allocation17 + $0x14] ss:$0 sm:$0xff]  ;;  %v3456_v40 = vld [vmem:[#allocation17 + $0x16] ss:$0 sm:$0xff]  ;;  %v7290_v12 = vld [vmem:[#allocation14 + $0x37] ss:$0 sm:$0xff] }
 0x9cc   : > { %3344 = vmatprep.subr.bf16.mxu1 %v12097_v13  ;;  %v3264_v39 = vpack.c.bf16 %v3173_v38, %v3172_v62  ;;  %v3272_v9 = vpack.c.bf16 %v3214_v6, %v3213_v54  ;;  %v3132_v42 = vmul.f32 %v11543_v22, %v11547_v25  ;;  %v3220_v36 = vmul.f32 %v7276_v52, %v11547_v25  ;;  %v7291_v62 = vld [vmem:[#allocation14 + $0x38] ss:$0 sm:$0xff]  ;;  %v7293_v38 = vld [vmem:[#allocation14 + $0x3a] ss:$0 sm:$0xff] }
 0x9cd   : > { %v3221_v49 = vmul.f32 %v7276_v52, %v11555_v31  ;;  %v3222_v0 = vmul.f32 %v7276_v52, %v11545_v20  ;;  %v3228_v11 = vmul.f32 %v7277_v61, %v11547_v25  ;;  %v3229_v37 = vmul.f32 %v7277_v61, %v11555_v31 }
 0x9ce   : > { %7999 = vmatpush3.bf16.msra.mxu0 %v3252_v16  ;;  %v3256_v59 = vpack.c.bf16 %v3132_v42, %v3126_v58  ;;  %v3230_v41 = vmul.f32 %v7277_v61, %v11545_v20  ;;  %v3236_v30 = vmul.f32 %v7278_v23, %v11547_v25  ;;  %v3237_v5 = vmul.f32 %v7278_v23, %v11555_v31  ;;  %v8628_v16 = vld [vmem:[#allocation16 + $0xa0] ss:$8 sps:$4 sm:$0xff]   ;;  %v7294_v58 = vld [vmem:[#allocation14 + $0x3b] ss:$0 sm:$0xff] }
 0x9cf   : > { %8000 = vmatprep.subr.bf16.mxu0 %v3261_v15  ;;  %3345 = vmatpush1.bf16.msra.mxu1 %v3269_v32  ;;  %v3273_v22 = vpack.c.bf16 %v3221_v49, %v3220_v36  ;;  %v3274_v35 = vpack.c.bf16 %v3228_v11, %v3222_v0  ;;  %v3238_v2 = vmul.f32 %v7278_v23, %v11545_v20  ;;  %v8629_v15 = vld [vmem:[#allocation16 + $0xb0] ss:$8 sps:$4 sm:$0xff]   ;;  %v7295_v23 = vld [vmem:[#allocation14 + $0x3c] ss:$0 sm:$0xff]  ;;  %v7296_v36 = vld [vmem:[#allocation14 + $0x3d] ss:$0 sm:$0xff] }
 0x9d0   : > { %3346 = vmatprep.subr.bf16.mxu1 %v12097_v13  ;;  %v3275_v63 = vpack.c.bf16 %v3230_v41, %v3229_v37  ;;  %v3276_v19 = vpack.c.bf16 %v3237_v5, %v3236_v30  ;;  %v3244_v60 = vmul.f32 %v7279_v28, %v11547_v25  ;;  %v3245_v55 = vmul.f32 %v7279_v28, %v11555_v31  ;;  %v8627_v25 = vld [vmem:[#allocation16 + $0x90] ss:$8 sps:$4 sm:$0xff]   ;;  %v11657_v31 = vld [vmem:[#allocation2] sm:$0xff]  ;;  %v7297_v49 = vld [vmem:[#allocation14 + $0x3e] ss:$0 sm:$0xff] }
 0x9d1   : > { %v3246_v14 = vmul.f32 %v7279_v28, %v11545_v20  ;;  %v7280_v20 = vcombine.low %v11533_v27, %v11533_v27  ;;  %v7282_v27 = vcombine.low %v11537_v8, %v11537_v8  ;;  %v7298_v0 = vld [vmem:[#allocation14 + $0x3f] ss:$0 sm:$0xff] }
 0x9d2   : > { %8001 = vmatpush3.bf16.msra.mxu0 %v3253_v47  ;;  %v3277_v10 = vpack.c.bf16 %v3244_v60, %v3238_v2  ;;  %v8632_v2 = vld [vmem:[#allocation16 + $0xe0] ss:$8 sps:$4 sm:$0xff]   ;;  %v8635_v60 = vld [vmem:[#allocation16 + $0x110] ss:$8 sps:$4 sm:$0xff]  }
 0x9d3   : > { %8002 = vmatprep.subr.bf16.mxu0 %v3262_v34  ;;  %3347 = vmatpush1.bf16.msra.mxu1 %v3270_v18  ;;  %v3278_v51 = vpack.c.bf16 %v3246_v14, %v3245_v55  ;;  %v3454_v18 = vld [vmem:[#allocation17 + $0x15] ss:$0 sm:$0xff]  ;;  %v8636_v55 = vld [vmem:[#allocation16 + $0x120] ss:$8 sps:$4 sm:$0xff]   ;;  %v8637_v14 = vld [vmem:[#allocation16 + $0x130] ss:$8 sps:$4 sm:$0xff]  }
 0x9d4   : > { %3348 = vmatprep.subr.bf16.mxu1 %v12097_v13 }
 0x9d6   : > { %8003 = vmatpush3.bf16.msra.mxu0 %v3254_v4 }
 0x9d7   : > { %8004 = vmatprep.subr.bf16.mxu0 %v3263_v33  ;;  %3349 = vmatpush1.bf16.msra.mxu1 %v3271_v21  ;;  %v7292_v33 = vld [vmem:[#allocation14 + $0x39] ss:$0 sm:$0xff] }
 0x9d8   : > { %3350 = vmatprep.subr.bf16.mxu1 %v12097_v13 }
 0x9da   : > { %8005 = vmatpush3.bf16.msra.mxu0 %v3255_v3 }
 0x9db   : > { %8006 = vmatprep.subr.bf16.mxu0 %v3264_v39  ;;  %3351 = vmatpush1.bf16.msra.mxu1 %v3272_v9 }
 0x9dc   : > { %3352 = vmatprep.subr.bf16.mxu1 %v12097_v13 }
 0x9de   : > { %8007 = vmatpush3.bf16.msra.mxu0 %v3256_v59 }
 0x9df   : > { %3353 = vmatpush1.bf16.msra.mxu1 %v3273_v22  ;;  %8220 = vmatprep.subr.bf16.mxu0 %v11657_v31  ;;  %v3512_v22 = vld [vmem:[#allocation11] sm:$0xf] }
 0x9e0   : > { %3354 = vmatprep.subr.bf16.mxu1 %v12097_v13 }
 0x9e1   : > { %3329 = vmatmul.mubr.bf16.vlgmr.msra.gmra.mrb[100].mxu0 %v7280_v20 }
 0x9e2   : > { %8221 = vmatpush3.bf16.msra.mxu0 %v8627_v25  ;;  %8228 = vmatprep.mubr.msk.bf16.mxu0 %vm9617_vm5, %v11657_v31 }
 0x9e3   : > { %3355 = vmatpush1.bf16.msra.mxu1 %v3274_v35  ;;  %8222 = vmatprep.subr.bf16.mxu0 %v11657_v31  ;;  %v8631_v35 = vld [vmem:[#allocation16 + $0xd0] ss:$8 sps:$4 sm:$0xff]  }
 0x9e4   : > { %3356 = vmatprep.subr.bf16.mxu1 %v12097_v13 }
 0x9e6   : > { %8223 = vmatpush3.bf16.msra.mxu0 %v8628_v16 }
 0x9e7   : > { %3357 = vmatpush1.bf16.msra.mxu1 %v3275_v63  ;;  %8224 = vmatprep.subr.bf16.mxu0 %v11657_v31  ;;  %v8633_v63 = vld [vmem:[#allocation16 + $0xf0] ss:$8 sps:$4 sm:$0xff]  }
 0x9e8   : > { %3358 = vmatprep.subr.bf16.mxu1 %v12097_v13 }
 0x9ea   : > { %8225 = vmatpush3.bf16.msra.mxu0 %v8629_v15  ;;  %v3582_v15 = vld [vmem:[#allocation17 + $0x17] ss:$0 sm:$0xff] }
 0x9eb   : > { %3359 = vmatpush1.bf16.msra.mxu1 %v3276_v19  ;;  %8226 = vmatprep.subr.bf16.mxu0 %v11657_v31  ;;  %v8634_v19 = vld [vmem:[#allocation16 + $0x100] ss:$8 sps:$4 sm:$0xff]  }
 0x9ec   : > { %3360 = vmatprep.subr.bf16.mxu1 %v12097_v13 }
 0x9ee   : > { %8227 = vmatpush3.bf16.msra.mxu0 %v8630_v56 }
 0x9ef   : > { %3361 = vmatpush1.bf16.msra.mxu1 %v3277_v10  ;;  %8232 = vmatprep.subr.bf16.mxu0 %v11657_v31  ;;  %v8638_v10 = vld [vmem:[#allocation16 + $0x140] ss:$8 sps:$4 sm:$0xff]  }
 0x9f0   : > { %3362 = vmatprep.subr.bf16.mxu1 %v12097_v13 }
 0x9f3   : > { %3363 = vmatpush1.bf16.msra.mxu1 %v3278_v51 }
 0x9f4   : > { %8266 = vmatprep.subr.bf16.mxu1 %v11657_v31 }
 0x9f6   : > { %3369 = vmatmul.mubr.bf16.vlgmr.msra.gmra.mrb[96].mxu1 %v7282_v27 }
 0x9f7   : > { %8268 = vmatprep.mubr.msk.bf16.mxu1 %vm9617_vm5, %v11657_v31 }
 0xab4   : > { %v8008_v1 = vpop.f32.mrb[100].mxu0 }
 0xab5   : > { %v8009_v48 = vpop.f32.mrb[101].mxu0 }
 0xab6   : > { %v8010_v43 = vadd.f32 %v8009_v48, %v8008_v1  ;;  %v8011_v24 = vpop.f32.mrb[102].mxu0 }
 0xab7   : > { %v8012_v8 = vpop.f32.mrb[103].mxu0 }
 0xac9   : > { %v3370_v26 = vpop.f32.mrb[96].mxu1 }
 0xaca   : > { %v3371_v32 = vadd.f32 %v8010_v43, %v3370_v26  ;;  %v3372_v46 = vpop.f32.mrb[97].mxu1  ;;  %v3672_v43 = vld [vmem:[#allocation17 + $0x20] ss:$0 sm:$0xff] }
 0xacb   : > { %v3373_v44 = vpop.f32.mrb[98].mxu1 }
 0xacc   : > { %v3376_v57 = vpack.c.bf16 %v3371_v32, %v3371_v32  ;;  %v3374_v29 = vpop.f32.mrb[99].mxu1  ;;  %v3674_v32 = vld [vmem:[#allocation17 + $0x21] ss:$0 sm:$0xff]  ;;  %v7308_v44 = vld [vmem:[#allocation14 + $0x40] ss:$0 sm:$0xff] }
 0xace   : > { %8229 = vmatmul.mubr.msk.bf16.vlgmr.msra.gmra.mrb[104].mxu0 %vm3021_vm9, %v3376_v57 }
 0xacf   : > { %8242 = vmatprep.mubr.msk.bf16.mxu0 %vm9617_vm5, %v11657_v31 }
 0xba1   : > { %v3447_v47 = vpop.f32.mrb[104].mxu0 }
 0xba2   : > { %v3448_v34 = vadd.f32 %v3447_v47, %v3385_v50  ;;  %v8230_v45 = vpop.f32.mrb[105].mxu0  ;;  %v8641_v47 = vld [vmem:[#allocation16 + $0x154] ss:$8 sps:$4 sm:$0xff]  }
 0xba3   : > { %v3450_v4 = vpop.f32.mrb[106].mxu0  ;;  %v3682_v45 = vld [vmem:[#allocation13] sm:$0xf] }
 0xba4   : > { %v3453_v7 = vmax.f32 %v3448_v34, 0.0  ;;  %v8231_v53 = vpop.f32.mrb[107].mxu0  ;;  %v8644_v4 = vld [vmem:[#allocation16 + $0x164] ss:$8 sps:$4 sm:$0xff]  }
 0xba5   : > { %v8647_v53 = vld [vmem:[#allocation16 + $0x174] ss:$8 sps:$4 sm:$0xff]  }
 0xba6   : > { %v3455_v17 = vmul.f32 %v3454_v18, %v3453_v7  ;;  %v8639_v18 = vld [vmem:[#allocation16 + $0x150] ss:$8 sps:$4 sm:$0xff]   ;;  %v8642_v7 = vld [vmem:[#allocation16 + $0x160] ss:$8 sps:$4 sm:$0xff]  }
 0xba8   : > { %v3457_v52 = vadd.f32 %v3456_v40, %v3455_v17  ;;  %v8645_v40 = vld [vmem:[#allocation16 + $0x170] ss:$8 sps:$4 sm:$0xff]   ;;  %v8650_v17 = vld [vmem:[#allocation16 + $0x184] ss:$8 sps:$4 sm:$0xff]  }
 0xbaa   : > { %v3463_v54 = vmul.f32 %v7290_v12, %v3457_v52  ;;  %v3469_v6 = vmul.f32 %v7291_v62, %v3457_v52  ;;  %v3475_v21 = vmul.f32 %v7292_v33, %v3457_v52  ;;  %v3481_v3 = vmul.f32 %v7293_v38, %v3457_v52  ;;  %v8648_v12 = vld [vmem:[#allocation16 + $0x180] ss:$8 sps:$4 sm:$0xff]   ;;  %v8653_v62 = vld [vmem:[#allocation16 + $0x194] ss:$8 sps:$4 sm:$0xff]   ;;  %v8656_v33 = vld [vmem:[#allocation16 + $0x1a4] ss:$8 sps:$4 sm:$0xff]  }
 0xbab   : > { %v3487_v9 = vmul.f32 %v7294_v58, %v3457_v52  ;;  %v3493_v42 = vmul.f32 %v7295_v23, %v3457_v52  ;;  %v3499_v37 = vmul.f32 %v7296_v36, %v3457_v52  ;;  %v3505_v28 = vmul.f32 %v7297_v49, %v3457_v52  ;;  %v8654_v38 = vld [vmem:[#allocation16 + $0x1a0] ss:$8 sps:$4 sm:$0xff]   ;;  %v8665_v58 = vld [vmem:[#allocation19 + $0x4] ss:$16 sps:$4 sm:$0xff]   ;;  %v8668_v23 = vld [vmem:[#allocation19 + $0xc] ss:$16 sps:$4 sm:$0xff]  }
 0xbac   : > { %v3513_v61 = vpack.c.bf16 %v3469_v6, %v3463_v54  ;;  %v3514_v39 = vpack.c.bf16 %v3481_v3, %v3475_v21  ;;  %v3511_v59 = vmul.f32 %v7298_v0, %v3457_v52  ;;  %v8651_v52 = vld [vmem:[#allocation16 + $0x190] ss:$8 sps:$4 sm:$0xff]   ;;  %v8659_v54 = vld [vmem:[#allocation16 + $0x1b4] ss:$8 sps:$4 sm:$0xff]   ;;  %v8660_v21 = vld [vmem:[#allocation16 + $0x1c0] ss:$8 sps:$4 sm:$0xff]  }
 0xbad   : > { %v3515_v11 = vpack.c.bf16 %v3493_v42, %v3487_v9  ;;  %v3516_v41 = vpack.c.bf16 %v3505_v28, %v3499_v37  ;;  %v8657_v6 = vld [vmem:[#allocation16 + $0x1b0] ss:$8 sps:$4 sm:$0xff]   ;;  %v8677_v42 = vld [vmem:[#allocation19 + $0x44] ss:$16 sps:$4 sm:$0xff]  }
 0xbae   : > { %8233 = vmatpush3.bf16.msra.mxu0 %v3513_v61  ;;  %v3517_v30 = vpack.c.bf16 %v3511_v59, %v3511_v59  ;;  %v8662_v61 = vld [vmem:[#allocation16 + $0x1c4] ss:$8 sps:$4 sm:$0xff]   ;;  %v8663_v3 = vld [vmem:[#allocation19] ss:$16 sps:$4 sm:$0xff]  }
 0xbaf   : > { %8234 = vmatprep.subr.bf16.mxu0 %v11657_v31  ;;  %v8669_v9 = vld [vmem:[#allocation19 + $0x20] ss:$16 sps:$4 sm:$0xff]   ;;  %v8683_v49 = vld [vmem:[#allocation19 + $0x64] ss:$16 sps:$4 sm:$0xff]  }
 0xbb0   : > { %v3523_v5 = vsel %vm1044_vm1, %v3517_v30, 0  ;;  %v8675_v36 = vld [vmem:[#allocation19 + $0x40] ss:$16 sps:$4 sm:$0xff]   ;;  %v8695_v28 = vld [vmem:[#allocation19 + $0xa4] ss:$16 sps:$4 sm:$0xff]  }
 0xbb1   : > { %v8681_v0 = vld [vmem:[#allocation19 + $0x60] ss:$16 sps:$4 sm:$0xff]  }
 0xbb2   : > { %8235 = vmatpush3.bf16.msra.mxu0 %v3514_v39  ;;  %v8671_v39 = vld [vmem:[#allocation19 + $0x24] ss:$16 sps:$4 sm:$0xff]   ;;  %v8687_v37 = vld [vmem:[#allocation19 + $0x80] ss:$16 sps:$4 sm:$0xff]  }
 0xbb3   : > { %8236 = vmatprep.subr.bf16.mxu0 %v11657_v31  ;;  %v8693_v59 = vld [vmem:[#allocation19 + $0xa0] ss:$16 sps:$4 sm:$0xff]  }
 0xbb4   : > { %v8699_v30 = vld [vmem:[#allocation19 + $0xc0] ss:$16 sps:$4 sm:$0xff]  }
 0xbb6   : > { %8237 = vmatpush3.bf16.msra.mxu0 %v3515_v11  ;;  %v8689_v11 = vld [vmem:[#allocation19 + $0x84] ss:$16 sps:$4 sm:$0xff]  }
 0xbb7   : > { %8238 = vmatprep.subr.bf16.mxu0 %v11657_v31 }
 0xbba   : > { %8239 = vmatpush3.bf16.msra.mxu0 %v3516_v41  ;;  %v8701_v41 = vld [vmem:[#allocation19 + $0xc4] ss:$16 sps:$4 sm:$0xff]  }
 0xbbb   : > { %8240 = vmatprep.subr.bf16.mxu0 %v11657_v31 }
 0xbbe   : > { %8241 = vmatpush3.bf16.msra.mxu0 %v3523_v5  ;;  %v8707_v5 = vld [vmem:[#allocation19 + $0xe4] ss:$16 sps:$4 sm:$0xff]  }
 0xbbf   : > { %8246 = vmatprep.subr.bf16.mxu0 %v11657_v31 }
 0xbc1   : > { %8243 = vmatmul.mubr.msk.bf16.vlgmr.msra.gmra.mrb[108].mxu0 %vm3518_vm11, %v3512_v22  ;;  %v8705_v22 = vld [vmem:[#allocation19 + $0xe0] ss:$16 sps:$4 sm:$0xff]  }
 0xbc2   : > { %8247 = vmatpush3.bf16.msra.mxu0 %v8631_v35  ;;  %8262 = vmatprep.mubr.msk.bf16.mxu0 %vm9617_vm5, %v11657_v31  ;;  %v8713_v35 = vld [vmem:[#allocation19 + $0x104] ss:$16 sps:$4 sm:$0xff]  }
 0xbc3   : > { %8248 = vmatprep.subr.bf16.mxu0 %v11657_v31 }
 0xbc6   : > { %8249 = vmatpush3.bf16.msra.mxu0 %v8632_v2  ;;  %v8711_v2 = vld [vmem:[#allocation19 + $0x100] ss:$16 sps:$4 sm:$0xff]  }
 0xbc7   : > { %8250 = vmatprep.subr.bf16.mxu0 %v11657_v31 }
 0xbca   : > { %8251 = vmatpush3.bf16.msra.mxu0 %v8633_v63  ;;  %v8719_v63 = vld [vmem:[#allocation19 + $0x124] ss:$16 sps:$4 sm:$0xff]  }
 0xbcb   : > { %8252 = vmatprep.subr.bf16.mxu0 %v11657_v31 }
 0xbce   : > { %8253 = vmatpush3.bf16.msra.mxu0 %v8634_v19  ;;  %v8717_v19 = vld [vmem:[#allocation19 + $0x120] ss:$16 sps:$4 sm:$0xff]  }
 0xbcf   : > { %8254 = vmatprep.subr.bf16.mxu0 %v11657_v31 }
 0xbd2   : > { %8255 = vmatpush3.bf16.msra.mxu0 %v8635_v60 }
 0xbd3   : > { %8256 = vmatprep.subr.bf16.mxu0 %v11657_v31 }
 0xbd6   : > { %8257 = vmatpush3.bf16.msra.mxu0 %v8636_v55  ;;  %v8666_v55 = vld [vmem:[#allocation19 + $0x8] ss:$16 sps:$4 sm:$0xff]  }
 0xbd7   : > { %8258 = vmatprep.subr.bf16.mxu0 %v11657_v31 }
 0xbda   : > { %8259 = vmatpush3.bf16.msra.mxu0 %v8637_v14 }
 0xbdb   : > { %8260 = vmatprep.subr.bf16.mxu0 %v11657_v31 }
 0xbde   : > { %8261 = vmatpush3.bf16.msra.mxu0 %v8638_v10 }
 0xbdf   : > { %5729 = vmatprep.subr.bf16.mxu0 %v8665_v58  ;;  %v8747_v58 = vld [vmem:[#allocation19 + $0x1c0] ss:$16 sps:$4 sm:$0xff]  }
 0xc94   : > { %v3559_v51 = vpop.f32.mrb[108].mxu0 }
 0xc95   : > { %v3565_v20 = vpack.c.bf16 %v3559_v51, %v3559_v51  ;;  %v8244_v25 = vpop.f32.mrb[109].mxu0  ;;  %v8674_v51 = vld [vmem:[#allocation19 + $0x2c] ss:$16 sps:$4 sm:$0xff]  }
 0xc96   : > { %v3562_v16 = vpop.f32.mrb[110].mxu0 }
 0xc97   : > { %v8245_v27 = vpop.f32.mrb[111].mxu0  ;;  %8263 = vmatmul.mubr.bf16.vlgmr.msra.gmra.mrb[112].mxu0 %v3565_v20  ;;  %v8672_v16 = vld [vmem:[#allocation19 + $0x28] ss:$16 sps:$4 sm:$0xff]  }
 0xc98   : > { %5730 = vmatpush1.bf16.msra.mxu0 %v8663_v3  ;;  %v8680_v27 = vld [vmem:[#allocation19 + $0x4c] ss:$16 sps:$4 sm:$0xff]  }
 0xc99   : > { %5731 = vmatprep.subr.bf16.mxu0 %v8671_v39  ;;  %v8752_v3 = vld [vmem:[#allocation19 + $0x1cc] ss:$16 sps:$4 sm:$0xff]   ;;  %v8755_v39 = vld [vmem:[#allocation19 + $0x1e4] ss:$16 sps:$4 sm:$0xff]  }
 0xc9c   : > { %5732 = vmatpush1.bf16.msra.mxu0 %v8669_v9  ;;  %v8758_v9 = vld [vmem:[#allocation19 + $0x1ec] ss:$16 sps:$4 sm:$0xff]  }
 0xc9d   : > { %5733 = vmatprep.subr.bf16.mxu0 %v8677_v42  ;;  %v8753_v42 = vld [vmem:[#allocation19 + $0x1e0] ss:$16 sps:$4 sm:$0xff]  }
 0xca0   : > { %5734 = vmatpush1.bf16.msra.mxu0 %v8675_v36  ;;  %v8756_v36 = vld [vmem:[#allocation19 + $0x1e8] ss:$16 sps:$4 sm:$0xff]  }
 0xca1   : > { %5735 = vmatprep.subr.bf16.mxu0 %v8683_v49  ;;  %v8761_v49 = vld [vmem:[#allocation19 + $0x204] ss:$16 sps:$4 sm:$0xff]  }
 0xca4   : > { %5736 = vmatpush1.bf16.msra.mxu0 %v8681_v0  ;;  %v8764_v0 = vld [vmem:[#allocation19 + $0x20c] ss:$16 sps:$4 sm:$0xff]  }
 0xca5   : > { %5737 = vmatprep.subr.bf16.mxu0 %v8689_v11  ;;  %v3751_v11 = vlaneseq }
 0xca7   : > { %vm3934_vm13 = vcmp.lt.s32.totalorder %v3751_v11, 256 }
 0xca8   : > { %5738 = vmatpush1.bf16.msra.mxu0 %v8687_v37  ;;  %v11696_v37 = vshrl.u32 %v3751_v11, 7  ;;  %v8789_v11 = vld [vmem:[#allocation19 + $0x2a0] ss:$16 sps:$4 sm:$0xff]  }
 0xca9   : > { %5739 = vmatprep.subr.bf16.mxu0 %v8695_v28 }
 0xcaa   : > { %v11699_v28 = vsub.s32 0, %v11696_v37 }
 0xcac   : > { %5740 = vmatpush1.bf16.msra.mxu0 %v8693_v59  ;;  %v3749_v59 = vld [vmem:[#allocation17 + $0x22] ss:$8 sm:$0x3] }
 0xcad   : > { %5741 = vmatprep.subr.bf16.mxu0 %v8701_v41  ;;  %v11702_v41 = vsub.s32 1, %v11696_v37 }
 0xcb0   : > { %5742 = vmatpush1.bf16.msra.mxu0 %v8699_v30  ;;  %v3754_v30 = vrot.slane %v3749_v59, %v11699_v28 }
 0xcb1   : > { %5743 = vmatprep.subr.bf16.mxu0 %v8707_v5  ;;  %v3885_v5 = vld [vmem:[#allocation17 + $0x23] ss:$8 sm:$0x3] }
 0xcb4   : > { %5744 = vmatpush1.bf16.msra.mxu0 %v8705_v22  ;;  %v3758_v22 = vrot.slane %v3749_v59, %v11702_v41  ;;  %v8792_v59 = vld [vmem:[#allocation19 + $0x2a8] ss:$16 sps:$4 sm:$0xff]  }
 0xcb5   : > { %5745 = vmatprep.subr.bf16.mxu0 %v8713_v35 }
 0xcb8   : > { %5746 = vmatpush1.bf16.msra.mxu0 %v8711_v2  ;;  %v3900_v2 = vld [vmem:[#allocation17 + $0x24] ss:$8 sm:$0x3] }
 0xcb9   : > { %5747 = vmatprep.subr.bf16.mxu0 %v8719_v63  ;;  %v9618_v63 = vmov 1966171168  }
 0xcbc   : > { %5748 = vmatpush1.bf16.msra.mxu0 %v8717_v19  ;;  %v3918_v19 = vunpack.c.l.s4 %v9618_v63  ;;  %v8806_v63 = vld [vmem:[#allocation19 + $0x2ec] ss:$16 sps:$4 sm:$0xff]  }
 0xd6a   : > { %v3665_v56 = vpop.f32.mrb[112].mxu0 }
 0xd6b   : > { %v3666_v1 = vadd.f32 %v3665_v56, %v3582_v15  ;;  %v8264_v48 = vpop.f32.mrb[113].mxu0  ;;  %v8678_v15 = vld [vmem:[#allocation19 + $0x48] ss:$16 sps:$4 sm:$0xff]   ;;  %v8686_v56 = vld [vmem:[#allocation19 + $0x6c] ss:$16 sps:$4 sm:$0xff]  }
 0xd6c   : > { %v3668_v24 = vpop.f32.mrb[114].mxu0  ;;  %v8692_v48 = vld [vmem:[#allocation19 + $0x8c] ss:$16 sps:$4 sm:$0xff]  }
 0xd6d   : > { %v3671_v8 = vmax.f32 %v3666_v1, 0.0  ;;  %v8265_v26 = vpop.f32.mrb[115].mxu0  ;;  %v8684_v1 = vld [vmem:[#allocation19 + $0x68] ss:$16 sps:$4 sm:$0xff]   ;;  %v8698_v24 = vld [vmem:[#allocation19 + $0xac] ss:$16 sps:$4 sm:$0xff]  }
 0xd6e   : > { %v8704_v26 = vld [vmem:[#allocation19 + $0xcc] ss:$16 sps:$4 sm:$0xff]  }
 0xd6f   : > { %v3673_v46 = vmul.f32 %v3672_v43, %v3671_v8  ;;  %v8690_v43 = vld [vmem:[#allocation19 + $0x88] ss:$16 sps:$4 sm:$0xff]  }
 0xd70   : > { %v8696_v8 = vld [vmem:[#allocation19 + $0xa8] ss:$16 sps:$4 sm:$0xff]  }
 0xd71   : > { %v3675_v57 = vadd.f32 %v3674_v32, %v3673_v46  ;;  %v8702_v32 = vld [vmem:[#allocation19 + $0xc8] ss:$16 sps:$4 sm:$0xff]   ;;  %v8710_v46 = vld [vmem:[#allocation19 + $0xec] ss:$16 sps:$4 sm:$0xff]  }
 0xd73   : > { %v3681_v29 = vmul.f32 %v7308_v44, %v3675_v57  ;;  %v8708_v44 = vld [vmem:[#allocation19 + $0xe8] ss:$16 sps:$4 sm:$0xff]   ;;  %v8716_v57 = vld [vmem:[#allocation19 + $0x10c] ss:$16 sps:$4 sm:$0xff]  }
 0xd75   : > { %v3683_v50 = vpack.c.bf16 %v3681_v29, %v3681_v29  ;;  %v8714_v29 = vld [vmem:[#allocation19 + $0x108] ss:$16 sps:$4 sm:$0xff]  }
 0xd77   : > { %v3689_v34 = vsel %vm1044_vm1, %v3683_v50, 0  ;;  %v8722_v50 = vld [vmem:[#allocation19 + $0x12c] ss:$16 sps:$4 sm:$0xff]  }
 0xd78   : > { %8267 = vmatpush3.bf16.msra.mxu1 %v3689_v34  ;;  %v8723_v34 = vld [vmem:[#allocation19 + $0x140] ss:$16 sps:$4 sm:$0xff]  }
 0xd79   : > { %3841 = vmatprep.subr.bf16.mxu1 %v8641_v47  ;;  %v8720_v47 = vld [vmem:[#allocation19 + $0x128] ss:$16 sps:$4 sm:$0xff]  }
 0xd7b   : > { %8269 = vmatmul.mubr.msk.bf16.vlgmr.msra.gmra.mrb[100].mxu1 %vm3684_vm12, %v3682_v45  ;;  %v8725_v45 = vld [vmem:[#allocation19 + $0x144] ss:$16 sps:$4 sm:$0xff]  }
 0xd7c   : > { %3842 = vmatpush1.bf16.msra.mxu1 %v8639_v18  ;;  %3873 = vmatprep.mubr.bf16.mxu1 %v12097_v13  ;;  %v8726_v18 = vld [vmem:[#allocation19 + $0x148] ss:$16 sps:$4 sm:$0xff]  }
 0xd7d   : > { %3843 = vmatprep.subr.bf16.mxu1 %v8644_v4  ;;  %v8728_v4 = vld [vmem:[#allocation19 + $0x14c] ss:$16 sps:$4 sm:$0xff]   ;;  %5749 = vmatprep.subr.bf16.mxu0 %v8725_v45 }
 0xd7e   : > { %5750 = vmatpush1.bf16.msra.mxu0 %v8723_v34 }
 0xd80   : > { %3844 = vmatpush1.bf16.msra.mxu1 %v8642_v7  ;;  %v8731_v7 = vld [vmem:[#allocation19 + $0x164] ss:$16 sps:$4 sm:$0xff]  }
 0xd81   : > { %3845 = vmatprep.subr.bf16.mxu1 %v8647_v53  ;;  %v8734_v53 = vld [vmem:[#allocation19 + $0x16c] ss:$16 sps:$4 sm:$0xff]   ;;  %5751 = vmatprep.subr.bf16.mxu0 %v8731_v7  ;;  %v8762_v7 = vld [vmem:[#allocation19 + $0x208] ss:$16 sps:$4 sm:$0xff]  }
 0xd84   : > { %3846 = vmatpush1.bf16.msra.mxu1 %v8645_v40  ;;  %v8729_v40 = vld [vmem:[#allocation19 + $0x160] ss:$16 sps:$4 sm:$0xff]  }
 0xd85   : > { %3847 = vmatprep.subr.bf16.mxu1 %v8650_v17  ;;  %v8732_v17 = vld [vmem:[#allocation19 + $0x168] ss:$16 sps:$4 sm:$0xff]   ;;  %5752 = vmatpush1.bf16.msra.mxu0 %v8729_v40  ;;  %v8767_v40 = vld [vmem:[#allocation19 + $0x224] ss:$16 sps:$4 sm:$0xff]  }
 0xd88   : > { %3848 = vmatpush1.bf16.msra.mxu1 %v8648_v12  ;;  %v8737_v12 = vld [vmem:[#allocation19 + $0x184] ss:$16 sps:$4 sm:$0xff]  }
 0xd89   : > { %3849 = vmatprep.subr.bf16.mxu1 %v8653_v62  ;;  %v8740_v62 = vld [vmem:[#allocation19 + $0x18c] ss:$16 sps:$4 sm:$0xff]   ;;  %5753 = vmatprep.subr.bf16.mxu0 %v8737_v12 }
 0xd8c   : > { %3850 = vmatpush1.bf16.msra.mxu1 %v8651_v52  ;;  %v8735_v52 = vld [vmem:[#allocation19 + $0x180] ss:$16 sps:$4 sm:$0xff]  }
 0xd8d   : > { %3851 = vmatprep.subr.bf16.mxu1 %v8656_v33  ;;  %v8738_v33 = vld [vmem:[#allocation19 + $0x188] ss:$16 sps:$4 sm:$0xff]   ;;  %5754 = vmatpush1.bf16.msra.mxu0 %v8735_v52  ;;  %v8765_v52 = vld [vmem:[#allocation19 + $0x220] ss:$16 sps:$4 sm:$0xff]  }
 0xd90   : > { %3852 = vmatpush1.bf16.msra.mxu1 %v8654_v38  ;;  %v8743_v38 = vld [vmem:[#allocation19 + $0x1a4] ss:$16 sps:$4 sm:$0xff]  }
 0xd91   : > { %3853 = vmatprep.subr.bf16.mxu1 %v8659_v54  ;;  %v8746_v54 = vld [vmem:[#allocation19 + $0x1ac] ss:$16 sps:$4 sm:$0xff]   ;;  %5755 = vmatprep.subr.bf16.mxu0 %v8743_v38  ;;  %v8773_v38 = vld [vmem:[#allocation19 + $0x244] ss:$16 sps:$4 sm:$0xff]  }
 0xd94   : > { %3854 = vmatpush1.bf16.msra.mxu1 %v8657_v6  ;;  %v8741_v6 = vld [vmem:[#allocation19 + $0x1a0] ss:$16 sps:$4 sm:$0xff]  }
 0xd95   : > { %3855 = vmatprep.subr.bf16.mxu1 %v8662_v61  ;;  %v8744_v61 = vld [vmem:[#allocation19 + $0x1a8] ss:$16 sps:$4 sm:$0xff]   ;;  %5756 = vmatpush1.bf16.msra.mxu0 %v8741_v6  ;;  %v8771_v6 = vld [vmem:[#allocation19 + $0x240] ss:$16 sps:$4 sm:$0xff]  }
 0xd98   : > { %3856 = vmatpush1.bf16.msra.mxu1 %v8660_v21  ;;  %v8749_v21 = vld [vmem:[#allocation19 + $0x1c4] ss:$16 sps:$4 sm:$0xff]  }
 0xd99   : > { %5934 = vmatprep.subr.bf16.mxu1 %v8668_v23  ;;  %5757 = vmatprep.subr.bf16.mxu0 %v8749_v21  ;;  %v8750_v23 = vld [vmem:[#allocation19 + $0x1c8] ss:$16 sps:$4 sm:$0xff]   ;;  %v8779_v21 = vld [vmem:[#allocation19 + $0x264] ss:$16 sps:$4 sm:$0xff]  }
 0xd9a   : > { %5758 = vmatpush1.bf16.msra.mxu0 %v8747_v58  ;;  %v8777_v58 = vld [vmem:[#allocation19 + $0x260] ss:$16 sps:$4 sm:$0xff]  }
 0xd9b   : > { %5759 = vmatprep.subr.bf16.mxu0 %v8755_v39  ;;  %v8785_v39 = vld [vmem:[#allocation19 + $0x284] ss:$16 sps:$4 sm:$0xff]  }
 0xd9e   : > { %5760 = vmatpush1.bf16.msra.mxu0 %v8753_v42  ;;  %v8783_v42 = vld [vmem:[#allocation19 + $0x280] ss:$16 sps:$4 sm:$0xff]  }
 0xd9f   : > { %5770 = vmatprep.subr.bf16.mxu0 %v8761_v49  ;;  %v8791_v49 = vld [vmem:[#allocation19 + $0x2a4] ss:$16 sps:$4 sm:$0xff]  }
 0xe4e   : > { %v3725_v60 = vpop.f32.mrb[100].mxu1 }
 0xe4f   : > { %v3731_v14 = vpack.c.bf16 %v3725_v60, %v3725_v60  ;;  %v8270_v10 = vpop.f32.mrb[101].mxu1 }
 0xe50   : > { %v3728_v20 = vpop.f32.mrb[102].mxu1 }
 0xe51   : > { %3874 = vmatmul.mubr.bf16.vlgmr.msra.gmra.mrb[104].mxu1 %v3731_v14  ;;  %v8271_v25 = vpop.f32.mrb[103].mxu1 }
 0xe52   : > { %5935 = vmatpush1.bf16.msra.mxu1 %v8666_v55  ;;  %v3890_v55 = vrot.slane %v3885_v5, %v11699_v28 }
 0xe53   : > { %5936 = vmatprep.subr.bf16.mxu1 %v8674_v51  ;;  %v3894_v51 = vrot.slane %v3885_v5, %v11702_v41  ;;  %v8800_v5 = vld [vmem:[#allocation19 + $0x2cc] ss:$16 sps:$4 sm:$0xff]  }
 0xe56   : > { %5937 = vmatpush1.bf16.msra.mxu1 %v8672_v16  ;;  %v3905_v16 = vrot.slane %v3900_v2, %v11699_v28 }
 0xe57   : > { %5938 = vmatprep.subr.bf16.mxu1 %v8680_v27 }
 0xe5a   : > { %5939 = vmatpush1.bf16.msra.mxu1 %v8678_v15 }
 0xe5b   : > { %5940 = vmatprep.subr.bf16.mxu1 %v8686_v56  ;;  %v3909_v56 = vrot.slane %v3900_v2, %v11702_v41  ;;  %v8803_v2 = vld [vmem:[#allocation19 + $0x2e4] ss:$16 sps:$4 sm:$0xff]  }
 0xe5e   : > { %5941 = vmatpush1.bf16.msra.mxu1 %v8684_v1  ;;  %v3919_v1 = vunpack.c.0.s8 %v3918_v19  ;;  %v8801_v19 = vld [vmem:[#allocation19 + $0x2e0] ss:$16 sps:$4 sm:$0xff]  }
 0xe5f   : > { %5942 = vmatprep.subr.bf16.mxu1 %v8692_v48 }
 0xe62   : > { %5943 = vmatpush1.bf16.msra.mxu1 %v8690_v43 }
 0xe63   : > { %5944 = vmatprep.subr.bf16.mxu1 %v8698_v24 }
 0xe66   : > { %5945 = vmatpush1.bf16.msra.mxu1 %v8696_v8 }
 0xe67   : > { %5946 = vmatprep.subr.bf16.mxu1 %v8704_v26  ;;  %v3922_v26 = vsub.s32 %v3919_v1, %v11696_v37  ;;  %v8819_v1 = vld [vmem:[#allocation19 + $0x340] ss:$16 sps:$4 sm:$0xff]  }
 0xe6a   : > { %5947 = vmatpush1.bf16.msra.mxu1 %v8702_v32 }
 0xe6b   : > { %5948 = vmatprep.subr.bf16.mxu1 %v8710_v46 }
 0xe6e   : > { %5949 = vmatpush1.bf16.msra.mxu1 %v8708_v44 }
 0xe6f   : > { %5950 = vmatprep.subr.bf16.mxu1 %v8716_v57 }
 0xe72   : > { %5951 = vmatpush1.bf16.msra.mxu1 %v8714_v29 }
 0xe73   : > { %5952 = vmatprep.subr.bf16.mxu1 %v8722_v50 }
 0xe76   : > { %5953 = vmatpush1.bf16.msra.mxu1 %v8720_v47 }
 0xe77   : > { %5954 = vmatprep.subr.bf16.mxu1 %v8728_v4  ;;  %v8759_v4 = vld [vmem:[#allocation19 + $0x200] ss:$16 sps:$4 sm:$0xff]  }
 0xe7a   : > { %5955 = vmatpush1.bf16.msra.mxu1 %v8726_v18 }
 0xe7b   : > { %5956 = vmatprep.subr.bf16.mxu1 %v8734_v53 }
 0xe7e   : > { %5957 = vmatpush1.bf16.msra.mxu1 %v8732_v17  ;;  %v8770_v17 = vld [vmem:[#allocation19 + $0x22c] ss:$16 sps:$4 sm:$0xff]  }
 0xe7f   : > { %5958 = vmatprep.subr.bf16.mxu1 %v8740_v62 }
 0xe82   : > { %5959 = vmatpush1.bf16.msra.mxu1 %v8738_v33  ;;  %v8768_v33 = vld [vmem:[#allocation19 + $0x228] ss:$16 sps:$4 sm:$0xff]  }
 0xe83   : > { %5960 = vmatprep.subr.bf16.mxu1 %v8746_v54  ;;  %v8776_v54 = vld [vmem:[#allocation19 + $0x24c] ss:$16 sps:$4 sm:$0xff]  }
 0xe86   : > { %5961 = vmatpush1.bf16.msra.mxu1 %v8744_v61  ;;  %v8774_v61 = vld [vmem:[#allocation19 + $0x248] ss:$16 sps:$4 sm:$0xff]  }
 0xe87   : > { %5962 = vmatprep.subr.bf16.mxu1 %v8752_v3  ;;  %v8782_v3 = vld [vmem:[#allocation19 + $0x26c] ss:$16 sps:$4 sm:$0xff]  }
 0xe8a   : > { %5963 = vmatpush1.bf16.msra.mxu1 %v8750_v23  ;;  %v8780_v23 = vld [vmem:[#allocation19 + $0x268] ss:$16 sps:$4 sm:$0xff]  }
 0xe8b   : > { %5964 = vmatprep.subr.bf16.mxu1 %v8758_v9  ;;  %v8788_v9 = vld [vmem:[#allocation19 + $0x28c] ss:$16 sps:$4 sm:$0xff]  }
 0xe8e   : > { %5965 = vmatpush1.bf16.msra.mxu1 %v8756_v36  ;;  %v8786_v36 = vld [vmem:[#allocation19 + $0x288] ss:$16 sps:$4 sm:$0xff]  }
 0xe8f   : > { %5975 = vmatprep.subr.bf16.mxu1 %v8764_v0  ;;  %v8794_v0 = vld [vmem:[#allocation19 + $0x2ac] ss:$16 sps:$4 sm:$0xff]  }
 0xf24   : > { %v3875_v35 = vpop.f32.mrb[104].mxu1 }
 0xf25   : > { %v3876_v60 = vadd.f32 %v3875_v35, %v3754_v30  ;;  %v3877_v14 = vpop.f32.mrb[105].mxu1  ;;  %v8797_v30 = vld [vmem:[#allocation19 + $0x2c4] ss:$16 sps:$4 sm:$0xff]   ;;  %v8798_v35 = vld [vmem:[#allocation19 + $0x2c8] ss:$16 sps:$4 sm:$0xff]  }
 0xf26   : > { %v3878_v10 = vadd.f32 %v3877_v14, %v3758_v22  ;;  %v3879_v20 = vpop.f32.mrb[106].mxu1  ;;  %v8795_v22 = vld [vmem:[#allocation19 + $0x2c0] ss:$16 sps:$4 sm:$0xff]   ;;  %v8812_v14 = vld [vmem:[#allocation19 + $0x30c] ss:$16 sps:$4 sm:$0xff]  }
 0xf27   : > { %v3882_v25 = vmax.f32 %v3876_v60, 0.0  ;;  %v3880_v27 = vpop.f32.mrb[107].mxu1  ;;  %v8804_v60 = vld [vmem:[#allocation19 + $0x2e8] ss:$16 sps:$4 sm:$0xff]   ;;  %v8815_v20 = vld [vmem:[#allocation19 + $0x324] ss:$16 sps:$4 sm:$0xff]  }
 0xf28   : > { %v3883_v15 = vmax.f32 %v3878_v10, 0.0  ;;  %v8807_v10 = vld [vmem:[#allocation19 + $0x300] ss:$16 sps:$4 sm:$0xff]   ;;  %v8816_v27 = vld [vmem:[#allocation19 + $0x328] ss:$16 sps:$4 sm:$0xff]  }
 0xf29   : > { %v3897_v48 = vmul.f32 %v3890_v55, %v3882_v25  ;;  %v8809_v55 = vld [vmem:[#allocation19 + $0x304] ss:$16 sps:$4 sm:$0xff]   ;;  %v8818_v25 = vld [vmem:[#allocation19 + $0x32c] ss:$16 sps:$4 sm:$0xff]  }
 0xf2a   : > { %v3898_v43 = vmul.f32 %v3894_v51, %v3883_v15  ;;  %v8810_v51 = vld [vmem:[#allocation19 + $0x308] ss:$16 sps:$4 sm:$0xff]   ;;  %v8821_v15 = vld [vmem:[#allocation19 + $0x344] ss:$16 sps:$4 sm:$0xff]  }
 0xf2b   : > { %v3912_v24 = vadd.f32 %v3905_v16, %v3897_v48  ;;  %v8813_v16 = vld [vmem:[#allocation19 + $0x320] ss:$16 sps:$4 sm:$0xff]   ;;  %v8822_v48 = vld [vmem:[#allocation19 + $0x348] ss:$16 sps:$4 sm:$0xff]  }
 0xf2c   : > { %v3913_v8 = vadd.f32 %v3909_v56, %v3898_v43  ;;  %v8824_v56 = vld [vmem:[#allocation19 + $0x34c] ss:$16 sps:$4 sm:$0xff]   ;;  %v8827_v43 = vld [vmem:[#allocation19 + $0x364] ss:$16 sps:$4 sm:$0xff]  }
 0xf2e   : > { %v3916_v32 = vcombine.low %v3912_v24, %v3913_v8  ;;  %v8830_v24 = vld [vmem:[#allocation19 + $0x36c] ss:$16 sps:$4 sm:$0xff]   ;;  %v8825_v8 = vld [vmem:[#allocation19 + $0x360] ss:$16 sps:$4 sm:$0xff]  }
 0xf30   : > { %v3923_v46 = vrot.slane %v3916_v32, %v3922_v26  ;;  %v8833_v32 = vld [vmem:[#allocation19 + $0x384] ss:$16 sps:$4 sm:$0xff]  }
 0xf32   : > { %v3930_v44 = vrot.slane %v3923_v46, %v3922_v26  ;;  %v3938_v57 = vcombine.high %v3923_v46, %v3923_v46  ;;  %v8836_v46 = vld [vmem:[#allocation19 + $0x38c] ss:$16 sps:$4 sm:$0xff]  }
 0xf34   : > { %3936 = vst.msk [vmem:[#allocation2] ss:$8 sm:$0x3] %vm3934_vm13, %v3930_v44  ;;  %v3945_v29 = vrot.slane %v3938_v57, %v3922_v26  ;;  %v3950_v50 = vcombine.high %v3930_v44, %v3930_v44  ;;  %v8828_v26 = vld [vmem:[#allocation19 + $0x368] ss:$16 sps:$4 sm:$0xff]  }
 0xf35   : > { %v8831_v44 = vld [vmem:[#allocation19 + $0x380] ss:$16 sps:$4 sm:$0xff]   ;;  %v8834_v57 = vld [vmem:[#allocation19 + $0x388] ss:$16 sps:$4 sm:$0xff]  }
 0xf36   : > { %3948 = vst.msk [vmem:[#allocation2 + $0x10] ss:$8 sm:$0x3] %vm3934_vm13, %v3945_v29  ;;  %3953 = vst.msk [vmem:[#allocation2 + $0x20] ss:$8 sm:$0x3] %vm3934_vm13, %v3950_v50  ;;  %v3955_v47 = vcombine.high %v3945_v29, %v3945_v29 }
 0xf37   : > { %v8839_v29 = vld [vmem:[#allocation19 + $0x3a4] ss:$16 sps:$4 sm:$0xff]   ;;  %v8842_v50 = vld [vmem:[#allocation19 + $0x3ac] ss:$16 sps:$4 sm:$0xff]  }
 0xf38   : > { %3958 = vst.msk [vmem:[#allocation2 + $0x30] ss:$8 sm:$0x3] %vm3934_vm13, %v3955_v47  ;;  %v8837_v47 = vld [vmem:[#allocation19 + $0x3a0] ss:$16 sps:$4 sm:$0xff]  }
 0xf3b   : > { %v3962_v34 = vld [vmem:[#allocation2 + $0x8] sm:$0xff]  ;;  %v3961_v45 = vld [vmem:[#allocation2] sm:$0xff] }
 0xf3c   : > { %v3971_v18 = vpack.c.bf16 %v3962_v34, %v3962_v34  ;;  %v3970_v53 = vpack.c.bf16 %v3961_v45, %v3961_v45  ;;  %v8840_v34 = vld [vmem:[#allocation19 + $0x3a8] ss:$16 sps:$4 sm:$0xff]   ;;  %v8845_v45 = vld [vmem:[#allocation19 + $0x3c4] ss:$16 sps:$4 sm:$0xff]  }
 0xf3d   : > { %v3964_v12 = vld [vmem:[#allocation2 + $0x18] sm:$0xff] }
 0xf3e   : > { %5761 = vmatprep.mubr.bf16.mxu0 %v3971_v18  ;;  %5966 = vmatprep.mubr.bf16.mxu1 %v3971_v18  ;;  %v3973_v62 = vpack.c.bf16 %v3964_v12, %v3964_v12  ;;  %v8848_v18 = vld [vmem:[#allocation19 + $0x3cc] ss:$16 sps:$4 sm:$0xff]   ;;  %v8852_v12 = vld [vmem:[#allocation19 + $0x3e8] ss:$16 sps:$4 sm:$0xff]  }
 0xf3f   : > { %5762 = vmatmul.mubr.bf16.vlgmr.msra.gmra.mrb[116].mxu0 %v3970_v53  ;;  %5967 = vmatmul.mubr.bf16.vlgmr.msra.gmra.mrb[108].mxu1 %v3970_v53  ;;  %v8851_v53 = vld [vmem:[#allocation19 + $0x3e4] ss:$16 sps:$4 sm:$0xff]  }
 0xf40   : > { %5771 = vmatpush1.bf16.msra.mxu0 %v8759_v4  ;;  %5976 = vmatpush1.bf16.msra.mxu1 %v8762_v7  ;;  %v8843_v4 = vld [vmem:[#allocation19 + $0x3c0] ss:$16 sps:$4 sm:$0xff]   ;;  %v8846_v7 = vld [vmem:[#allocation19 + $0x3c8] ss:$16 sps:$4 sm:$0xff]  }
 0xf41   : > { %5772 = vmatprep.subr.bf16.mxu0 %v8767_v40  ;;  %5977 = vmatprep.subr.bf16.mxu1 %v8770_v17  ;;  %v8854_v40 = vld [vmem:[#allocation19 + $0x3ec] ss:$16 sps:$4 sm:$0xff]   ;;  %v8849_v17 = vld [vmem:[#allocation19 + $0x3e0] ss:$16 sps:$4 sm:$0xff]  }
 0xf42   : > { %5802 = vmatprep.mubr.bf16.mxu0 %v3973_v62  ;;  %6007 = vmatprep.mubr.bf16.mxu1 %v3973_v62  ;;  %v8857_v62 = vld [vmem:[#allocation19 + $0x404] ss:$16 sps:$4 sm:$0xff]  }
 0xf44   : > { %5773 = vmatpush1.bf16.msra.mxu0 %v8765_v52  ;;  %5978 = vmatpush1.bf16.msra.mxu1 %v8768_v33  ;;  %v8860_v52 = vld [vmem:[#allocation19 + $0x40c] ss:$16 sps:$4 sm:$0xff]  }
 0xf45   : > { %5774 = vmatprep.subr.bf16.mxu0 %v8773_v38  ;;  %5979 = vmatprep.subr.bf16.mxu1 %v8776_v54  ;;  %v3963_v33 = vld [vmem:[#allocation2 + $0x10] sm:$0xff]  ;;  %v3966_v38 = vld [vmem:[#allocation2 + $0x28] sm:$0xff] }
 0xf46   : > { %v8855_v54 = vld [vmem:[#allocation19 + $0x400] ss:$16 sps:$4 sm:$0xff]  }
 0xf48   : > { %5775 = vmatpush1.bf16.msra.mxu0 %v8771_v6  ;;  %5980 = vmatpush1.bf16.msra.mxu1 %v8774_v61  ;;  %v3972_v6 = vpack.c.bf16 %v3963_v33, %v3963_v33  ;;  %v8858_v61 = vld [vmem:[#allocation19 + $0x408] ss:$16 sps:$4 sm:$0xff]   ;;  %v8941_v33 = vld [vmem:[#allocation19 + $0x5c4] ss:$16 sps:$4 sm:$0xff]  }
 0xf49   : > { %5776 = vmatprep.subr.bf16.mxu0 %v8779_v21  ;;  %5981 = vmatprep.subr.bf16.mxu1 %v8782_v3  ;;  %v3975_v21 = vpack.c.bf16 %v3966_v38, %v3966_v38  ;;  %v8863_v3 = vld [vmem:[#allocation19 + $0x424] ss:$16 sps:$4 sm:$0xff]   ;;  %v8944_v38 = vld [vmem:[#allocation19 + $0x5cc] ss:$16 sps:$4 sm:$0xff]  }
 0xf4c   : > { %5777 = vmatpush1.bf16.msra.mxu0 %v8777_v58  ;;  %5982 = vmatpush1.bf16.msra.mxu1 %v8780_v23  ;;  %v8866_v58 = vld [vmem:[#allocation19 + $0x42c] ss:$16 sps:$4 sm:$0xff]   ;;  %v8861_v23 = vld [vmem:[#allocation19 + $0x420] ss:$16 sps:$4 sm:$0xff]  }
 0xf4d   : > { %5778 = vmatprep.subr.bf16.mxu0 %v8785_v39  ;;  %5983 = vmatprep.subr.bf16.mxu1 %v8788_v9  ;;  %v8864_v39 = vld [vmem:[#allocation19 + $0x428] ss:$16 sps:$4 sm:$0xff]   ;;  %v8869_v9 = vld [vmem:[#allocation19 + $0x444] ss:$16 sps:$4 sm:$0xff]  }
 0xf50   : > { %5779 = vmatpush1.bf16.msra.mxu0 %v8783_v42  ;;  %5984 = vmatpush1.bf16.msra.mxu1 %v8786_v36  ;;  %v8872_v42 = vld [vmem:[#allocation19 + $0x44c] ss:$16 sps:$4 sm:$0xff]   ;;  %v8867_v36 = vld [vmem:[#allocation19 + $0x440] ss:$16 sps:$4 sm:$0xff]  }
 0xf51   : > { %5780 = vmatprep.subr.bf16.mxu0 %v8791_v49  ;;  %5985 = vmatprep.subr.bf16.mxu1 %v8794_v0  ;;  %v8870_v49 = vld [vmem:[#allocation19 + $0x448] ss:$16 sps:$4 sm:$0xff]   ;;  %v8875_v0 = vld [vmem:[#allocation19 + $0x464] ss:$16 sps:$4 sm:$0xff]  }
 0xf54   : > { %5781 = vmatpush1.bf16.msra.mxu0 %v8789_v11  ;;  %5986 = vmatpush1.bf16.msra.mxu1 %v8792_v59  ;;  %v8878_v11 = vld [vmem:[#allocation19 + $0x46c] ss:$16 sps:$4 sm:$0xff]   ;;  %v8873_v59 = vld [vmem:[#allocation19 + $0x460] ss:$16 sps:$4 sm:$0xff]  }
 0xf55   : > { %5782 = vmatprep.subr.bf16.mxu0 %v8797_v30  ;;  %5987 = vmatprep.subr.bf16.mxu1 %v8800_v5  ;;  %v8876_v30 = vld [vmem:[#allocation19 + $0x468] ss:$16 sps:$4 sm:$0xff]   ;;  %v8881_v5 = vld [vmem:[#allocation19 + $0x484] ss:$16 sps:$4 sm:$0xff]  }
 0xf58   : > { %5783 = vmatpush1.bf16.msra.mxu0 %v8795_v22  ;;  %5988 = vmatpush1.bf16.msra.mxu1 %v8798_v35  ;;  %v8884_v22 = vld [vmem:[#allocation19 + $0x48c] ss:$16 sps:$4 sm:$0xff]   ;;  %v8879_v35 = vld [vmem:[#allocation19 + $0x480] ss:$16 sps:$4 sm:$0xff]  }
 0xf59   : > { %5784 = vmatprep.subr.bf16.mxu0 %v8803_v2  ;;  %5989 = vmatprep.subr.bf16.mxu1 %v8806_v63  ;;  %v8882_v2 = vld [vmem:[#allocation19 + $0x488] ss:$16 sps:$4 sm:$0xff]   ;;  %v8887_v63 = vld [vmem:[#allocation19 + $0x4a4] ss:$16 sps:$4 sm:$0xff]  }
 0xf5c   : > { %5785 = vmatpush1.bf16.msra.mxu0 %v8801_v19  ;;  %5990 = vmatpush1.bf16.msra.mxu1 %v8804_v60  ;;  %v8890_v19 = vld [vmem:[#allocation19 + $0x4ac] ss:$16 sps:$4 sm:$0xff]   ;;  %v8885_v60 = vld [vmem:[#allocation19 + $0x4a0] ss:$16 sps:$4 sm:$0xff]  }
 0xf5d   : > { %5786 = vmatprep.subr.bf16.mxu0 %v8809_v55  ;;  %5991 = vmatprep.subr.bf16.mxu1 %v8812_v14  ;;  %v8888_v55 = vld [vmem:[#allocation19 + $0x4a8] ss:$16 sps:$4 sm:$0xff]   ;;  %v8893_v14 = vld [vmem:[#allocation19 + $0x4c4] ss:$16 sps:$4 sm:$0xff]  }
 0xf60   : > { %5787 = vmatpush1.bf16.msra.mxu0 %v8807_v10  ;;  %5992 = vmatpush1.bf16.msra.mxu1 %v8810_v51  ;;  %v8896_v10 = vld [vmem:[#allocation19 + $0x4cc] ss:$16 sps:$4 sm:$0xff]   ;;  %v8891_v51 = vld [vmem:[#allocation19 + $0x4c0] ss:$16 sps:$4 sm:$0xff]  }
 0xf61   : > { %5788 = vmatprep.subr.bf16.mxu0 %v8815_v20  ;;  %5993 = vmatprep.subr.bf16.mxu1 %v8818_v25  ;;  %v8894_v20 = vld [vmem:[#allocation19 + $0x4c8] ss:$16 sps:$4 sm:$0xff]   ;;  %v8899_v25 = vld [vmem:[#allocation19 + $0x4e4] ss:$16 sps:$4 sm:$0xff]  }
 0xf64   : > { %5789 = vmatpush1.bf16.msra.mxu0 %v8813_v16  ;;  %5994 = vmatpush1.bf16.msra.mxu1 %v8816_v27  ;;  %v8902_v16 = vld [vmem:[#allocation19 + $0x4ec] ss:$16 sps:$4 sm:$0xff]   ;;  %v8897_v27 = vld [vmem:[#allocation19 + $0x4e0] ss:$16 sps:$4 sm:$0xff]  }
 0xf65   : > { %5790 = vmatprep.subr.bf16.mxu0 %v8821_v15  ;;  %5995 = vmatprep.subr.bf16.mxu1 %v8824_v56  ;;  %v8900_v15 = vld [vmem:[#allocation19 + $0x4e8] ss:$16 sps:$4 sm:$0xff]   ;;  %v8905_v56 = vld [vmem:[#allocation19 + $0x504] ss:$16 sps:$4 sm:$0xff]  }
 0xf68   : > { %5791 = vmatpush1.bf16.msra.mxu0 %v8819_v1  ;;  %5996 = vmatpush1.bf16.msra.mxu1 %v8822_v48  ;;  %v8908_v1 = vld [vmem:[#allocation19 + $0x50c] ss:$16 sps:$4 sm:$0xff]   ;;  %v8903_v48 = vld [vmem:[#allocation19 + $0x500] ss:$16 sps:$4 sm:$0xff]  }
 0xf69   : > { %5792 = vmatprep.subr.bf16.mxu0 %v8827_v43  ;;  %5997 = vmatprep.subr.bf16.mxu1 %v8830_v24  ;;  %v8906_v43 = vld [vmem:[#allocation19 + $0x508] ss:$16 sps:$4 sm:$0xff]   ;;  %v8911_v24 = vld [vmem:[#allocation19 + $0x524] ss:$16 sps:$4 sm:$0xff]  }
 0xf6c   : > { %5793 = vmatpush1.bf16.msra.mxu0 %v8825_v8  ;;  %5998 = vmatpush1.bf16.msra.mxu1 %v8828_v26  ;;  %v8914_v8 = vld [vmem:[#allocation19 + $0x52c] ss:$16 sps:$4 sm:$0xff]   ;;  %v8909_v26 = vld [vmem:[#allocation19 + $0x520] ss:$16 sps:$4 sm:$0xff]  }
 0xf6d   : > { %5794 = vmatprep.subr.bf16.mxu0 %v8833_v32  ;;  %5999 = vmatprep.subr.bf16.mxu1 %v8836_v46  ;;  %v11711_v32 = vld [vmem:[#allocation23 + $0x6] ss:$0 sm:$0xff]  ;;  %v8912_v46 = vld [vmem:[#allocation19 + $0x528] ss:$16 sps:$4 sm:$0xff]  }
 0xf6e   : > { %6146 = vperm.xlu0 %8511, %v11711_v32  }
 0xf70   : > { %5795 = vmatpush1.bf16.msra.mxu0 %v8831_v44  ;;  %6000 = vmatpush1.bf16.msra.mxu1 %v8834_v57  ;;  %v8917_v44 = vld [vmem:[#allocation19 + $0x544] ss:$16 sps:$4 sm:$0xff]   ;;  %v8920_v57 = vld [vmem:[#allocation19 + $0x54c] ss:$16 sps:$4 sm:$0xff]  }
 0xf71   : > { %5796 = vmatprep.subr.bf16.mxu0 %v8839_v29  ;;  %6001 = vmatprep.subr.bf16.mxu1 %v8842_v50  ;;  %v8915_v29 = vld [vmem:[#allocation19 + $0x540] ss:$16 sps:$4 sm:$0xff]   ;;  %v8918_v50 = vld [vmem:[#allocation19 + $0x548] ss:$16 sps:$4 sm:$0xff]  }
 0xf74   : > { %5797 = vmatpush1.bf16.msra.mxu0 %v8837_v47  ;;  %6002 = vmatpush1.bf16.msra.mxu1 %v8840_v34  ;;  %v8923_v47 = vld [vmem:[#allocation19 + $0x564] ss:$16 sps:$4 sm:$0xff]   ;;  %v8926_v34 = vld [vmem:[#allocation19 + $0x56c] ss:$16 sps:$4 sm:$0xff]  }
 0xf75   : > { %5798 = vmatprep.subr.bf16.mxu0 %v8845_v45  ;;  %6003 = vmatprep.subr.bf16.mxu1 %v8848_v18  ;;  %v8921_v45 = vld [vmem:[#allocation19 + $0x560] ss:$16 sps:$4 sm:$0xff]   ;;  %v8924_v18 = vld [vmem:[#allocation19 + $0x568] ss:$16 sps:$4 sm:$0xff]  }
 0xf78   : > { %5799 = vmatpush1.bf16.msra.mxu0 %v8843_v4  ;;  %6004 = vmatpush1.bf16.msra.mxu1 %v8846_v7  ;;  %v8929_v4 = vld [vmem:[#allocation19 + $0x584] ss:$16 sps:$4 sm:$0xff]   ;;  %v8932_v7 = vld [vmem:[#allocation19 + $0x58c] ss:$16 sps:$4 sm:$0xff]  }
 0xf79   : > { %5800 = vmatprep.subr.bf16.mxu0 %v8851_v53  ;;  %6005 = vmatprep.subr.bf16.mxu1 %v8854_v40  ;;  %v8927_v53 = vld [vmem:[#allocation19 + $0x580] ss:$16 sps:$4 sm:$0xff]   ;;  %v8930_v40 = vld [vmem:[#allocation19 + $0x588] ss:$16 sps:$4 sm:$0xff]  }
 0xf7c   : > { %5801 = vmatpush1.bf16.msra.mxu0 %v8849_v17  ;;  %6006 = vmatpush1.bf16.msra.mxu1 %v8852_v12  ;;  %v8935_v17 = vld [vmem:[#allocation19 + $0x5a4] ss:$16 sps:$4 sm:$0xff]   ;;  %v8938_v12 = vld [vmem:[#allocation19 + $0x5ac] ss:$16 sps:$4 sm:$0xff]  }
 0xf7d   : > { %5811 = vmatprep.subr.bf16.mxu0 %v8857_v62  ;;  %6016 = vmatprep.subr.bf16.mxu1 %v8860_v52  ;;  %v8933_v62 = vld [vmem:[#allocation19 + $0x5a0] ss:$16 sps:$4 sm:$0xff]   ;;  %v8936_v52 = vld [vmem:[#allocation19 + $0x5a8] ss:$16 sps:$4 sm:$0xff]  }
 0xf7f   : > { %5803 = vmatmul.mubr.bf16.vlgmr.msra.gmra.mrb[116].mxu0 %v3972_v6  ;;  %6008 = vmatmul.mubr.bf16.vlgmr.msra.gmra.mrb[108].mxu1 %v3972_v6  ;;  %v8942_v6 = vld [vmem:[#allocation19 + $0x5c8] ss:$16 sps:$4 sm:$0xff]  }
 0xf80   : > { %5812 = vmatpush1.bf16.msra.mxu0 %v8855_v54  ;;  %5843 = vmatprep.mubr.bf16.mxu0 %v3975_v21  ;;  %v8939_v54 = vld [vmem:[#allocation19 + $0x5c0] ss:$16 sps:$4 sm:$0xff]  }
 0xf81   : > { %6017 = vmatpush1.bf16.msra.mxu1 %v8858_v61  ;;  %6048 = vmatprep.mubr.bf16.mxu1 %v3975_v21  ;;  %v8947_v61 = vld [vmem:[#allocation19 + $0x5e4] ss:$16 sps:$4 sm:$0xff]   ;;  %v8950_v21 = vld [vmem:[#allocation19 + $0x5ec] ss:$16 sps:$4 sm:$0xff]  }
 0xf82   : > { %5813 = vmatprep.subr.bf16.mxu0 %v8863_v3  ;;  %6018 = vmatprep.subr.bf16.mxu1 %v8866_v58  ;;  %v8945_v3 = vld [vmem:[#allocation19 + $0x5e0] ss:$16 sps:$4 sm:$0xff]   ;;  %v8948_v58 = vld [vmem:[#allocation19 + $0x5e8] ss:$16 sps:$4 sm:$0xff]  }
 0xf84   : > { %5814 = vmatpush1.bf16.msra.mxu0 %v8861_v23  ;;  %v8953_v23 = vld [vmem:[#allocation19 + $0x604] ss:$16 sps:$4 sm:$0xff]  }
 0xf85   : > { %6019 = vmatpush1.bf16.msra.mxu1 %v8864_v39  ;;  %5815 = vmatprep.subr.bf16.mxu0 %v8869_v9  ;;  %v3965_v39 = vld [vmem:[#allocation2 + $0x20] sm:$0xff] }
 0xf86   : > { %6020 = vmatprep.subr.bf16.mxu1 %v8872_v42  ;;  %v8956_v9 = vld [vmem:[#allocation19 + $0x60c] ss:$16 sps:$4 sm:$0xff]   ;;  %v8951_v42 = vld [vmem:[#allocation19 + $0x600] ss:$16 sps:$4 sm:$0xff]  }
 0xf88   : > { %5816 = vmatpush1.bf16.msra.mxu0 %v8867_v36  ;;  %v3968_v36 = vld [vmem:[#allocation2 + $0x38] sm:$0xff] }
 0xf89   : > { %6021 = vmatpush1.bf16.msra.mxu1 %v8870_v49  ;;  %5817 = vmatprep.subr.bf16.mxu0 %v8875_v0  ;;  %v3974_v49 = vpack.c.bf16 %v3965_v39, %v3965_v39  ;;  %v8954_v0 = vld [vmem:[#allocation19 + $0x608] ss:$16 sps:$4 sm:$0xff]  }
 0xf8a   : > { %6022 = vmatprep.subr.bf16.mxu1 %v8878_v11  ;;  %v8959_v11 = vld [vmem:[#allocation19 + $0x624] ss:$16 sps:$4 sm:$0xff]   ;;  %v9032_v39 = vld [vmem:[#allocation19 + $0x7a8] ss:$16 sps:$4 sm:$0xff]  }
 0xf8c   : > { %5818 = vmatpush1.bf16.msra.mxu0 %v8873_v59  ;;  %v3977_v59 = vpack.c.bf16 %v3968_v36, %v3968_v36  ;;  %v9035_v36 = vld [vmem:[#allocation19 + $0x7c0] ss:$16 sps:$4 sm:$0xff]  }
 0xf8d   : > { %6023 = vmatpush1.bf16.msra.mxu1 %v8876_v30  ;;  %5819 = vmatprep.subr.bf16.mxu0 %v8881_v5  ;;  %v8962_v30 = vld [vmem:[#allocation19 + $0x62c] ss:$16 sps:$4 sm:$0xff]   ;;  %v8957_v5 = vld [vmem:[#allocation19 + $0x620] ss:$16 sps:$4 sm:$0xff]  }
 0xf8e   : > { %6024 = vmatprep.subr.bf16.mxu1 %v8884_v22  ;;  %v8960_v22 = vld [vmem:[#allocation19 + $0x628] ss:$16 sps:$4 sm:$0xff]  }
 0xf90   : > { %5820 = vmatpush1.bf16.msra.mxu0 %v8879_v35  ;;  %v8965_v35 = vld [vmem:[#allocation19 + $0x644] ss:$16 sps:$4 sm:$0xff]  }
 0xf91   : > { %6025 = vmatpush1.bf16.msra.mxu1 %v8882_v2  ;;  %5821 = vmatprep.subr.bf16.mxu0 %v8887_v63  ;;  %v8968_v2 = vld [vmem:[#allocation19 + $0x64c] ss:$16 sps:$4 sm:$0xff]   ;;  %v8963_v63 = vld [vmem:[#allocation19 + $0x640] ss:$16 sps:$4 sm:$0xff]  }
 0xf92   : > { %6026 = vmatprep.subr.bf16.mxu1 %v8890_v19  ;;  %v8966_v19 = vld [vmem:[#allocation19 + $0x648] ss:$16 sps:$4 sm:$0xff]  }
 0xf94   : > { %5822 = vmatpush1.bf16.msra.mxu0 %v8885_v60  ;;  %v8971_v60 = vld [vmem:[#allocation19 + $0x664] ss:$16 sps:$4 sm:$0xff]  }
 0xf95   : > { %6027 = vmatpush1.bf16.msra.mxu1 %v8888_v55  ;;  %5823 = vmatprep.subr.bf16.mxu0 %v8893_v14  ;;  %v8974_v55 = vld [vmem:[#allocation19 + $0x66c] ss:$16 sps:$4 sm:$0xff]   ;;  %v8969_v14 = vld [vmem:[#allocation19 + $0x660] ss:$16 sps:$4 sm:$0xff]  }
 0xf96   : > { %6028 = vmatprep.subr.bf16.mxu1 %v8896_v10  ;;  %v8972_v10 = vld [vmem:[#allocation19 + $0x668] ss:$16 sps:$4 sm:$0xff]  }
 0xf98   : > { %5824 = vmatpush1.bf16.msra.mxu0 %v8891_v51  ;;  %v8977_v51 = vld [vmem:[#allocation19 + $0x684] ss:$16 sps:$4 sm:$0xff]  }
 0xf99   : > { %6029 = vmatpush1.bf16.msra.mxu1 %v8894_v20  ;;  %5825 = vmatprep.subr.bf16.mxu0 %v8899_v25  ;;  %v8980_v20 = vld [vmem:[#allocation19 + $0x68c] ss:$16 sps:$4 sm:$0xff]   ;;  %v8975_v25 = vld [vmem:[#allocation19 + $0x680] ss:$16 sps:$4 sm:$0xff]  }
 0xf9a   : > { %6030 = vmatprep.subr.bf16.mxu1 %v8902_v16  ;;  %v8978_v16 = vld [vmem:[#allocation19 + $0x688] ss:$16 sps:$4 sm:$0xff]  }
 0xf9c   : > { %5826 = vmatpush1.bf16.msra.mxu0 %v8897_v27  ;;  %v8983_v27 = vld [vmem:[#allocation19 + $0x6a4] ss:$16 sps:$4 sm:$0xff]  }
 0xf9d   : > { %6031 = vmatpush1.bf16.msra.mxu1 %v8900_v15  ;;  %5827 = vmatprep.subr.bf16.mxu0 %v8905_v56  ;;  %v8986_v15 = vld [vmem:[#allocation19 + $0x6ac] ss:$16 sps:$4 sm:$0xff]   ;;  %v8981_v56 = vld [vmem:[#allocation19 + $0x6a0] ss:$16 sps:$4 sm:$0xff]  }
 0xf9e   : > { %6032 = vmatprep.subr.bf16.mxu1 %v8908_v1  ;;  %v8984_v1 = vld [vmem:[#allocation19 + $0x6a8] ss:$16 sps:$4 sm:$0xff]  }
 0xfa0   : > { %5828 = vmatpush1.bf16.msra.mxu0 %v8903_v48  ;;  %v8989_v48 = vld [vmem:[#allocation19 + $0x6c4] ss:$16 sps:$4 sm:$0xff]  }
 0xfa1   : > { %6033 = vmatpush1.bf16.msra.mxu1 %v8906_v43  ;;  %5829 = vmatprep.subr.bf16.mxu0 %v8911_v24  ;;  %v8992_v43 = vld [vmem:[#allocation19 + $0x6cc] ss:$16 sps:$4 sm:$0xff]   ;;  %v8987_v24 = vld [vmem:[#allocation19 + $0x6c0] ss:$16 sps:$4 sm:$0xff]  }
 0xfa2   : > { %6034 = vmatprep.subr.bf16.mxu1 %v8914_v8  ;;  %v8990_v8 = vld [vmem:[#allocation19 + $0x6c8] ss:$16 sps:$4 sm:$0xff]  }
 0xfa4   : > { %5830 = vmatpush1.bf16.msra.mxu0 %v8909_v26  ;;  %v8995_v26 = vld [vmem:[#allocation19 + $0x6e4] ss:$16 sps:$4 sm:$0xff]  }
 0xfa5   : > { %6035 = vmatpush1.bf16.msra.mxu1 %v8912_v46  ;;  %5831 = vmatprep.subr.bf16.mxu0 %v8917_v44  ;;  %v8998_v46 = vld [vmem:[#allocation19 + $0x6ec] ss:$16 sps:$4 sm:$0xff]   ;;  %v8993_v44 = vld [vmem:[#allocation19 + $0x6e0] ss:$16 sps:$4 sm:$0xff]  }
 0xfa6   : > { %6036 = vmatprep.subr.bf16.mxu1 %v8920_v57  ;;  %v8996_v57 = vld [vmem:[#allocation19 + $0x6e8] ss:$16 sps:$4 sm:$0xff]  }
 0xfa8   : > { %5832 = vmatpush1.bf16.msra.mxu0 %v8915_v29  ;;  %v9001_v29 = vld [vmem:[#allocation19 + $0x704] ss:$16 sps:$4 sm:$0xff]  }
 0xfa9   : > { %6037 = vmatpush1.bf16.msra.mxu1 %v8918_v50  ;;  %5833 = vmatprep.subr.bf16.mxu0 %v8923_v47  ;;  %v9004_v50 = vld [vmem:[#allocation19 + $0x70c] ss:$16 sps:$4 sm:$0xff]   ;;  %v8999_v47 = vld [vmem:[#allocation19 + $0x700] ss:$16 sps:$4 sm:$0xff]  }
 0xfaa   : > { %6038 = vmatprep.subr.bf16.mxu1 %v8926_v34  ;;  %v9002_v34 = vld [vmem:[#allocation19 + $0x708] ss:$16 sps:$4 sm:$0xff]  }
 0xfac   : > { %5834 = vmatpush1.bf16.msra.mxu0 %v8921_v45  ;;  %v9007_v45 = vld [vmem:[#allocation19 + $0x724] ss:$16 sps:$4 sm:$0xff]  }
 0xfad   : > { %6039 = vmatpush1.bf16.msra.mxu1 %v8924_v18  ;;  %5835 = vmatprep.subr.bf16.mxu0 %v8929_v4  ;;  %v9010_v18 = vld [vmem:[#allocation19 + $0x72c] ss:$16 sps:$4 sm:$0xff]   ;;  %v9005_v4 = vld [vmem:[#allocation19 + $0x720] ss:$16 sps:$4 sm:$0xff]  }
 0xfae   : > { %6040 = vmatprep.subr.bf16.mxu1 %v8932_v7  ;;  %v9008_v7 = vld [vmem:[#allocation19 + $0x728] ss:$16 sps:$4 sm:$0xff]  }
 0xfb0   : > { %5836 = vmatpush1.bf16.msra.mxu0 %v8927_v53  ;;  %v9013_v53 = vld [vmem:[#allocation19 + $0x744] ss:$16 sps:$4 sm:$0xff]  }
 0xfb1   : > { %6041 = vmatpush1.bf16.msra.mxu1 %v8930_v40  ;;  %5837 = vmatprep.subr.bf16.mxu0 %v8935_v17  ;;  %v9016_v40 = vld [vmem:[#allocation19 + $0x74c] ss:$16 sps:$4 sm:$0xff]   ;;  %v9011_v17 = vld [vmem:[#allocation19 + $0x740] ss:$16 sps:$4 sm:$0xff]  }
 0xfb2   : > { %6042 = vmatprep.subr.bf16.mxu1 %v8938_v12  ;;  %v9014_v12 = vld [vmem:[#allocation19 + $0x748] ss:$16 sps:$4 sm:$0xff]  }
 0xfb4   : > { %5838 = vmatpush1.bf16.msra.mxu0 %v8933_v62  ;;  %v9019_v62 = vld [vmem:[#allocation19 + $0x764] ss:$16 sps:$4 sm:$0xff]  }
 0xfb5   : > { %6043 = vmatpush1.bf16.msra.mxu1 %v8936_v52  ;;  %5839 = vmatprep.subr.bf16.mxu0 %v8941_v33  ;;  %v9022_v52 = vld [vmem:[#allocation19 + $0x76c] ss:$16 sps:$4 sm:$0xff]   ;;  %v9017_v33 = vld [vmem:[#allocation19 + $0x760] ss:$16 sps:$4 sm:$0xff]  }
 0xfb6   : > { %6044 = vmatprep.subr.bf16.mxu1 %v8944_v38  ;;  %v9020_v38 = vld [vmem:[#allocation19 + $0x768] ss:$16 sps:$4 sm:$0xff]  }
 0xfb8   : > { %5840 = vmatpush1.bf16.msra.mxu0 %v8939_v54  ;;  %v9025_v54 = vld [vmem:[#allocation19 + $0x784] ss:$16 sps:$4 sm:$0xff]  }
 0xfb9   : > { %6045 = vmatpush1.bf16.msra.mxu1 %v8942_v6  ;;  %5841 = vmatprep.subr.bf16.mxu0 %v8947_v61  ;;  %v9028_v6 = vld [vmem:[#allocation19 + $0x78c] ss:$16 sps:$4 sm:$0xff]   ;;  %v9023_v61 = vld [vmem:[#allocation19 + $0x780] ss:$16 sps:$4 sm:$0xff]  }
 0xfba   : > { %6046 = vmatprep.subr.bf16.mxu1 %v8950_v21  ;;  %v9026_v21 = vld [vmem:[#allocation19 + $0x788] ss:$16 sps:$4 sm:$0xff]  }
 0xfbc   : > { %5842 = vmatpush1.bf16.msra.mxu0 %v8945_v3  ;;  %v9031_v3 = vld [vmem:[#allocation19 + $0x7a4] ss:$16 sps:$4 sm:$0xff]  }
 0xfbd   : > { %6047 = vmatpush1.bf16.msra.mxu1 %v8948_v58  ;;  %5852 = vmatprep.subr.bf16.mxu0 %v8953_v23  ;;  %v9034_v58 = vld [vmem:[#allocation19 + $0x7ac] ss:$16 sps:$4 sm:$0xff]   ;;  %v9029_v23 = vld [vmem:[#allocation19 + $0x7a0] ss:$16 sps:$4 sm:$0xff]  }
 0xfbe   : > { %6057 = vmatprep.subr.bf16.mxu1 %v8956_v9  ;;  %v9037_v9 = vld [vmem:[#allocation19 + $0x7c4] ss:$16 sps:$4 sm:$0xff]  }
 0xfbf   : > { %5844 = vmatmul.mubr.bf16.vlgmr.msra.gmra.mrb[116].mxu0 %v3974_v49 }
 0xfc0   : > { %6049 = vmatmul.mubr.bf16.vlgmr.msra.gmra.mrb[108].mxu1 %v3974_v49  ;;  %5853 = vmatpush1.bf16.msra.mxu0 %v8951_v42  ;;  %v9040_v42 = vld [vmem:[#allocation19 + $0x7cc] ss:$16 sps:$4 sm:$0xff]   ;;  %v9038_v49 = vld [vmem:[#allocation19 + $0x7c8] ss:$16 sps:$4 sm:$0xff]  }
 0xfc1   : > { %5884 = vmatprep.mubr.bf16.mxu0 %v3977_v59  ;;  %6058 = vmatpush1.bf16.msra.mxu1 %v8954_v0  ;;  %v9043_v0 = vld [vmem:[#allocation19 + $0x7e4] ss:$16 sps:$4 sm:$0xff]  }
 0xfc2   : > { %6089 = vmatprep.mubr.bf16.mxu1 %v3977_v59  ;;  %5854 = vmatprep.subr.bf16.mxu0 %v8959_v11  ;;  %v9046_v11 = vld [vmem:[#allocation19 + $0x7ec] ss:$16 sps:$4 sm:$0xff]   ;;  %v9041_v59 = vld [vmem:[#allocation19 + $0x7e0] ss:$16 sps:$4 sm:$0xff]  }
 0xfc3   : > { %6059 = vmatprep.subr.bf16.mxu1 %v8962_v30  ;;  %v9044_v30 = vld [vmem:[#allocation19 + $0x7e8] ss:$16 sps:$4 sm:$0xff]  }
 0xfc4   : > { %5855 = vmatpush1.bf16.msra.mxu0 %v8957_v5  ;;  %v9049_v5 = vld [vmem:[#allocation19 + $0x804] ss:$16 sps:$4 sm:$0xff]  }
 0xfc5   : > { %6060 = vmatpush1.bf16.msra.mxu1 %v8960_v22  ;;  %5856 = vmatprep.subr.bf16.mxu0 %v8965_v35  ;;  %v3967_v22 = vld [vmem:[#allocation2 + $0x30] sm:$0xff] }
 0xfc6   : > { %6061 = vmatprep.subr.bf16.mxu1 %v8968_v2  ;;  %v9052_v35 = vld [vmem:[#allocation19 + $0x80c] ss:$16 sps:$4 sm:$0xff]   ;;  %v9047_v2 = vld [vmem:[#allocation19 + $0x800] ss:$16 sps:$4 sm:$0xff]  }
 0xfc8   : > { %5857 = vmatpush1.bf16.msra.mxu0 %v8963_v63  ;;  %v3976_v63 = vpack.c.bf16 %v3967_v22, %v3967_v22  ;;  %v9119_v22 = vld [vmem:[#allocation20 + $0x70] sm:$0xff]  }
 0xfc9   : > { %6062 = vmatpush1.bf16.msra.mxu1 %v8966_v19  ;;  %5858 = vmatprep.subr.bf16.mxu0 %v8971_v60  ;;  %v9050_v19 = vld [vmem:[#allocation19 + $0x808] ss:$16 sps:$4 sm:$0xff]   ;;  %v9055_v60 = vld [vmem:[#allocation19 + $0x824] ss:$16 sps:$4 sm:$0xff]  }
 0xfca   : > { %6063 = vmatprep.subr.bf16.mxu1 %v8974_v55  ;;  %v9058_v55 = vld [vmem:[#allocation19 + $0x82c] ss:$16 sps:$4 sm:$0xff]  }
 0xfcc   : > { %5859 = vmatpush1.bf16.msra.mxu0 %v8969_v14  ;;  %v9053_v14 = vld [vmem:[#allocation19 + $0x820] ss:$16 sps:$4 sm:$0xff]  }
 0xfcd   : > { %6064 = vmatpush1.bf16.msra.mxu1 %v8972_v10  ;;  %5860 = vmatprep.subr.bf16.mxu0 %v8977_v51  ;;  %v9056_v10 = vld [vmem:[#allocation19 + $0x828] ss:$16 sps:$4 sm:$0xff]   ;;  %v9061_v51 = vld [vmem:[#allocation19 + $0x844] ss:$16 sps:$4 sm:$0xff]  }
 0xfce   : > { %6065 = vmatprep.subr.bf16.mxu1 %v8980_v20  ;;  %v9064_v20 = vld [vmem:[#allocation19 + $0x84c] ss:$16 sps:$4 sm:$0xff]  }
 0xfd0   : > { %5861 = vmatpush1.bf16.msra.mxu0 %v8975_v25  ;;  %v9059_v25 = vld [vmem:[#allocation19 + $0x840] ss:$16 sps:$4 sm:$0xff]  }
 0xfd1   : > { %6066 = vmatpush1.bf16.msra.mxu1 %v8978_v16  ;;  %5862 = vmatprep.subr.bf16.mxu0 %v8983_v27  ;;  %v9062_v16 = vld [vmem:[#allocation19 + $0x848] ss:$16 sps:$4 sm:$0xff]   ;;  %v9067_v27 = vld [vmem:[#allocation19 + $0x864] ss:$16 sps:$4 sm:$0xff]  }
 0xfd2   : > { %6067 = vmatprep.subr.bf16.mxu1 %v8986_v15  ;;  %v9070_v15 = vld [vmem:[#allocation19 + $0x86c] ss:$16 sps:$4 sm:$0xff]  }
 0xfd4   : > { %5863 = vmatpush1.bf16.msra.mxu0 %v8981_v56  ;;  %v9065_v56 = vld [vmem:[#allocation19 + $0x860] ss:$16 sps:$4 sm:$0xff]  }
 0xfd5   : > { %6068 = vmatpush1.bf16.msra.mxu1 %v8984_v1  ;;  %5864 = vmatprep.subr.bf16.mxu0 %v8989_v48  ;;  %v9068_v1 = vld [vmem:[#allocation19 + $0x868] ss:$16 sps:$4 sm:$0xff]   ;;  %v9073_v48 = vld [vmem:[#allocation19 + $0x884] ss:$16 sps:$4 sm:$0xff]  }
 0xfd6   : > { %6069 = vmatprep.subr.bf16.mxu1 %v8992_v43  ;;  %v9076_v43 = vld [vmem:[#allocation19 + $0x88c] ss:$16 sps:$4 sm:$0xff]  }
 0xfd8   : > { %5865 = vmatpush1.bf16.msra.mxu0 %v8987_v24  ;;  %v9071_v24 = vld [vmem:[#allocation19 + $0x880] ss:$16 sps:$4 sm:$0xff]  }
 0xfd9   : > { %6070 = vmatpush1.bf16.msra.mxu1 %v8990_v8  ;;  %5866 = vmatprep.subr.bf16.mxu0 %v8995_v26  ;;  %v9079_v8 = vld [vmem:[#allocation19 + $0x8a4] ss:$16 sps:$4 sm:$0xff]   ;;  %v9082_v26 = vld [vmem:[#allocation19 + $0x8ac] ss:$16 sps:$4 sm:$0xff]  }
 0xfda   : > { %6071 = vmatprep.subr.bf16.mxu1 %v8998_v46  ;;  %v9077_v46 = vld [vmem:[#allocation19 + $0x8a0] ss:$16 sps:$4 sm:$0xff]  }
 0xfdc   : > { %5867 = vmatpush1.bf16.msra.mxu0 %v8993_v44  ;;  %v9080_v44 = vld [vmem:[#allocation19 + $0x8a8] ss:$16 sps:$4 sm:$0xff]  }
 0xfdd   : > { %6072 = vmatpush1.bf16.msra.mxu1 %v8996_v57  ;;  %5868 = vmatprep.subr.bf16.mxu0 %v9001_v29  ;;  %v9085_v57 = vld [vmem:[#allocation19 + $0x8c4] ss:$16 sps:$4 sm:$0xff]   ;;  %v9088_v29 = vld [vmem:[#allocation19 + $0x8cc] ss:$16 sps:$4 sm:$0xff]  }
 0xfde   : > { %6073 = vmatprep.subr.bf16.mxu1 %v9004_v50  ;;  %v9083_v50 = vld [vmem:[#allocation19 + $0x8c0] ss:$16 sps:$4 sm:$0xff]  }
 0xfe0   : > { %5869 = vmatpush1.bf16.msra.mxu0 %v8999_v47  ;;  %v9086_v47 = vld [vmem:[#allocation19 + $0x8c8] ss:$16 sps:$4 sm:$0xff]  }
 0xfe1   : > { %6074 = vmatpush1.bf16.msra.mxu1 %v9002_v34  ;;  %5870 = vmatprep.subr.bf16.mxu0 %v9007_v45  ;;  %v9091_v34 = vld [vmem:[#allocation19 + $0x8e4] ss:$16 sps:$4 sm:$0xff]   ;;  %v9094_v45 = vld [vmem:[#allocation19 + $0x8ec] ss:$16 sps:$4 sm:$0xff]  }
 0xfe2   : > { %6075 = vmatprep.subr.bf16.mxu1 %v9010_v18  ;;  %v9089_v18 = vld [vmem:[#allocation19 + $0x8e0] ss:$16 sps:$4 sm:$0xff]  }
 0xfe4   : > { %5871 = vmatpush1.bf16.msra.mxu0 %v9005_v4  ;;  %v3969_v4 = vld [vmem:[#allocation2 + $0x40] sm:$0xff] }
 0xfe5   : > { %6076 = vmatpush1.bf16.msra.mxu1 %v9008_v7  ;;  %5872 = vmatprep.subr.bf16.mxu0 %v9013_v53  ;;  %v9092_v7 = vld [vmem:[#allocation19 + $0x8e8] ss:$16 sps:$4 sm:$0xff]   ;;  %v9095_v53 = vld [vmem:[#allocation20 + $0x40] sm:$0xff]  }
 0xfe6   : > { %6077 = vmatprep.subr.bf16.mxu1 %v9016_v40  ;;  %v9097_v40 = vld [vmem:[#allocation20 + $0xc0] sm:$0xff]  }
 0xfe8   : > { %5873 = vmatpush1.bf16.msra.mxu0 %v9011_v17  ;;  %v3978_v17 = vpack.c.bf16 %v3969_v4, %v3969_v4 }
 0xfe9   : > { %6078 = vmatpush1.bf16.msra.mxu1 %v9014_v12  ;;  %5874 = vmatprep.subr.bf16.mxu0 %v9019_v62  ;;  %v9096_v12 = vld [vmem:[#allocation20] sm:$0xff]  }
 0xfea   : > { %6079 = vmatprep.subr.bf16.mxu1 %v9022_v52  ;;  %v9098_v62 = vld [vmem:[#allocation20 + $0x80] sm:$0xff]   ;;  %v9099_v52 = vld [vmem:[#allocation20 + $0x48] sm:$0xff]  }
 0xfec   : > { %5875 = vmatpush1.bf16.msra.mxu0 %v9017_v33  ;;  %v9101_v33 = vld [vmem:[#allocation20 + $0xc8] sm:$0xff]  }
 0xfed   : > { %6080 = vmatpush1.bf16.msra.mxu1 %v9020_v38  ;;  %5876 = vmatprep.subr.bf16.mxu0 %v9025_v54  ;;  %v9100_v38 = vld [vmem:[#allocation20 + $0x8] sm:$0xff]  }
 0xfee   : > { %6081 = vmatprep.subr.bf16.mxu1 %v9028_v6  ;;  %v9102_v54 = vld [vmem:[#allocation20 + $0x88] sm:$0xff]   ;;  %v9103_v6 = vld [vmem:[#allocation20 + $0x50] sm:$0xff]  }
 0xff0   : > { %5877 = vmatpush1.bf16.msra.mxu0 %v9023_v61  ;;  %v9105_v61 = vld [vmem:[#allocation20 + $0xd0] sm:$0xff]  }
 0xff1   : > { %6082 = vmatpush1.bf16.msra.mxu1 %v9026_v21  ;;  %5878 = vmatprep.subr.bf16.mxu0 %v9031_v3  ;;  %v9104_v21 = vld [vmem:[#allocation20 + $0x10] sm:$0xff]  }
 0xff2   : > { %6083 = vmatprep.subr.bf16.mxu1 %v9034_v58  ;;  %v9106_v3 = vld [vmem:[#allocation20 + $0x90] sm:$0xff]   ;;  %v9107_v58 = vld [vmem:[#allocation20 + $0x58] sm:$0xff]  }
 0xff4   : > { %5879 = vmatpush1.bf16.msra.mxu0 %v9029_v23  ;;  %v9109_v23 = vld [vmem:[#allocation20 + $0xd8] sm:$0xff]  }
 0xff5   : > { %6084 = vmatpush1.bf16.msra.mxu1 %v9032_v39  ;;  %5880 = vmatprep.subr.bf16.mxu0 %v9037_v9  ;;  %v9108_v39 = vld [vmem:[#allocation20 + $0x18] sm:$0xff]  }
 0xff6   : > { %6085 = vmatprep.subr.bf16.mxu1 %v9040_v42  ;;  %v9110_v9 = vld [vmem:[#allocation20 + $0x98] sm:$0xff]   ;;  %v9111_v42 = vld [vmem:[#allocation20 + $0x60] sm:$0xff]  }
 0xff8   : > { %5881 = vmatpush1.bf16.msra.mxu0 %v9035_v36  ;;  %v9113_v36 = vld [vmem:[#allocation20 + $0xe0] sm:$0xff]  }
 0xff9   : > { %6086 = vmatpush1.bf16.msra.mxu1 %v9038_v49  ;;  %5882 = vmatprep.subr.bf16.mxu0 %v9043_v0  ;;  %v9112_v49 = vld [vmem:[#allocation20 + $0x20] sm:$0xff]  }
 0xffa   : > { %6087 = vmatprep.subr.bf16.mxu1 %v9046_v11  ;;  %v9114_v0 = vld [vmem:[#allocation20 + $0xa0] sm:$0xff]   ;;  %v9115_v11 = vld [vmem:[#allocation20 + $0x68] sm:$0xff]  }
 0xffc   : > { %5883 = vmatpush1.bf16.msra.mxu0 %v9041_v59  ;;  %v9117_v59 = vld [vmem:[#allocation20 + $0xe8] sm:$0xff]  }
 0xffd   : > { %6088 = vmatpush1.bf16.msra.mxu1 %v9044_v30  ;;  %5893 = vmatprep.subr.bf16.mxu0 %v9049_v5  ;;  %v9116_v30 = vld [vmem:[#allocation20 + $0x28] sm:$0xff]  }
 0xffe   : > { %6098 = vmatprep.subr.bf16.mxu1 %v9052_v35  ;;  %v9118_v5 = vld [vmem:[#allocation20 + $0xa8] sm:$0xff]   ;;  %v9120_v35 = vld [vmem:[#allocation20 + $0x30] sm:$0xff]  }
 0xfff   : > { %5885 = vmatmul.mubr.bf16.vlgmr.msra.gmra.mrb[116].mxu0 %v3976_v63 }
0x1000   : > { %6090 = vmatmul.mubr.bf16.vlgmr.msra.gmra.mrb[108].mxu1 %v3976_v63  ;;  %5894 = vmatpush1.bf16.msra.mxu0 %v9047_v2  ;;  %v9121_v2 = vld [vmem:[#allocation20 + $0xf0] sm:$0xff]  }
0x1001   : > { %6099 = vmatpush1.bf16.msra.mxu1 %v9050_v19  ;;  %5895 = vmatprep.subr.bf16.mxu0 %v9055_v60  ;;  %v9122_v63 = vld [vmem:[#allocation20 + $0xb0] sm:$0xff]   ;;  %v9123_v19 = vld [vmem:[#allocation20 + $0x78] sm:$0xff]  }
0x1002   : > { %6100 = vmatprep.subr.bf16.mxu1 %v9058_v55  ;;  %5925 = vmatprep.mubr.bf16.mxu0 %v12097_v13  ;;  %v9125_v60 = vld [vmem:[#allocation20 + $0xf8] sm:$0xff]  }
0x1003   : > { %6130 = vmatprep.mubr.bf16.mxu1 %v12097_v13  ;;  %v9074_v13 = vld [vmem:[#allocation19 + $0x888] ss:$16 sps:$4 sm:$0xff]  }
0x1004   : > { %5896 = vmatpush1.bf16.msra.mxu0 %v9053_v14  ;;  %v9124_v55 = vld [vmem:[#allocation20 + $0x38] sm:$0xff]  }
0x1005   : > { %6101 = vmatpush1.bf16.msra.mxu1 %v9056_v10  ;;  %5897 = vmatprep.subr.bf16.mxu0 %v9061_v51  ;;  %v9126_v14 = vld [vmem:[#allocation20 + $0xb8] sm:$0xff]   ;;  %v9619_v10 = vmov 1   ;;  %v9620_v51 = vmov 2  }
0x1006   : > { %6102 = vmatprep.subr.bf16.mxu1 %v9064_v20  ;;  %8512 = vset.pattern.permute.xlu0 %v9619_v10  ;;  %v4267_v20 = vld [vmem:[#allocation23] ss:$8 sm:$0xf] }
0x1007   : > { %8513 = vset.pattern.permute.xlu1 %v9620_v51  ;;  %6605 = vperm.xlu0 %8512, %v11711_v32  }
0x1008   : > { %5898 = vmatpush1.bf16.msra.mxu0 %v9059_v25  ;;  %6616 = vperm.xlu1 %8513, %v11711_v32   ;;  %v4279_v25 = vsub.s32 2, %v11696_v37 }
0x1009   : > { %6103 = vmatpush1.bf16.msra.mxu1 %v9062_v16  ;;  %5899 = vmatprep.subr.bf16.mxu0 %v9067_v27  ;;  %v4283_v16 = vsub.s32 3, %v11696_v37  ;;  %v4272_v27 = vrot.slane %v4267_v20, %v11699_v28 }
0x100a   : > { %6104 = vmatprep.subr.bf16.mxu1 %v9070_v15  ;;  %v4280_v15 = vrot.slane %v4267_v20, %v4279_v25 }
0x100b   : > { %8514 = vset.pattern.permute.xlu0 %v9620_v51  ;;  %v6242_v51 = vld [vmem:[#allocation23 + $0x1] ss:$0 sm:$0xff] }
0x100c   : > { %5900 = vmatpush1.bf16.msra.mxu0 %v9065_v56  ;;  %v4276_v56 = vrot.slane %v4267_v20, %v11702_v41 }
0x100d   : > { %6105 = vmatpush1.bf16.msra.mxu1 %v9068_v1  ;;  %5901 = vmatprep.subr.bf16.mxu0 %v9073_v48  ;;  %v4284_v1 = vrot.slane %v4267_v20, %v4283_v16 }
0x100e   : > { %6106 = vmatprep.subr.bf16.mxu1 %v9076_v43  ;;  %v6147_v43 = vpop.permute.xlu0 %6146 }
0x1010   : > { %5902 = vmatpush1.bf16.msra.mxu0 %v9071_v24 }
0x1011   : > { %6107 = vmatpush1.bf16.msra.mxu1 %v9074_v13  ;;  %5903 = vmatprep.subr.bf16.mxu0 %v9079_v8 }
0x1012   : > { %6108 = vmatprep.subr.bf16.mxu1 %v9082_v26 }
0x1014   : > { %5904 = vmatpush1.bf16.msra.mxu0 %v9077_v46 }
0x1015   : > { %6109 = vmatpush1.bf16.msra.mxu1 %v9080_v44  ;;  %5905 = vmatprep.subr.bf16.mxu0 %v9085_v57 }
0x1016   : > { %6110 = vmatprep.subr.bf16.mxu1 %v9088_v29 }
0x1018   : > { %5906 = vmatpush1.bf16.msra.mxu0 %v9083_v50 }
0x1019   : > { %6111 = vmatpush1.bf16.msra.mxu1 %v9086_v47  ;;  %5907 = vmatprep.subr.bf16.mxu0 %v9091_v34 }
0x101a   : > { %6112 = vmatprep.subr.bf16.mxu1 %v9094_v45 }
0x101c   : > { %5908 = vmatpush1.bf16.msra.mxu0 %v9089_v18 }
0x101d   : > { %6113 = vmatpush1.bf16.msra.mxu1 %v9092_v7  ;;  %8036 = vmatprep.subr.bf16.mxu0 %v9095_v53 }
0x101e   : > { %8058 = vmatprep.subr.bf16.mxu1 %v9097_v40  ;;  %v9127_v40 = vld [vmem:[#allocation20 + $0x100] sm:$0xff]  }
0x101f   : > { %5926 = vmatmul.mubr.bf16.vlgmr.msra.gmra.mrb[116].mxu0 %v3978_v17 }
0x1020   : > { %6131 = vmatmul.mubr.bf16.vlgmr.msra.gmra.mrb[108].mxu1 %v3978_v17  ;;  %8037 = vmatpush3.bf16.msra.mxu0 %v9096_v12 }
0x1021   : > { %8059 = vmatpush3.bf16.msra.mxu1 %v9098_v62  ;;  %8038 = vmatprep.subr.bf16.mxu0 %v9099_v52  ;;  %v3960_v62 = vld [vmem:[%s10075_s22] sm:$0xff] }
0x1022   : > { %8060 = vmatprep.subr.bf16.mxu1 %v9101_v33  ;;  %v9128_v33 = vld [vmem:[#allocation20 + $0x108] sm:$0xff]  }
0x1024   : > { %8039 = vmatpush3.bf16.msra.mxu0 %v9100_v38  ;;  %v6161_v38 = vpack.c.bf16 %v3960_v62, %v3960_v62 }
0x1025   : > { %8061 = vmatpush3.bf16.msra.mxu1 %v9102_v54  ;;  %8040 = vmatprep.subr.bf16.mxu0 %v9103_v6  ;;  %v9129_v54 = vld [vmem:[#allocation20 + $0x110] sm:$0xff]   ;;  %v9130_v6 = vld [vmem:[#allocation20 + $0x118] sm:$0xff]  }
0x1026   : > { %8062 = vmatprep.subr.bf16.mxu1 %v9105_v61  ;;  %v9131_v61 = vld [vmem:[#allocation20 + $0x120] sm:$0xff]  }
0x1028   : > { %8041 = vmatpush3.bf16.msra.mxu0 %v9104_v21  ;;  %v9132_v21 = vld [vmem:[#allocation20 + $0x128] sm:$0xff]  }
0x1029   : > { %8063 = vmatpush3.bf16.msra.mxu1 %v9106_v3  ;;  %8042 = vmatprep.subr.bf16.mxu0 %v9107_v58  ;;  %v9133_v3 = vld [vmem:[#allocation20 + $0x130] sm:$0xff]   ;;  %v9134_v58 = vld [vmem:[#allocation20 + $0x138] sm:$0xff]  }
0x102a   : > { %8064 = vmatprep.subr.bf16.mxu1 %v9109_v23  ;;  %v9135_v23 = vld [vmem:[%s12104_s2 + $0x40] sm:$0xff]  }
0x102c   : > { %8043 = vmatpush3.bf16.msra.mxu0 %v9108_v39  ;;  %v9136_v39 = vld [vmem:[%s12104_s2] sm:$0xff]  }
0x102d   : > { %8065 = vmatpush3.bf16.msra.mxu1 %v9110_v9  ;;  %8044 = vmatprep.subr.bf16.mxu0 %v9111_v42  ;;  %v9137_v9 = vld [vmem:[%s12104_s2 + $0x48] sm:$0xff]  }
0x102e   : > { %8066 = vmatprep.subr.bf16.mxu1 %v9113_v36  ;;  %v9138_v42 = vld [vmem:[%s12104_s2 + $0x8] sm:$0xff]   ;;  %v9139_v36 = vld [vmem:[%s12104_s2 + $0x50] sm:$0xff]  }
0x1030   : > { %8045 = vmatpush3.bf16.msra.mxu0 %v9112_v49  ;;  %v9140_v49 = vld [vmem:[%s12104_s2 + $0x10] sm:$0xff]  }
0x1031   : > { %8067 = vmatpush3.bf16.msra.mxu1 %v9114_v0  ;;  %8046 = vmatprep.subr.bf16.mxu0 %v9115_v11  ;;  %v9141_v0 = vld [vmem:[%s12104_s2 + $0x58] sm:$0xff]  }
0x1032   : > { %8068 = vmatprep.subr.bf16.mxu1 %v9117_v59  ;;  %v9142_v11 = vld [vmem:[%s12104_s2 + $0x18] sm:$0xff]   ;;  %v9143_v59 = vld [vmem:[%s12104_s2 + $0x60] sm:$0xff]  }
0x1034   : > { %8047 = vmatpush3.bf16.msra.mxu0 %v9116_v30  ;;  %v9144_v30 = vld [vmem:[%s12104_s2 + $0x20] sm:$0xff]  }
0x1035   : > { %8069 = vmatpush3.bf16.msra.mxu1 %v9118_v5  ;;  %8048 = vmatprep.subr.bf16.mxu0 %v9119_v22  ;;  %v9145_v5 = vld [vmem:[%s12104_s2 + $0x68] sm:$0xff]  }
0x1036   : > { %8070 = vmatprep.subr.bf16.mxu1 %v9121_v2  ;;  %v9146_v22 = vld [vmem:[%s12104_s2 + $0x28] sm:$0xff]   ;;  %v9148_v2 = vld [vmem:[%s12104_s2 + $0x30] sm:$0xff]  }
0x1038   : > { %8049 = vmatpush3.bf16.msra.mxu0 %v9120_v35  ;;  %v9147_v35 = vld [vmem:[%s12104_s2 + $0x70] sm:$0xff]  }
0x1039   : > { %8071 = vmatpush3.bf16.msra.mxu1 %v9122_v63  ;;  %8050 = vmatprep.subr.bf16.mxu0 %v9123_v19  ;;  %v9149_v63 = vld [vmem:[%s12104_s2 + $0x78] sm:$0xff]  }
0x103a   : > { %8072 = vmatprep.subr.bf16.mxu1 %v9125_v60  ;;  %v9150_v19 = vld [vmem:[%s12104_s2 + $0x38] sm:$0xff]  }
0x103b   : > { %v9151_v60 = vld [vmem:[#allocation22] sm:$0xff]  }
0x103c   : > { %8051 = vmatpush3.bf16.msra.mxu0 %v9124_v55  ;;  %v9152_v55 = vld [vmem:[#allocation22 + $0x8] sm:$0xff]  }
0x103d   : > { %8073 = vmatpush3.bf16.msra.mxu1 %v9126_v14  ;;  %8272 = vmatprep.subr.bf16.mxu0 %v11657_v31 }
0x103e   : > { %8089 = vmatprep.subr.bf16.mxu1 %v9135_v23 }
0x10f2   : > { %v5927_v48 = vpop.f32.mrb[116].mxu0 }
0x10f3   : > { %v8304_v24 = vadd.f32 %v5927_v48, %v4272_v27  ;;  %v6132_v13 = vpop.f32.mrb[108].mxu1  ;;  %v5929_v8 = vpop.f32.mrb[117].mxu0 }
0x10f4   : > { %v8306_v26 = vadd.f32 %v6132_v13, %v4280_v15  ;;  %v8305_v46 = vadd.f32 %v5929_v8, %v4276_v56  ;;  %v6134_v32 = vpop.f32.mrb[109].mxu1  ;;  %v5931_v44 = vpop.f32.mrb[118].mxu0 }
0x10f5   : > { %vm6140_vm14 = vcmp.ge.f32.partialorder %v8304_v24, 0.0  ;;  %v8307_v57 = vadd.f32 %v6134_v32, %v4284_v1  ;;  %v6149_v29 = vmul.f32 %v8304_v24, %v6147_v43  ;;  %v6136_v50 = vpop.f32.mrb[110].mxu1  ;;  %v5932_v37 = vpop.f32.mrb[119].mxu0  ;;  %v6610_v44 = vld [vmem:[#allocation23 + $0x2] ss:$0 sm:$0xff] }
0x10f6   : > { %vm6142_vm15 = vcmp.ge.f32.partialorder %v8306_v26, 0.0  ;;  %vm6141_vm0 = vcmp.ge.f32.partialorder %v8305_v46, 0.0  ;;  %v6150_v28 = vmul.f32 %v8305_v46, %v6147_v43  ;;  %v6151_v41 = vmul.f32 %v8306_v26, %v6147_v43  ;;  %v6137_v47 = vpop.f32.mrb[111].mxu1  ;;  %v6606_v8 = vpop.permute.xlu0 %6605  ;;  %v6612_v37 = vld [vmem:[#allocation23 + $0x3] ss:$0 sm:$0xff] }
0x10f7   : > { %vm6143_vm1 = vcmp.ge.f32.partialorder %v8307_v57, 0.0  ;;  %v6152_v34 = vmul.f32 %v8307_v57, %v6147_v43  ;;  %v6153_v45 = vsel %vm6140_vm14, %v8304_v24, %v6149_v29 }
0x10f8   : > { %v6154_v18 = vsel %vm6141_vm0, %v8305_v46, %v6150_v28  ;;  %v6155_v4 = vsel %vm6142_vm15, %v8306_v26, %v6151_v41  ;;  %v6157_v12 = vpack.c.bf16 %v6153_v45, %v6153_v45  ;;  %v6617_v41 = vpop.permute.xlu1 %6616 }
0x10f9   : > { %v6158_v7 = vpack.c.bf16 %v6154_v18, %v6154_v18  ;;  %v6156_v53 = vsel %vm6143_vm1, %v8307_v57, %v6152_v34  ;;  %v6159_v52 = vpack.c.bf16 %v6155_v4, %v6155_v4  ;;  %v9153_v4 = vld [vmem:[#allocation22 + $0x10] sm:$0xff]  }
0x10fa   : > { %v6160_v17 = vpack.c.bf16 %v6156_v53, %v6156_v53 }
0x10fb   : > { %6515 = vmatprep.mubr.bf16.mxu0 %v6158_v7  ;;  %v9154_v7 = vld [vmem:[#allocation22 + $0x18] sm:$0xff]  }
0x10fc   : > { %6555 = vmatprep.mubr.bf16.mxu1 %v6160_v17  ;;  %6516 = vmatmul.mubr.bf16.vlgmr.msra.gmra.mrb[120].mxu0 %v6157_v12 }
0x10fd   : > { %6556 = vmatmul.mubr.bf16.vlgmr.msra.gmra.mrb[112].mxu1 %v6159_v52  ;;  %8273 = vmatpush3.bf16.msra.mxu0 %v9127_v40  ;;  %v6654_v40 = vld [vmem:[#allocation23 + $0x4] ss:$0 sm:$0xff] }
0x10fe   : > { %8274 = vmatprep.subr.bf16.mxu0 %v11657_v31  ;;  %8288 = vmatprep.mubr.msk.bf16.mxu0 %vm9617_vm5, %v11657_v31 }
0x10ff   : > { %6783 = vmatprep.mubr.bf16.mxu1 %v6161_v38  ;;  %8090 = vmatpush3.bf16.msra.mxu1 %v9136_v39 }
0x1100   : > { %8091 = vmatprep.subr.bf16.mxu1 %v9137_v9 }
0x1101   : > { %8275 = vmatpush3.bf16.msra.mxu0 %v9128_v33 }
0x1102   : > { %8276 = vmatprep.subr.bf16.mxu0 %v11657_v31 }
0x1103   : > { %8092 = vmatpush3.bf16.msra.mxu1 %v9138_v42 }
0x1104   : > { %8093 = vmatprep.subr.bf16.mxu1 %v9139_v36 }
0x1105   : > { %8277 = vmatpush3.bf16.msra.mxu0 %v9129_v54 }
0x1106   : > { %8278 = vmatprep.subr.bf16.mxu0 %v11657_v31 }
0x1107   : > { %8094 = vmatpush3.bf16.msra.mxu1 %v9140_v49 }
0x1108   : > { %8095 = vmatprep.subr.bf16.mxu1 %v9141_v0 }
0x1109   : > { %8279 = vmatpush3.bf16.msra.mxu0 %v9130_v6  ;;  %v6801_v6 = vld [vmem:[#allocation23 + $0x5] ss:$0 sm:$0xff] }
0x110a   : > { %8280 = vmatprep.subr.bf16.mxu0 %v11657_v31 }
0x110b   : > { %8096 = vmatpush3.bf16.msra.mxu1 %v9142_v11 }
0x110c   : > { %8097 = vmatprep.subr.bf16.mxu1 %v9143_v59 }
0x110d   : > { %8281 = vmatpush3.bf16.msra.mxu0 %v9131_v61 }
0x110e   : > { %8282 = vmatprep.subr.bf16.mxu0 %v11657_v31 }
0x110f   : > { %8098 = vmatpush3.bf16.msra.mxu1 %v9144_v30 }
0x1110   : > { %8099 = vmatprep.subr.bf16.mxu1 %v9145_v5 }
0x1111   : > { %8283 = vmatpush3.bf16.msra.mxu0 %v9132_v21 }
0x1112   : > { %8284 = vmatprep.subr.bf16.mxu0 %v11657_v31 }
0x1113   : > { %8100 = vmatpush3.bf16.msra.mxu1 %v9146_v22 }
0x1114   : > { %8101 = vmatprep.subr.bf16.mxu1 %v9147_v35 }
0x1115   : > { %8285 = vmatpush3.bf16.msra.mxu0 %v9133_v3 }
0x1116   : > { %8286 = vmatprep.subr.bf16.mxu0 %v11657_v31 }
0x1117   : > { %8102 = vmatpush3.bf16.msra.mxu1 %v9148_v2 }
0x1118   : > { %8103 = vmatprep.subr.bf16.mxu1 %v9149_v63 }
0x1119   : > { %8287 = vmatpush3.bf16.msra.mxu0 %v9134_v58 }
0x111a   : > { %8292 = vmatprep.subr.bf16.mxu0 %v11657_v31 }
0x111b   : > { %8104 = vmatpush3.bf16.msra.mxu1 %v9150_v19 }
0x111c   : > { %8289 = vmatmul.mubr.bf16.vlgmr.msra.gmra.mrb[124].mxu0 %v6161_v38 }
0x111d   : > { %8300 = vmatprep.mubr.msk.bf16.mxu0 %vm9617_vm5, %v11657_v31  ;;  %8293 = vmatpush3.bf16.msra.mxu0 %v9151_v60 }
0x111e   : > { %8294 = vmatprep.subr.bf16.mxu0 %v11657_v31 }
0x1121   : > { %8295 = vmatpush3.bf16.msra.mxu0 %v9152_v55 }
0x1122   : > { %8296 = vmatprep.subr.bf16.mxu0 %v11657_v31 }
0x1125   : > { %8297 = vmatpush3.bf16.msra.mxu0 %v9153_v4 }
0x1126   : > { %8298 = vmatprep.subr.bf16.mxu0 %v11657_v31 }
0x1129   : > { %8299 = vmatpush3.bf16.msra.mxu0 %v9154_v7 }
0x11cf   : > { %v8052_v14 = vpop.f32.mrb[120].mxu0 }
0x11d0   : > { %v8074_v10 = vpop.f32.mrb[112].mxu1  ;;  %v8053_v20 = vpop.f32.mrb[121].mxu0 }
0x11d1   : > { %v8054_v25 = vadd.f32 %v8053_v20, %v8052_v14  ;;  %v8075_v16 = vpop.f32.mrb[113].mxu1  ;;  %v8055_v27 = vpop.f32.mrb[122].mxu0 }
0x11d2   : > { %v8076_v15 = vadd.f32 %v8075_v16, %v8074_v10  ;;  %v8077_v56 = vpop.f32.mrb[114].mxu1  ;;  %v8056_v1 = vpop.f32.mrb[123].mxu0 }
0x11d3   : > { %v6518_v48 = vadd.f32 %v8054_v25, %v6242_v51  ;;  %v8078_v43 = vpop.f32.mrb[115].mxu1 }
0x11d5   : > { %v6558_v24 = vadd.f32 %v8076_v15, %v6518_v48 }
0x11ef   : > { %v6597_v13 = vpop.f32.mrb[124].mxu0 }
0x11f0   : > { %v6598_v26 = vadd.f32 %v6597_v13, %v6558_v24  ;;  %v8290_v46 = vpop.f32.mrb[125].mxu0 }
0x11f1   : > { %v6600_v32 = vpop.f32.mrb[126].mxu0 }
0x11f2   : > { %vm6603_vm2 = vcmp.ge.f32.partialorder %v6598_v26, 0.0  ;;  %v6608_v57 = vmul.f32 %v6606_v8, %v6598_v26  ;;  %v8291_v29 = vpop.f32.mrb[127].mxu0 }
0x11f4   : > { %v6609_v50 = vsel %vm6603_vm2, %v6598_v26, %v6608_v57 }
0x11f5   : > { %v6611_v28 = vmul.f32 %v6610_v44, %v6609_v50 }
0x11f7   : > { %v6613_v47 = vadd.f32 %v6612_v37, %v6611_v28 }
0x11f9   : > { %vm6614_vm3 = vcmp.ge.f32.partialorder %v6613_v47, 0.0  ;;  %v6619_v34 = vmul.f32 %v6617_v41, %v6613_v47 }
0x11fb   : > { %v6620_v45 = vsel %vm6614_vm3, %v6613_v47, %v6619_v34 }
0x11fc   : > { %v6621_v18 = vpack.c.bf16 %v6620_v45, %v6620_v45 }
0x11fe   : > { %6784 = vmatmul.mubr.bf16.vlgmr.msra.gmra.mrb[116].mxu1 %v6621_v18 }
0x12d1   : > { %v8105_v53 = vpop.f32.mrb[116].mxu1 }
0x12d2   : > { %v8106_v17 = vpop.f32.mrb[117].mxu1 }
0x12d3   : > { %v8107_v12 = vadd.f32 %v8106_v17, %v8105_v53  ;;  %v8108_v62 = vpop.f32.mrb[118].mxu1 }
0x12d4   : > { %v8109_v52 = vpop.f32.mrb[119].mxu1 }
0x12d5   : > { %v6786_v33 = vadd.f32 %v8107_v12, %v6654_v40 }
0x12d7   : > { %v6791_v38 = vmax.f32 %v6786_v33, 0.0 }
0x12d9   : > { %v6792_v54 = vpack.c.bf16 %v6791_v38, %v6791_v38 }
0x12db   : > { %8301 = vmatmul.mubr.msk.bf16.vlgmr.msra.gmra.mrb[128].mxu0 %vm3021_vm9, %v6792_v54 }
0x13ae   : > { %v6863_v61 = vpop.f32.mrb[128].mxu0 }
0x13af   : > { %v6864_v31 = vadd.f32 %v6863_v61, %v6801_v6  ;;  %v8302_v21 = vpop.f32.mrb[129].mxu0 }
0x13b0   : > { %v6866_v3 = vpop.f32.mrb[130].mxu0 }
0x13b1   : > { %6869 = vst [vmem:[%s759_s0] sm:$0xff] %v6864_v31  ;;  %v8303_v58 = vpop.f32.mrb[131].mxu0 }
0x13b2 PF: > { %s12106_s24 = sld [smem:[#allocation33_spill]] }
0x13b8   : > { %s35_s24 = sadd.s32 1, %s12106_s24  }
0x13b9   : > { %p32_p3 = scmp.ge.s32.totalorder %s35_s24, 4  }
0x13bb   :  { %34 = sbr.rel (!%p32_p3) target bundleno = 15 (0xf), region = 184 }
0x13c2   :  { %6889 = vsyncpa [#allocation4], 1 }
0x13c3   :  { %6891 = vsyncpa [#allocation4 + $0x1], 1 }
0x13c4   :  { %6892 = vsyncpa [#allocation6], 1 }
0x13c5   :  { %6893 = vsyncpa [#allocation9], 1 }
0x13c6   :  { %6894 = vsyncpa [#allocation12], 1 }
0x13c7   :  { %6895 = vsyncpa [#allocation15], 1 }
0x13c8   :  { %6896 = vsyncpa [#allocation18], 1 }
0x13c9   :  { %6897 = vsyncpa [#allocation21], 1 }
0x13ca   :  { %6898 = vsyncpa [#allocation24], 1 }

</bundles_post_ra>
